<compile_context>
chip_gen: v7x
topology: tpu7x:2x2x1
jax: 0.10.0
libtpu: 0.0.40
codegen_flags: <defaults>
</compile_context>

<pallas_src>
import functools

import jax
import jax.numpy as jnp
from jax.experimental import pallas as pl
from jax.experimental.pallas import tpu as pltpu

B_BLK = 8                       # batch rows per grid block (sublane multiple)
T_BLK = 8                       # timesteps folded into one grid step
LANE = 128
VMEM_LIMIT = 32 * 1024 * 1024   # explicit scoped-VMEM budget (safe on v5e/v6e/v7x)


# ----------------------------- small helpers -------------------------------

def _const_spec(arr):
    """Whole-array block with a constant index -> stays VMEM-resident."""
    shape = arr.shape
    return pl.BlockSpec(shape, lambda b, t, _n=len(shape): (0,) * _n)


def _round_up(n, mult):
    return ((n + mult - 1) // mult) * mult


def _pad_axis(x, axis, mult):
    pad = (-x.shape[axis]) % mult
    if pad == 0:
        return x
    widths = [(0, 0)] * x.ndim
    widths[axis] = (0, pad)
    return jnp.pad(x, widths)


def _dot(a, b):
    return jnp.dot(a, b, preferred_element_type=jnp.float32)


def _gate_stack(x_t, wih, bih, bhh, hidden_dim):
    """Hoisted, recurrence-independent GRU input projection for ALL timesteps.

    Returns [T, 3, B, H] with gate order (r, z, n).  The bhh biases of the r and
    z gates are folded in (purely additive inside the sigmoid); the n-gate bhh
    stays in the kernel because it is gated by r.
    """
    H = hidden_dim
    gi = jnp.dot(x_t, wih) + bih                              # [T, B, 3H]
    return jnp.stack([gi[..., :H] + bhh[:, :H],
                      gi[..., H:2 * H] + bhh[:, H:2 * H],
                      gi[..., 2 * H:]], axis=1)               # [T, 3, B, H]


# ----------------------------- encoder kernel ------------------------------

def _encoder_kernel(gi_f_ref, gi_b_ref,
                    whh_f_r, whh_f_z, whh_f_n, bhh_f_n,
                    whh_b_r, whh_b_z, whh_b_n, bhh_b_n,
                    fcw_hf, fcw_hb, fc_b,
                    fwd_ref, bwd_ref, hid_ref,
                    h_f_scr, h_b_scr,
                    *, t_blk, s_valid, s_pad):
    t = pl.program_id(1)

    @pl.when(t == 0)
    def _init():
        h_f_scr[...] = jnp.zeros_like(h_f_scr)
        h_b_scr[...] = jnp.zeros_like(h_b_scr)

    def gru(gi, h, w_r, w_z, w_n, b_n):
        # Only the three recurrent h @ Whh_g dots remain per step (input side hoisted).
        r = jax.nn.sigmoid(gi[0] + _dot(h, w_r[...]))
        z = jax.nn.sigmoid(gi[1] + _dot(h, w_z[...]))
        n = jnp.tanh(gi[2] + r * (_dot(h, w_n[...]) + b_n[...]))
        return (1.0 - z) * n + z * h

    h_f = h_f_scr[...]
    h_b = h_b_scr[...]
    # T_BLK timesteps per grid step; static trip count -> fully unrolled.
    for i in range(t_blk):
        g = t * t_blk + i                      # forward-time index of the fwd step
        h_f_new = gru(gi_f_ref[i], h_f, whh_f_r, whh_f_z, whh_f_n, bhh_f_n)
        h_f = jnp.where(g < s_valid, h_f_new, h_f)            # freeze on padded steps
        fwd_ref[i] = h_f
        # The backward direction walks this block in reverse; the block itself is the
        # (nT-1-t)-th one via a reversed index_map, so no jnp.flip is ever needed and
        # the output already lands in forward time order.
        j = t_blk - 1 - i
        h_b_new = gru(gi_b_ref[j], h_b, whh_b_r, whh_b_z, whh_b_n, bhh_b_n)
        h_b = jnp.where(g >= s_pad - s_valid, h_b_new, h_b)
        bwd_ref[j] = h_b
    h_f_scr[...] = h_f
    h_b_scr[...] = h_b

    @pl.when(t == pl.num_programs(1) - 1)
    def _final():
        # tanh(fc([h_f ; h_b])) with the concat folded into two row-split dots.
        hid_ref[...] = jnp.tanh(_dot(h_f, fcw_hf[...]) + _dot(h_b, fcw_hb[...])
                                + fc_b[...])


def encoder_forward(p, src):
    Bp, S = src.shape
    H = p["enc_whh_f"].shape[0]

    emb_t = p["enc_emb"][src.T]                               # [S, Bp, E] (dropout = id)
    gi_f = _gate_stack(emb_t, p["enc_wih_f"], p["enc_bih_f"], p["enc_bhh_f"], H)
    gi_b = _gate_stack(emb_t, p["enc_wih_b"], p["enc_bih_b"], p["enc_bhh_b"], H)

    S_pad = _round_up(S, T_BLK)
    gi_f = _pad_axis(gi_f, 0, T_BLK)
    gi_b = _pad_axis(gi_b, 0, T_BLK)
    nT = S_pad // T_BLK
    nB = Bp // B_BLK

    def split_gates(w):
        return w[:, :H], w[:, H:2 * H], w[:, 2 * H:]

    whh_f_r, whh_f_z, whh_f_n = split_gates(p["enc_whh_f"])
    whh_b_r, whh_b_z, whh_b_n = split_gates(p["enc_whh_b"])
    bhh_f_n = p["enc_bhh_f"][:, 2 * H:]
    bhh_b_n = p["enc_bhh_b"][:, 2 * H:]
    fcw_hf, fcw_hb = p["enc_fc_w"][:H], p["enc_fc_w"][H:]

    weights = (whh_f_r, whh_f_z, whh_f_n, bhh_f_n,
               whh_b_r, whh_b_z, whh_b_n, bhh_b_n,
               fcw_hf, fcw_hb, p["enc_fc_b"])

    gi_spec_f = pl.BlockSpec((T_BLK, 3, B_BLK, H), lambda b, t: (t, 0, b, 0))
    gi_spec_b = pl.BlockSpec((T_BLK, 3, B_BLK, H), lambda b, t: (nT - 1 - t, 0, b, 0))
    out_spec_f = pl.BlockSpec((T_BLK, B_BLK, H), lambda b, t: (t, b, 0))
    out_spec_b = pl.BlockSpec((T_BLK, B_BLK, H), lambda b, t: (nT - 1 - t, b, 0))
    hid_spec = pl.BlockSpec((B_BLK, H), lambda b, t: (b, 0))

    fwd, bwd, hidden = pl.pallas_call(
        functools.partial(_encoder_kernel, t_blk=T_BLK, s_valid=S, s_pad=S_pad),
        out_shape=(jax.ShapeDtypeStruct((S_pad, Bp, H), jnp.float32),
                   jax.ShapeDtypeStruct((S_pad, Bp, H), jnp.float32),
                   jax.ShapeDtypeStruct((Bp, H), jnp.float32)),
        grid_spec=pltpu.PrefetchScalarGridSpec(
            num_scalar_prefetch=0,
            grid=(nB, nT),
            in_specs=[gi_spec_f, gi_spec_b] + [_const_spec(w) for w in weights],
            out_specs=(out_spec_f, out_spec_b, hid_spec),
            scratch_shapes=[pltpu.VMEM((B_BLK, H), jnp.float32),
                            pltpu.VMEM((B_BLK, H), jnp.float32)]),
        compiler_params=pltpu.CompilerParams(
            dimension_semantics=("parallel", "arbitrary"),
            vmem_limit_bytes=VMEM_LIMIT),
    )(gi_f, gi_b, *weights)

    # Both halves are already in forward time order; drop the (masked) padded tail.
    return fwd[:S], bwd[:S], hidden


# ----------------------------- decoder kernel ------------------------------

def _decoder_kernel(gi_emb_ref, pred_emb_ref, enc_f_ref, enc_b_ref, h0_ref,
                    wa_hid, wa_f, wa_b, attn_b, attn_v,
                    whh_r, whh_z, whh_n, bhh_n,
                    wih_wf_r, wih_wf_z, wih_wf_n,
                    wih_wb_r, wih_wb_z, wih_wb_n,
                    fcw_h, fcw_wf, fcw_wb,
                    pred_ref,
                    h_scr, proj_scr,
                    *, t_blk):
    t = pl.program_id(1)
    S, Bb, H = enc_f_ref.shape

    @pl.when(t == 0)
    def _init():
        h_scr[...] = h0_ref[...]
        # Encoder-side half of the additive attention projection is invariant across
        # decoder steps: one (S*B, H) x (H, H) MXU matmul per direction, kept in VMEM.
        proj = (_dot(enc_f_ref[...].reshape(S * Bb, H), wa_f[...])
                + _dot(enc_b_ref[...].reshape(S * Bb, H), wa_b[...])
                + attn_b[...])
        proj_scr[...] = proj.reshape(S, Bb, H)

    h = h_scr[...]
    for i in range(t_blk):                     # static trip count -> fully unrolled
        # ---- additive attention (time-major; fwd/bwd halves never concatenated) ----
        hid_q = _dot(h, wa_hid[...])                                   # [B, H]
        energy = jnp.tanh(proj_scr[...] + hid_q[None])                 # [S, B, H]
        scores = _dot(energy.reshape(S * Bb, H), attn_v[...])          # (S*B,1) on MXU
        scores = scores.reshape(S, Bb, 1)
        m = jnp.max(scores, axis=0, keepdims=True)                     # major-axis reduce
        e = jnp.exp(scores - m)
        attn = e * pl.reciprocal(jnp.sum(e, axis=0, keepdims=True), approx=True)
        w_f = jnp.sum(attn * enc_f_ref[...], axis=0)                   # [B, H]
        w_b = jnp.sum(attn * enc_b_ref[...], axis=0)                   # [B, H]

        # ---- GRU on [embedded ; weighted]: embedded-side projection was hoisted ----
        gi = gi_emb_ref[i]                                             # [3, B, H]
        gi_r = gi[0] + _dot(w_f, wih_wf_r[...]) + _dot(w_b, wih_wb_r[...])
        gi_z = gi[1] + _dot(w_f, wih_wf_z[...]) + _dot(w_b, wih_wb_z[...])
        gi_n = gi[2] + _dot(w_f, wih_wf_n[...]) + _dot(w_b, wih_wb_n[...])
        r = jax.nn.sigmoid(gi_r + _dot(h, whh_r[...]))
        z = jax.nn.sigmoid(gi_z + _dot(h, whh_z[...]))
        n = jnp.tanh(gi_n + r * (_dot(h, whh_n[...]) + bhh_n[...]))
        h = (1.0 - z) * n + z * h

        # ---- fc_out([h ; w_f ; w_b ; emb]) as split dots; lane-dense 128-wide store ----
        pred_ref[i] = (pred_emb_ref[i] + _dot(h, fcw_h[...])
                       + _dot(w_f, fcw_wf[...]) + _dot(w_b, fcw_wb[...]))
    h_scr[...] = h


def decoder_forward(p, trg, enc_f, enc_b, hidden):
    S, Bp, H = enc_f.shape
    E = p["dec_emb"].shape[1]
    O = p["fc_out_b"].shape[1]
    O_pad = _round_up(O, LANE)
    n_steps = trg.shape[1] - 1
    T_pad = _round_up(n_steps, T_BLK)
    nT = T_pad // T_BLK
    nB = Bp // B_BLK

    # Teacher forcing always on: decoder input at step t is trg[:, t], t = 0 .. T-2.
    emb_t = p["dec_emb"][trg[:, :-1].T]                       # [T-1, Bp, E] (dropout = id)

    wih, bih, bhh = p["dec_wih"], p["dec_bih"], p["dec_bhh"]
    gi_emb = _gate_stack(emb_t, wih[:E], bih, bhh, H)         # embedded rows of dec_wih
    gi_emb = _pad_axis(gi_emb, 0, T_BLK)

    # fc_out row-split ([h ; w_f ; w_b ; emb]); output dim zero-padded to a lane multiple.
    fcw, fcb = p["fc_out_w"], p["fc_out_b"]
    pad_o = ((0, 0), (0, O_pad - O))
    fcw_h = jnp.pad(fcw[:H], pad_o)
    fcw_wf = jnp.pad(fcw[H:2 * H], pad_o)
    fcw_wb = jnp.pad(fcw[2 * H:3 * H], pad_o)
    fcw_e = jnp.pad(fcw[3 * H:], pad_o)
    fcb_p = jnp.pad(fcb, pad_o)
    pred_emb = jnp.dot(emb_t, fcw_e) + fcb_p                  # hoisted embedded-side fc_out
    pred_emb = _pad_axis(pred_emb, 0, T_BLK)

    # attention Linear(3H, H) split into hidden / enc-fwd / enc-bwd row blocks.
    wa_f, wa_b = p["attn_w_enc"][:H], p["attn_w_enc"][H:]

    def split_gates(w):
        return w[:, :H], w[:, H:2 * H], w[:, 2 * H:]

    whh_r, whh_z, whh_n = split_gates(p["dec_whh"])
    bhh_n = bhh[:, 2 * H:]
    wih_wf_r, wih_wf_z, wih_wf_n = split_gates(wih[E:E + H])
    wih_wb_r, wih_wb_z, wih_wb_n = split_gates(wih[E + H:])

    weights = (p["attn_w_hid"], wa_f, wa_b, p["attn_b"], p["attn_v"],
               whh_r, whh_z, whh_n, bhh_n,
               wih_wf_r, wih_wf_z, wih_wf_n,
               wih_wb_r, wih_wb_z, wih_wb_n,
               fcw_h, fcw_wf, fcw_wb)

    gi_spec = pl.BlockSpec((T_BLK, 3, B_BLK, H), lambda b, t: (t, 0, b, 0))
    o_spec = pl.BlockSpec((T_BLK, B_BLK, O_pad), lambda b, t: (t, b, 0))
    enc_spec = pl.BlockSpec((S, B_BLK, H), lambda b, t: (0, b, 0))
    h0_spec = pl.BlockSpec((B_BLK, H), lambda b, t: (b, 0))

    preds = pl.pallas_call(
        functools.partial(_decoder_kernel, t_blk=T_BLK),
        out_shape=jax.ShapeDtypeStruct((T_pad, Bp, O_pad), jnp.float32),
        grid_spec=pltpu.PrefetchScalarGridSpec(
            num_scalar_prefetch=0,
            grid=(nB, nT),
            in_specs=[gi_spec, o_spec, enc_spec, enc_spec, h0_spec]
                     + [_const_spec(w) for w in weights],
            out_specs=o_spec,
            scratch_shapes=[pltpu.VMEM((B_BLK, H), jnp.float32),
                            pltpu.VMEM((S, B_BLK, H), jnp.float32)]),
        compiler_params=pltpu.CompilerParams(
            dimension_semantics=("parallel", "arbitrary"),
            vmem_limit_bytes=VMEM_LIMIT),
    )(gi_emb, pred_emb, enc_f, enc_b, hidden, *weights)

    return preds                                              # [T_pad, Bp, O_pad]


# ----------------------------- model ---------------------------------------

def init_params(key, *, input_dim, output_dim, emb_dim, hidden_dim):
    H, E = hidden_dim, emb_dim
    keys = jax.random.split(key, 32)
    k = iter(keys)
    s = 0.1

    def rnd(shape):
        return (s * jax.random.normal(next(k), shape)).astype(jnp.float32)

    return {
        # encoder (weights stored pre-transposed as [in, out]; gate order r,z,n)
        "enc_emb": rnd((input_dim, E)),
        "enc_wih_f": rnd((E, 3 * H)), "enc_whh_f": rnd((H, 3 * H)),
        "enc_bih_f": rnd((1, 3 * H)), "enc_bhh_f": rnd((1, 3 * H)),
        "enc_wih_b": rnd((E, 3 * H)), "enc_whh_b": rnd((H, 3 * H)),
        "enc_bih_b": rnd((1, 3 * H)), "enc_bhh_b": rnd((1, 3 * H)),
        "enc_fc_w": rnd((2 * H, H)), "enc_fc_b": rnd((1, H)),
        # decoder; attention Linear(3H, H) split into hidden / encoder halves
        "dec_emb": rnd((output_dim, E)),
        "attn_w_hid": rnd((H, H)), "attn_w_enc": rnd((2 * H, H)),
        "attn_b": rnd((1, H)),
        "attn_v": rnd((H, 1)),                                # v as a column vector
        "dec_wih": rnd((E + 2 * H, 3 * H)), "dec_whh": rnd((H, 3 * H)),
        "dec_bih": rnd((1, 3 * H)), "dec_bhh": rnd((1, 3 * H)),
        "fc_out_w": rnd((3 * H + E, output_dim)), "fc_out_b": rnd((1, output_dim)),
    }


@jax.jit
def seq2seq_attn_forward(p, src, trg):
    B = src.shape[0]
    Bp = _round_up(B, B_BLK)                                  # pad batch to sublane mult
    if Bp != B:
        src = jnp.pad(src, ((0, Bp - B), (0, 0)))
        trg = jnp.pad(trg, ((0, Bp - B), (0, 0)))
    enc_f, enc_b, hidden = encoder_forward(p, src)
    preds = decoder_forward(p, trg, enc_f, enc_b, hidden)     # [T_pad, Bp, O_pad]
    n_steps = trg.shape[1] - 1
    O = p["fc_out_b"].shape[1]
    out = jnp.transpose(preds[:n_steps, :, :O], (1, 0, 2))    # [Bp, T-1, O]
    return out[:B]


# ----------------------------- main ----------------------------------------

if __name__ == "__main__":
    INPUT_DIM = 20    # source vocab
    OUTPUT_DIM = 18   # target vocab
    EMB_DIM = 16
    HIDDEN_DIM = 32
    BATCH = 2
    SRC_LEN = 8
    TRG_LEN = 6

    key = jax.random.PRNGKey(0)
    pkey, skey, tkey = jax.random.split(key, 3)

    params = init_params(pkey, input_dim=INPUT_DIM, output_dim=OUTPUT_DIM,
                         emb_dim=EMB_DIM, hidden_dim=HIDDEN_DIM)

    src = jax.random.randint(skey, (BATCH, SRC_LEN), 0, INPUT_DIM, dtype=jnp.int32)
    trg = jax.random.randint(tkey, (BATCH, TRG_LEN), 0, OUTPUT_DIM, dtype=jnp.int32)

    out = seq2seq_attn_forward(params, src, trg)
    out = jax.block_until_ready(out)

    assert out.shape == (BATCH, TRG_LEN - 1, OUTPUT_DIM), out.shape
    assert bool(jnp.all(jnp.isfinite(out)))
    print("KERNEL_OK")
</pallas_src>

<mosaic_0001>
module attributes {stable_mosaic.version = 11 : i64} {
  func.func @_encoder_kernel(%arg0: i32, %arg1: i32, %arg2: memref<8x3x8x32xf32, #tpu.memory_space<vmem>>, %arg3: memref<8x3x8x32xf32, #tpu.memory_space<vmem>>, %arg4: memref<32x32xf32, #tpu.memory_space<vmem>>, %arg5: memref<32x32xf32, #tpu.memory_space<vmem>>, %arg6: memref<32x32xf32, #tpu.memory_space<vmem>>, %arg7: memref<1x32xf32, #tpu.memory_space<vmem>>, %arg8: memref<32x32xf32, #tpu.memory_space<vmem>>, %arg9: memref<32x32xf32, #tpu.memory_space<vmem>>, %arg10: memref<32x32xf32, #tpu.memory_space<vmem>>, %arg11: memref<1x32xf32, #tpu.memory_space<vmem>>, %arg12: memref<32x32xf32, #tpu.memory_space<vmem>>, %arg13: memref<32x32xf32, #tpu.memory_space<vmem>>, %arg14: memref<1x32xf32, #tpu.memory_space<vmem>>, %arg15: memref<8x8x32xf32, #tpu.memory_space<vmem>>, %arg16: memref<8x8x32xf32, #tpu.memory_space<vmem>>, %arg17: memref<8x32xf32, #tpu.memory_space<vmem>>, %arg18: memref<8x32xf32, #tpu.memory_space<vmem>>, %arg19: memref<8x32xf32, #tpu.memory_space<vmem>>) attributes {dimension_semantics = [#tpu.dimension_semantics<parallel>, #tpu.dimension_semantics<arbitrary>], iteration_bounds = array<i64: 1, 1>, scalar_prefetch = 0 : i64, scratch_operands = 2 : i64, tpu.core_type = #tpu.core_type<tc>, window_params = [{transform_indices = @transform_0, window_bounds = array<i64: 8, 3, 8, 32>}, {transform_indices = @transform_1, window_bounds = array<i64: 8, 3, 8, 32>}, {pipeline_mode = #tpu.pipeline_mode<synchronous>, transform_indices = @transform_2, window_bounds = array<i64: 32, 32>}, {pipeline_mode = #tpu.pipeline_mode<synchronous>, transform_indices = @transform_3, window_bounds = array<i64: 32, 32>}, {pipeline_mode = #tpu.pipeline_mode<synchronous>, transform_indices = @transform_4, window_bounds = array<i64: 32, 32>}, {pipeline_mode = #tpu.pipeline_mode<synchronous>, transform_indices = @transform_5, window_bounds = array<i64: 1, 32>}, {pipeline_mode = #tpu.pipeline_mode<synchronous>, transform_indices = @transform_6, window_bounds = array<i64: 32, 32>}, {pipeline_mode = #tpu.pipeline_mode<synchronous>, transform_indices = @transform_7, window_bounds = array<i64: 32, 32>}, {pipeline_mode = #tpu.pipeline_mode<synchronous>, transform_indices = @transform_8, window_bounds = array<i64: 32, 32>}, {pipeline_mode = #tpu.pipeline_mode<synchronous>, transform_indices = @transform_9, window_bounds = array<i64: 1, 32>}, {pipeline_mode = #tpu.pipeline_mode<synchronous>, transform_indices = @transform_10, window_bounds = array<i64: 32, 32>}, {pipeline_mode = #tpu.pipeline_mode<synchronous>, transform_indices = @transform_11, window_bounds = array<i64: 32, 32>}, {pipeline_mode = #tpu.pipeline_mode<synchronous>, transform_indices = @transform_12, window_bounds = array<i64: 1, 32>}, {transform_indices = @transform_13, window_bounds = array<i64: 8, 8, 32>}, {transform_indices = @transform_14, window_bounds = array<i64: 8, 8, 32>}, {transform_indices = @transform_15, window_bounds = array<i64: 8, 32>}]} {
    %c0_i32 = arith.constant 0 : i32
    %0 = arith.cmpi eq, %arg1, %c0_i32 : i32
    %1 = arith.extui %0 : i1 to i32
    %c0_i32_0 = arith.constant 0 : i32
    %2 = arith.cmpi ne, %1, %c0_i32_0 : i32
    scf.if %2 {
      %cst_362 = arith.constant 0.000000e+00 : f32
      %698 = vector.broadcast %cst_362 : f32 to vector<8x32xf32>
      %c0_363 = arith.constant 0 : index
      %c0_364 = arith.constant 0 : index
      %699 = vector.load %arg18[%c0_363, %c0_364] : memref<8x32xf32, #tpu.memory_space<vmem>>, vector<8x32xf32>
      tpu.vector_store %arg18[%c0_363, %c0_364], %698 {strides = array<i32>} : memref<8x32xf32, #tpu.memory_space<vmem>>, vector<8x32xf32>,
      %cst_365 = arith.constant 0.000000e+00 : f32
      %700 = vector.broadcast %cst_365 : f32 to vector<8x32xf32>
      %c0_366 = arith.constant 0 : index
      %c0_367 = arith.constant 0 : index
      %701 = vector.load %arg19[%c0_366, %c0_367] : memref<8x32xf32, #tpu.memory_space<vmem>>, vector<8x32xf32>
      tpu.vector_store %arg19[%c0_366, %c0_367], %700 {strides = array<i32>} : memref<8x32xf32, #tpu.memory_space<vmem>>, vector<8x32xf32>,
    } else {
    }
    %c0 = arith.constant 0 : index
    %c0_1 = arith.constant 0 : index
    %3 = vector.load %arg18[%c0, %c0_1] : memref<8x32xf32, #tpu.memory_space<vmem>>, vector<8x32xf32>
    %c0_2 = arith.constant 0 : index
    %c0_3 = arith.constant 0 : index
    %4 = vector.load %arg19[%c0_2, %c0_3] : memref<8x32xf32, #tpu.memory_space<vmem>>, vector<8x32xf32>
    %c8_i32 = arith.constant 8 : i32
    %5 = arith.muli %arg1, %c8_i32 : i32
    %c0_i32_4 = arith.constant 0 : i32
    %6 = arith.addi %5, %c0_i32_4 : i32
    %c0_5 = arith.constant 0 : index
    %c0_6 = arith.constant 0 : index
    %c0_7 = arith.constant 0 : index
    %c0_8 = arith.constant 0 : index
    %7 = vector.load %arg2[%c0_5, %c0_6, %c0_7, %c0_8] : memref<8x3x8x32xf32, #tpu.memory_space<vmem>>, vector<1x3x8x32xf32>
    %8 = vector.shape_cast %7 : vector<1x3x8x32xf32> to vector<3x8x32xf32>
    %9 = vector.extract_strided_slice %8 {offsets = [0, 0, 0], sizes = [1, 8, 32], strides = [1, 1, 1]} : vector<3x8x32xf32> to vector<1x8x32xf32>
    %10 = vector.shape_cast %9 : vector<1x8x32xf32> to vector<8x32xf32>
    %c0_9 = arith.constant 0 : index
    %c0_10 = arith.constant 0 : index
    %11 = vector.load %arg4[%c0_9, %c0_10] : memref<32x32xf32, #tpu.memory_space<vmem>>, vector<32x32xf32>
    %cst = arith.constant dense<0.000000e+00> : vector<8x32xf32>
    %12 = tpu.matmul %3, %11, %cst {dimension_numbers = #tpu.dot_dimension_numbers<[1], [0], [0], [1], [0, 0, 1, 1], [], []>} : vector<8x32xf32>, vector<32x32xf32>, vector<8x32xf32> -> vector<8x32xf32>
    %13 = arith.addf %10, %12 : vector<8x32xf32>
    %14 = arith.negf %13 : vector<8x32xf32>
    %15 = math.exp %14 : vector<8x32xf32>
    %cst_11 = arith.constant 1.000000e+00 : f32
    %16 = vector.broadcast %cst_11 : f32 to vector<8x32xf32>
    %17 = arith.addf %16, %15 : vector<8x32xf32>
    %18 = arith.divf %16, %17 : vector<8x32xf32>
    %19 = vector.extract_strided_slice %8 {offsets = [1, 0, 0], sizes = [1, 8, 32], strides = [1, 1, 1]} : vector<3x8x32xf32> to vector<1x8x32xf32>
    %20 = vector.shape_cast %19 : vector<1x8x32xf32> to vector<8x32xf32>
    %c0_12 = arith.constant 0 : index
    %c0_13 = arith.constant 0 : index
    %21 = vector.load %arg5[%c0_12, %c0_13] : memref<32x32xf32, #tpu.memory_space<vmem>>, vector<32x32xf32>
    %cst_14 = arith.constant dense<0.000000e+00> : vector<8x32xf32>
    %22 = tpu.matmul %3, %21, %cst_14 {dimension_numbers = #tpu.dot_dimension_numbers<[1], [0], [0], [1], [0, 0, 1, 1], [], []>} : vector<8x32xf32>, vector<32x32xf32>, vector<8x32xf32> -> vector<8x32xf32>
    %23 = arith.addf %20, %22 : vector<8x32xf32>
    %24 = arith.negf %23 : vector<8x32xf32>
    %25 = math.exp %24 : vector<8x32xf32>
    %cst_15 = arith.constant 1.000000e+00 : f32
    %26 = vector.broadcast %cst_15 : f32 to vector<8x32xf32>
    %27 = arith.addf %26, %25 : vector<8x32xf32>
    %28 = arith.divf %26, %27 : vector<8x32xf32>
    %29 = vector.extract_strided_slice %8 {offsets = [2, 0, 0], sizes = [1, 8, 32], strides = [1, 1, 1]} : vector<3x8x32xf32> to vector<1x8x32xf32>
    %30 = vector.shape_cast %29 : vector<1x8x32xf32> to vector<8x32xf32>
    %c0_16 = arith.constant 0 : index
    %c0_17 = arith.constant 0 : index
    %31 = vector.load %arg6[%c0_16, %c0_17] : memref<32x32xf32, #tpu.memory_space<vmem>>, vector<32x32xf32>
    %cst_18 = arith.constant dense<0.000000e+00> : vector<8x32xf32>
    %32 = tpu.matmul %3, %31, %cst_18 {dimension_numbers = #tpu.dot_dimension_numbers<[1], [0], [0], [1], [0, 0, 1, 1], [], []>} : vector<8x32xf32>, vector<32x32xf32>, vector<8x32xf32> -> vector<8x32xf32>
    %c0_19 = arith.constant 0 : index
    %c0_20 = arith.constant 0 : index
    %33 = vector.load %arg7[%c0_19, %c0_20] : memref<1x32xf32, #tpu.memory_space<vmem>>, vector<1x32xf32>
    %34 = vector.broadcast %33 : vector<1x32xf32> to vector<8x32xf32>
    %35 = arith.addf %32, %34 : vector<8x32xf32>
    %36 = arith.mulf %18, %35 : vector<8x32xf32>
    %37 = arith.addf %30, %36 : vector<8x32xf32>
    %38 = math.tanh %37 : vector<8x32xf32>
    %cst_21 = arith.constant 1.000000e+00 : f32
    %39 = vector.broadcast %cst_21 : f32 to vector<8x32xf32>
    %40 = arith.subf %39, %28 : vector<8x32xf32>
    %41 = arith.mulf %40, %38 : vector<8x32xf32>
    %42 = arith.mulf %28, %3 : vector<8x32xf32>
    %43 = arith.addf %41, %42 : vector<8x32xf32>
    %c8_i32_22 = arith.constant 8 : i32
    %44 = arith.cmpi slt, %6, %c8_i32_22 : i32
    %45 = arith.select %44, %43, %3 : vector<8x32xf32>
    %c0_23 = arith.constant 0 : index
    %c0_24 = arith.constant 0 : index
    %c0_25 = arith.constant 0 : index
    %46 = vector.load %arg15[%c0_23, %c0_24, %c0_25] : memref<8x8x32xf32, #tpu.memory_space<vmem>>, vector<1x8x32xf32>
    %47 = vector.shape_cast %46 : vector<1x8x32xf32> to vector<8x32xf32>
    %48 = vector.shape_cast %45 : vector<8x32xf32> to vector<1x8x32xf32>
    tpu.vector_store %arg15[%c0_23, %c0_24, %c0_25], %48 {strides = array<i32>} : memref<8x8x32xf32, #tpu.memory_space<vmem>>, vector<1x8x32xf32>,
    %c7 = arith.constant 7 : index
    %c0_26 = arith.constant 0 : index
    %c0_27 = arith.constant 0 : index
    %c0_28 = arith.constant 0 : index
    %49 = vector.load %arg3[%c7, %c0_26, %c0_27, %c0_28] : memref<8x3x8x32xf32, #tpu.memory_space<vmem>>, vector<1x3x8x32xf32>
    %50 = vector.shape_cast %49 : vector<1x3x8x32xf32> to vector<3x8x32xf32>
    %51 = vector.extract_strided_slice %50 {offsets = [0, 0, 0], sizes = [1, 8, 32], strides = [1, 1, 1]} : vector<3x8x32xf32> to vector<1x8x32xf32>
    %52 = vector.shape_cast %51 : vector<1x8x32xf32> to vector<8x32xf32>
    %c0_29 = arith.constant 0 : index
    %c0_30 = arith.constant 0 : index
    %53 = vector.load %arg8[%c0_29, %c0_30] : memref<32x32xf32, #tpu.memory_space<vmem>>, vector<32x32xf32>
    %cst_31 = arith.constant dense<0.000000e+00> : vector<8x32xf32>
    %54 = tpu.matmul %4, %53, %cst_31 {dimension_numbers = #tpu.dot_dimension_numbers<[1], [0], [0], [1], [0, 0, 1, 1], [], []>} : vector<8x32xf32>, vector<32x32xf32>, vector<8x32xf32> -> vector<8x32xf32>
    %55 = arith.addf %52, %54 : vector<8x32xf32>
    %56 = arith.negf %55 : vector<8x32xf32>
    %57 = math.exp %56 : vector<8x32xf32>
    %cst_32 = arith.constant 1.000000e+00 : f32
    %58 = vector.broadcast %cst_32 : f32 to vector<8x32xf32>
    %59 = arith.addf %58, %57 : vector<8x32xf32>
    %60 = arith.divf %58, %59 : vector<8x32xf32>
    %61 = vector.extract_strided_slice %50 {offsets = [1, 0, 0], sizes = [1, 8, 32], strides = [1, 1, 1]} : vector<3x8x32xf32> to vector<1x8x32xf32>
    %62 = vector.shape_cast %61 : vector<1x8x32xf32> to vector<8x32xf32>
    %c0_33 = arith.constant 0 : index
    %c0_34 = arith.constant 0 : index
    %63 = vector.load %arg9[%c0_33, %c0_34] : memref<32x32xf32, #tpu.memory_space<vmem>>, vector<32x32xf32>
    %cst_35 = arith.constant dense<0.000000e+00> : vector<8x32xf32>
    %64 = tpu.matmul %4, %63, %cst_35 {dimension_numbers = #tpu.dot_dimension_numbers<[1], [0], [0], [1], [0, 0, 1, 1], [], []>} : vector<8x32xf32>, vector<32x32xf32>, vector<8x32xf32> -> vector<8x32xf32>
    %65 = arith.addf %62, %64 : vector<8x32xf32>
    %66 = arith.negf %65 : vector<8x32xf32>
    %67 = math.exp %66 : vector<8x32xf32>
    %cst_36 = arith.constant 1.000000e+00 : f32
    %68 = vector.broadcast %cst_36 : f32 to vector<8x32xf32>
    %69 = arith.addf %68, %67 : vector<8x32xf32>
    %70 = arith.divf %68, %69 : vector<8x32xf32>
    %71 = vector.extract_strided_slice %50 {offsets = [2, 0, 0], sizes = [1, 8, 32], strides = [1, 1, 1]} : vector<3x8x32xf32> to vector<1x8x32xf32>
    %72 = vector.shape_cast %71 : vector<1x8x32xf32> to vector<8x32xf32>
    %c0_37 = arith.constant 0 : index
    %c0_38 = arith.constant 0 : index
    %73 = vector.load %arg10[%c0_37, %c0_38] : memref<32x32xf32, #tpu.memory_space<vmem>>, vector<32x32xf32>
    %cst_39 = arith.constant dense<0.000000e+00> : vector<8x32xf32>
    %74 = tpu.matmul %4, %73, %cst_39 {dimension_numbers = #tpu.dot_dimension_numbers<[1], [0], [0], [1], [0, 0, 1, 1], [], []>} : vector<8x32xf32>, vector<32x32xf32>, vector<8x32xf32> -> vector<8x32xf32>
    %c0_40 = arith.constant 0 : index
    %c0_41 = arith.constant 0 : index
    %75 = vector.load %arg11[%c0_40, %c0_41] : memref<1x32xf32, #tpu.memory_space<vmem>>, vector<1x32xf32>
    %76 = vector.broadcast %75 : vector<1x32xf32> to vector<8x32xf32>
    %77 = arith.addf %74, %76 : vector<8x32xf32>
    %78 = arith.mulf %60, %77 : vector<8x32xf32>
    %79 = arith.addf %72, %78 : vector<8x32xf32>
    %80 = math.tanh %79 : vector<8x32xf32>
    %cst_42 = arith.constant 1.000000e+00 : f32
    %81 = vector.broadcast %cst_42 : f32 to vector<8x32xf32>
    %82 = arith.subf %81, %70 : vector<8x32xf32>
    %83 = arith.mulf %82, %80 : vector<8x32xf32>
    %84 = arith.mulf %70, %4 : vector<8x32xf32>
    %85 = arith.addf %83, %84 : vector<8x32xf32>
    %c0_i32_43 = arith.constant 0 : i32
    %86 = arith.cmpi sge, %6, %c0_i32_43 : i32
    %87 = arith.select %86, %85, %4 : vector<8x32xf32>
    %c7_44 = arith.constant 7 : index
    %c0_45 = arith.constant 0 : index
    %c0_46 = arith.constant 0 : index
    %88 = vector.load %arg16[%c7_44, %c0_45, %c0_46] : memref<8x8x32xf32, #tpu.memory_space<vmem>>, vector<1x8x32xf32>
    %89 = vector.shape_cast %88 : vector<1x8x32xf32> to vector<8x32xf32>
    %90 = vector.shape_cast %87 : vector<8x32xf32> to vector<1x8x32xf32>
    tpu.vector_store %arg16[%c7_44, %c0_45, %c0_46], %90 {strides = array<i32>} : memref<8x8x32xf32, #tpu.memory_space<vmem>>, vector<1x8x32xf32>,
    %c8_i32_47 = arith.constant 8 : i32
    %91 = arith.muli %arg1, %c8_i32_47 : i32
    %c1_i32 = arith.constant 1 : i32
    %92 = arith.addi %91, %c1_i32 : i32
    %c1 = arith.constant 1 : index
    %c0_48 = arith.constant 0 : index
    %c0_49 = arith.constant 0 : index
    %c0_50 = arith.constant 0 : index
    %93 = vector.load %arg2[%c1, %c0_48, %c0_49, %c0_50] : memref<8x3x8x32xf32, #tpu.memory_space<vmem>>, vector<1x3x8x32xf32>
    %94 = vector.shape_cast %93 : vector<1x3x8x32xf32> to vector<3x8x32xf32>
    %95 = vector.extract_strided_slice %94 {offsets = [0, 0, 0], sizes = [1, 8, 32], strides = [1, 1, 1]} : vector<3x8x32xf32> to vector<1x8x32xf32>
    %96 = vector.shape_cast %95 : vector<1x8x32xf32> to vector<8x32xf32>
    %c0_51 = arith.constant 0 : index
    %c0_52 = arith.constant 0 : index
    %97 = vector.load %arg4[%c0_51, %c0_52] : memref<32x32xf32, #tpu.memory_space<vmem>>, vector<32x32xf32>
    %cst_53 = arith.constant dense<0.000000e+00> : vector<8x32xf32>
    %98 = tpu.matmul %45, %97, %cst_53 {dimension_numbers = #tpu.dot_dimension_numbers<[1], [0], [0], [1], [0, 0, 1, 1], [], []>} : vector<8x32xf32>, vector<32x32xf32>, vector<8x32xf32> -> vector<8x32xf32>
    %99 = arith.addf %96, %98 : vector<8x32xf32>
    %100 = arith.negf %99 : vector<8x32xf32>
    %101 = math.exp %100 : vector<8x32xf32>
    %cst_54 = arith.constant 1.000000e+00 : f32
    %102 = vector.broadcast %cst_54 : f32 to vector<8x32xf32>
    %103 = arith.addf %102, %101 : vector<8x32xf32>
    %104 = arith.divf %102, %103 : vector<8x32xf32>
    %105 = vector.extract_strided_slice %94 {offsets = [1, 0, 0], sizes = [1, 8, 32], strides = [1, 1, 1]} : vector<3x8x32xf32> to vector<1x8x32xf32>
    %106 = vector.shape_cast %105 : vector<1x8x32xf32> to vector<8x32xf32>
    %c0_55 = arith.constant 0 : index
    %c0_56 = arith.constant 0 : index
    %107 = vector.load %arg5[%c0_55, %c0_56] : memref<32x32xf32, #tpu.memory_space<vmem>>, vector<32x32xf32>
    %cst_57 = arith.constant dense<0.000000e+00> : vector<8x32xf32>
    %108 = tpu.matmul %45, %107, %cst_57 {dimension_numbers = #tpu.dot_dimension_numbers<[1], [0], [0], [1], [0, 0, 1, 1], [], []>} : vector<8x32xf32>, vector<32x32xf32>, vector<8x32xf32> -> vector<8x32xf32>
    %109 = arith.addf %106, %108 : vector<8x32xf32>
    %110 = arith.negf %109 : vector<8x32xf32>
    %111 = math.exp %110 : vector<8x32xf32>
    %cst_58 = arith.constant 1.000000e+00 : f32
    %112 = vector.broadcast %cst_58 : f32 to vector<8x32xf32>
    %113 = arith.addf %112, %111 : vector<8x32xf32>
    %114 = arith.divf %112, %113 : vector<8x32xf32>
    %115 = vector.extract_strided_slice %94 {offsets = [2, 0, 0], sizes = [1, 8, 32], strides = [1, 1, 1]} : vector<3x8x32xf32> to vector<1x8x32xf32>
    %116 = vector.shape_cast %115 : vector<1x8x32xf32> to vector<8x32xf32>
    %c0_59 = arith.constant 0 : index
    %c0_60 = arith.constant 0 : index
    %117 = vector.load %arg6[%c0_59, %c0_60] : memref<32x32xf32, #tpu.memory_space<vmem>>, vector<32x32xf32>
    %cst_61 = arith.constant dense<0.000000e+00> : vector<8x32xf32>
    %118 = tpu.matmul %45, %117, %cst_61 {dimension_numbers = #tpu.dot_dimension_numbers<[1], [0], [0], [1], [0, 0, 1, 1], [], []>} : vector<8x32xf32>, vector<32x32xf32>, vector<8x32xf32> -> vector<8x32xf32>
    %c0_62 = arith.constant 0 : index
    %c0_63 = arith.constant 0 : index
    %119 = vector.load %arg7[%c0_62, %c0_63] : memref<1x32xf32, #tpu.memory_space<vmem>>, vector<1x32xf32>
    %120 = vector.broadcast %119 : vector<1x32xf32> to vector<8x32xf32>
    %121 = arith.addf %118, %120 : vector<8x32xf32>
    %122 = arith.mulf %104, %121 : vector<8x32xf32>
    %123 = arith.addf %116, %122 : vector<8x32xf32>
    %124 = math.tanh %123 : vector<8x32xf32>
    %cst_64 = arith.constant 1.000000e+00 : f32
    %125 = vector.broadcast %cst_64 : f32 to vector<8x32xf32>
    %126 = arith.subf %125, %114 : vector<8x32xf32>
    %127 = arith.mulf %126, %124 : vector<8x32xf32>
    %128 = arith.mulf %114, %45 : vector<8x32xf32>
    %129 = arith.addf %127, %128 : vector<8x32xf32>
    %c8_i32_65 = arith.constant 8 : i32
    %130 = arith.cmpi slt, %92, %c8_i32_65 : i32
    %131 = arith.select %130, %129, %45 : vector<8x32xf32>
    %c1_66 = arith.constant 1 : index
    %c0_67 = arith.constant 0 : index
    %c0_68 = arith.constant 0 : index
    %132 = vector.load %arg15[%c1_66, %c0_67, %c0_68] : memref<8x8x32xf32, #tpu.memory_space<vmem>>, vector<1x8x32xf32>
    %133 = vector.shape_cast %132 : vector<1x8x32xf32> to vector<8x32xf32>
    %134 = vector.shape_cast %131 : vector<8x32xf32> to vector<1x8x32xf32>
    tpu.vector_store %arg15[%c1_66, %c0_67, %c0_68], %134 {strides = array<i32>} : memref<8x8x32xf32, #tpu.memory_space<vmem>>, vector<1x8x32xf32>,
    %c6 = arith.constant 6 : index
    %c0_69 = arith.constant 0 : index
    %c0_70 = arith.constant 0 : index
    %c0_71 = arith.constant 0 : index
    %135 = vector.load %arg3[%c6, %c0_69, %c0_70, %c0_71] : memref<8x3x8x32xf32, #tpu.memory_space<vmem>>, vector<1x3x8x32xf32>
    %136 = vector.shape_cast %135 : vector<1x3x8x32xf32> to vector<3x8x32xf32>
    %137 = vector.extract_strided_slice %136 {offsets = [0, 0, 0], sizes = [1, 8, 32], strides = [1, 1, 1]} : vector<3x8x32xf32> to vector<1x8x32xf32>
    %138 = vector.shape_cast %137 : vector<1x8x32xf32> to vector<8x32xf32>
    %c0_72 = arith.constant 0 : index
    %c0_73 = arith.constant 0 : index
    %139 = vector.load %arg8[%c0_72, %c0_73] : memref<32x32xf32, #tpu.memory_space<vmem>>, vector<32x32xf32>
    %cst_74 = arith.constant dense<0.000000e+00> : vector<8x32xf32>
    %140 = tpu.matmul %87, %139, %cst_74 {dimension_numbers = #tpu.dot_dimension_numbers<[1], [0], [0], [1], [0, 0, 1, 1], [], []>} : vector<8x32xf32>, vector<32x32xf32>, vector<8x32xf32> -> vector<8x32xf32>
    %141 = arith.addf %138, %140 : vector<8x32xf32>
    %142 = arith.negf %141 : vector<8x32xf32>
    %143 = math.exp %142 : vector<8x32xf32>
    %cst_75 = arith.constant 1.000000e+00 : f32
    %144 = vector.broadcast %cst_75 : f32 to vector<8x32xf32>
    %145 = arith.addf %144, %143 : vector<8x32xf32>
    %146 = arith.divf %144, %145 : vector<8x32xf32>
    %147 = vector.extract_strided_slice %136 {offsets = [1, 0, 0], sizes = [1, 8, 32], strides = [1, 1, 1]} : vector<3x8x32xf32> to vector<1x8x32xf32>
    %148 = vector.shape_cast %147 : vector<1x8x32xf32> to vector<8x32xf32>
    %c0_76 = arith.constant 0 : index
    %c0_77 = arith.constant 0 : index
    %149 = vector.load %arg9[%c0_76, %c0_77] : memref<32x32xf32, #tpu.memory_space<vmem>>, vector<32x32xf32>
    %cst_78 = arith.constant dense<0.000000e+00> : vector<8x32xf32>
    %150 = tpu.matmul %87, %149, %cst_78 {dimension_numbers = #tpu.dot_dimension_numbers<[1], [0], [0], [1], [0, 0, 1, 1], [], []>} : vector<8x32xf32>, vector<32x32xf32>, vector<8x32xf32> -> vector<8x32xf32>
    %151 = arith.addf %148, %150 : vector<8x32xf32>
    %152 = arith.negf %151 : vector<8x32xf32>
    %153 = math.exp %152 : vector<8x32xf32>
    %cst_79 = arith.constant 1.000000e+00 : f32
    %154 = vector.broadcast %cst_79 : f32 to vector<8x32xf32>
    %155 = arith.addf %154, %153 : vector<8x32xf32>
    %156 = arith.divf %154, %155 : vector<8x32xf32>
    %157 = vector.extract_strided_slice %136 {offsets = [2, 0, 0], sizes = [1, 8, 32], strides = [1, 1, 1]} : vector<3x8x32xf32> to vector<1x8x32xf32>
    %158 = vector.shape_cast %157 : vector<1x8x32xf32> to vector<8x32xf32>
    %c0_80 = arith.constant 0 : index
    %c0_81 = arith.constant 0 : index
    %159 = vector.load %arg10[%c0_80, %c0_81] : memref<32x32xf32, #tpu.memory_space<vmem>>, vector<32x32xf32>
    %cst_82 = arith.constant dense<0.000000e+00> : vector<8x32xf32>
    %160 = tpu.matmul %87, %159, %cst_82 {dimension_numbers = #tpu.dot_dimension_numbers<[1], [0], [0], [1], [0, 0, 1, 1], [], []>} : vector<8x32xf32>, vector<32x32xf32>, vector<8x32xf32> -> vector<8x32xf32>
    %c0_83 = arith.constant 0 : index
    %c0_84 = arith.constant 0 : index
    %161 = vector.load %arg11[%c0_83, %c0_84] : memref<1x32xf32, #tpu.memory_space<vmem>>, vector<1x32xf32>
    %162 = vector.broadcast %161 : vector<1x32xf32> to vector<8x32xf32>
    %163 = arith.addf %160, %162 : vector<8x32xf32>
    %164 = arith.mulf %146, %163 : vector<8x32xf32>
    %165 = arith.addf %158, %164 : vector<8x32xf32>
    %166 = math.tanh %165 : vector<8x32xf32>
    %cst_85 = arith.constant 1.000000e+00 : f32
    %167 = vector.broadcast %cst_85 : f32 to vector<8x32xf32>
    %168 = arith.subf %167, %156 : vector<8x32xf32>
    %169 = arith.mulf %168, %166 : vector<8x32xf32>
    %170 = arith.mulf %156, %87 : vector<8x32xf32>
    %171 = arith.addf %169, %170 : vector<8x32xf32>
    %c0_i32_86 = arith.constant 0 : i32
    %172 = arith.cmpi sge, %92, %c0_i32_86 : i32
    %173 = arith.select %172, %171, %87 : vector<8x32xf32>
    %c6_87 = arith.constant 6 : index
    %c0_88 = arith.constant 0 : index
    %c0_89 = arith.constant 0 : index
    %174 = vector.load %arg16[%c6_87, %c0_88, %c0_89] : memref<8x8x32xf32, #tpu.memory_space<vmem>>, vector<1x8x32xf32>
    %175 = vector.shape_cast %174 : vector<1x8x32xf32> to vector<8x32xf32>
    %176 = vector.shape_cast %173 : vector<8x32xf32> to vector<1x8x32xf32>
    tpu.vector_store %arg16[%c6_87, %c0_88, %c0_89], %176 {strides = array<i32>} : memref<8x8x32xf32, #tpu.memory_space<vmem>>, vector<1x8x32xf32>,
    %c8_i32_90 = arith.constant 8 : i32
    %177 = arith.muli %arg1, %c8_i32_90 : i32
    %c2_i32 = arith.constant 2 : i32
    %178 = arith.addi %177, %c2_i32 : i32
    %c2 = arith.constant 2 : index
    %c0_91 = arith.constant 0 : index
    %c0_92 = arith.constant 0 : index
    %c0_93 = arith.constant 0 : index
    %179 = vector.load %arg2[%c2, %c0_91, %c0_92, %c0_93] : memref<8x3x8x32xf32, #tpu.memory_space<vmem>>, vector<1x3x8x32xf32>
    %180 = vector.shape_cast %179 : vector<1x3x8x32xf32> to vector<3x8x32xf32>
    %181 = vector.extract_strided_slice %180 {offsets = [0, 0, 0], sizes = [1, 8, 32], strides = [1, 1, 1]} : vector<3x8x32xf32> to vector<1x8x32xf32>
    %182 = vector.shape_cast %181 : vector<1x8x32xf32> to vector<8x32xf32>
    %c0_94 = arith.constant 0 : index
    %c0_95 = arith.constant 0 : index
    %183 = vector.load %arg4[%c0_94, %c0_95] : memref<32x32xf32, #tpu.memory_space<vmem>>, vector<32x32xf32>
    %cst_96 = arith.constant dense<0.000000e+00> : vector<8x32xf32>
    %184 = tpu.matmul %131, %183, %cst_96 {dimension_numbers = #tpu.dot_dimension_numbers<[1], [0], [0], [1], [0, 0, 1, 1], [], []>} : vector<8x32xf32>, vector<32x32xf32>, vector<8x32xf32> -> vector<8x32xf32>
    %185 = arith.addf %182, %184 : vector<8x32xf32>
    %186 = arith.negf %185 : vector<8x32xf32>
    %187 = math.exp %186 : vector<8x32xf32>
    %cst_97 = arith.constant 1.000000e+00 : f32
    %188 = vector.broadcast %cst_97 : f32 to vector<8x32xf32>
    %189 = arith.addf %188, %187 : vector<8x32xf32>
    %190 = arith.divf %188, %189 : vector<8x32xf32>
    %191 = vector.extract_strided_slice %180 {offsets = [1, 0, 0], sizes = [1, 8, 32], strides = [1, 1, 1]} : vector<3x8x32xf32> to vector<1x8x32xf32>
    %192 = vector.shape_cast %191 : vector<1x8x32xf32> to vector<8x32xf32>
    %c0_98 = arith.constant 0 : index
    %c0_99 = arith.constant 0 : index
    %193 = vector.load %arg5[%c0_98, %c0_99] : memref<32x32xf32, #tpu.memory_space<vmem>>, vector<32x32xf32>
    %cst_100 = arith.constant dense<0.000000e+00> : vector<8x32xf32>
    %194 = tpu.matmul %131, %193, %cst_100 {dimension_numbers = #tpu.dot_dimension_numbers<[1], [0], [0], [1], [0, 0, 1, 1], [], []>} : vector<8x32xf32>, vector<32x32xf32>, vector<8x32xf32> -> vector<8x32xf32>
    %195 = arith.addf %192, %194 : vector<8x32xf32>
    %196 = arith.negf %195 : vector<8x32xf32>
    %197 = math.exp %196 : vector<8x32xf32>
    %cst_101 = arith.constant 1.000000e+00 : f32
    %198 = vector.broadcast %cst_101 : f32 to vector<8x32xf32>
    %199 = arith.addf %198, %197 : vector<8x32xf32>
    %200 = arith.divf %198, %199 : vector<8x32xf32>
    %201 = vector.extract_strided_slice %180 {offsets = [2, 0, 0], sizes = [1, 8, 32], strides = [1, 1, 1]} : vector<3x8x32xf32> to vector<1x8x32xf32>
    %202 = vector.shape_cast %201 : vector<1x8x32xf32> to vector<8x32xf32>
    %c0_102 = arith.constant 0 : index
    %c0_103 = arith.constant 0 : index
    %203 = vector.load %arg6[%c0_102, %c0_103] : memref<32x32xf32, #tpu.memory_space<vmem>>, vector<32x32xf32>
    %cst_104 = arith.constant dense<0.000000e+00> : vector<8x32xf32>
    %204 = tpu.matmul %131, %203, %cst_104 {dimension_numbers = #tpu.dot_dimension_numbers<[1], [0], [0], [1], [0, 0, 1, 1], [], []>} : vector<8x32xf32>, vector<32x32xf32>, vector<8x32xf32> -> vector<8x32xf32>
    %c0_105 = arith.constant 0 : index
    %c0_106 = arith.constant 0 : index
    %205 = vector.load %arg7[%c0_105, %c0_106] : memref<1x32xf32, #tpu.memory_space<vmem>>, vector<1x32xf32>
    %206 = vector.broadcast %205 : vector<1x32xf32> to vector<8x32xf32>
    %207 = arith.addf %204, %206 : vector<8x32xf32>
    %208 = arith.mulf %190, %207 : vector<8x32xf32>
    %209 = arith.addf %202, %208 : vector<8x32xf32>
    %210 = math.tanh %209 : vector<8x32xf32>
    %cst_107 = arith.constant 1.000000e+00 : f32
    %211 = vector.broadcast %cst_107 : f32 to vector<8x32xf32>
    %212 = arith.subf %211, %200 : vector<8x32xf32>
    %213 = arith.mulf %212, %210 : vector<8x32xf32>
    %214 = arith.mulf %200, %131 : vector<8x32xf32>
    %215 = arith.addf %213, %214 : vector<8x32xf32>
    %c8_i32_108 = arith.constant 8 : i32
    %216 = arith.cmpi slt, %178, %c8_i32_108 : i32
    %217 = arith.select %216, %215, %131 : vector<8x32xf32>
    %c2_109 = arith.constant 2 : index
    %c0_110 = arith.constant 0 : index
    %c0_111 = arith.constant 0 : index
    %218 = vector.load %arg15[%c2_109, %c0_110, %c0_111] : memref<8x8x32xf32, #tpu.memory_space<vmem>>, vector<1x8x32xf32>
    %219 = vector.shape_cast %218 : vector<1x8x32xf32> to vector<8x32xf32>
    %220 = vector.shape_cast %217 : vector<8x32xf32> to vector<1x8x32xf32>
    tpu.vector_store %arg15[%c2_109, %c0_110, %c0_111], %220 {strides = array<i32>} : memref<8x8x32xf32, #tpu.memory_space<vmem>>, vector<1x8x32xf32>,
    %c5 = arith.constant 5 : index
    %c0_112 = arith.constant 0 : index
    %c0_113 = arith.constant 0 : index
    %c0_114 = arith.constant 0 : index
    %221 = vector.load %arg3[%c5, %c0_112, %c0_113, %c0_114] : memref<8x3x8x32xf32, #tpu.memory_space<vmem>>, vector<1x3x8x32xf32>
    %222 = vector.shape_cast %221 : vector<1x3x8x32xf32> to vector<3x8x32xf32>
    %223 = vector.extract_strided_slice %222 {offsets = [0, 0, 0], sizes = [1, 8, 32], strides = [1, 1, 1]} : vector<3x8x32xf32> to vector<1x8x32xf32>
    %224 = vector.shape_cast %223 : vector<1x8x32xf32> to vector<8x32xf32>
    %c0_115 = arith.constant 0 : index
    %c0_116 = arith.constant 0 : index
    %225 = vector.load %arg8[%c0_115, %c0_116] : memref<32x32xf32, #tpu.memory_space<vmem>>, vector<32x32xf32>
    %cst_117 = arith.constant dense<0.000000e+00> : vector<8x32xf32>
    %226 = tpu.matmul %173, %225, %cst_117 {dimension_numbers = #tpu.dot_dimension_numbers<[1], [0], [0], [1], [0, 0, 1, 1], [], []>} : vector<8x32xf32>, vector<32x32xf32>, vector<8x32xf32> -> vector<8x32xf32>
    %227 = arith.addf %224, %226 : vector<8x32xf32>
    %228 = arith.negf %227 : vector<8x32xf32>
    %229 = math.exp %228 : vector<8x32xf32>
    %cst_118 = arith.constant 1.000000e+00 : f32
    %230 = vector.broadcast %cst_118 : f32 to vector<8x32xf32>
    %231 = arith.addf %230, %229 : vector<8x32xf32>
    %232 = arith.divf %230, %231 : vector<8x32xf32>
    %233 = vector.extract_strided_slice %222 {offsets = [1, 0, 0], sizes = [1, 8, 32], strides = [1, 1, 1]} : vector<3x8x32xf32> to vector<1x8x32xf32>
    %234 = vector.shape_cast %233 : vector<1x8x32xf32> to vector<8x32xf32>
    %c0_119 = arith.constant 0 : index
    %c0_120 = arith.constant 0 : index
    %235 = vector.load %arg9[%c0_119, %c0_120] : memref<32x32xf32, #tpu.memory_space<vmem>>, vector<32x32xf32>
    %cst_121 = arith.constant dense<0.000000e+00> : vector<8x32xf32>
    %236 = tpu.matmul %173, %235, %cst_121 {dimension_numbers = #tpu.dot_dimension_numbers<[1], [0], [0], [1], [0, 0, 1, 1], [], []>} : vector<8x32xf32>, vector<32x32xf32>, vector<8x32xf32> -> vector<8x32xf32>
    %237 = arith.addf %234, %236 : vector<8x32xf32>
    %238 = arith.negf %237 : vector<8x32xf32>
    %239 = math.exp %238 : vector<8x32xf32>
    %cst_122 = arith.constant 1.000000e+00 : f32
    %240 = vector.broadcast %cst_122 : f32 to vector<8x32xf32>
    %241 = arith.addf %240, %239 : vector<8x32xf32>
    %242 = arith.divf %240, %241 : vector<8x32xf32>
    %243 = vector.extract_strided_slice %222 {offsets = [2, 0, 0], sizes = [1, 8, 32], strides = [1, 1, 1]} : vector<3x8x32xf32> to vector<1x8x32xf32>
    %244 = vector.shape_cast %243 : vector<1x8x32xf32> to vector<8x32xf32>
    %c0_123 = arith.constant 0 : index
    %c0_124 = arith.constant 0 : index
    %245 = vector.load %arg10[%c0_123, %c0_124] : memref<32x32xf32, #tpu.memory_space<vmem>>, vector<32x32xf32>
    %cst_125 = arith.constant dense<0.000000e+00> : vector<8x32xf32>
    %246 = tpu.matmul %173, %245, %cst_125 {dimension_numbers = #tpu.dot_dimension_numbers<[1], [0], [0], [1], [0, 0, 1, 1], [], []>} : vector<8x32xf32>, vector<32x32xf32>, vector<8x32xf32> -> vector<8x32xf32>
    %c0_126 = arith.constant 0 : index
    %c0_127 = arith.constant 0 : index
    %247 = vector.load %arg11[%c0_126, %c0_127] : memref<1x32xf32, #tpu.memory_space<vmem>>, vector<1x32xf32>
    %248 = vector.broadcast %247 : vector<1x32xf32> to vector<8x32xf32>
    %249 = arith.addf %246, %248 : vector<8x32xf32>
    %250 = arith.mulf %232, %249 : vector<8x32xf32>
    %251 = arith.addf %244, %250 : vector<8x32xf32>
    %252 = math.tanh %251 : vector<8x32xf32>
    %cst_128 = arith.constant 1.000000e+00 : f32
    %253 = vector.broadcast %cst_128 : f32 to vector<8x32xf32>
    %254 = arith.subf %253, %242 : vector<8x32xf32>
    %255 = arith.mulf %254, %252 : vector<8x32xf32>
    %256 = arith.mulf %242, %173 : vector<8x32xf32>
    %257 = arith.addf %255, %256 : vector<8x32xf32>
    %c0_i32_129 = arith.constant 0 : i32
    %258 = arith.cmpi sge, %178, %c0_i32_129 : i32
    %259 = arith.select %258, %257, %173 : vector<8x32xf32>
    %c5_130 = arith.constant 5 : index
    %c0_131 = arith.constant 0 : index
    %c0_132 = arith.constant 0 : index
    %260 = vector.load %arg16[%c5_130, %c0_131, %c0_132] : memref<8x8x32xf32, #tpu.memory_space<vmem>>, vector<1x8x32xf32>
    %261 = vector.shape_cast %260 : vector<1x8x32xf32> to vector<8x32xf32>
    %262 = vector.shape_cast %259 : vector<8x32xf32> to vector<1x8x32xf32>
    tpu.vector_store %arg16[%c5_130, %c0_131, %c0_132], %262 {strides = array<i32>} : memref<8x8x32xf32, #tpu.memory_space<vmem>>, vector<1x8x32xf32>,
    %c8_i32_133 = arith.constant 8 : i32
    %263 = arith.muli %arg1, %c8_i32_133 : i32
    %c3_i32 = arith.constant 3 : i32
    %264 = arith.addi %263, %c3_i32 : i32
    %c3 = arith.constant 3 : index
    %c0_134 = arith.constant 0 : index
    %c0_135 = arith.constant 0 : index
    %c0_136 = arith.constant 0 : index
    %265 = vector.load %arg2[%c3, %c0_134, %c0_135, %c0_136] : memref<8x3x8x32xf32, #tpu.memory_space<vmem>>, vector<1x3x8x32xf32>
    %266 = vector.shape_cast %265 : vector<1x3x8x32xf32> to vector<3x8x32xf32>
    %267 = vector.extract_strided_slice %266 {offsets = [0, 0, 0], sizes = [1, 8, 32], strides = [1, 1, 1]} : vector<3x8x32xf32> to vector<1x8x32xf32>
    %268 = vector.shape_cast %267 : vector<1x8x32xf32> to vector<8x32xf32>
    %c0_137 = arith.constant 0 : index
    %c0_138 = arith.constant 0 : index
    %269 = vector.load %arg4[%c0_137, %c0_138] : memref<32x32xf32, #tpu.memory_space<vmem>>, vector<32x32xf32>
    %cst_139 = arith.constant dense<0.000000e+00> : vector<8x32xf32>
    %270 = tpu.matmul %217, %269, %cst_139 {dimension_numbers = #tpu.dot_dimension_numbers<[1], [0], [0], [1], [0, 0, 1, 1], [], []>} : vector<8x32xf32>, vector<32x32xf32>, vector<8x32xf32> -> vector<8x32xf32>
    %271 = arith.addf %268, %270 : vector<8x32xf32>
    %272 = arith.negf %271 : vector<8x32xf32>
    %273 = math.exp %272 : vector<8x32xf32>
    %cst_140 = arith.constant 1.000000e+00 : f32
    %274 = vector.broadcast %cst_140 : f32 to vector<8x32xf32>
    %275 = arith.addf %274, %273 : vector<8x32xf32>
    %276 = arith.divf %274, %275 : vector<8x32xf32>
    %277 = vector.extract_strided_slice %266 {offsets = [1, 0, 0], sizes = [1, 8, 32], strides = [1, 1, 1]} : vector<3x8x32xf32> to vector<1x8x32xf32>
    %278 = vector.shape_cast %277 : vector<1x8x32xf32> to vector<8x32xf32>
    %c0_141 = arith.constant 0 : index
    %c0_142 = arith.constant 0 : index
    %279 = vector.load %arg5[%c0_141, %c0_142] : memref<32x32xf32, #tpu.memory_space<vmem>>, vector<32x32xf32>
    %cst_143 = arith.constant dense<0.000000e+00> : vector<8x32xf32>
    %280 = tpu.matmul %217, %279, %cst_143 {dimension_numbers = #tpu.dot_dimension_numbers<[1], [0], [0], [1], [0, 0, 1, 1], [], []>} : vector<8x32xf32>, vector<32x32xf32>, vector<8x32xf32> -> vector<8x32xf32>
    %281 = arith.addf %278, %280 : vector<8x32xf32>
    %282 = arith.negf %281 : vector<8x32xf32>
    %283 = math.exp %282 : vector<8x32xf32>
    %cst_144 = arith.constant 1.000000e+00 : f32
    %284 = vector.broadcast %cst_144 : f32 to vector<8x32xf32>
    %285 = arith.addf %284, %283 : vector<8x32xf32>
    %286 = arith.divf %284, %285 : vector<8x32xf32>
    %287 = vector.extract_strided_slice %266 {offsets = [2, 0, 0], sizes = [1, 8, 32], strides = [1, 1, 1]} : vector<3x8x32xf32> to vector<1x8x32xf32>
    %288 = vector.shape_cast %287 : vector<1x8x32xf32> to vector<8x32xf32>
    %c0_145 = arith.constant 0 : index
    %c0_146 = arith.constant 0 : index
    %289 = vector.load %arg6[%c0_145, %c0_146] : memref<32x32xf32, #tpu.memory_space<vmem>>, vector<32x32xf32>
    %cst_147 = arith.constant dense<0.000000e+00> : vector<8x32xf32>
    %290 = tpu.matmul %217, %289, %cst_147 {dimension_numbers = #tpu.dot_dimension_numbers<[1], [0], [0], [1], [0, 0, 1, 1], [], []>} : vector<8x32xf32>, vector<32x32xf32>, vector<8x32xf32> -> vector<8x32xf32>
    %c0_148 = arith.constant 0 : index
    %c0_149 = arith.constant 0 : index
    %291 = vector.load %arg7[%c0_148, %c0_149] : memref<1x32xf32, #tpu.memory_space<vmem>>, vector<1x32xf32>
    %292 = vector.broadcast %291 : vector<1x32xf32> to vector<8x32xf32>
    %293 = arith.addf %290, %292 : vector<8x32xf32>
    %294 = arith.mulf %276, %293 : vector<8x32xf32>
    %295 = arith.addf %288, %294 : vector<8x32xf32>
    %296 = math.tanh %295 : vector<8x32xf32>
    %cst_150 = arith.constant 1.000000e+00 : f32
    %297 = vector.broadcast %cst_150 : f32 to vector<8x32xf32>
    %298 = arith.subf %297, %286 : vector<8x32xf32>
    %299 = arith.mulf %298, %296 : vector<8x32xf32>
    %300 = arith.mulf %286, %217 : vector<8x32xf32>
    %301 = arith.addf %299, %300 : vector<8x32xf32>
    %c8_i32_151 = arith.constant 8 : i32
    %302 = arith.cmpi slt, %264, %c8_i32_151 : i32
    %303 = arith.select %302, %301, %217 : vector<8x32xf32>
    %c3_152 = arith.constant 3 : index
    %c0_153 = arith.constant 0 : index
    %c0_154 = arith.constant 0 : index
    %304 = vector.load %arg15[%c3_152, %c0_153, %c0_154] : memref<8x8x32xf32, #tpu.memory_space<vmem>>, vector<1x8x32xf32>
    %305 = vector.shape_cast %304 : vector<1x8x32xf32> to vector<8x32xf32>
    %306 = vector.shape_cast %303 : vector<8x32xf32> to vector<1x8x32xf32>
    tpu.vector_store %arg15[%c3_152, %c0_153, %c0_154], %306 {strides = array<i32>} : memref<8x8x32xf32, #tpu.memory_space<vmem>>, vector<1x8x32xf32>,
    %c4 = arith.constant 4 : index
    %c0_155 = arith.constant 0 : index
    %c0_156 = arith.constant 0 : index
    %c0_157 = arith.constant 0 : index
    %307 = vector.load %arg3[%c4, %c0_155, %c0_156, %c0_157] : memref<8x3x8x32xf32, #tpu.memory_space<vmem>>, vector<1x3x8x32xf32>
    %308 = vector.shape_cast %307 : vector<1x3x8x32xf32> to vector<3x8x32xf32>
    %309 = vector.extract_strided_slice %308 {offsets = [0, 0, 0], sizes = [1, 8, 32], strides = [1, 1, 1]} : vector<3x8x32xf32> to vector<1x8x32xf32>
    %310 = vector.shape_cast %309 : vector<1x8x32xf32> to vector<8x32xf32>
    %c0_158 = arith.constant 0 : index
    %c0_159 = arith.constant 0 : index
    %311 = vector.load %arg8[%c0_158, %c0_159] : memref<32x32xf32, #tpu.memory_space<vmem>>, vector<32x32xf32>
    %cst_160 = arith.constant dense<0.000000e+00> : vector<8x32xf32>
    %312 = tpu.matmul %259, %311, %cst_160 {dimension_numbers = #tpu.dot_dimension_numbers<[1], [0], [0], [1], [0, 0, 1, 1], [], []>} : vector<8x32xf32>, vector<32x32xf32>, vector<8x32xf32> -> vector<8x32xf32>
    %313 = arith.addf %310, %312 : vector<8x32xf32>
    %314 = arith.negf %313 : vector<8x32xf32>
    %315 = math.exp %314 : vector<8x32xf32>
    %cst_161 = arith.constant 1.000000e+00 : f32
    %316 = vector.broadcast %cst_161 : f32 to vector<8x32xf32>
    %317 = arith.addf %316, %315 : vector<8x32xf32>
    %318 = arith.divf %316, %317 : vector<8x32xf32>
    %319 = vector.extract_strided_slice %308 {offsets = [1, 0, 0], sizes = [1, 8, 32], strides = [1, 1, 1]} : vector<3x8x32xf32> to vector<1x8x32xf32>
    %320 = vector.shape_cast %319 : vector<1x8x32xf32> to vector<8x32xf32>
    %c0_162 = arith.constant 0 : index
    %c0_163 = arith.constant 0 : index
    %321 = vector.load %arg9[%c0_162, %c0_163] : memref<32x32xf32, #tpu.memory_space<vmem>>, vector<32x32xf32>
    %cst_164 = arith.constant dense<0.000000e+00> : vector<8x32xf32>
    %322 = tpu.matmul %259, %321, %cst_164 {dimension_numbers = #tpu.dot_dimension_numbers<[1], [0], [0], [1], [0, 0, 1, 1], [], []>} : vector<8x32xf32>, vector<32x32xf32>, vector<8x32xf32> -> vector<8x32xf32>
    %323 = arith.addf %320, %322 : vector<8x32xf32>
    %324 = arith.negf %323 : vector<8x32xf32>
    %325 = math.exp %324 : vector<8x32xf32>
    %cst_165 = arith.constant 1.000000e+00 : f32
    %326 = vector.broadcast %cst_165 : f32 to vector<8x32xf32>
    %327 = arith.addf %326, %325 : vector<8x32xf32>
    %328 = arith.divf %326, %327 : vector<8x32xf32>
    %329 = vector.extract_strided_slice %308 {offsets = [2, 0, 0], sizes = [1, 8, 32], strides = [1, 1, 1]} : vector<3x8x32xf32> to vector<1x8x32xf32>
    %330 = vector.shape_cast %329 : vector<1x8x32xf32> to vector<8x32xf32>
    %c0_166 = arith.constant 0 : index
    %c0_167 = arith.constant 0 : index
    %331 = vector.load %arg10[%c0_166, %c0_167] : memref<32x32xf32, #tpu.memory_space<vmem>>, vector<32x32xf32>
    %cst_168 = arith.constant dense<0.000000e+00> : vector<8x32xf32>
    %332 = tpu.matmul %259, %331, %cst_168 {dimension_numbers = #tpu.dot_dimension_numbers<[1], [0], [0], [1], [0, 0, 1, 1], [], []>} : vector<8x32xf32>, vector<32x32xf32>, vector<8x32xf32> -> vector<8x32xf32>
    %c0_169 = arith.constant 0 : index
    %c0_170 = arith.constant 0 : index
    %333 = vector.load %arg11[%c0_169, %c0_170] : memref<1x32xf32, #tpu.memory_space<vmem>>, vector<1x32xf32>
    %334 = vector.broadcast %333 : vector<1x32xf32> to vector<8x32xf32>
    %335 = arith.addf %332, %334 : vector<8x32xf32>
    %336 = arith.mulf %318, %335 : vector<8x32xf32>
    %337 = arith.addf %330, %336 : vector<8x32xf32>
    %338 = math.tanh %337 : vector<8x32xf32>
    %cst_171 = arith.constant 1.000000e+00 : f32
    %339 = vector.broadcast %cst_171 : f32 to vector<8x32xf32>
    %340 = arith.subf %339, %328 : vector<8x32xf32>
    %341 = arith.mulf %340, %338 : vector<8x32xf32>
    %342 = arith.mulf %328, %259 : vector<8x32xf32>
    %343 = arith.addf %341, %342 : vector<8x32xf32>
    %c0_i32_172 = arith.constant 0 : i32
    %344 = arith.cmpi sge, %264, %c0_i32_172 : i32
    %345 = arith.select %344, %343, %259 : vector<8x32xf32>
    %c4_173 = arith.constant 4 : index
    %c0_174 = arith.constant 0 : index
    %c0_175 = arith.constant 0 : index
    %346 = vector.load %arg16[%c4_173, %c0_174, %c0_175] : memref<8x8x32xf32, #tpu.memory_space<vmem>>, vector<1x8x32xf32>
    %347 = vector.shape_cast %346 : vector<1x8x32xf32> to vector<8x32xf32>
    %348 = vector.shape_cast %345 : vector<8x32xf32> to vector<1x8x32xf32>
    tpu.vector_store %arg16[%c4_173, %c0_174, %c0_175], %348 {strides = array<i32>} : memref<8x8x32xf32, #tpu.memory_space<vmem>>, vector<1x8x32xf32>,
    %c8_i32_176 = arith.constant 8 : i32
    %349 = arith.muli %arg1, %c8_i32_176 : i32
    %c4_i32 = arith.constant 4 : i32
    %350 = arith.addi %349, %c4_i32 : i32
    %c4_177 = arith.constant 4 : index
    %c0_178 = arith.constant 0 : index
    %c0_179 = arith.constant 0 : index
    %c0_180 = arith.constant 0 : index
    %351 = vector.load %arg2[%c4_177, %c0_178, %c0_179, %c0_180] : memref<8x3x8x32xf32, #tpu.memory_space<vmem>>, vector<1x3x8x32xf32>
    %352 = vector.shape_cast %351 : vector<1x3x8x32xf32> to vector<3x8x32xf32>
    %353 = vector.extract_strided_slice %352 {offsets = [0, 0, 0], sizes = [1, 8, 32], strides = [1, 1, 1]} : vector<3x8x32xf32> to vector<1x8x32xf32>
    %354 = vector.shape_cast %353 : vector<1x8x32xf32> to vector<8x32xf32>
    %c0_181 = arith.constant 0 : index
    %c0_182 = arith.constant 0 : index
    %355 = vector.load %arg4[%c0_181, %c0_182] : memref<32x32xf32, #tpu.memory_space<vmem>>, vector<32x32xf32>
    %cst_183 = arith.constant dense<0.000000e+00> : vector<8x32xf32>
    %356 = tpu.matmul %303, %355, %cst_183 {dimension_numbers = #tpu.dot_dimension_numbers<[1], [0], [0], [1], [0, 0, 1, 1], [], []>} : vector<8x32xf32>, vector<32x32xf32>, vector<8x32xf32> -> vector<8x32xf32>
    %357 = arith.addf %354, %356 : vector<8x32xf32>
    %358 = arith.negf %357 : vector<8x32xf32>
    %359 = math.exp %358 : vector<8x32xf32>
    %cst_184 = arith.constant 1.000000e+00 : f32
    %360 = vector.broadcast %cst_184 : f32 to vector<8x32xf32>
    %361 = arith.addf %360, %359 : vector<8x32xf32>
    %362 = arith.divf %360, %361 : vector<8x32xf32>
    %363 = vector.extract_strided_slice %352 {offsets = [1, 0, 0], sizes = [1, 8, 32], strides = [1, 1, 1]} : vector<3x8x32xf32> to vector<1x8x32xf32>
    %364 = vector.shape_cast %363 : vector<1x8x32xf32> to vector<8x32xf32>
    %c0_185 = arith.constant 0 : index
    %c0_186 = arith.constant 0 : index
    %365 = vector.load %arg5[%c0_185, %c0_186] : memref<32x32xf32, #tpu.memory_space<vmem>>, vector<32x32xf32>
    %cst_187 = arith.constant dense<0.000000e+00> : vector<8x32xf32>
    %366 = tpu.matmul %303, %365, %cst_187 {dimension_numbers = #tpu.dot_dimension_numbers<[1], [0], [0], [1], [0, 0, 1, 1], [], []>} : vector<8x32xf32>, vector<32x32xf32>, vector<8x32xf32> -> vector<8x32xf32>
    %367 = arith.addf %364, %366 : vector<8x32xf32>
    %368 = arith.negf %367 : vector<8x32xf32>
    %369 = math.exp %368 : vector<8x32xf32>
    %cst_188 = arith.constant 1.000000e+00 : f32
    %370 = vector.broadcast %cst_188 : f32 to vector<8x32xf32>
    %371 = arith.addf %370, %369 : vector<8x32xf32>
    %372 = arith.divf %370, %371 : vector<8x32xf32>
    %373 = vector.extract_strided_slice %352 {offsets = [2, 0, 0], sizes = [1, 8, 32], strides = [1, 1, 1]} : vector<3x8x32xf32> to vector<1x8x32xf32>
    %374 = vector.shape_cast %373 : vector<1x8x32xf32> to vector<8x32xf32>
    %c0_189 = arith.constant 0 : index
    %c0_190 = arith.constant 0 : index
    %375 = vector.load %arg6[%c0_189, %c0_190] : memref<32x32xf32, #tpu.memory_space<vmem>>, vector<32x32xf32>
    %cst_191 = arith.constant dense<0.000000e+00> : vector<8x32xf32>
    %376 = tpu.matmul %303, %375, %cst_191 {dimension_numbers = #tpu.dot_dimension_numbers<[1], [0], [0], [1], [0, 0, 1, 1], [], []>} : vector<8x32xf32>, vector<32x32xf32>, vector<8x32xf32> -> vector<8x32xf32>
    %c0_192 = arith.constant 0 : index
    %c0_193 = arith.constant 0 : index
    %377 = vector.load %arg7[%c0_192, %c0_193] : memref<1x32xf32, #tpu.memory_space<vmem>>, vector<1x32xf32>
    %378 = vector.broadcast %377 : vector<1x32xf32> to vector<8x32xf32>
    %379 = arith.addf %376, %378 : vector<8x32xf32>
    %380 = arith.mulf %362, %379 : vector<8x32xf32>
    %381 = arith.addf %374, %380 : vector<8x32xf32>
    %382 = math.tanh %381 : vector<8x32xf32>
    %cst_194 = arith.constant 1.000000e+00 : f32
    %383 = vector.broadcast %cst_194 : f32 to vector<8x32xf32>
    %384 = arith.subf %383, %372 : vector<8x32xf32>
    %385 = arith.mulf %384, %382 : vector<8x32xf32>
    %386 = arith.mulf %372, %303 : vector<8x32xf32>
    %387 = arith.addf %385, %386 : vector<8x32xf32>
    %c8_i32_195 = arith.constant 8 : i32
    %388 = arith.cmpi slt, %350, %c8_i32_195 : i32
    %389 = arith.select %388, %387, %303 : vector<8x32xf32>
    %c4_196 = arith.constant 4 : index
    %c0_197 = arith.constant 0 : index
    %c0_198 = arith.constant 0 : index
    %390 = vector.load %arg15[%c4_196, %c0_197, %c0_198] : memref<8x8x32xf32, #tpu.memory_space<vmem>>, vector<1x8x32xf32>
    %391 = vector.shape_cast %390 : vector<1x8x32xf32> to vector<8x32xf32>
    %392 = vector.shape_cast %389 : vector<8x32xf32> to vector<1x8x32xf32>
    tpu.vector_store %arg15[%c4_196, %c0_197, %c0_198], %392 {strides = array<i32>} : memref<8x8x32xf32, #tpu.memory_space<vmem>>, vector<1x8x32xf32>,
    %c3_199 = arith.constant 3 : index
    %c0_200 = arith.constant 0 : index
    %c0_201 = arith.constant 0 : index
    %c0_202 = arith.constant 0 : index
    %393 = vector.load %arg3[%c3_199, %c0_200, %c0_201, %c0_202] : memref<8x3x8x32xf32, #tpu.memory_space<vmem>>, vector<1x3x8x32xf32>
    %394 = vector.shape_cast %393 : vector<1x3x8x32xf32> to vector<3x8x32xf32>
    %395 = vector.extract_strided_slice %394 {offsets = [0, 0, 0], sizes = [1, 8, 32], strides = [1, 1, 1]} : vector<3x8x32xf32> to vector<1x8x32xf32>
    %396 = vector.shape_cast %395 : vector<1x8x32xf32> to vector<8x32xf32>
    %c0_203 = arith.constant 0 : index
    %c0_204 = arith.constant 0 : index
    %397 = vector.load %arg8[%c0_203, %c0_204] : memref<32x32xf32, #tpu.memory_space<vmem>>, vector<32x32xf32>
    %cst_205 = arith.constant dense<0.000000e+00> : vector<8x32xf32>
    %398 = tpu.matmul %345, %397, %cst_205 {dimension_numbers = #tpu.dot_dimension_numbers<[1], [0], [0], [1], [0, 0, 1, 1], [], []>} : vector<8x32xf32>, vector<32x32xf32>, vector<8x32xf32> -> vector<8x32xf32>
    %399 = arith.addf %396, %398 : vector<8x32xf32>
    %400 = arith.negf %399 : vector<8x32xf32>
    %401 = math.exp %400 : vector<8x32xf32>
    %cst_206 = arith.constant 1.000000e+00 : f32
    %402 = vector.broadcast %cst_206 : f32 to vector<8x32xf32>
    %403 = arith.addf %402, %401 : vector<8x32xf32>
    %404 = arith.divf %402, %403 : vector<8x32xf32>
    %405 = vector.extract_strided_slice %394 {offsets = [1, 0, 0], sizes = [1, 8, 32], strides = [1, 1, 1]} : vector<3x8x32xf32> to vector<1x8x32xf32>
    %406 = vector.shape_cast %405 : vector<1x8x32xf32> to vector<8x32xf32>
    %c0_207 = arith.constant 0 : index
    %c0_208 = arith.constant 0 : index
    %407 = vector.load %arg9[%c0_207, %c0_208] : memref<32x32xf32, #tpu.memory_space<vmem>>, vector<32x32xf32>
    %cst_209 = arith.constant dense<0.000000e+00> : vector<8x32xf32>
    %408 = tpu.matmul %345, %407, %cst_209 {dimension_numbers = #tpu.dot_dimension_numbers<[1], [0], [0], [1], [0, 0, 1, 1], [], []>} : vector<8x32xf32>, vector<32x32xf32>, vector<8x32xf32> -> vector<8x32xf32>
    %409 = arith.addf %406, %408 : vector<8x32xf32>
    %410 = arith.negf %409 : vector<8x32xf32>
    %411 = math.exp %410 : vector<8x32xf32>
    %cst_210 = arith.constant 1.000000e+00 : f32
    %412 = vector.broadcast %cst_210 : f32 to vector<8x32xf32>
    %413 = arith.addf %412, %411 : vector<8x32xf32>
    %414 = arith.divf %412, %413 : vector<8x32xf32>
    %415 = vector.extract_strided_slice %394 {offsets = [2, 0, 0], sizes = [1, 8, 32], strides = [1, 1, 1]} : vector<3x8x32xf32> to vector<1x8x32xf32>
    %416 = vector.shape_cast %415 : vector<1x8x32xf32> to vector<8x32xf32>
    %c0_211 = arith.constant 0 : index
    %c0_212 = arith.constant 0 : index
    %417 = vector.load %arg10[%c0_211, %c0_212] : memref<32x32xf32, #tpu.memory_space<vmem>>, vector<32x32xf32>
    %cst_213 = arith.constant dense<0.000000e+00> : vector<8x32xf32>
    %418 = tpu.matmul %345, %417, %cst_213 {dimension_numbers = #tpu.dot_dimension_numbers<[1], [0], [0], [1], [0, 0, 1, 1], [], []>} : vector<8x32xf32>, vector<32x32xf32>, vector<8x32xf32> -> vector<8x32xf32>
    %c0_214 = arith.constant 0 : index
    %c0_215 = arith.constant 0 : index
    %419 = vector.load %arg11[%c0_214, %c0_215] : memref<1x32xf32, #tpu.memory_space<vmem>>, vector<1x32xf32>
    %420 = vector.broadcast %419 : vector<1x32xf32> to vector<8x32xf32>
    %421 = arith.addf %418, %420 : vector<8x32xf32>
    %422 = arith.mulf %404, %421 : vector<8x32xf32>
    %423 = arith.addf %416, %422 : vector<8x32xf32>
    %424 = math.tanh %423 : vector<8x32xf32>
    %cst_216 = arith.constant 1.000000e+00 : f32
    %425 = vector.broadcast %cst_216 : f32 to vector<8x32xf32>
    %426 = arith.subf %425, %414 : vector<8x32xf32>
    %427 = arith.mulf %426, %424 : vector<8x32xf32>
    %428 = arith.mulf %414, %345 : vector<8x32xf32>
    %429 = arith.addf %427, %428 : vector<8x32xf32>
    %c0_i32_217 = arith.constant 0 : i32
    %430 = arith.cmpi sge, %350, %c0_i32_217 : i32
    %431 = arith.select %430, %429, %345 : vector<8x32xf32>
    %c3_218 = arith.constant 3 : index
    %c0_219 = arith.constant 0 : index
    %c0_220 = arith.constant 0 : index
    %432 = vector.load %arg16[%c3_218, %c0_219, %c0_220] : memref<8x8x32xf32, #tpu.memory_space<vmem>>, vector<1x8x32xf32>
    %433 = vector.shape_cast %432 : vector<1x8x32xf32> to vector<8x32xf32>
    %434 = vector.shape_cast %431 : vector<8x32xf32> to vector<1x8x32xf32>
    tpu.vector_store %arg16[%c3_218, %c0_219, %c0_220], %434 {strides = array<i32>} : memref<8x8x32xf32, #tpu.memory_space<vmem>>, vector<1x8x32xf32>,
    %c8_i32_221 = arith.constant 8 : i32
    %435 = arith.muli %arg1, %c8_i32_221 : i32
    %c5_i32 = arith.constant 5 : i32
    %436 = arith.addi %435, %c5_i32 : i32
    %c5_222 = arith.constant 5 : index
    %c0_223 = arith.constant 0 : index
    %c0_224 = arith.constant 0 : index
    %c0_225 = arith.constant 0 : index
    %437 = vector.load %arg2[%c5_222, %c0_223, %c0_224, %c0_225] : memref<8x3x8x32xf32, #tpu.memory_space<vmem>>, vector<1x3x8x32xf32>
    %438 = vector.shape_cast %437 : vector<1x3x8x32xf32> to vector<3x8x32xf32>
    %439 = vector.extract_strided_slice %438 {offsets = [0, 0, 0], sizes = [1, 8, 32], strides = [1, 1, 1]} : vector<3x8x32xf32> to vector<1x8x32xf32>
    %440 = vector.shape_cast %439 : vector<1x8x32xf32> to vector<8x32xf32>
    %c0_226 = arith.constant 0 : index
    %c0_227 = arith.constant 0 : index
    %441 = vector.load %arg4[%c0_226, %c0_227] : memref<32x32xf32, #tpu.memory_space<vmem>>, vector<32x32xf32>
    %cst_228 = arith.constant dense<0.000000e+00> : vector<8x32xf32>
    %442 = tpu.matmul %389, %441, %cst_228 {dimension_numbers = #tpu.dot_dimension_numbers<[1], [0], [0], [1], [0, 0, 1, 1], [], []>} : vector<8x32xf32>, vector<32x32xf32>, vector<8x32xf32> -> vector<8x32xf32>
    %443 = arith.addf %440, %442 : vector<8x32xf32>
    %444 = arith.negf %443 : vector<8x32xf32>
    %445 = math.exp %444 : vector<8x32xf32>
    %cst_229 = arith.constant 1.000000e+00 : f32
    %446 = vector.broadcast %cst_229 : f32 to vector<8x32xf32>
    %447 = arith.addf %446, %445 : vector<8x32xf32>
    %448 = arith.divf %446, %447 : vector<8x32xf32>
    %449 = vector.extract_strided_slice %438 {offsets = [1, 0, 0], sizes = [1, 8, 32], strides = [1, 1, 1]} : vector<3x8x32xf32> to vector<1x8x32xf32>
    %450 = vector.shape_cast %449 : vector<1x8x32xf32> to vector<8x32xf32>
    %c0_230 = arith.constant 0 : index
    %c0_231 = arith.constant 0 : index
    %451 = vector.load %arg5[%c0_230, %c0_231] : memref<32x32xf32, #tpu.memory_space<vmem>>, vector<32x32xf32>
    %cst_232 = arith.constant dense<0.000000e+00> : vector<8x32xf32>
    %452 = tpu.matmul %389, %451, %cst_232 {dimension_numbers = #tpu.dot_dimension_numbers<[1], [0], [0], [1], [0, 0, 1, 1], [], []>} : vector<8x32xf32>, vector<32x32xf32>, vector<8x32xf32> -> vector<8x32xf32>
    %453 = arith.addf %450, %452 : vector<8x32xf32>
    %454 = arith.negf %453 : vector<8x32xf32>
    %455 = math.exp %454 : vector<8x32xf32>
    %cst_233 = arith.constant 1.000000e+00 : f32
    %456 = vector.broadcast %cst_233 : f32 to vector<8x32xf32>
    %457 = arith.addf %456, %455 : vector<8x32xf32>
    %458 = arith.divf %456, %457 : vector<8x32xf32>
    %459 = vector.extract_strided_slice %438 {offsets = [2, 0, 0], sizes = [1, 8, 32], strides = [1, 1, 1]} : vector<3x8x32xf32> to vector<1x8x32xf32>
    %460 = vector.shape_cast %459 : vector<1x8x32xf32> to vector<8x32xf32>
    %c0_234 = arith.constant 0 : index
    %c0_235 = arith.constant 0 : index
    %461 = vector.load %arg6[%c0_234, %c0_235] : memref<32x32xf32, #tpu.memory_space<vmem>>, vector<32x32xf32>
    %cst_236 = arith.constant dense<0.000000e+00> : vector<8x32xf32>
    %462 = tpu.matmul %389, %461, %cst_236 {dimension_numbers = #tpu.dot_dimension_numbers<[1], [0], [0], [1], [0, 0, 1, 1], [], []>} : vector<8x32xf32>, vector<32x32xf32>, vector<8x32xf32> -> vector<8x32xf32>
    %c0_237 = arith.constant 0 : index
    %c0_238 = arith.constant 0 : index
    %463 = vector.load %arg7[%c0_237, %c0_238] : memref<1x32xf32, #tpu.memory_space<vmem>>, vector<1x32xf32>
    %464 = vector.broadcast %463 : vector<1x32xf32> to vector<8x32xf32>
    %465 = arith.addf %462, %464 : vector<8x32xf32>
    %466 = arith.mulf %448, %465 : vector<8x32xf32>
    %467 = arith.addf %460, %466 : vector<8x32xf32>
    %468 = math.tanh %467 : vector<8x32xf32>
    %cst_239 = arith.constant 1.000000e+00 : f32
    %469 = vector.broadcast %cst_239 : f32 to vector<8x32xf32>
    %470 = arith.subf %469, %458 : vector<8x32xf32>
    %471 = arith.mulf %470, %468 : vector<8x32xf32>
    %472 = arith.mulf %458, %389 : vector<8x32xf32>
    %473 = arith.addf %471, %472 : vector<8x32xf32>
    %c8_i32_240 = arith.constant 8 : i32
    %474 = arith.cmpi slt, %436, %c8_i32_240 : i32
    %475 = arith.select %474, %473, %389 : vector<8x32xf32>
    %c5_241 = arith.constant 5 : index
    %c0_242 = arith.constant 0 : index
    %c0_243 = arith.constant 0 : index
    %476 = vector.load %arg15[%c5_241, %c0_242, %c0_243] : memref<8x8x32xf32, #tpu.memory_space<vmem>>, vector<1x8x32xf32>
    %477 = vector.shape_cast %476 : vector<1x8x32xf32> to vector<8x32xf32>
    %478 = vector.shape_cast %475 : vector<8x32xf32> to vector<1x8x32xf32>
    tpu.vector_store %arg15[%c5_241, %c0_242, %c0_243], %478 {strides = array<i32>} : memref<8x8x32xf32, #tpu.memory_space<vmem>>, vector<1x8x32xf32>,
    %c2_244 = arith.constant 2 : index
    %c0_245 = arith.constant 0 : index
    %c0_246 = arith.constant 0 : index
    %c0_247 = arith.constant 0 : index
    %479 = vector.load %arg3[%c2_244, %c0_245, %c0_246, %c0_247] : memref<8x3x8x32xf32, #tpu.memory_space<vmem>>, vector<1x3x8x32xf32>
    %480 = vector.shape_cast %479 : vector<1x3x8x32xf32> to vector<3x8x32xf32>
    %481 = vector.extract_strided_slice %480 {offsets = [0, 0, 0], sizes = [1, 8, 32], strides = [1, 1, 1]} : vector<3x8x32xf32> to vector<1x8x32xf32>
    %482 = vector.shape_cast %481 : vector<1x8x32xf32> to vector<8x32xf32>
    %c0_248 = arith.constant 0 : index
    %c0_249 = arith.constant 0 : index
    %483 = vector.load %arg8[%c0_248, %c0_249] : memref<32x32xf32, #tpu.memory_space<vmem>>, vector<32x32xf32>
    %cst_250 = arith.constant dense<0.000000e+00> : vector<8x32xf32>
    %484 = tpu.matmul %431, %483, %cst_250 {dimension_numbers = #tpu.dot_dimension_numbers<[1], [0], [0], [1], [0, 0, 1, 1], [], []>} : vector<8x32xf32>, vector<32x32xf32>, vector<8x32xf32> -> vector<8x32xf32>
    %485 = arith.addf %482, %484 : vector<8x32xf32>
    %486 = arith.negf %485 : vector<8x32xf32>
    %487 = math.exp %486 : vector<8x32xf32>
    %cst_251 = arith.constant 1.000000e+00 : f32
    %488 = vector.broadcast %cst_251 : f32 to vector<8x32xf32>
    %489 = arith.addf %488, %487 : vector<8x32xf32>
    %490 = arith.divf %488, %489 : vector<8x32xf32>
    %491 = vector.extract_strided_slice %480 {offsets = [1, 0, 0], sizes = [1, 8, 32], strides = [1, 1, 1]} : vector<3x8x32xf32> to vector<1x8x32xf32>
    %492 = vector.shape_cast %491 : vector<1x8x32xf32> to vector<8x32xf32>
    %c0_252 = arith.constant 0 : index
    %c0_253 = arith.constant 0 : index
    %493 = vector.load %arg9[%c0_252, %c0_253] : memref<32x32xf32, #tpu.memory_space<vmem>>, vector<32x32xf32>
    %cst_254 = arith.constant dense<0.000000e+00> : vector<8x32xf32>
    %494 = tpu.matmul %431, %493, %cst_254 {dimension_numbers = #tpu.dot_dimension_numbers<[1], [0], [0], [1], [0, 0, 1, 1], [], []>} : vector<8x32xf32>, vector<32x32xf32>, vector<8x32xf32> -> vector<8x32xf32>
    %495 = arith.addf %492, %494 : vector<8x32xf32>
    %496 = arith.negf %495 : vector<8x32xf32>
    %497 = math.exp %496 : vector<8x32xf32>
    %cst_255 = arith.constant 1.000000e+00 : f32
    %498 = vector.broadcast %cst_255 : f32 to vector<8x32xf32>
    %499 = arith.addf %498, %497 : vector<8x32xf32>
    %500 = arith.divf %498, %499 : vector<8x32xf32>
    %501 = vector.extract_strided_slice %480 {offsets = [2, 0, 0], sizes = [1, 8, 32], strides = [1, 1, 1]} : vector<3x8x32xf32> to vector<1x8x32xf32>
    %502 = vector.shape_cast %501 : vector<1x8x32xf32> to vector<8x32xf32>
    %c0_256 = arith.constant 0 : index
    %c0_257 = arith.constant 0 : index
    %503 = vector.load %arg10[%c0_256, %c0_257] : memref<32x32xf32, #tpu.memory_space<vmem>>, vector<32x32xf32>
    %cst_258 = arith.constant dense<0.000000e+00> : vector<8x32xf32>
    %504 = tpu.matmul %431, %503, %cst_258 {dimension_numbers = #tpu.dot_dimension_numbers<[1], [0], [0], [1], [0, 0, 1, 1], [], []>} : vector<8x32xf32>, vector<32x32xf32>, vector<8x32xf32> -> vector<8x32xf32>
    %c0_259 = arith.constant 0 : index
    %c0_260 = arith.constant 0 : index
    %505 = vector.load %arg11[%c0_259, %c0_260] : memref<1x32xf32, #tpu.memory_space<vmem>>, vector<1x32xf32>
    %506 = vector.broadcast %505 : vector<1x32xf32> to vector<8x32xf32>
    %507 = arith.addf %504, %506 : vector<8x32xf32>
    %508 = arith.mulf %490, %507 : vector<8x32xf32>
    %509 = arith.addf %502, %508 : vector<8x32xf32>
    %510 = math.tanh %509 : vector<8x32xf32>
    %cst_261 = arith.constant 1.000000e+00 : f32
    %511 = vector.broadcast %cst_261 : f32 to vector<8x32xf32>
    %512 = arith.subf %511, %500 : vector<8x32xf32>
    %513 = arith.mulf %512, %510 : vector<8x32xf32>
    %514 = arith.mulf %500, %431 : vector<8x32xf32>
    %515 = arith.addf %513, %514 : vector<8x32xf32>
    %c0_i32_262 = arith.constant 0 : i32
    %516 = arith.cmpi sge, %436, %c0_i32_262 : i32
    %517 = arith.select %516, %515, %431 : vector<8x32xf32>
    %c2_263 = arith.constant 2 : index
    %c0_264 = arith.constant 0 : index
    %c0_265 = arith.constant 0 : index
    %518 = vector.load %arg16[%c2_263, %c0_264, %c0_265] : memref<8x8x32xf32, #tpu.memory_space<vmem>>, vector<1x8x32xf32>
    %519 = vector.shape_cast %518 : vector<1x8x32xf32> to vector<8x32xf32>
    %520 = vector.shape_cast %517 : vector<8x32xf32> to vector<1x8x32xf32>
    tpu.vector_store %arg16[%c2_263, %c0_264, %c0_265], %520 {strides = array<i32>} : memref<8x8x32xf32, #tpu.memory_space<vmem>>, vector<1x8x32xf32>,
    %c8_i32_266 = arith.constant 8 : i32
    %521 = arith.muli %arg1, %c8_i32_266 : i32
    %c6_i32 = arith.constant 6 : i32
    %522 = arith.addi %521, %c6_i32 : i32
    %c6_267 = arith.constant 6 : index
    %c0_268 = arith.constant 0 : index
    %c0_269 = arith.constant 0 : index
    %c0_270 = arith.constant 0 : index
    %523 = vector.load %arg2[%c6_267, %c0_268, %c0_269, %c0_270] : memref<8x3x8x32xf32, #tpu.memory_space<vmem>>, vector<1x3x8x32xf32>
    %524 = vector.shape_cast %523 : vector<1x3x8x32xf32> to vector<3x8x32xf32>
    %525 = vector.extract_strided_slice %524 {offsets = [0, 0, 0], sizes = [1, 8, 32], strides = [1, 1, 1]} : vector<3x8x32xf32> to vector<1x8x32xf32>
    %526 = vector.shape_cast %525 : vector<1x8x32xf32> to vector<8x32xf32>
    %c0_271 = arith.constant 0 : index
    %c0_272 = arith.constant 0 : index
    %527 = vector.load %arg4[%c0_271, %c0_272] : memref<32x32xf32, #tpu.memory_space<vmem>>, vector<32x32xf32>
    %cst_273 = arith.constant dense<0.000000e+00> : vector<8x32xf32>
    %528 = tpu.matmul %475, %527, %cst_273 {dimension_numbers = #tpu.dot_dimension_numbers<[1], [0], [0], [1], [0, 0, 1, 1], [], []>} : vector<8x32xf32>, vector<32x32xf32>, vector<8x32xf32> -> vector<8x32xf32>
    %529 = arith.addf %526, %528 : vector<8x32xf32>
    %530 = arith.negf %529 : vector<8x32xf32>
    %531 = math.exp %530 : vector<8x32xf32>
    %cst_274 = arith.constant 1.000000e+00 : f32
    %532 = vector.broadcast %cst_274 : f32 to vector<8x32xf32>
    %533 = arith.addf %532, %531 : vector<8x32xf32>
    %534 = arith.divf %532, %533 : vector<8x32xf32>
    %535 = vector.extract_strided_slice %524 {offsets = [1, 0, 0], sizes = [1, 8, 32], strides = [1, 1, 1]} : vector<3x8x32xf32> to vector<1x8x32xf32>
    %536 = vector.shape_cast %535 : vector<1x8x32xf32> to vector<8x32xf32>
    %c0_275 = arith.constant 0 : index
    %c0_276 = arith.constant 0 : index
    %537 = vector.load %arg5[%c0_275, %c0_276] : memref<32x32xf32, #tpu.memory_space<vmem>>, vector<32x32xf32>
    %cst_277 = arith.constant dense<0.000000e+00> : vector<8x32xf32>
    %538 = tpu.matmul %475, %537, %cst_277 {dimension_numbers = #tpu.dot_dimension_numbers<[1], [0], [0], [1], [0, 0, 1, 1], [], []>} : vector<8x32xf32>, vector<32x32xf32>, vector<8x32xf32> -> vector<8x32xf32>
    %539 = arith.addf %536, %538 : vector<8x32xf32>
    %540 = arith.negf %539 : vector<8x32xf32>
    %541 = math.exp %540 : vector<8x32xf32>
    %cst_278 = arith.constant 1.000000e+00 : f32
    %542 = vector.broadcast %cst_278 : f32 to vector<8x32xf32>
    %543 = arith.addf %542, %541 : vector<8x32xf32>
    %544 = arith.divf %542, %543 : vector<8x32xf32>
    %545 = vector.extract_strided_slice %524 {offsets = [2, 0, 0], sizes = [1, 8, 32], strides = [1, 1, 1]} : vector<3x8x32xf32> to vector<1x8x32xf32>
    %546 = vector.shape_cast %545 : vector<1x8x32xf32> to vector<8x32xf32>
    %c0_279 = arith.constant 0 : index
    %c0_280 = arith.constant 0 : index
    %547 = vector.load %arg6[%c0_279, %c0_280] : memref<32x32xf32, #tpu.memory_space<vmem>>, vector<32x32xf32>
    %cst_281 = arith.constant dense<0.000000e+00> : vector<8x32xf32>
    %548 = tpu.matmul %475, %547, %cst_281 {dimension_numbers = #tpu.dot_dimension_numbers<[1], [0], [0], [1], [0, 0, 1, 1], [], []>} : vector<8x32xf32>, vector<32x32xf32>, vector<8x32xf32> -> vector<8x32xf32>
    %c0_282 = arith.constant 0 : index
    %c0_283 = arith.constant 0 : index
    %549 = vector.load %arg7[%c0_282, %c0_283] : memref<1x32xf32, #tpu.memory_space<vmem>>, vector<1x32xf32>
    %550 = vector.broadcast %549 : vector<1x32xf32> to vector<8x32xf32>
    %551 = arith.addf %548, %550 : vector<8x32xf32>
    %552 = arith.mulf %534, %551 : vector<8x32xf32>
    %553 = arith.addf %546, %552 : vector<8x32xf32>
    %554 = math.tanh %553 : vector<8x32xf32>
    %cst_284 = arith.constant 1.000000e+00 : f32
    %555 = vector.broadcast %cst_284 : f32 to vector<8x32xf32>
    %556 = arith.subf %555, %544 : vector<8x32xf32>
    %557 = arith.mulf %556, %554 : vector<8x32xf32>
    %558 = arith.mulf %544, %475 : vector<8x32xf32>
    %559 = arith.addf %557, %558 : vector<8x32xf32>
    %c8_i32_285 = arith.constant 8 : i32
    %560 = arith.cmpi slt, %522, %c8_i32_285 : i32
    %561 = arith.select %560, %559, %475 : vector<8x32xf32>
    %c6_286 = arith.constant 6 : index
    %c0_287 = arith.constant 0 : index
    %c0_288 = arith.constant 0 : index
    %562 = vector.load %arg15[%c6_286, %c0_287, %c0_288] : memref<8x8x32xf32, #tpu.memory_space<vmem>>, vector<1x8x32xf32>
    %563 = vector.shape_cast %562 : vector<1x8x32xf32> to vector<8x32xf32>
    %564 = vector.shape_cast %561 : vector<8x32xf32> to vector<1x8x32xf32>
    tpu.vector_store %arg15[%c6_286, %c0_287, %c0_288], %564 {strides = array<i32>} : memref<8x8x32xf32, #tpu.memory_space<vmem>>, vector<1x8x32xf32>,
    %c1_289 = arith.constant 1 : index
    %c0_290 = arith.constant 0 : index
    %c0_291 = arith.constant 0 : index
    %c0_292 = arith.constant 0 : index
    %565 = vector.load %arg3[%c1_289, %c0_290, %c0_291, %c0_292] : memref<8x3x8x32xf32, #tpu.memory_space<vmem>>, vector<1x3x8x32xf32>
    %566 = vector.shape_cast %565 : vector<1x3x8x32xf32> to vector<3x8x32xf32>
    %567 = vector.extract_strided_slice %566 {offsets = [0, 0, 0], sizes = [1, 8, 32], strides = [1, 1, 1]} : vector<3x8x32xf32> to vector<1x8x32xf32>
    %568 = vector.shape_cast %567 : vector<1x8x32xf32> to vector<8x32xf32>
    %c0_293 = arith.constant 0 : index
    %c0_294 = arith.constant 0 : index
    %569 = vector.load %arg8[%c0_293, %c0_294] : memref<32x32xf32, #tpu.memory_space<vmem>>, vector<32x32xf32>
    %cst_295 = arith.constant dense<0.000000e+00> : vector<8x32xf32>
    %570 = tpu.matmul %517, %569, %cst_295 {dimension_numbers = #tpu.dot_dimension_numbers<[1], [0], [0], [1], [0, 0, 1, 1], [], []>} : vector<8x32xf32>, vector<32x32xf32>, vector<8x32xf32> -> vector<8x32xf32>
    %571 = arith.addf %568, %570 : vector<8x32xf32>
    %572 = arith.negf %571 : vector<8x32xf32>
    %573 = math.exp %572 : vector<8x32xf32>
    %cst_296 = arith.constant 1.000000e+00 : f32
    %574 = vector.broadcast %cst_296 : f32 to vector<8x32xf32>
    %575 = arith.addf %574, %573 : vector<8x32xf32>
    %576 = arith.divf %574, %575 : vector<8x32xf32>
    %577 = vector.extract_strided_slice %566 {offsets = [1, 0, 0], sizes = [1, 8, 32], strides = [1, 1, 1]} : vector<3x8x32xf32> to vector<1x8x32xf32>
    %578 = vector.shape_cast %577 : vector<1x8x32xf32> to vector<8x32xf32>
    %c0_297 = arith.constant 0 : index
    %c0_298 = arith.constant 0 : index
    %579 = vector.load %arg9[%c0_297, %c0_298] : memref<32x32xf32, #tpu.memory_space<vmem>>, vector<32x32xf32>
    %cst_299 = arith.constant dense<0.000000e+00> : vector<8x32xf32>
    %580 = tpu.matmul %517, %579, %cst_299 {dimension_numbers = #tpu.dot_dimension_numbers<[1], [0], [0], [1], [0, 0, 1, 1], [], []>} : vector<8x32xf32>, vector<32x32xf32>, vector<8x32xf32> -> vector<8x32xf32>
    %581 = arith.addf %578, %580 : vector<8x32xf32>
    %582 = arith.negf %581 : vector<8x32xf32>
    %583 = math.exp %582 : vector<8x32xf32>
    %cst_300 = arith.constant 1.000000e+00 : f32
    %584 = vector.broadcast %cst_300 : f32 to vector<8x32xf32>
    %585 = arith.addf %584, %583 : vector<8x32xf32>
    %586 = arith.divf %584, %585 : vector<8x32xf32>
    %587 = vector.extract_strided_slice %566 {offsets = [2, 0, 0], sizes = [1, 8, 32], strides = [1, 1, 1]} : vector<3x8x32xf32> to vector<1x8x32xf32>
    %588 = vector.shape_cast %587 : vector<1x8x32xf32> to vector<8x32xf32>
    %c0_301 = arith.constant 0 : index
    %c0_302 = arith.constant 0 : index
    %589 = vector.load %arg10[%c0_301, %c0_302] : memref<32x32xf32, #tpu.memory_space<vmem>>, vector<32x32xf32>
    %cst_303 = arith.constant dense<0.000000e+00> : vector<8x32xf32>
    %590 = tpu.matmul %517, %589, %cst_303 {dimension_numbers = #tpu.dot_dimension_numbers<[1], [0], [0], [1], [0, 0, 1, 1], [], []>} : vector<8x32xf32>, vector<32x32xf32>, vector<8x32xf32> -> vector<8x32xf32>
    %c0_304 = arith.constant 0 : index
    %c0_305 = arith.constant 0 : index
    %591 = vector.load %arg11[%c0_304, %c0_305] : memref<1x32xf32, #tpu.memory_space<vmem>>, vector<1x32xf32>
    %592 = vector.broadcast %591 : vector<1x32xf32> to vector<8x32xf32>
    %593 = arith.addf %590, %592 : vector<8x32xf32>
    %594 = arith.mulf %576, %593 : vector<8x32xf32>
    %595 = arith.addf %588, %594 : vector<8x32xf32>
    %596 = math.tanh %595 : vector<8x32xf32>
    %cst_306 = arith.constant 1.000000e+00 : f32
    %597 = vector.broadcast %cst_306 : f32 to vector<8x32xf32>
    %598 = arith.subf %597, %586 : vector<8x32xf32>
    %599 = arith.mulf %598, %596 : vector<8x32xf32>
    %600 = arith.mulf %586, %517 : vector<8x32xf32>
    %601 = arith.addf %599, %600 : vector<8x32xf32>
    %c0_i32_307 = arith.constant 0 : i32
    %602 = arith.cmpi sge, %522, %c0_i32_307 : i32
    %603 = arith.select %602, %601, %517 : vector<8x32xf32>
    %c1_308 = arith.constant 1 : index
    %c0_309 = arith.constant 0 : index
    %c0_310 = arith.constant 0 : index
    %604 = vector.load %arg16[%c1_308, %c0_309, %c0_310] : memref<8x8x32xf32, #tpu.memory_space<vmem>>, vector<1x8x32xf32>
    %605 = vector.shape_cast %604 : vector<1x8x32xf32> to vector<8x32xf32>
    %606 = vector.shape_cast %603 : vector<8x32xf32> to vector<1x8x32xf32>
    tpu.vector_store %arg16[%c1_308, %c0_309, %c0_310], %606 {strides = array<i32>} : memref<8x8x32xf32, #tpu.memory_space<vmem>>, vector<1x8x32xf32>,
    %c8_i32_311 = arith.constant 8 : i32
    %607 = arith.muli %arg1, %c8_i32_311 : i32
    %c7_i32 = arith.constant 7 : i32
    %608 = arith.addi %607, %c7_i32 : i32
    %c7_312 = arith.constant 7 : index
    %c0_313 = arith.constant 0 : index
    %c0_314 = arith.constant 0 : index
    %c0_315 = arith.constant 0 : index
    %609 = vector.load %arg2[%c7_312, %c0_313, %c0_314, %c0_315] : memref<8x3x8x32xf32, #tpu.memory_space<vmem>>, vector<1x3x8x32xf32>
    %610 = vector.shape_cast %609 : vector<1x3x8x32xf32> to vector<3x8x32xf32>
    %611 = vector.extract_strided_slice %610 {offsets = [0, 0, 0], sizes = [1, 8, 32], strides = [1, 1, 1]} : vector<3x8x32xf32> to vector<1x8x32xf32>
    %612 = vector.shape_cast %611 : vector<1x8x32xf32> to vector<8x32xf32>
    %c0_316 = arith.constant 0 : index
    %c0_317 = arith.constant 0 : index
    %613 = vector.load %arg4[%c0_316, %c0_317] : memref<32x32xf32, #tpu.memory_space<vmem>>, vector<32x32xf32>
    %cst_318 = arith.constant dense<0.000000e+00> : vector<8x32xf32>
    %614 = tpu.matmul %561, %613, %cst_318 {dimension_numbers = #tpu.dot_dimension_numbers<[1], [0], [0], [1], [0, 0, 1, 1], [], []>} : vector<8x32xf32>, vector<32x32xf32>, vector<8x32xf32> -> vector<8x32xf32>
    %615 = arith.addf %612, %614 : vector<8x32xf32>
    %616 = arith.negf %615 : vector<8x32xf32>
    %617 = math.exp %616 : vector<8x32xf32>
    %cst_319 = arith.constant 1.000000e+00 : f32
    %618 = vector.broadcast %cst_319 : f32 to vector<8x32xf32>
    %619 = arith.addf %618, %617 : vector<8x32xf32>
    %620 = arith.divf %618, %619 : vector<8x32xf32>
    %621 = vector.extract_strided_slice %610 {offsets = [1, 0, 0], sizes = [1, 8, 32], strides = [1, 1, 1]} : vector<3x8x32xf32> to vector<1x8x32xf32>
    %622 = vector.shape_cast %621 : vector<1x8x32xf32> to vector<8x32xf32>
    %c0_320 = arith.constant 0 : index
    %c0_321 = arith.constant 0 : index
    %623 = vector.load %arg5[%c0_320, %c0_321] : memref<32x32xf32, #tpu.memory_space<vmem>>, vector<32x32xf32>
    %cst_322 = arith.constant dense<0.000000e+00> : vector<8x32xf32>
    %624 = tpu.matmul %561, %623, %cst_322 {dimension_numbers = #tpu.dot_dimension_numbers<[1], [0], [0], [1], [0, 0, 1, 1], [], []>} : vector<8x32xf32>, vector<32x32xf32>, vector<8x32xf32> -> vector<8x32xf32>
    %625 = arith.addf %622, %624 : vector<8x32xf32>
    %626 = arith.negf %625 : vector<8x32xf32>
    %627 = math.exp %626 : vector<8x32xf32>
    %cst_323 = arith.constant 1.000000e+00 : f32
    %628 = vector.broadcast %cst_323 : f32 to vector<8x32xf32>
    %629 = arith.addf %628, %627 : vector<8x32xf32>
    %630 = arith.divf %628, %629 : vector<8x32xf32>
    %631 = vector.extract_strided_slice %610 {offsets = [2, 0, 0], sizes = [1, 8, 32], strides = [1, 1, 1]} : vector<3x8x32xf32> to vector<1x8x32xf32>
    %632 = vector.shape_cast %631 : vector<1x8x32xf32> to vector<8x32xf32>
    %c0_324 = arith.constant 0 : index
    %c0_325 = arith.constant 0 : index
    %633 = vector.load %arg6[%c0_324, %c0_325] : memref<32x32xf32, #tpu.memory_space<vmem>>, vector<32x32xf32>
    %cst_326 = arith.constant dense<0.000000e+00> : vector<8x32xf32>
    %634 = tpu.matmul %561, %633, %cst_326 {dimension_numbers = #tpu.dot_dimension_numbers<[1], [0], [0], [1], [0, 0, 1, 1], [], []>} : vector<8x32xf32>, vector<32x32xf32>, vector<8x32xf32> -> vector<8x32xf32>
    %c0_327 = arith.constant 0 : index
    %c0_328 = arith.constant 0 : index
    %635 = vector.load %arg7[%c0_327, %c0_328] : memref<1x32xf32, #tpu.memory_space<vmem>>, vector<1x32xf32>
    %636 = vector.broadcast %635 : vector<1x32xf32> to vector<8x32xf32>
    %637 = arith.addf %634, %636 : vector<8x32xf32>
    %638 = arith.mulf %620, %637 : vector<8x32xf32>
    %639 = arith.addf %632, %638 : vector<8x32xf32>
    %640 = math.tanh %639 : vector<8x32xf32>
    %cst_329 = arith.constant 1.000000e+00 : f32
    %641 = vector.broadcast %cst_329 : f32 to vector<8x32xf32>
    %642 = arith.subf %641, %630 : vector<8x32xf32>
    %643 = arith.mulf %642, %640 : vector<8x32xf32>
    %644 = arith.mulf %630, %561 : vector<8x32xf32>
    %645 = arith.addf %643, %644 : vector<8x32xf32>
    %c8_i32_330 = arith.constant 8 : i32
    %646 = arith.cmpi slt, %608, %c8_i32_330 : i32
    %647 = arith.select %646, %645, %561 : vector<8x32xf32>
    %c7_331 = arith.constant 7 : index
    %c0_332 = arith.constant 0 : index
    %c0_333 = arith.constant 0 : index
    %648 = vector.load %arg15[%c7_331, %c0_332, %c0_333] : memref<8x8x32xf32, #tpu.memory_space<vmem>>, vector<1x8x32xf32>
    %649 = vector.shape_cast %648 : vector<1x8x32xf32> to vector<8x32xf32>
    %650 = vector.shape_cast %647 : vector<8x32xf32> to vector<1x8x32xf32>
    tpu.vector_store %arg15[%c7_331, %c0_332, %c0_333], %650 {strides = array<i32>} : memref<8x8x32xf32, #tpu.memory_space<vmem>>, vector<1x8x32xf32>,
    %c0_334 = arith.constant 0 : index
    %c0_335 = arith.constant 0 : index
    %c0_336 = arith.constant 0 : index
    %c0_337 = arith.constant 0 : index
    %651 = vector.load %arg3[%c0_334, %c0_335, %c0_336, %c0_337] : memref<8x3x8x32xf32, #tpu.memory_space<vmem>>, vector<1x3x8x32xf32>
    %652 = vector.shape_cast %651 : vector<1x3x8x32xf32> to vector<3x8x32xf32>
    %653 = vector.extract_strided_slice %652 {offsets = [0, 0, 0], sizes = [1, 8, 32], strides = [1, 1, 1]} : vector<3x8x32xf32> to vector<1x8x32xf32>
    %654 = vector.shape_cast %653 : vector<1x8x32xf32> to vector<8x32xf32>
    %c0_338 = arith.constant 0 : index
    %c0_339 = arith.constant 0 : index
    %655 = vector.load %arg8[%c0_338, %c0_339] : memref<32x32xf32, #tpu.memory_space<vmem>>, vector<32x32xf32>
    %cst_340 = arith.constant dense<0.000000e+00> : vector<8x32xf32>
    %656 = tpu.matmul %603, %655, %cst_340 {dimension_numbers = #tpu.dot_dimension_numbers<[1], [0], [0], [1], [0, 0, 1, 1], [], []>} : vector<8x32xf32>, vector<32x32xf32>, vector<8x32xf32> -> vector<8x32xf32>
    %657 = arith.addf %654, %656 : vector<8x32xf32>
    %658 = arith.negf %657 : vector<8x32xf32>
    %659 = math.exp %658 : vector<8x32xf32>
    %cst_341 = arith.constant 1.000000e+00 : f32
    %660 = vector.broadcast %cst_341 : f32 to vector<8x32xf32>
    %661 = arith.addf %660, %659 : vector<8x32xf32>
    %662 = arith.divf %660, %661 : vector<8x32xf32>
    %663 = vector.extract_strided_slice %652 {offsets = [1, 0, 0], sizes = [1, 8, 32], strides = [1, 1, 1]} : vector<3x8x32xf32> to vector<1x8x32xf32>
    %664 = vector.shape_cast %663 : vector<1x8x32xf32> to vector<8x32xf32>
    %c0_342 = arith.constant 0 : index
    %c0_343 = arith.constant 0 : index
    %665 = vector.load %arg9[%c0_342, %c0_343] : memref<32x32xf32, #tpu.memory_space<vmem>>, vector<32x32xf32>
    %cst_344 = arith.constant dense<0.000000e+00> : vector<8x32xf32>
    %666 = tpu.matmul %603, %665, %cst_344 {dimension_numbers = #tpu.dot_dimension_numbers<[1], [0], [0], [1], [0, 0, 1, 1], [], []>} : vector<8x32xf32>, vector<32x32xf32>, vector<8x32xf32> -> vector<8x32xf32>
    %667 = arith.addf %664, %666 : vector<8x32xf32>
    %668 = arith.negf %667 : vector<8x32xf32>
    %669 = math.exp %668 : vector<8x32xf32>
    %cst_345 = arith.constant 1.000000e+00 : f32
    %670 = vector.broadcast %cst_345 : f32 to vector<8x32xf32>
    %671 = arith.addf %670, %669 : vector<8x32xf32>
    %672 = arith.divf %670, %671 : vector<8x32xf32>
    %673 = vector.extract_strided_slice %652 {offsets = [2, 0, 0], sizes = [1, 8, 32], strides = [1, 1, 1]} : vector<3x8x32xf32> to vector<1x8x32xf32>
    %674 = vector.shape_cast %673 : vector<1x8x32xf32> to vector<8x32xf32>
    %c0_346 = arith.constant 0 : index
    %c0_347 = arith.constant 0 : index
    %675 = vector.load %arg10[%c0_346, %c0_347] : memref<32x32xf32, #tpu.memory_space<vmem>>, vector<32x32xf32>
    %cst_348 = arith.constant dense<0.000000e+00> : vector<8x32xf32>
    %676 = tpu.matmul %603, %675, %cst_348 {dimension_numbers = #tpu.dot_dimension_numbers<[1], [0], [0], [1], [0, 0, 1, 1], [], []>} : vector<8x32xf32>, vector<32x32xf32>, vector<8x32xf32> -> vector<8x32xf32>
    %c0_349 = arith.constant 0 : index
    %c0_350 = arith.constant 0 : index
    %677 = vector.load %arg11[%c0_349, %c0_350] : memref<1x32xf32, #tpu.memory_space<vmem>>, vector<1x32xf32>
    %678 = vector.broadcast %677 : vector<1x32xf32> to vector<8x32xf32>
    %679 = arith.addf %676, %678 : vector<8x32xf32>
    %680 = arith.mulf %662, %679 : vector<8x32xf32>
    %681 = arith.addf %674, %680 : vector<8x32xf32>
    %682 = math.tanh %681 : vector<8x32xf32>
    %cst_351 = arith.constant 1.000000e+00 : f32
    %683 = vector.broadcast %cst_351 : f32 to vector<8x32xf32>
    %684 = arith.subf %683, %672 : vector<8x32xf32>
    %685 = arith.mulf %684, %682 : vector<8x32xf32>
    %686 = arith.mulf %672, %603 : vector<8x32xf32>
    %687 = arith.addf %685, %686 : vector<8x32xf32>
    %c0_i32_352 = arith.constant 0 : i32
    %688 = arith.cmpi sge, %608, %c0_i32_352 : i32
    %689 = arith.select %688, %687, %603 : vector<8x32xf32>
    %c0_353 = arith.constant 0 : index
    %c0_354 = arith.constant 0 : index
    %c0_355 = arith.constant 0 : index
    %690 = vector.load %arg16[%c0_353, %c0_354, %c0_355] : memref<8x8x32xf32, #tpu.memory_space<vmem>>, vector<1x8x32xf32>
    %691 = vector.shape_cast %690 : vector<1x8x32xf32> to vector<8x32xf32>
    %692 = vector.shape_cast %689 : vector<8x32xf32> to vector<1x8x32xf32>
    tpu.vector_store %arg16[%c0_353, %c0_354, %c0_355], %692 {strides = array<i32>} : memref<8x8x32xf32, #tpu.memory_space<vmem>>, vector<1x8x32xf32>,
    %c0_356 = arith.constant 0 : index
    %c0_357 = arith.constant 0 : index
    %693 = vector.load %arg18[%c0_356, %c0_357] : memref<8x32xf32, #tpu.memory_space<vmem>>, vector<8x32xf32>
    tpu.vector_store %arg18[%c0_356, %c0_357], %647 {strides = array<i32>} : memref<8x32xf32, #tpu.memory_space<vmem>>, vector<8x32xf32>,
    %c0_358 = arith.constant 0 : index
    %c0_359 = arith.constant 0 : index
    %694 = vector.load %arg19[%c0_358, %c0_359] : memref<8x32xf32, #tpu.memory_space<vmem>>, vector<8x32xf32>
    tpu.vector_store %arg19[%c0_358, %c0_359], %689 {strides = array<i32>} : memref<8x32xf32, #tpu.memory_space<vmem>>, vector<8x32xf32>,
    %c0_i32_360 = arith.constant 0 : i32
    %695 = arith.cmpi eq, %arg1, %c0_i32_360 : i32
    %696 = arith.extui %695 : i1 to i32
    %c0_i32_361 = arith.constant 0 : i32
    %697 = arith.cmpi ne, %696, %c0_i32_361 : i32
    scf.if %697 {
      %c0_362 = arith.constant 0 : index
      %c0_363 = arith.constant 0 : index
      %698 = vector.load %arg12[%c0_362, %c0_363] : memref<32x32xf32, #tpu.memory_space<vmem>>, vector<32x32xf32>
      %cst_364 = arith.constant dense<0.000000e+00> : vector<8x32xf32>
      %699 = tpu.matmul %647, %698, %cst_364 {dimension_numbers = #tpu.dot_dimension_numbers<[1], [0], [0], [1], [0, 0, 1, 1], [], []>} : vector<8x32xf32>, vector<32x32xf32>, vector<8x32xf32> -> vector<8x32xf32>
      %c0_365 = arith.constant 0 : index
      %c0_366 = arith.constant 0 : index
      %700 = vector.load %arg13[%c0_365, %c0_366] : memref<32x32xf32, #tpu.memory_space<vmem>>, vector<32x32xf32>
      %cst_367 = arith.constant dense<0.000000e+00> : vector<8x32xf32>
      %701 = tpu.matmul %689, %700, %cst_367 {dimension_numbers = #tpu.dot_dimension_numbers<[1], [0], [0], [1], [0, 0, 1, 1], [], []>} : vector<8x32xf32>, vector<32x32xf32>, vector<8x32xf32> -> vector<8x32xf32>
      %702 = arith.addf %699, %701 : vector<8x32xf32>
      %c0_368 = arith.constant 0 : index
      %c0_369 = arith.constant 0 : index
      %703 = vector.load %arg14[%c0_368, %c0_369] : memref<1x32xf32, #tpu.memory_space<vmem>>, vector<1x32xf32>
      %704 = vector.broadcast %703 : vector<1x32xf32> to vector<8x32xf32>
      %705 = arith.addf %702, %704 : vector<8x32xf32>
      %706 = math.tanh %705 : vector<8x32xf32>
      %c0_370 = arith.constant 0 : index
      %c0_371 = arith.constant 0 : index
      %707 = vector.load %arg17[%c0_370, %c0_371] : memref<8x32xf32, #tpu.memory_space<vmem>>, vector<8x32xf32>
      tpu.vector_store %arg17[%c0_370, %c0_371], %706 {strides = array<i32>} : memref<8x32xf32, #tpu.memory_space<vmem>>, vector<8x32xf32>,
    } else {
    }
    return
  }
  func.func @transform_0(%arg0: i32, %arg1: i32) -> (i32, i32, i32, i32) {
    %c0_i32 = arith.constant 0 : i32
    %c0_i32_0 = arith.constant 0 : i32
    %c0_i32_1 = arith.constant 0 : i32
    return %arg1, %c0_i32, %arg0, %c0_i32_0 : i32, i32, i32, i32
  }
  func.func @transform_1(%arg0: i32, %arg1: i32) -> (i32, i32, i32, i32) {
    %c0_i32 = arith.constant 0 : i32
    %0 = arith.subi %c0_i32, %arg1 : i32
    %c0_i32_0 = arith.constant 0 : i32
    %c0_i32_1 = arith.constant 0 : i32
    %c0_i32_2 = arith.constant 0 : i32
    return %0, %c0_i32_0, %arg0, %c0_i32_1 : i32, i32, i32, i32
  }
  func.func @transform_2(%arg0: i32, %arg1: i32) -> (i32, i32) {
    %c0_i32 = arith.constant 0 : i32
    %c0_i32_0 = arith.constant 0 : i32
    %c0_i32_1 = arith.constant 0 : i32
    return %c0_i32, %c0_i32_0 : i32, i32
  }
  func.func @transform_3(%arg0: i32, %arg1: i32) -> (i32, i32) {
    %c0_i32 = arith.constant 0 : i32
    %c0_i32_0 = arith.constant 0 : i32
    %c0_i32_1 = arith.constant 0 : i32
    return %c0_i32, %c0_i32_0 : i32, i32
  }
  func.func @transform_4(%arg0: i32, %arg1: i32) -> (i32, i32) {
    %c0_i32 = arith.constant 0 : i32
    %c0_i32_0 = arith.constant 0 : i32
    %c0_i32_1 = arith.constant 0 : i32
    return %c0_i32, %c0_i32_0 : i32, i32
  }
  func.func @transform_5(%arg0: i32, %arg1: i32) -> (i32, i32) {
    %c0_i32 = arith.constant 0 : i32
    %c0_i32_0 = arith.constant 0 : i32
    %c0_i32_1 = arith.constant 0 : i32
    return %c0_i32, %c0_i32_0 : i32, i32
  }
  func.func @transform_6(%arg0: i32, %arg1: i32) -> (i32, i32) {
    %c0_i32 = arith.constant 0 : i32
    %c0_i32_0 = arith.constant 0 : i32
    %c0_i32_1 = arith.constant 0 : i32
    return %c0_i32, %c0_i32_0 : i32, i32
  }
  func.func @transform_7(%arg0: i32, %arg1: i32) -> (i32, i32) {
    %c0_i32 = arith.constant 0 : i32
    %c0_i32_0 = arith.constant 0 : i32
    %c0_i32_1 = arith.constant 0 : i32
    return %c0_i32, %c0_i32_0 : i32, i32
  }
  func.func @transform_8(%arg0: i32, %arg1: i32) -> (i32, i32) {
    %c0_i32 = arith.constant 0 : i32
    %c0_i32_0 = arith.constant 0 : i32
    %c0_i32_1 = arith.constant 0 : i32
    return %c0_i32, %c0_i32_0 : i32, i32
  }
  func.func @transform_9(%arg0: i32, %arg1: i32) -> (i32, i32) {
    %c0_i32 = arith.constant 0 : i32
    %c0_i32_0 = arith.constant 0 : i32
    %c0_i32_1 = arith.constant 0 : i32
    return %c0_i32, %c0_i32_0 : i32, i32
  }
  func.func @transform_10(%arg0: i32, %arg1: i32) -> (i32, i32) {
    %c0_i32 = arith.constant 0 : i32
    %c0_i32_0 = arith.constant 0 : i32
    %c0_i32_1 = arith.constant 0 : i32
    return %c0_i32, %c0_i32_0 : i32, i32
  }
  func.func @transform_11(%arg0: i32, %arg1: i32) -> (i32, i32) {
    %c0_i32 = arith.constant 0 : i32
    %c0_i32_0 = arith.constant 0 : i32
    %c0_i32_1 = arith.constant 0 : i32
    return %c0_i32, %c0_i32_0 : i32, i32
  }
  func.func @transform_12(%arg0: i32, %arg1: i32) -> (i32, i32) {
    %c0_i32 = arith.constant 0 : i32
    %c0_i32_0 = arith.constant 0 : i32
    %c0_i32_1 = arith.constant 0 : i32
    return %c0_i32, %c0_i32_0 : i32, i32
  }
  func.func @transform_13(%arg0: i32, %arg1: i32) -> (i32, i32, i32) {
    %c0_i32 = arith.constant 0 : i32
    %c0_i32_0 = arith.constant 0 : i32
    return %arg1, %arg0, %c0_i32 : i32, i32, i32
  }
  func.func @transform_14(%arg0: i32, %arg1: i32) -> (i32, i32, i32) {
    %c0_i32 = arith.constant 0 : i32
    %0 = arith.subi %c0_i32, %arg1 : i32
    %c0_i32_0 = arith.constant 0 : i32
    %c0_i32_1 = arith.constant 0 : i32
    return %0, %arg0, %c0_i32_0 : i32, i32, i32
  }
  func.func @transform_15(%arg0: i32, %arg1: i32) -> (i32, i32) {
    %c0_i32 = arith.constant 0 : i32
    %c0_i32_0 = arith.constant 0 : i32
    return %arg0, %c0_i32 : i32, i32
  }
}

module attributes {stable_mosaic.version = 11 : i64} {
  func.func @_decoder_kernel(%arg0: i32, %arg1: i32, %arg2: memref<8x3x8x32xf32, #tpu.memory_space<vmem>>, %arg3: memref<8x8x128xf32, #tpu.memory_space<vmem>>, %arg4: memref<8x8x32xf32, #tpu.memory_space<vmem>>, %arg5: memref<8x8x32xf32, #tpu.memory_space<vmem>>, %arg6: memref<8x32xf32, #tpu.memory_space<vmem>>, %arg7: memref<32x32xf32, #tpu.memory_space<vmem>>, %arg8: memref<32x32xf32, #tpu.memory_space<vmem>>, %arg9: memref<32x32xf32, #tpu.memory_space<vmem>>, %arg10: memref<1x32xf32, #tpu.memory_space<vmem>>, %arg11: memref<32x1xf32, #tpu.memory_space<vmem>>, %arg12: memref<32x32xf32, #tpu.memory_space<vmem>>, %arg13: memref<32x32xf32, #tpu.memory_space<vmem>>, %arg14: memref<32x32xf32, #tpu.memory_space<vmem>>, %arg15: memref<1x32xf32, #tpu.memory_space<vmem>>, %arg16: memref<32x32xf32, #tpu.memory_space<vmem>>, %arg17: memref<32x32xf32, #tpu.memory_space<vmem>>, %arg18: memref<32x32xf32, #tpu.memory_space<vmem>>, %arg19: memref<32x32xf32, #tpu.memory_space<vmem>>, %arg20: memref<32x32xf32, #tpu.memory_space<vmem>>, %arg21: memref<32x32xf32, #tpu.memory_space<vmem>>, %arg22: memref<32x128xf32, #tpu.memory_space<vmem>>, %arg23: memref<32x128xf32, #tpu.memory_space<vmem>>, %arg24: memref<32x128xf32, #tpu.memory_space<vmem>>, %arg25: memref<8x8x128xf32, #tpu.memory_space<vmem>>, %arg26: memref<8x32xf32, #tpu.memory_space<vmem>>, %arg27: memref<8x8x32xf32, #tpu.memory_space<vmem>>) attributes {dimension_semantics = [#tpu.dimension_semantics<parallel>, #tpu.dimension_semantics<arbitrary>], iteration_bounds = array<i64: 1, 1>, scalar_prefetch = 0 : i64, scratch_operands = 2 : i64, tpu.core_type = #tpu.core_type<tc>, window_params = [{transform_indices = @transform_0, window_bounds = array<i64: 8, 3, 8, 32>}, {transform_indices = @transform_1, window_bounds = array<i64: 8, 8, 128>}, {transform_indices = @transform_2, window_bounds = array<i64: 8, 8, 32>}, {transform_indices = @transform_3, window_bounds = array<i64: 8, 8, 32>}, {transform_indices = @transform_4, window_bounds = array<i64: 8, 32>}, {pipeline_mode = #tpu.pipeline_mode<synchronous>, transform_indices = @transform_5, window_bounds = array<i64: 32, 32>}, {pipeline_mode = #tpu.pipeline_mode<synchronous>, transform_indices = @transform_6, window_bounds = array<i64: 32, 32>}, {pipeline_mode = #tpu.pipeline_mode<synchronous>, transform_indices = @transform_7, window_bounds = array<i64: 32, 32>}, {pipeline_mode = #tpu.pipeline_mode<synchronous>, transform_indices = @transform_8, window_bounds = array<i64: 1, 32>}, {pipeline_mode = #tpu.pipeline_mode<synchronous>, transform_indices = @transform_9, window_bounds = array<i64: 32, 1>}, {pipeline_mode = #tpu.pipeline_mode<synchronous>, transform_indices = @transform_10, window_bounds = array<i64: 32, 32>}, {pipeline_mode = #tpu.pipeline_mode<synchronous>, transform_indices = @transform_11, window_bounds = array<i64: 32, 32>}, {pipeline_mode = #tpu.pipeline_mode<synchronous>, transform_indices = @transform_12, window_bounds = array<i64: 32, 32>}, {pipeline_mode = #tpu.pipeline_mode<synchronous>, transform_indices = @transform_13, window_bounds = array<i64: 1, 32>}, {pipeline_mode = #tpu.pipeline_mode<synchronous>, transform_indices = @transform_14, window_bounds = array<i64: 32, 32>}, {pipeline_mode = #tpu.pipeline_mode<synchronous>, transform_indices = @transform_15, window_bounds = array<i64: 32, 32>}, {pipeline_mode = #tpu.pipeline_mode<synchronous>, transform_indices = @transform_16, window_bounds = array<i64: 32, 32>}, {pipeline_mode = #tpu.pipeline_mode<synchronous>, transform_indices = @transform_17, window_bounds = array<i64: 32, 32>}, {pipeline_mode = #tpu.pipeline_mode<synchronous>, transform_indices = @transform_18, window_bounds = array<i64: 32, 32>}, {pipeline_mode = #tpu.pipeline_mode<synchronous>, transform_indices = @transform_19, window_bounds = array<i64: 32, 32>}, {pipeline_mode = #tpu.pipeline_mode<synchronous>, transform_indices = @transform_20, window_bounds = array<i64: 32, 128>}, {pipeline_mode = #tpu.pipeline_mode<synchronous>, transform_indices = @transform_21, window_bounds = array<i64: 32, 128>}, {pipeline_mode = #tpu.pipeline_mode<synchronous>, transform_indices = @transform_22, window_bounds = array<i64: 32, 128>}, {transform_indices = @transform_23, window_bounds = array<i64: 8, 8, 128>}]} {
    %c0_i32 = arith.constant 0 : i32
    %0 = arith.cmpi eq, %arg1, %c0_i32 : i32
    %1 = arith.extui %0 : i1 to i32
    %c0_i32_0 = arith.constant 0 : i32
    %2 = arith.cmpi ne, %1, %c0_i32_0 : i32
    scf.if %2 {
      %c0_556 = arith.constant 0 : index
      %c0_557 = arith.constant 0 : index
      %789 = vector.load %arg6[%c0_556, %c0_557] : memref<8x32xf32, #tpu.memory_space<vmem>>, vector<8x32xf32>
      %c0_558 = arith.constant 0 : index
      %c0_559 = arith.constant 0 : index
      %790 = vector.load %arg26[%c0_558, %c0_559] : memref<8x32xf32, #tpu.memory_space<vmem>>, vector<8x32xf32>
      tpu.vector_store %arg26[%c0_558, %c0_559], %789 {strides = array<i32>} : memref<8x32xf32, #tpu.memory_space<vmem>>, vector<8x32xf32>,
      %c0_560 = arith.constant 0 : index
      %c0_561 = arith.constant 0 : index
      %c0_562 = arith.constant 0 : index
      %791 = vector.load %arg4[%c0_560, %c0_561, %c0_562] : memref<8x8x32xf32, #tpu.memory_space<vmem>>, vector<8x8x32xf32>
      %792 = vector.shape_cast %791 : vector<8x8x32xf32> to vector<64x32xf32>
      %c0_563 = arith.constant 0 : index
      %c0_564 = arith.constant 0 : index
      %793 = vector.load %arg8[%c0_563, %c0_564] : memref<32x32xf32, #tpu.memory_space<vmem>>, vector<32x32xf32>
      %cst_565 = arith.constant dense<0.000000e+00> : vector<64x32xf32>
      %794 = tpu.matmul %792, %793, %cst_565 {dimension_numbers = #tpu.dot_dimension_numbers<[1], [0], [0], [1], [0, 0, 1, 1], [], []>} : vector<64x32xf32>, vector<32x32xf32>, vector<64x32xf32> -> vector<64x32xf32>
      %c0_566 = arith.constant 0 : index
      %c0_567 = arith.constant 0 : index
      %c0_568 = arith.constant 0 : index
      %795 = vector.load %arg5[%c0_566, %c0_567, %c0_568] : memref<8x8x32xf32, #tpu.memory_space<vmem>>, vector<8x8x32xf32>
      %796 = vector.shape_cast %795 : vector<8x8x32xf32> to vector<64x32xf32>
      %c0_569 = arith.constant 0 : index
      %c0_570 = arith.constant 0 : index
      %797 = vector.load %arg9[%c0_569, %c0_570] : memref<32x32xf32, #tpu.memory_space<vmem>>, vector<32x32xf32>
      %cst_571 = arith.constant dense<0.000000e+00> : vector<64x32xf32>
      %798 = tpu.matmul %796, %797, %cst_571 {dimension_numbers = #tpu.dot_dimension_numbers<[1], [0], [0], [1], [0, 0, 1, 1], [], []>} : vector<64x32xf32>, vector<32x32xf32>, vector<64x32xf32> -> vector<64x32xf32>
      %799 = arith.addf %794, %798 : vector<64x32xf32>
      %c0_572 = arith.constant 0 : index
      %c0_573 = arith.constant 0 : index
      %800 = vector.load %arg10[%c0_572, %c0_573] : memref<1x32xf32, #tpu.memory_space<vmem>>, vector<1x32xf32>
      %801 = vector.broadcast %800 : vector<1x32xf32> to vector<64x32xf32>
      %802 = arith.addf %799, %801 : vector<64x32xf32>
      %803 = vector.shape_cast %802 : vector<64x32xf32> to vector<8x8x32xf32>
      %c0_574 = arith.constant 0 : index
      %c0_575 = arith.constant 0 : index
      %c0_576 = arith.constant 0 : index
      %804 = vector.load %arg27[%c0_574, %c0_575, %c0_576] : memref<8x8x32xf32, #tpu.memory_space<vmem>>, vector<8x8x32xf32>
      tpu.vector_store %arg27[%c0_574, %c0_575, %c0_576], %803 {strides = array<i32>} : memref<8x8x32xf32, #tpu.memory_space<vmem>>, vector<8x8x32xf32>,
    } else {
    }
    %c0 = arith.constant 0 : index
    %c0_1 = arith.constant 0 : index
    %3 = vector.load %arg26[%c0, %c0_1] : memref<8x32xf32, #tpu.memory_space<vmem>>, vector<8x32xf32>
    %c0_2 = arith.constant 0 : index
    %c0_3 = arith.constant 0 : index
    %4 = vector.load %arg7[%c0_2, %c0_3] : memref<32x32xf32, #tpu.memory_space<vmem>>, vector<32x32xf32>
    %cst = arith.constant dense<0.000000e+00> : vector<8x32xf32>
    %5 = tpu.matmul %3, %4, %cst {dimension_numbers = #tpu.dot_dimension_numbers<[1], [0], [0], [1], [0, 0, 1, 1], [], []>} : vector<8x32xf32>, vector<32x32xf32>, vector<8x32xf32> -> vector<8x32xf32>
    %c0_4 = arith.constant 0 : index
    %c0_5 = arith.constant 0 : index
    %c0_6 = arith.constant 0 : index
    %6 = vector.load %arg27[%c0_4, %c0_5, %c0_6] : memref<8x8x32xf32, #tpu.memory_space<vmem>>, vector<8x8x32xf32>
    %7 = vector.shape_cast %5 : vector<8x32xf32> to vector<1x8x32xf32>
    %8 = vector.broadcast %7 : vector<1x8x32xf32> to vector<8x8x32xf32>
    %9 = arith.addf %6, %8 : vector<8x8x32xf32>
    %10 = math.tanh %9 : vector<8x8x32xf32>
    %11 = vector.shape_cast %10 : vector<8x8x32xf32> to vector<64x32xf32>
    %c0_7 = arith.constant 0 : index
    %c0_8 = arith.constant 0 : index
    %12 = vector.load %arg11[%c0_7, %c0_8] : memref<32x1xf32, #tpu.memory_space<vmem>>, vector<32x1xf32>
    %cst_9 = arith.constant dense<0.000000e+00> : vector<64x1xf32>
    %13 = tpu.matmul %11, %12, %cst_9 {dimension_numbers = #tpu.dot_dimension_numbers<[1], [0], [0], [1], [0, 0, 1, 1], [], []>} : vector<64x32xf32>, vector<32x1xf32>, vector<64x1xf32> -> vector<64x1xf32>
    %14 = vector.shape_cast %13 : vector<64x1xf32> to vector<8x8x1xf32>
    %cst_10 = arith.constant dense<0xFF800000> : vector<8x1xf32>
    %15 = vector.multi_reduction <maximumf>, %14, %cst_10 [0] : vector<8x8x1xf32> to vector<8x1xf32>
    %16 = vector.shape_cast %15 : vector<8x1xf32> to vector<1x8x1xf32>
    %17 = vector.broadcast %16 : vector<1x8x1xf32> to vector<8x8x1xf32>
    %18 = arith.subf %14, %17 : vector<8x8x1xf32>
    %19 = math.exp %18 : vector<8x8x1xf32>
    %cst_11 = arith.constant dense<0.000000e+00> : vector<8x1xf32>
    %20 = vector.multi_reduction <add>, %19, %cst_11 [0] : vector<8x8x1xf32> to vector<8x1xf32>
    %21 = vector.shape_cast %20 : vector<8x1xf32> to vector<1x8x1xf32>
    %22 = tpu.reciprocal %21 {approx = true} : vector<1x8x1xf32> -> vector<1x8x1xf32>
    %23 = vector.broadcast %22 : vector<1x8x1xf32> to vector<8x8x1xf32>
    %24 = arith.mulf %19, %23 : vector<8x8x1xf32>
    %c0_12 = arith.constant 0 : index
    %c0_13 = arith.constant 0 : index
    %c0_14 = arith.constant 0 : index
    %25 = vector.load %arg4[%c0_12, %c0_13, %c0_14] : memref<8x8x32xf32, #tpu.memory_space<vmem>>, vector<8x8x32xf32>
    %26 = vector.broadcast %24 : vector<8x8x1xf32> to vector<8x8x32xf32>
    %27 = arith.mulf %26, %25 : vector<8x8x32xf32>
    %cst_15 = arith.constant dense<0.000000e+00> : vector<8x32xf32>
    %28 = vector.multi_reduction <add>, %27, %cst_15 [0] : vector<8x8x32xf32> to vector<8x32xf32>
    %c0_16 = arith.constant 0 : index
    %c0_17 = arith.constant 0 : index
    %c0_18 = arith.constant 0 : index
    %29 = vector.load %arg5[%c0_16, %c0_17, %c0_18] : memref<8x8x32xf32, #tpu.memory_space<vmem>>, vector<8x8x32xf32>
    %30 = vector.broadcast %24 : vector<8x8x1xf32> to vector<8x8x32xf32>
    %31 = arith.mulf %30, %29 : vector<8x8x32xf32>
    %cst_19 = arith.constant dense<0.000000e+00> : vector<8x32xf32>
    %32 = vector.multi_reduction <add>, %31, %cst_19 [0] : vector<8x8x32xf32> to vector<8x32xf32>
    %c0_20 = arith.constant 0 : index
    %c0_21 = arith.constant 0 : index
    %c0_22 = arith.constant 0 : index
    %c0_23 = arith.constant 0 : index
    %33 = vector.load %arg2[%c0_20, %c0_21, %c0_22, %c0_23] : memref<8x3x8x32xf32, #tpu.memory_space<vmem>>, vector<1x3x8x32xf32>
    %34 = vector.shape_cast %33 : vector<1x3x8x32xf32> to vector<3x8x32xf32>
    %35 = vector.extract_strided_slice %34 {offsets = [0, 0, 0], sizes = [1, 8, 32], strides = [1, 1, 1]} : vector<3x8x32xf32> to vector<1x8x32xf32>
    %36 = vector.shape_cast %35 : vector<1x8x32xf32> to vector<8x32xf32>
    %c0_24 = arith.constant 0 : index
    %c0_25 = arith.constant 0 : index
    %37 = vector.load %arg16[%c0_24, %c0_25] : memref<32x32xf32, #tpu.memory_space<vmem>>, vector<32x32xf32>
    %cst_26 = arith.constant dense<0.000000e+00> : vector<8x32xf32>
    %38 = tpu.matmul %28, %37, %cst_26 {dimension_numbers = #tpu.dot_dimension_numbers<[1], [0], [0], [1], [0, 0, 1, 1], [], []>} : vector<8x32xf32>, vector<32x32xf32>, vector<8x32xf32> -> vector<8x32xf32>
    %39 = arith.addf %36, %38 : vector<8x32xf32>
    %c0_27 = arith.constant 0 : index
    %c0_28 = arith.constant 0 : index
    %40 = vector.load %arg19[%c0_27, %c0_28] : memref<32x32xf32, #tpu.memory_space<vmem>>, vector<32x32xf32>
    %cst_29 = arith.constant dense<0.000000e+00> : vector<8x32xf32>
    %41 = tpu.matmul %32, %40, %cst_29 {dimension_numbers = #tpu.dot_dimension_numbers<[1], [0], [0], [1], [0, 0, 1, 1], [], []>} : vector<8x32xf32>, vector<32x32xf32>, vector<8x32xf32> -> vector<8x32xf32>
    %42 = arith.addf %39, %41 : vector<8x32xf32>
    %43 = vector.extract_strided_slice %34 {offsets = [1, 0, 0], sizes = [1, 8, 32], strides = [1, 1, 1]} : vector<3x8x32xf32> to vector<1x8x32xf32>
    %44 = vector.shape_cast %43 : vector<1x8x32xf32> to vector<8x32xf32>
    %c0_30 = arith.constant 0 : index
    %c0_31 = arith.constant 0 : index
    %45 = vector.load %arg17[%c0_30, %c0_31] : memref<32x32xf32, #tpu.memory_space<vmem>>, vector<32x32xf32>
    %cst_32 = arith.constant dense<0.000000e+00> : vector<8x32xf32>
    %46 = tpu.matmul %28, %45, %cst_32 {dimension_numbers = #tpu.dot_dimension_numbers<[1], [0], [0], [1], [0, 0, 1, 1], [], []>} : vector<8x32xf32>, vector<32x32xf32>, vector<8x32xf32> -> vector<8x32xf32>
    %47 = arith.addf %44, %46 : vector<8x32xf32>
    %c0_33 = arith.constant 0 : index
    %c0_34 = arith.constant 0 : index
    %48 = vector.load %arg20[%c0_33, %c0_34] : memref<32x32xf32, #tpu.memory_space<vmem>>, vector<32x32xf32>
    %cst_35 = arith.constant dense<0.000000e+00> : vector<8x32xf32>
    %49 = tpu.matmul %32, %48, %cst_35 {dimension_numbers = #tpu.dot_dimension_numbers<[1], [0], [0], [1], [0, 0, 1, 1], [], []>} : vector<8x32xf32>, vector<32x32xf32>, vector<8x32xf32> -> vector<8x32xf32>
    %50 = arith.addf %47, %49 : vector<8x32xf32>
    %51 = vector.extract_strided_slice %34 {offsets = [2, 0, 0], sizes = [1, 8, 32], strides = [1, 1, 1]} : vector<3x8x32xf32> to vector<1x8x32xf32>
    %52 = vector.shape_cast %51 : vector<1x8x32xf32> to vector<8x32xf32>
    %c0_36 = arith.constant 0 : index
    %c0_37 = arith.constant 0 : index
    %53 = vector.load %arg18[%c0_36, %c0_37] : memref<32x32xf32, #tpu.memory_space<vmem>>, vector<32x32xf32>
    %cst_38 = arith.constant dense<0.000000e+00> : vector<8x32xf32>
    %54 = tpu.matmul %28, %53, %cst_38 {dimension_numbers = #tpu.dot_dimension_numbers<[1], [0], [0], [1], [0, 0, 1, 1], [], []>} : vector<8x32xf32>, vector<32x32xf32>, vector<8x32xf32> -> vector<8x32xf32>
    %55 = arith.addf %52, %54 : vector<8x32xf32>
    %c0_39 = arith.constant 0 : index
    %c0_40 = arith.constant 0 : index
    %56 = vector.load %arg21[%c0_39, %c0_40] : memref<32x32xf32, #tpu.memory_space<vmem>>, vector<32x32xf32>
    %cst_41 = arith.constant dense<0.000000e+00> : vector<8x32xf32>
    %57 = tpu.matmul %32, %56, %cst_41 {dimension_numbers = #tpu.dot_dimension_numbers<[1], [0], [0], [1], [0, 0, 1, 1], [], []>} : vector<8x32xf32>, vector<32x32xf32>, vector<8x32xf32> -> vector<8x32xf32>
    %58 = arith.addf %55, %57 : vector<8x32xf32>
    %c0_42 = arith.constant 0 : index
    %c0_43 = arith.constant 0 : index
    %59 = vector.load %arg12[%c0_42, %c0_43] : memref<32x32xf32, #tpu.memory_space<vmem>>, vector<32x32xf32>
    %cst_44 = arith.constant dense<0.000000e+00> : vector<8x32xf32>
    %60 = tpu.matmul %3, %59, %cst_44 {dimension_numbers = #tpu.dot_dimension_numbers<[1], [0], [0], [1], [0, 0, 1, 1], [], []>} : vector<8x32xf32>, vector<32x32xf32>, vector<8x32xf32> -> vector<8x32xf32>
    %61 = arith.addf %42, %60 : vector<8x32xf32>
    %62 = arith.negf %61 : vector<8x32xf32>
    %63 = math.exp %62 : vector<8x32xf32>
    %cst_45 = arith.constant 1.000000e+00 : f32
    %64 = vector.broadcast %cst_45 : f32 to vector<8x32xf32>
    %65 = arith.addf %64, %63 : vector<8x32xf32>
    %66 = arith.divf %64, %65 : vector<8x32xf32>
    %c0_46 = arith.constant 0 : index
    %c0_47 = arith.constant 0 : index
    %67 = vector.load %arg13[%c0_46, %c0_47] : memref<32x32xf32, #tpu.memory_space<vmem>>, vector<32x32xf32>
    %cst_48 = arith.constant dense<0.000000e+00> : vector<8x32xf32>
    %68 = tpu.matmul %3, %67, %cst_48 {dimension_numbers = #tpu.dot_dimension_numbers<[1], [0], [0], [1], [0, 0, 1, 1], [], []>} : vector<8x32xf32>, vector<32x32xf32>, vector<8x32xf32> -> vector<8x32xf32>
    %69 = arith.addf %50, %68 : vector<8x32xf32>
    %70 = arith.negf %69 : vector<8x32xf32>
    %71 = math.exp %70 : vector<8x32xf32>
    %cst_49 = arith.constant 1.000000e+00 : f32
    %72 = vector.broadcast %cst_49 : f32 to vector<8x32xf32>
    %73 = arith.addf %72, %71 : vector<8x32xf32>
    %74 = arith.divf %72, %73 : vector<8x32xf32>
    %c0_50 = arith.constant 0 : index
    %c0_51 = arith.constant 0 : index
    %75 = vector.load %arg14[%c0_50, %c0_51] : memref<32x32xf32, #tpu.memory_space<vmem>>, vector<32x32xf32>
    %cst_52 = arith.constant dense<0.000000e+00> : vector<8x32xf32>
    %76 = tpu.matmul %3, %75, %cst_52 {dimension_numbers = #tpu.dot_dimension_numbers<[1], [0], [0], [1], [0, 0, 1, 1], [], []>} : vector<8x32xf32>, vector<32x32xf32>, vector<8x32xf32> -> vector<8x32xf32>
    %c0_53 = arith.constant 0 : index
    %c0_54 = arith.constant 0 : index
    %77 = vector.load %arg15[%c0_53, %c0_54] : memref<1x32xf32, #tpu.memory_space<vmem>>, vector<1x32xf32>
    %78 = vector.broadcast %77 : vector<1x32xf32> to vector<8x32xf32>
    %79 = arith.addf %76, %78 : vector<8x32xf32>
    %80 = arith.mulf %66, %79 : vector<8x32xf32>
    %81 = arith.addf %58, %80 : vector<8x32xf32>
    %82 = math.tanh %81 : vector<8x32xf32>
    %cst_55 = arith.constant 1.000000e+00 : f32
    %83 = vector.broadcast %cst_55 : f32 to vector<8x32xf32>
    %84 = arith.subf %83, %74 : vector<8x32xf32>
    %85 = arith.mulf %84, %82 : vector<8x32xf32>
    %86 = arith.mulf %74, %3 : vector<8x32xf32>
    %87 = arith.addf %85, %86 : vector<8x32xf32>
    %c0_56 = arith.constant 0 : index
    %c0_57 = arith.constant 0 : index
    %c0_58 = arith.constant 0 : index
    %88 = vector.load %arg3[%c0_56, %c0_57, %c0_58] : memref<8x8x128xf32, #tpu.memory_space<vmem>>, vector<1x8x128xf32>
    %89 = vector.shape_cast %88 : vector<1x8x128xf32> to vector<8x128xf32>
    %c0_59 = arith.constant 0 : index
    %c0_60 = arith.constant 0 : index
    %90 = vector.load %arg22[%c0_59, %c0_60] : memref<32x128xf32, #tpu.memory_space<vmem>>, vector<32x128xf32>
    %cst_61 = arith.constant dense<0.000000e+00> : vector<8x128xf32>
    %91 = tpu.matmul %87, %90, %cst_61 {dimension_numbers = #tpu.dot_dimension_numbers<[1], [0], [0], [1], [0, 0, 1, 1], [], []>} : vector<8x32xf32>, vector<32x128xf32>, vector<8x128xf32> -> vector<8x128xf32>
    %92 = arith.addf %89, %91 : vector<8x128xf32>
    %c0_62 = arith.constant 0 : index
    %c0_63 = arith.constant 0 : index
    %93 = vector.load %arg23[%c0_62, %c0_63] : memref<32x128xf32, #tpu.memory_space<vmem>>, vector<32x128xf32>
    %cst_64 = arith.constant dense<0.000000e+00> : vector<8x128xf32>
    %94 = tpu.matmul %28, %93, %cst_64 {dimension_numbers = #tpu.dot_dimension_numbers<[1], [0], [0], [1], [0, 0, 1, 1], [], []>} : vector<8x32xf32>, vector<32x128xf32>, vector<8x128xf32> -> vector<8x128xf32>
    %95 = arith.addf %92, %94 : vector<8x128xf32>
    %c0_65 = arith.constant 0 : index
    %c0_66 = arith.constant 0 : index
    %96 = vector.load %arg24[%c0_65, %c0_66] : memref<32x128xf32, #tpu.memory_space<vmem>>, vector<32x128xf32>
    %cst_67 = arith.constant dense<0.000000e+00> : vector<8x128xf32>
    %97 = tpu.matmul %32, %96, %cst_67 {dimension_numbers = #tpu.dot_dimension_numbers<[1], [0], [0], [1], [0, 0, 1, 1], [], []>} : vector<8x32xf32>, vector<32x128xf32>, vector<8x128xf32> -> vector<8x128xf32>
    %98 = arith.addf %95, %97 : vector<8x128xf32>
    %c0_68 = arith.constant 0 : index
    %c0_69 = arith.constant 0 : index
    %c0_70 = arith.constant 0 : index
    %99 = vector.load %arg25[%c0_68, %c0_69, %c0_70] : memref<8x8x128xf32, #tpu.memory_space<vmem>>, vector<1x8x128xf32>
    %100 = vector.shape_cast %99 : vector<1x8x128xf32> to vector<8x128xf32>
    %101 = vector.shape_cast %98 : vector<8x128xf32> to vector<1x8x128xf32>
    tpu.vector_store %arg25[%c0_68, %c0_69, %c0_70], %101 {strides = array<i32>} : memref<8x8x128xf32, #tpu.memory_space<vmem>>, vector<1x8x128xf32>,
    %c0_71 = arith.constant 0 : index
    %c0_72 = arith.constant 0 : index
    %102 = vector.load %arg7[%c0_71, %c0_72] : memref<32x32xf32, #tpu.memory_space<vmem>>, vector<32x32xf32>
    %cst_73 = arith.constant dense<0.000000e+00> : vector<8x32xf32>
    %103 = tpu.matmul %87, %102, %cst_73 {dimension_numbers = #tpu.dot_dimension_numbers<[1], [0], [0], [1], [0, 0, 1, 1], [], []>} : vector<8x32xf32>, vector<32x32xf32>, vector<8x32xf32> -> vector<8x32xf32>
    %c0_74 = arith.constant 0 : index
    %c0_75 = arith.constant 0 : index
    %c0_76 = arith.constant 0 : index
    %104 = vector.load %arg27[%c0_74, %c0_75, %c0_76] : memref<8x8x32xf32, #tpu.memory_space<vmem>>, vector<8x8x32xf32>
    %105 = vector.shape_cast %103 : vector<8x32xf32> to vector<1x8x32xf32>
    %106 = vector.broadcast %105 : vector<1x8x32xf32> to vector<8x8x32xf32>
    %107 = arith.addf %104, %106 : vector<8x8x32xf32>
    %108 = math.tanh %107 : vector<8x8x32xf32>
    %109 = vector.shape_cast %108 : vector<8x8x32xf32> to vector<64x32xf32>
    %c0_77 = arith.constant 0 : index
    %c0_78 = arith.constant 0 : index
    %110 = vector.load %arg11[%c0_77, %c0_78] : memref<32x1xf32, #tpu.memory_space<vmem>>, vector<32x1xf32>
    %cst_79 = arith.constant dense<0.000000e+00> : vector<64x1xf32>
    %111 = tpu.matmul %109, %110, %cst_79 {dimension_numbers = #tpu.dot_dimension_numbers<[1], [0], [0], [1], [0, 0, 1, 1], [], []>} : vector<64x32xf32>, vector<32x1xf32>, vector<64x1xf32> -> vector<64x1xf32>
    %112 = vector.shape_cast %111 : vector<64x1xf32> to vector<8x8x1xf32>
    %cst_80 = arith.constant dense<0xFF800000> : vector<8x1xf32>
    %113 = vector.multi_reduction <maximumf>, %112, %cst_80 [0] : vector<8x8x1xf32> to vector<8x1xf32>
    %114 = vector.shape_cast %113 : vector<8x1xf32> to vector<1x8x1xf32>
    %115 = vector.broadcast %114 : vector<1x8x1xf32> to vector<8x8x1xf32>
    %116 = arith.subf %112, %115 : vector<8x8x1xf32>
    %117 = math.exp %116 : vector<8x8x1xf32>
    %cst_81 = arith.constant dense<0.000000e+00> : vector<8x1xf32>
    %118 = vector.multi_reduction <add>, %117, %cst_81 [0] : vector<8x8x1xf32> to vector<8x1xf32>
    %119 = vector.shape_cast %118 : vector<8x1xf32> to vector<1x8x1xf32>
    %120 = tpu.reciprocal %119 {approx = true} : vector<1x8x1xf32> -> vector<1x8x1xf32>
    %121 = vector.broadcast %120 : vector<1x8x1xf32> to vector<8x8x1xf32>
    %122 = arith.mulf %117, %121 : vector<8x8x1xf32>
    %c0_82 = arith.constant 0 : index
    %c0_83 = arith.constant 0 : index
    %c0_84 = arith.constant 0 : index
    %123 = vector.load %arg4[%c0_82, %c0_83, %c0_84] : memref<8x8x32xf32, #tpu.memory_space<vmem>>, vector<8x8x32xf32>
    %124 = vector.broadcast %122 : vector<8x8x1xf32> to vector<8x8x32xf32>
    %125 = arith.mulf %124, %123 : vector<8x8x32xf32>
    %cst_85 = arith.constant dense<0.000000e+00> : vector<8x32xf32>
    %126 = vector.multi_reduction <add>, %125, %cst_85 [0] : vector<8x8x32xf32> to vector<8x32xf32>
    %c0_86 = arith.constant 0 : index
    %c0_87 = arith.constant 0 : index
    %c0_88 = arith.constant 0 : index
    %127 = vector.load %arg5[%c0_86, %c0_87, %c0_88] : memref<8x8x32xf32, #tpu.memory_space<vmem>>, vector<8x8x32xf32>
    %128 = vector.broadcast %122 : vector<8x8x1xf32> to vector<8x8x32xf32>
    %129 = arith.mulf %128, %127 : vector<8x8x32xf32>
    %cst_89 = arith.constant dense<0.000000e+00> : vector<8x32xf32>
    %130 = vector.multi_reduction <add>, %129, %cst_89 [0] : vector<8x8x32xf32> to vector<8x32xf32>
    %c1 = arith.constant 1 : index
    %c0_90 = arith.constant 0 : index
    %c0_91 = arith.constant 0 : index
    %c0_92 = arith.constant 0 : index
    %131 = vector.load %arg2[%c1, %c0_90, %c0_91, %c0_92] : memref<8x3x8x32xf32, #tpu.memory_space<vmem>>, vector<1x3x8x32xf32>
    %132 = vector.shape_cast %131 : vector<1x3x8x32xf32> to vector<3x8x32xf32>
    %133 = vector.extract_strided_slice %132 {offsets = [0, 0, 0], sizes = [1, 8, 32], strides = [1, 1, 1]} : vector<3x8x32xf32> to vector<1x8x32xf32>
    %134 = vector.shape_cast %133 : vector<1x8x32xf32> to vector<8x32xf32>
    %c0_93 = arith.constant 0 : index
    %c0_94 = arith.constant 0 : index
    %135 = vector.load %arg16[%c0_93, %c0_94] : memref<32x32xf32, #tpu.memory_space<vmem>>, vector<32x32xf32>
    %cst_95 = arith.constant dense<0.000000e+00> : vector<8x32xf32>
    %136 = tpu.matmul %126, %135, %cst_95 {dimension_numbers = #tpu.dot_dimension_numbers<[1], [0], [0], [1], [0, 0, 1, 1], [], []>} : vector<8x32xf32>, vector<32x32xf32>, vector<8x32xf32> -> vector<8x32xf32>
    %137 = arith.addf %134, %136 : vector<8x32xf32>
    %c0_96 = arith.constant 0 : index
    %c0_97 = arith.constant 0 : index
    %138 = vector.load %arg19[%c0_96, %c0_97] : memref<32x32xf32, #tpu.memory_space<vmem>>, vector<32x32xf32>
    %cst_98 = arith.constant dense<0.000000e+00> : vector<8x32xf32>
    %139 = tpu.matmul %130, %138, %cst_98 {dimension_numbers = #tpu.dot_dimension_numbers<[1], [0], [0], [1], [0, 0, 1, 1], [], []>} : vector<8x32xf32>, vector<32x32xf32>, vector<8x32xf32> -> vector<8x32xf32>
    %140 = arith.addf %137, %139 : vector<8x32xf32>
    %141 = vector.extract_strided_slice %132 {offsets = [1, 0, 0], sizes = [1, 8, 32], strides = [1, 1, 1]} : vector<3x8x32xf32> to vector<1x8x32xf32>
    %142 = vector.shape_cast %141 : vector<1x8x32xf32> to vector<8x32xf32>
    %c0_99 = arith.constant 0 : index
    %c0_100 = arith.constant 0 : index
    %143 = vector.load %arg17[%c0_99, %c0_100] : memref<32x32xf32, #tpu.memory_space<vmem>>, vector<32x32xf32>
    %cst_101 = arith.constant dense<0.000000e+00> : vector<8x32xf32>
    %144 = tpu.matmul %126, %143, %cst_101 {dimension_numbers = #tpu.dot_dimension_numbers<[1], [0], [0], [1], [0, 0, 1, 1], [], []>} : vector<8x32xf32>, vector<32x32xf32>, vector<8x32xf32> -> vector<8x32xf32>
    %145 = arith.addf %142, %144 : vector<8x32xf32>
    %c0_102 = arith.constant 0 : index
    %c0_103 = arith.constant 0 : index
    %146 = vector.load %arg20[%c0_102, %c0_103] : memref<32x32xf32, #tpu.memory_space<vmem>>, vector<32x32xf32>
    %cst_104 = arith.constant dense<0.000000e+00> : vector<8x32xf32>
    %147 = tpu.matmul %130, %146, %cst_104 {dimension_numbers = #tpu.dot_dimension_numbers<[1], [0], [0], [1], [0, 0, 1, 1], [], []>} : vector<8x32xf32>, vector<32x32xf32>, vector<8x32xf32> -> vector<8x32xf32>
    %148 = arith.addf %145, %147 : vector<8x32xf32>
    %149 = vector.extract_strided_slice %132 {offsets = [2, 0, 0], sizes = [1, 8, 32], strides = [1, 1, 1]} : vector<3x8x32xf32> to vector<1x8x32xf32>
    %150 = vector.shape_cast %149 : vector<1x8x32xf32> to vector<8x32xf32>
    %c0_105 = arith.constant 0 : index
    %c0_106 = arith.constant 0 : index
    %151 = vector.load %arg18[%c0_105, %c0_106] : memref<32x32xf32, #tpu.memory_space<vmem>>, vector<32x32xf32>
    %cst_107 = arith.constant dense<0.000000e+00> : vector<8x32xf32>
    %152 = tpu.matmul %126, %151, %cst_107 {dimension_numbers = #tpu.dot_dimension_numbers<[1], [0], [0], [1], [0, 0, 1, 1], [], []>} : vector<8x32xf32>, vector<32x32xf32>, vector<8x32xf32> -> vector<8x32xf32>
    %153 = arith.addf %150, %152 : vector<8x32xf32>
    %c0_108 = arith.constant 0 : index
    %c0_109 = arith.constant 0 : index
    %154 = vector.load %arg21[%c0_108, %c0_109] : memref<32x32xf32, #tpu.memory_space<vmem>>, vector<32x32xf32>
    %cst_110 = arith.constant dense<0.000000e+00> : vector<8x32xf32>
    %155 = tpu.matmul %130, %154, %cst_110 {dimension_numbers = #tpu.dot_dimension_numbers<[1], [0], [0], [1], [0, 0, 1, 1], [], []>} : vector<8x32xf32>, vector<32x32xf32>, vector<8x32xf32> -> vector<8x32xf32>
    %156 = arith.addf %153, %155 : vector<8x32xf32>
    %c0_111 = arith.constant 0 : index
    %c0_112 = arith.constant 0 : index
    %157 = vector.load %arg12[%c0_111, %c0_112] : memref<32x32xf32, #tpu.memory_space<vmem>>, vector<32x32xf32>
    %cst_113 = arith.constant dense<0.000000e+00> : vector<8x32xf32>
    %158 = tpu.matmul %87, %157, %cst_113 {dimension_numbers = #tpu.dot_dimension_numbers<[1], [0], [0], [1], [0, 0, 1, 1], [], []>} : vector<8x32xf32>, vector<32x32xf32>, vector<8x32xf32> -> vector<8x32xf32>
    %159 = arith.addf %140, %158 : vector<8x32xf32>
    %160 = arith.negf %159 : vector<8x32xf32>
    %161 = math.exp %160 : vector<8x32xf32>
    %cst_114 = arith.constant 1.000000e+00 : f32
    %162 = vector.broadcast %cst_114 : f32 to vector<8x32xf32>
    %163 = arith.addf %162, %161 : vector<8x32xf32>
    %164 = arith.divf %162, %163 : vector<8x32xf32>
    %c0_115 = arith.constant 0 : index
    %c0_116 = arith.constant 0 : index
    %165 = vector.load %arg13[%c0_115, %c0_116] : memref<32x32xf32, #tpu.memory_space<vmem>>, vector<32x32xf32>
    %cst_117 = arith.constant dense<0.000000e+00> : vector<8x32xf32>
    %166 = tpu.matmul %87, %165, %cst_117 {dimension_numbers = #tpu.dot_dimension_numbers<[1], [0], [0], [1], [0, 0, 1, 1], [], []>} : vector<8x32xf32>, vector<32x32xf32>, vector<8x32xf32> -> vector<8x32xf32>
    %167 = arith.addf %148, %166 : vector<8x32xf32>
    %168 = arith.negf %167 : vector<8x32xf32>
    %169 = math.exp %168 : vector<8x32xf32>
    %cst_118 = arith.constant 1.000000e+00 : f32
    %170 = vector.broadcast %cst_118 : f32 to vector<8x32xf32>
    %171 = arith.addf %170, %169 : vector<8x32xf32>
    %172 = arith.divf %170, %171 : vector<8x32xf32>
    %c0_119 = arith.constant 0 : index
    %c0_120 = arith.constant 0 : index
    %173 = vector.load %arg14[%c0_119, %c0_120] : memref<32x32xf32, #tpu.memory_space<vmem>>, vector<32x32xf32>
    %cst_121 = arith.constant dense<0.000000e+00> : vector<8x32xf32>
    %174 = tpu.matmul %87, %173, %cst_121 {dimension_numbers = #tpu.dot_dimension_numbers<[1], [0], [0], [1], [0, 0, 1, 1], [], []>} : vector<8x32xf32>, vector<32x32xf32>, vector<8x32xf32> -> vector<8x32xf32>
    %c0_122 = arith.constant 0 : index
    %c0_123 = arith.constant 0 : index
    %175 = vector.load %arg15[%c0_122, %c0_123] : memref<1x32xf32, #tpu.memory_space<vmem>>, vector<1x32xf32>
    %176 = vector.broadcast %175 : vector<1x32xf32> to vector<8x32xf32>
    %177 = arith.addf %174, %176 : vector<8x32xf32>
    %178 = arith.mulf %164, %177 : vector<8x32xf32>
    %179 = arith.addf %156, %178 : vector<8x32xf32>
    %180 = math.tanh %179 : vector<8x32xf32>
    %cst_124 = arith.constant 1.000000e+00 : f32
    %181 = vector.broadcast %cst_124 : f32 to vector<8x32xf32>
    %182 = arith.subf %181, %172 : vector<8x32xf32>
    %183 = arith.mulf %182, %180 : vector<8x32xf32>
    %184 = arith.mulf %172, %87 : vector<8x32xf32>
    %185 = arith.addf %183, %184 : vector<8x32xf32>
    %c1_125 = arith.constant 1 : index
    %c0_126 = arith.constant 0 : index
    %c0_127 = arith.constant 0 : index
    %186 = vector.load %arg3[%c1_125, %c0_126, %c0_127] : memref<8x8x128xf32, #tpu.memory_space<vmem>>, vector<1x8x128xf32>
    %187 = vector.shape_cast %186 : vector<1x8x128xf32> to vector<8x128xf32>
    %c0_128 = arith.constant 0 : index
    %c0_129 = arith.constant 0 : index
    %188 = vector.load %arg22[%c0_128, %c0_129] : memref<32x128xf32, #tpu.memory_space<vmem>>, vector<32x128xf32>
    %cst_130 = arith.constant dense<0.000000e+00> : vector<8x128xf32>
    %189 = tpu.matmul %185, %188, %cst_130 {dimension_numbers = #tpu.dot_dimension_numbers<[1], [0], [0], [1], [0, 0, 1, 1], [], []>} : vector<8x32xf32>, vector<32x128xf32>, vector<8x128xf32> -> vector<8x128xf32>
    %190 = arith.addf %187, %189 : vector<8x128xf32>
    %c0_131 = arith.constant 0 : index
    %c0_132 = arith.constant 0 : index
    %191 = vector.load %arg23[%c0_131, %c0_132] : memref<32x128xf32, #tpu.memory_space<vmem>>, vector<32x128xf32>
    %cst_133 = arith.constant dense<0.000000e+00> : vector<8x128xf32>
    %192 = tpu.matmul %126, %191, %cst_133 {dimension_numbers = #tpu.dot_dimension_numbers<[1], [0], [0], [1], [0, 0, 1, 1], [], []>} : vector<8x32xf32>, vector<32x128xf32>, vector<8x128xf32> -> vector<8x128xf32>
    %193 = arith.addf %190, %192 : vector<8x128xf32>
    %c0_134 = arith.constant 0 : index
    %c0_135 = arith.constant 0 : index
    %194 = vector.load %arg24[%c0_134, %c0_135] : memref<32x128xf32, #tpu.memory_space<vmem>>, vector<32x128xf32>
    %cst_136 = arith.constant dense<0.000000e+00> : vector<8x128xf32>
    %195 = tpu.matmul %130, %194, %cst_136 {dimension_numbers = #tpu.dot_dimension_numbers<[1], [0], [0], [1], [0, 0, 1, 1], [], []>} : vector<8x32xf32>, vector<32x128xf32>, vector<8x128xf32> -> vector<8x128xf32>
    %196 = arith.addf %193, %195 : vector<8x128xf32>
    %c1_137 = arith.constant 1 : index
    %c0_138 = arith.constant 0 : index
    %c0_139 = arith.constant 0 : index
    %197 = vector.load %arg25[%c1_137, %c0_138, %c0_139] : memref<8x8x128xf32, #tpu.memory_space<vmem>>, vector<1x8x128xf32>
    %198 = vector.shape_cast %197 : vector<1x8x128xf32> to vector<8x128xf32>
    %199 = vector.shape_cast %196 : vector<8x128xf32> to vector<1x8x128xf32>
    tpu.vector_store %arg25[%c1_137, %c0_138, %c0_139], %199 {strides = array<i32>} : memref<8x8x128xf32, #tpu.memory_space<vmem>>, vector<1x8x128xf32>,
    %c0_140 = arith.constant 0 : index
    %c0_141 = arith.constant 0 : index
    %200 = vector.load %arg7[%c0_140, %c0_141] : memref<32x32xf32, #tpu.memory_space<vmem>>, vector<32x32xf32>
    %cst_142 = arith.constant dense<0.000000e+00> : vector<8x32xf32>
    %201 = tpu.matmul %185, %200, %cst_142 {dimension_numbers = #tpu.dot_dimension_numbers<[1], [0], [0], [1], [0, 0, 1, 1], [], []>} : vector<8x32xf32>, vector<32x32xf32>, vector<8x32xf32> -> vector<8x32xf32>
    %c0_143 = arith.constant 0 : index
    %c0_144 = arith.constant 0 : index
    %c0_145 = arith.constant 0 : index
    %202 = vector.load %arg27[%c0_143, %c0_144, %c0_145] : memref<8x8x32xf32, #tpu.memory_space<vmem>>, vector<8x8x32xf32>
    %203 = vector.shape_cast %201 : vector<8x32xf32> to vector<1x8x32xf32>
    %204 = vector.broadcast %203 : vector<1x8x32xf32> to vector<8x8x32xf32>
    %205 = arith.addf %202, %204 : vector<8x8x32xf32>
    %206 = math.tanh %205 : vector<8x8x32xf32>
    %207 = vector.shape_cast %206 : vector<8x8x32xf32> to vector<64x32xf32>
    %c0_146 = arith.constant 0 : index
    %c0_147 = arith.constant 0 : index
    %208 = vector.load %arg11[%c0_146, %c0_147] : memref<32x1xf32, #tpu.memory_space<vmem>>, vector<32x1xf32>
    %cst_148 = arith.constant dense<0.000000e+00> : vector<64x1xf32>
    %209 = tpu.matmul %207, %208, %cst_148 {dimension_numbers = #tpu.dot_dimension_numbers<[1], [0], [0], [1], [0, 0, 1, 1], [], []>} : vector<64x32xf32>, vector<32x1xf32>, vector<64x1xf32> -> vector<64x1xf32>
    %210 = vector.shape_cast %209 : vector<64x1xf32> to vector<8x8x1xf32>
    %cst_149 = arith.constant dense<0xFF800000> : vector<8x1xf32>
    %211 = vector.multi_reduction <maximumf>, %210, %cst_149 [0] : vector<8x8x1xf32> to vector<8x1xf32>
    %212 = vector.shape_cast %211 : vector<8x1xf32> to vector<1x8x1xf32>
    %213 = vector.broadcast %212 : vector<1x8x1xf32> to vector<8x8x1xf32>
    %214 = arith.subf %210, %213 : vector<8x8x1xf32>
    %215 = math.exp %214 : vector<8x8x1xf32>
    %cst_150 = arith.constant dense<0.000000e+00> : vector<8x1xf32>
    %216 = vector.multi_reduction <add>, %215, %cst_150 [0] : vector<8x8x1xf32> to vector<8x1xf32>
    %217 = vector.shape_cast %216 : vector<8x1xf32> to vector<1x8x1xf32>
    %218 = tpu.reciprocal %217 {approx = true} : vector<1x8x1xf32> -> vector<1x8x1xf32>
    %219 = vector.broadcast %218 : vector<1x8x1xf32> to vector<8x8x1xf32>
    %220 = arith.mulf %215, %219 : vector<8x8x1xf32>
    %c0_151 = arith.constant 0 : index
    %c0_152 = arith.constant 0 : index
    %c0_153 = arith.constant 0 : index
    %221 = vector.load %arg4[%c0_151, %c0_152, %c0_153] : memref<8x8x32xf32, #tpu.memory_space<vmem>>, vector<8x8x32xf32>
    %222 = vector.broadcast %220 : vector<8x8x1xf32> to vector<8x8x32xf32>
    %223 = arith.mulf %222, %221 : vector<8x8x32xf32>
    %cst_154 = arith.constant dense<0.000000e+00> : vector<8x32xf32>
    %224 = vector.multi_reduction <add>, %223, %cst_154 [0] : vector<8x8x32xf32> to vector<8x32xf32>
    %c0_155 = arith.constant 0 : index
    %c0_156 = arith.constant 0 : index
    %c0_157 = arith.constant 0 : index
    %225 = vector.load %arg5[%c0_155, %c0_156, %c0_157] : memref<8x8x32xf32, #tpu.memory_space<vmem>>, vector<8x8x32xf32>
    %226 = vector.broadcast %220 : vector<8x8x1xf32> to vector<8x8x32xf32>
    %227 = arith.mulf %226, %225 : vector<8x8x32xf32>
    %cst_158 = arith.constant dense<0.000000e+00> : vector<8x32xf32>
    %228 = vector.multi_reduction <add>, %227, %cst_158 [0] : vector<8x8x32xf32> to vector<8x32xf32>
    %c2 = arith.constant 2 : index
    %c0_159 = arith.constant 0 : index
    %c0_160 = arith.constant 0 : index
    %c0_161 = arith.constant 0 : index
    %229 = vector.load %arg2[%c2, %c0_159, %c0_160, %c0_161] : memref<8x3x8x32xf32, #tpu.memory_space<vmem>>, vector<1x3x8x32xf32>
    %230 = vector.shape_cast %229 : vector<1x3x8x32xf32> to vector<3x8x32xf32>
    %231 = vector.extract_strided_slice %230 {offsets = [0, 0, 0], sizes = [1, 8, 32], strides = [1, 1, 1]} : vector<3x8x32xf32> to vector<1x8x32xf32>
    %232 = vector.shape_cast %231 : vector<1x8x32xf32> to vector<8x32xf32>
    %c0_162 = arith.constant 0 : index
    %c0_163 = arith.constant 0 : index
    %233 = vector.load %arg16[%c0_162, %c0_163] : memref<32x32xf32, #tpu.memory_space<vmem>>, vector<32x32xf32>
    %cst_164 = arith.constant dense<0.000000e+00> : vector<8x32xf32>
    %234 = tpu.matmul %224, %233, %cst_164 {dimension_numbers = #tpu.dot_dimension_numbers<[1], [0], [0], [1], [0, 0, 1, 1], [], []>} : vector<8x32xf32>, vector<32x32xf32>, vector<8x32xf32> -> vector<8x32xf32>
    %235 = arith.addf %232, %234 : vector<8x32xf32>
    %c0_165 = arith.constant 0 : index
    %c0_166 = arith.constant 0 : index
    %236 = vector.load %arg19[%c0_165, %c0_166] : memref<32x32xf32, #tpu.memory_space<vmem>>, vector<32x32xf32>
    %cst_167 = arith.constant dense<0.000000e+00> : vector<8x32xf32>
    %237 = tpu.matmul %228, %236, %cst_167 {dimension_numbers = #tpu.dot_dimension_numbers<[1], [0], [0], [1], [0, 0, 1, 1], [], []>} : vector<8x32xf32>, vector<32x32xf32>, vector<8x32xf32> -> vector<8x32xf32>
    %238 = arith.addf %235, %237 : vector<8x32xf32>
    %239 = vector.extract_strided_slice %230 {offsets = [1, 0, 0], sizes = [1, 8, 32], strides = [1, 1, 1]} : vector<3x8x32xf32> to vector<1x8x32xf32>
    %240 = vector.shape_cast %239 : vector<1x8x32xf32> to vector<8x32xf32>
    %c0_168 = arith.constant 0 : index
    %c0_169 = arith.constant 0 : index
    %241 = vector.load %arg17[%c0_168, %c0_169] : memref<32x32xf32, #tpu.memory_space<vmem>>, vector<32x32xf32>
    %cst_170 = arith.constant dense<0.000000e+00> : vector<8x32xf32>
    %242 = tpu.matmul %224, %241, %cst_170 {dimension_numbers = #tpu.dot_dimension_numbers<[1], [0], [0], [1], [0, 0, 1, 1], [], []>} : vector<8x32xf32>, vector<32x32xf32>, vector<8x32xf32> -> vector<8x32xf32>
    %243 = arith.addf %240, %242 : vector<8x32xf32>
    %c0_171 = arith.constant 0 : index
    %c0_172 = arith.constant 0 : index
    %244 = vector.load %arg20[%c0_171, %c0_172] : memref<32x32xf32, #tpu.memory_space<vmem>>, vector<32x32xf32>
    %cst_173 = arith.constant dense<0.000000e+00> : vector<8x32xf32>
    %245 = tpu.matmul %228, %244, %cst_173 {dimension_numbers = #tpu.dot_dimension_numbers<[1], [0], [0], [1], [0, 0, 1, 1], [], []>} : vector<8x32xf32>, vector<32x32xf32>, vector<8x32xf32> -> vector<8x32xf32>
    %246 = arith.addf %243, %245 : vector<8x32xf32>
    %247 = vector.extract_strided_slice %230 {offsets = [2, 0, 0], sizes = [1, 8, 32], strides = [1, 1, 1]} : vector<3x8x32xf32> to vector<1x8x32xf32>
    %248 = vector.shape_cast %247 : vector<1x8x32xf32> to vector<8x32xf32>
    %c0_174 = arith.constant 0 : index
    %c0_175 = arith.constant 0 : index
    %249 = vector.load %arg18[%c0_174, %c0_175] : memref<32x32xf32, #tpu.memory_space<vmem>>, vector<32x32xf32>
    %cst_176 = arith.constant dense<0.000000e+00> : vector<8x32xf32>
    %250 = tpu.matmul %224, %249, %cst_176 {dimension_numbers = #tpu.dot_dimension_numbers<[1], [0], [0], [1], [0, 0, 1, 1], [], []>} : vector<8x32xf32>, vector<32x32xf32>, vector<8x32xf32> -> vector<8x32xf32>
    %251 = arith.addf %248, %250 : vector<8x32xf32>
    %c0_177 = arith.constant 0 : index
    %c0_178 = arith.constant 0 : index
    %252 = vector.load %arg21[%c0_177, %c0_178] : memref<32x32xf32, #tpu.memory_space<vmem>>, vector<32x32xf32>
    %cst_179 = arith.constant dense<0.000000e+00> : vector<8x32xf32>
    %253 = tpu.matmul %228, %252, %cst_179 {dimension_numbers = #tpu.dot_dimension_numbers<[1], [0], [0], [1], [0, 0, 1, 1], [], []>} : vector<8x32xf32>, vector<32x32xf32>, vector<8x32xf32> -> vector<8x32xf32>
    %254 = arith.addf %251, %253 : vector<8x32xf32>
    %c0_180 = arith.constant 0 : index
    %c0_181 = arith.constant 0 : index
    %255 = vector.load %arg12[%c0_180, %c0_181] : memref<32x32xf32, #tpu.memory_space<vmem>>, vector<32x32xf32>
    %cst_182 = arith.constant dense<0.000000e+00> : vector<8x32xf32>
    %256 = tpu.matmul %185, %255, %cst_182 {dimension_numbers = #tpu.dot_dimension_numbers<[1], [0], [0], [1], [0, 0, 1, 1], [], []>} : vector<8x32xf32>, vector<32x32xf32>, vector<8x32xf32> -> vector<8x32xf32>
    %257 = arith.addf %238, %256 : vector<8x32xf32>
    %258 = arith.negf %257 : vector<8x32xf32>
    %259 = math.exp %258 : vector<8x32xf32>
    %cst_183 = arith.constant 1.000000e+00 : f32
    %260 = vector.broadcast %cst_183 : f32 to vector<8x32xf32>
    %261 = arith.addf %260, %259 : vector<8x32xf32>
    %262 = arith.divf %260, %261 : vector<8x32xf32>
    %c0_184 = arith.constant 0 : index
    %c0_185 = arith.constant 0 : index
    %263 = vector.load %arg13[%c0_184, %c0_185] : memref<32x32xf32, #tpu.memory_space<vmem>>, vector<32x32xf32>
    %cst_186 = arith.constant dense<0.000000e+00> : vector<8x32xf32>
    %264 = tpu.matmul %185, %263, %cst_186 {dimension_numbers = #tpu.dot_dimension_numbers<[1], [0], [0], [1], [0, 0, 1, 1], [], []>} : vector<8x32xf32>, vector<32x32xf32>, vector<8x32xf32> -> vector<8x32xf32>
    %265 = arith.addf %246, %264 : vector<8x32xf32>
    %266 = arith.negf %265 : vector<8x32xf32>
    %267 = math.exp %266 : vector<8x32xf32>
    %cst_187 = arith.constant 1.000000e+00 : f32
    %268 = vector.broadcast %cst_187 : f32 to vector<8x32xf32>
    %269 = arith.addf %268, %267 : vector<8x32xf32>
    %270 = arith.divf %268, %269 : vector<8x32xf32>
    %c0_188 = arith.constant 0 : index
    %c0_189 = arith.constant 0 : index
    %271 = vector.load %arg14[%c0_188, %c0_189] : memref<32x32xf32, #tpu.memory_space<vmem>>, vector<32x32xf32>
    %cst_190 = arith.constant dense<0.000000e+00> : vector<8x32xf32>
    %272 = tpu.matmul %185, %271, %cst_190 {dimension_numbers = #tpu.dot_dimension_numbers<[1], [0], [0], [1], [0, 0, 1, 1], [], []>} : vector<8x32xf32>, vector<32x32xf32>, vector<8x32xf32> -> vector<8x32xf32>
    %c0_191 = arith.constant 0 : index
    %c0_192 = arith.constant 0 : index
    %273 = vector.load %arg15[%c0_191, %c0_192] : memref<1x32xf32, #tpu.memory_space<vmem>>, vector<1x32xf32>
    %274 = vector.broadcast %273 : vector<1x32xf32> to vector<8x32xf32>
    %275 = arith.addf %272, %274 : vector<8x32xf32>
    %276 = arith.mulf %262, %275 : vector<8x32xf32>
    %277 = arith.addf %254, %276 : vector<8x32xf32>
    %278 = math.tanh %277 : vector<8x32xf32>
    %cst_193 = arith.constant 1.000000e+00 : f32
    %279 = vector.broadcast %cst_193 : f32 to vector<8x32xf32>
    %280 = arith.subf %279, %270 : vector<8x32xf32>
    %281 = arith.mulf %280, %278 : vector<8x32xf32>
    %282 = arith.mulf %270, %185 : vector<8x32xf32>
    %283 = arith.addf %281, %282 : vector<8x32xf32>
    %c2_194 = arith.constant 2 : index
    %c0_195 = arith.constant 0 : index
    %c0_196 = arith.constant 0 : index
    %284 = vector.load %arg3[%c2_194, %c0_195, %c0_196] : memref<8x8x128xf32, #tpu.memory_space<vmem>>, vector<1x8x128xf32>
    %285 = vector.shape_cast %284 : vector<1x8x128xf32> to vector<8x128xf32>
    %c0_197 = arith.constant 0 : index
    %c0_198 = arith.constant 0 : index
    %286 = vector.load %arg22[%c0_197, %c0_198] : memref<32x128xf32, #tpu.memory_space<vmem>>, vector<32x128xf32>
    %cst_199 = arith.constant dense<0.000000e+00> : vector<8x128xf32>
    %287 = tpu.matmul %283, %286, %cst_199 {dimension_numbers = #tpu.dot_dimension_numbers<[1], [0], [0], [1], [0, 0, 1, 1], [], []>} : vector<8x32xf32>, vector<32x128xf32>, vector<8x128xf32> -> vector<8x128xf32>
    %288 = arith.addf %285, %287 : vector<8x128xf32>
    %c0_200 = arith.constant 0 : index
    %c0_201 = arith.constant 0 : index
    %289 = vector.load %arg23[%c0_200, %c0_201] : memref<32x128xf32, #tpu.memory_space<vmem>>, vector<32x128xf32>
    %cst_202 = arith.constant dense<0.000000e+00> : vector<8x128xf32>
    %290 = tpu.matmul %224, %289, %cst_202 {dimension_numbers = #tpu.dot_dimension_numbers<[1], [0], [0], [1], [0, 0, 1, 1], [], []>} : vector<8x32xf32>, vector<32x128xf32>, vector<8x128xf32> -> vector<8x128xf32>
    %291 = arith.addf %288, %290 : vector<8x128xf32>
    %c0_203 = arith.constant 0 : index
    %c0_204 = arith.constant 0 : index
    %292 = vector.load %arg24[%c0_203, %c0_204] : memref<32x128xf32, #tpu.memory_space<vmem>>, vector<32x128xf32>
    %cst_205 = arith.constant dense<0.000000e+00> : vector<8x128xf32>
    %293 = tpu.matmul %228, %292, %cst_205 {dimension_numbers = #tpu.dot_dimension_numbers<[1], [0], [0], [1], [0, 0, 1, 1], [], []>} : vector<8x32xf32>, vector<32x128xf32>, vector<8x128xf32> -> vector<8x128xf32>
    %294 = arith.addf %291, %293 : vector<8x128xf32>
    %c2_206 = arith.constant 2 : index
    %c0_207 = arith.constant 0 : index
    %c0_208 = arith.constant 0 : index
    %295 = vector.load %arg25[%c2_206, %c0_207, %c0_208] : memref<8x8x128xf32, #tpu.memory_space<vmem>>, vector<1x8x128xf32>
    %296 = vector.shape_cast %295 : vector<1x8x128xf32> to vector<8x128xf32>
    %297 = vector.shape_cast %294 : vector<8x128xf32> to vector<1x8x128xf32>
    tpu.vector_store %arg25[%c2_206, %c0_207, %c0_208], %297 {strides = array<i32>} : memref<8x8x128xf32, #tpu.memory_space<vmem>>, vector<1x8x128xf32>,
    %c0_209 = arith.constant 0 : index
    %c0_210 = arith.constant 0 : index
    %298 = vector.load %arg7[%c0_209, %c0_210] : memref<32x32xf32, #tpu.memory_space<vmem>>, vector<32x32xf32>
    %cst_211 = arith.constant dense<0.000000e+00> : vector<8x32xf32>
    %299 = tpu.matmul %283, %298, %cst_211 {dimension_numbers = #tpu.dot_dimension_numbers<[1], [0], [0], [1], [0, 0, 1, 1], [], []>} : vector<8x32xf32>, vector<32x32xf32>, vector<8x32xf32> -> vector<8x32xf32>
    %c0_212 = arith.constant 0 : index
    %c0_213 = arith.constant 0 : index
    %c0_214 = arith.constant 0 : index
    %300 = vector.load %arg27[%c0_212, %c0_213, %c0_214] : memref<8x8x32xf32, #tpu.memory_space<vmem>>, vector<8x8x32xf32>
    %301 = vector.shape_cast %299 : vector<8x32xf32> to vector<1x8x32xf32>
    %302 = vector.broadcast %301 : vector<1x8x32xf32> to vector<8x8x32xf32>
    %303 = arith.addf %300, %302 : vector<8x8x32xf32>
    %304 = math.tanh %303 : vector<8x8x32xf32>
    %305 = vector.shape_cast %304 : vector<8x8x32xf32> to vector<64x32xf32>
    %c0_215 = arith.constant 0 : index
    %c0_216 = arith.constant 0 : index
    %306 = vector.load %arg11[%c0_215, %c0_216] : memref<32x1xf32, #tpu.memory_space<vmem>>, vector<32x1xf32>
    %cst_217 = arith.constant dense<0.000000e+00> : vector<64x1xf32>
    %307 = tpu.matmul %305, %306, %cst_217 {dimension_numbers = #tpu.dot_dimension_numbers<[1], [0], [0], [1], [0, 0, 1, 1], [], []>} : vector<64x32xf32>, vector<32x1xf32>, vector<64x1xf32> -> vector<64x1xf32>
    %308 = vector.shape_cast %307 : vector<64x1xf32> to vector<8x8x1xf32>
    %cst_218 = arith.constant dense<0xFF800000> : vector<8x1xf32>
    %309 = vector.multi_reduction <maximumf>, %308, %cst_218 [0] : vector<8x8x1xf32> to vector<8x1xf32>
    %310 = vector.shape_cast %309 : vector<8x1xf32> to vector<1x8x1xf32>
    %311 = vector.broadcast %310 : vector<1x8x1xf32> to vector<8x8x1xf32>
    %312 = arith.subf %308, %311 : vector<8x8x1xf32>
    %313 = math.exp %312 : vector<8x8x1xf32>
    %cst_219 = arith.constant dense<0.000000e+00> : vector<8x1xf32>
    %314 = vector.multi_reduction <add>, %313, %cst_219 [0] : vector<8x8x1xf32> to vector<8x1xf32>
    %315 = vector.shape_cast %314 : vector<8x1xf32> to vector<1x8x1xf32>
    %316 = tpu.reciprocal %315 {approx = true} : vector<1x8x1xf32> -> vector<1x8x1xf32>
    %317 = vector.broadcast %316 : vector<1x8x1xf32> to vector<8x8x1xf32>
    %318 = arith.mulf %313, %317 : vector<8x8x1xf32>
    %c0_220 = arith.constant 0 : index
    %c0_221 = arith.constant 0 : index
    %c0_222 = arith.constant 0 : index
    %319 = vector.load %arg4[%c0_220, %c0_221, %c0_222] : memref<8x8x32xf32, #tpu.memory_space<vmem>>, vector<8x8x32xf32>
    %320 = vector.broadcast %318 : vector<8x8x1xf32> to vector<8x8x32xf32>
    %321 = arith.mulf %320, %319 : vector<8x8x32xf32>
    %cst_223 = arith.constant dense<0.000000e+00> : vector<8x32xf32>
    %322 = vector.multi_reduction <add>, %321, %cst_223 [0] : vector<8x8x32xf32> to vector<8x32xf32>
    %c0_224 = arith.constant 0 : index
    %c0_225 = arith.constant 0 : index
    %c0_226 = arith.constant 0 : index
    %323 = vector.load %arg5[%c0_224, %c0_225, %c0_226] : memref<8x8x32xf32, #tpu.memory_space<vmem>>, vector<8x8x32xf32>
    %324 = vector.broadcast %318 : vector<8x8x1xf32> to vector<8x8x32xf32>
    %325 = arith.mulf %324, %323 : vector<8x8x32xf32>
    %cst_227 = arith.constant dense<0.000000e+00> : vector<8x32xf32>
    %326 = vector.multi_reduction <add>, %325, %cst_227 [0] : vector<8x8x32xf32> to vector<8x32xf32>
    %c3 = arith.constant 3 : index
    %c0_228 = arith.constant 0 : index
    %c0_229 = arith.constant 0 : index
    %c0_230 = arith.constant 0 : index
    %327 = vector.load %arg2[%c3, %c0_228, %c0_229, %c0_230] : memref<8x3x8x32xf32, #tpu.memory_space<vmem>>, vector<1x3x8x32xf32>
    %328 = vector.shape_cast %327 : vector<1x3x8x32xf32> to vector<3x8x32xf32>
    %329 = vector.extract_strided_slice %328 {offsets = [0, 0, 0], sizes = [1, 8, 32], strides = [1, 1, 1]} : vector<3x8x32xf32> to vector<1x8x32xf32>
    %330 = vector.shape_cast %329 : vector<1x8x32xf32> to vector<8x32xf32>
    %c0_231 = arith.constant 0 : index
    %c0_232 = arith.constant 0 : index
    %331 = vector.load %arg16[%c0_231, %c0_232] : memref<32x32xf32, #tpu.memory_space<vmem>>, vector<32x32xf32>
    %cst_233 = arith.constant dense<0.000000e+00> : vector<8x32xf32>
    %332 = tpu.matmul %322, %331, %cst_233 {dimension_numbers = #tpu.dot_dimension_numbers<[1], [0], [0], [1], [0, 0, 1, 1], [], []>} : vector<8x32xf32>, vector<32x32xf32>, vector<8x32xf32> -> vector<8x32xf32>
    %333 = arith.addf %330, %332 : vector<8x32xf32>
    %c0_234 = arith.constant 0 : index
    %c0_235 = arith.constant 0 : index
    %334 = vector.load %arg19[%c0_234, %c0_235] : memref<32x32xf32, #tpu.memory_space<vmem>>, vector<32x32xf32>
    %cst_236 = arith.constant dense<0.000000e+00> : vector<8x32xf32>
    %335 = tpu.matmul %326, %334, %cst_236 {dimension_numbers = #tpu.dot_dimension_numbers<[1], [0], [0], [1], [0, 0, 1, 1], [], []>} : vector<8x32xf32>, vector<32x32xf32>, vector<8x32xf32> -> vector<8x32xf32>
    %336 = arith.addf %333, %335 : vector<8x32xf32>
    %337 = vector.extract_strided_slice %328 {offsets = [1, 0, 0], sizes = [1, 8, 32], strides = [1, 1, 1]} : vector<3x8x32xf32> to vector<1x8x32xf32>
    %338 = vector.shape_cast %337 : vector<1x8x32xf32> to vector<8x32xf32>
    %c0_237 = arith.constant 0 : index
    %c0_238 = arith.constant 0 : index
    %339 = vector.load %arg17[%c0_237, %c0_238] : memref<32x32xf32, #tpu.memory_space<vmem>>, vector<32x32xf32>
    %cst_239 = arith.constant dense<0.000000e+00> : vector<8x32xf32>
    %340 = tpu.matmul %322, %339, %cst_239 {dimension_numbers = #tpu.dot_dimension_numbers<[1], [0], [0], [1], [0, 0, 1, 1], [], []>} : vector<8x32xf32>, vector<32x32xf32>, vector<8x32xf32> -> vector<8x32xf32>
    %341 = arith.addf %338, %340 : vector<8x32xf32>
    %c0_240 = arith.constant 0 : index
    %c0_241 = arith.constant 0 : index
    %342 = vector.load %arg20[%c0_240, %c0_241] : memref<32x32xf32, #tpu.memory_space<vmem>>, vector<32x32xf32>
    %cst_242 = arith.constant dense<0.000000e+00> : vector<8x32xf32>
    %343 = tpu.matmul %326, %342, %cst_242 {dimension_numbers = #tpu.dot_dimension_numbers<[1], [0], [0], [1], [0, 0, 1, 1], [], []>} : vector<8x32xf32>, vector<32x32xf32>, vector<8x32xf32> -> vector<8x32xf32>
    %344 = arith.addf %341, %343 : vector<8x32xf32>
    %345 = vector.extract_strided_slice %328 {offsets = [2, 0, 0], sizes = [1, 8, 32], strides = [1, 1, 1]} : vector<3x8x32xf32> to vector<1x8x32xf32>
    %346 = vector.shape_cast %345 : vector<1x8x32xf32> to vector<8x32xf32>
    %c0_243 = arith.constant 0 : index
    %c0_244 = arith.constant 0 : index
    %347 = vector.load %arg18[%c0_243, %c0_244] : memref<32x32xf32, #tpu.memory_space<vmem>>, vector<32x32xf32>
    %cst_245 = arith.constant dense<0.000000e+00> : vector<8x32xf32>
    %348 = tpu.matmul %322, %347, %cst_245 {dimension_numbers = #tpu.dot_dimension_numbers<[1], [0], [0], [1], [0, 0, 1, 1], [], []>} : vector<8x32xf32>, vector<32x32xf32>, vector<8x32xf32> -> vector<8x32xf32>
    %349 = arith.addf %346, %348 : vector<8x32xf32>
    %c0_246 = arith.constant 0 : index
    %c0_247 = arith.constant 0 : index
    %350 = vector.load %arg21[%c0_246, %c0_247] : memref<32x32xf32, #tpu.memory_space<vmem>>, vector<32x32xf32>
    %cst_248 = arith.constant dense<0.000000e+00> : vector<8x32xf32>
    %351 = tpu.matmul %326, %350, %cst_248 {dimension_numbers = #tpu.dot_dimension_numbers<[1], [0], [0], [1], [0, 0, 1, 1], [], []>} : vector<8x32xf32>, vector<32x32xf32>, vector<8x32xf32> -> vector<8x32xf32>
    %352 = arith.addf %349, %351 : vector<8x32xf32>
    %c0_249 = arith.constant 0 : index
    %c0_250 = arith.constant 0 : index
    %353 = vector.load %arg12[%c0_249, %c0_250] : memref<32x32xf32, #tpu.memory_space<vmem>>, vector<32x32xf32>
    %cst_251 = arith.constant dense<0.000000e+00> : vector<8x32xf32>
    %354 = tpu.matmul %283, %353, %cst_251 {dimension_numbers = #tpu.dot_dimension_numbers<[1], [0], [0], [1], [0, 0, 1, 1], [], []>} : vector<8x32xf32>, vector<32x32xf32>, vector<8x32xf32> -> vector<8x32xf32>
    %355 = arith.addf %336, %354 : vector<8x32xf32>
    %356 = arith.negf %355 : vector<8x32xf32>
    %357 = math.exp %356 : vector<8x32xf32>
    %cst_252 = arith.constant 1.000000e+00 : f32
    %358 = vector.broadcast %cst_252 : f32 to vector<8x32xf32>
    %359 = arith.addf %358, %357 : vector<8x32xf32>
    %360 = arith.divf %358, %359 : vector<8x32xf32>
    %c0_253 = arith.constant 0 : index
    %c0_254 = arith.constant 0 : index
    %361 = vector.load %arg13[%c0_253, %c0_254] : memref<32x32xf32, #tpu.memory_space<vmem>>, vector<32x32xf32>
    %cst_255 = arith.constant dense<0.000000e+00> : vector<8x32xf32>
    %362 = tpu.matmul %283, %361, %cst_255 {dimension_numbers = #tpu.dot_dimension_numbers<[1], [0], [0], [1], [0, 0, 1, 1], [], []>} : vector<8x32xf32>, vector<32x32xf32>, vector<8x32xf32> -> vector<8x32xf32>
    %363 = arith.addf %344, %362 : vector<8x32xf32>
    %364 = arith.negf %363 : vector<8x32xf32>
    %365 = math.exp %364 : vector<8x32xf32>
    %cst_256 = arith.constant 1.000000e+00 : f32
    %366 = vector.broadcast %cst_256 : f32 to vector<8x32xf32>
    %367 = arith.addf %366, %365 : vector<8x32xf32>
    %368 = arith.divf %366, %367 : vector<8x32xf32>
    %c0_257 = arith.constant 0 : index
    %c0_258 = arith.constant 0 : index
    %369 = vector.load %arg14[%c0_257, %c0_258] : memref<32x32xf32, #tpu.memory_space<vmem>>, vector<32x32xf32>
    %cst_259 = arith.constant dense<0.000000e+00> : vector<8x32xf32>
    %370 = tpu.matmul %283, %369, %cst_259 {dimension_numbers = #tpu.dot_dimension_numbers<[1], [0], [0], [1], [0, 0, 1, 1], [], []>} : vector<8x32xf32>, vector<32x32xf32>, vector<8x32xf32> -> vector<8x32xf32>
    %c0_260 = arith.constant 0 : index
    %c0_261 = arith.constant 0 : index
    %371 = vector.load %arg15[%c0_260, %c0_261] : memref<1x32xf32, #tpu.memory_space<vmem>>, vector<1x32xf32>
    %372 = vector.broadcast %371 : vector<1x32xf32> to vector<8x32xf32>
    %373 = arith.addf %370, %372 : vector<8x32xf32>
    %374 = arith.mulf %360, %373 : vector<8x32xf32>
    %375 = arith.addf %352, %374 : vector<8x32xf32>
    %376 = math.tanh %375 : vector<8x32xf32>
    %cst_262 = arith.constant 1.000000e+00 : f32
    %377 = vector.broadcast %cst_262 : f32 to vector<8x32xf32>
    %378 = arith.subf %377, %368 : vector<8x32xf32>
    %379 = arith.mulf %378, %376 : vector<8x32xf32>
    %380 = arith.mulf %368, %283 : vector<8x32xf32>
    %381 = arith.addf %379, %380 : vector<8x32xf32>
    %c3_263 = arith.constant 3 : index
    %c0_264 = arith.constant 0 : index
    %c0_265 = arith.constant 0 : index
    %382 = vector.load %arg3[%c3_263, %c0_264, %c0_265] : memref<8x8x128xf32, #tpu.memory_space<vmem>>, vector<1x8x128xf32>
    %383 = vector.shape_cast %382 : vector<1x8x128xf32> to vector<8x128xf32>
    %c0_266 = arith.constant 0 : index
    %c0_267 = arith.constant 0 : index
    %384 = vector.load %arg22[%c0_266, %c0_267] : memref<32x128xf32, #tpu.memory_space<vmem>>, vector<32x128xf32>
    %cst_268 = arith.constant dense<0.000000e+00> : vector<8x128xf32>
    %385 = tpu.matmul %381, %384, %cst_268 {dimension_numbers = #tpu.dot_dimension_numbers<[1], [0], [0], [1], [0, 0, 1, 1], [], []>} : vector<8x32xf32>, vector<32x128xf32>, vector<8x128xf32> -> vector<8x128xf32>
    %386 = arith.addf %383, %385 : vector<8x128xf32>
    %c0_269 = arith.constant 0 : index
    %c0_270 = arith.constant 0 : index
    %387 = vector.load %arg23[%c0_269, %c0_270] : memref<32x128xf32, #tpu.memory_space<vmem>>, vector<32x128xf32>
    %cst_271 = arith.constant dense<0.000000e+00> : vector<8x128xf32>
    %388 = tpu.matmul %322, %387, %cst_271 {dimension_numbers = #tpu.dot_dimension_numbers<[1], [0], [0], [1], [0, 0, 1, 1], [], []>} : vector<8x32xf32>, vector<32x128xf32>, vector<8x128xf32> -> vector<8x128xf32>
    %389 = arith.addf %386, %388 : vector<8x128xf32>
    %c0_272 = arith.constant 0 : index
    %c0_273 = arith.constant 0 : index
    %390 = vector.load %arg24[%c0_272, %c0_273] : memref<32x128xf32, #tpu.memory_space<vmem>>, vector<32x128xf32>
    %cst_274 = arith.constant dense<0.000000e+00> : vector<8x128xf32>
    %391 = tpu.matmul %326, %390, %cst_274 {dimension_numbers = #tpu.dot_dimension_numbers<[1], [0], [0], [1], [0, 0, 1, 1], [], []>} : vector<8x32xf32>, vector<32x128xf32>, vector<8x128xf32> -> vector<8x128xf32>
    %392 = arith.addf %389, %391 : vector<8x128xf32>
    %c3_275 = arith.constant 3 : index
    %c0_276 = arith.constant 0 : index
    %c0_277 = arith.constant 0 : index
    %393 = vector.load %arg25[%c3_275, %c0_276, %c0_277] : memref<8x8x128xf32, #tpu.memory_space<vmem>>, vector<1x8x128xf32>
    %394 = vector.shape_cast %393 : vector<1x8x128xf32> to vector<8x128xf32>
    %395 = vector.shape_cast %392 : vector<8x128xf32> to vector<1x8x128xf32>
    tpu.vector_store %arg25[%c3_275, %c0_276, %c0_277], %395 {strides = array<i32>} : memref<8x8x128xf32, #tpu.memory_space<vmem>>, vector<1x8x128xf32>,
    %c0_278 = arith.constant 0 : index
    %c0_279 = arith.constant 0 : index
    %396 = vector.load %arg7[%c0_278, %c0_279] : memref<32x32xf32, #tpu.memory_space<vmem>>, vector<32x32xf32>
    %cst_280 = arith.constant dense<0.000000e+00> : vector<8x32xf32>
    %397 = tpu.matmul %381, %396, %cst_280 {dimension_numbers = #tpu.dot_dimension_numbers<[1], [0], [0], [1], [0, 0, 1, 1], [], []>} : vector<8x32xf32>, vector<32x32xf32>, vector<8x32xf32> -> vector<8x32xf32>
    %c0_281 = arith.constant 0 : index
    %c0_282 = arith.constant 0 : index
    %c0_283 = arith.constant 0 : index
    %398 = vector.load %arg27[%c0_281, %c0_282, %c0_283] : memref<8x8x32xf32, #tpu.memory_space<vmem>>, vector<8x8x32xf32>
    %399 = vector.shape_cast %397 : vector<8x32xf32> to vector<1x8x32xf32>
    %400 = vector.broadcast %399 : vector<1x8x32xf32> to vector<8x8x32xf32>
    %401 = arith.addf %398, %400 : vector<8x8x32xf32>
    %402 = math.tanh %401 : vector<8x8x32xf32>
    %403 = vector.shape_cast %402 : vector<8x8x32xf32> to vector<64x32xf32>
    %c0_284 = arith.constant 0 : index
    %c0_285 = arith.constant 0 : index
    %404 = vector.load %arg11[%c0_284, %c0_285] : memref<32x1xf32, #tpu.memory_space<vmem>>, vector<32x1xf32>
    %cst_286 = arith.constant dense<0.000000e+00> : vector<64x1xf32>
    %405 = tpu.matmul %403, %404, %cst_286 {dimension_numbers = #tpu.dot_dimension_numbers<[1], [0], [0], [1], [0, 0, 1, 1], [], []>} : vector<64x32xf32>, vector<32x1xf32>, vector<64x1xf32> -> vector<64x1xf32>
    %406 = vector.shape_cast %405 : vector<64x1xf32> to vector<8x8x1xf32>
    %cst_287 = arith.constant dense<0xFF800000> : vector<8x1xf32>
    %407 = vector.multi_reduction <maximumf>, %406, %cst_287 [0] : vector<8x8x1xf32> to vector<8x1xf32>
    %408 = vector.shape_cast %407 : vector<8x1xf32> to vector<1x8x1xf32>
    %409 = vector.broadcast %408 : vector<1x8x1xf32> to vector<8x8x1xf32>
    %410 = arith.subf %406, %409 : vector<8x8x1xf32>
    %411 = math.exp %410 : vector<8x8x1xf32>
    %cst_288 = arith.constant dense<0.000000e+00> : vector<8x1xf32>
    %412 = vector.multi_reduction <add>, %411, %cst_288 [0] : vector<8x8x1xf32> to vector<8x1xf32>
    %413 = vector.shape_cast %412 : vector<8x1xf32> to vector<1x8x1xf32>
    %414 = tpu.reciprocal %413 {approx = true} : vector<1x8x1xf32> -> vector<1x8x1xf32>
    %415 = vector.broadcast %414 : vector<1x8x1xf32> to vector<8x8x1xf32>
    %416 = arith.mulf %411, %415 : vector<8x8x1xf32>
    %c0_289 = arith.constant 0 : index
    %c0_290 = arith.constant 0 : index
    %c0_291 = arith.constant 0 : index
    %417 = vector.load %arg4[%c0_289, %c0_290, %c0_291] : memref<8x8x32xf32, #tpu.memory_space<vmem>>, vector<8x8x32xf32>
    %418 = vector.broadcast %416 : vector<8x8x1xf32> to vector<8x8x32xf32>
    %419 = arith.mulf %418, %417 : vector<8x8x32xf32>
    %cst_292 = arith.constant dense<0.000000e+00> : vector<8x32xf32>
    %420 = vector.multi_reduction <add>, %419, %cst_292 [0] : vector<8x8x32xf32> to vector<8x32xf32>
    %c0_293 = arith.constant 0 : index
    %c0_294 = arith.constant 0 : index
    %c0_295 = arith.constant 0 : index
    %421 = vector.load %arg5[%c0_293, %c0_294, %c0_295] : memref<8x8x32xf32, #tpu.memory_space<vmem>>, vector<8x8x32xf32>
    %422 = vector.broadcast %416 : vector<8x8x1xf32> to vector<8x8x32xf32>
    %423 = arith.mulf %422, %421 : vector<8x8x32xf32>
    %cst_296 = arith.constant dense<0.000000e+00> : vector<8x32xf32>
    %424 = vector.multi_reduction <add>, %423, %cst_296 [0] : vector<8x8x32xf32> to vector<8x32xf32>
    %c4 = arith.constant 4 : index
    %c0_297 = arith.constant 0 : index
    %c0_298 = arith.constant 0 : index
    %c0_299 = arith.constant 0 : index
    %425 = vector.load %arg2[%c4, %c0_297, %c0_298, %c0_299] : memref<8x3x8x32xf32, #tpu.memory_space<vmem>>, vector<1x3x8x32xf32>
    %426 = vector.shape_cast %425 : vector<1x3x8x32xf32> to vector<3x8x32xf32>
    %427 = vector.extract_strided_slice %426 {offsets = [0, 0, 0], sizes = [1, 8, 32], strides = [1, 1, 1]} : vector<3x8x32xf32> to vector<1x8x32xf32>
    %428 = vector.shape_cast %427 : vector<1x8x32xf32> to vector<8x32xf32>
    %c0_300 = arith.constant 0 : index
    %c0_301 = arith.constant 0 : index
    %429 = vector.load %arg16[%c0_300, %c0_301] : memref<32x32xf32, #tpu.memory_space<vmem>>, vector<32x32xf32>
    %cst_302 = arith.constant dense<0.000000e+00> : vector<8x32xf32>
    %430 = tpu.matmul %420, %429, %cst_302 {dimension_numbers = #tpu.dot_dimension_numbers<[1], [0], [0], [1], [0, 0, 1, 1], [], []>} : vector<8x32xf32>, vector<32x32xf32>, vector<8x32xf32> -> vector<8x32xf32>
    %431 = arith.addf %428, %430 : vector<8x32xf32>
    %c0_303 = arith.constant 0 : index
    %c0_304 = arith.constant 0 : index
    %432 = vector.load %arg19[%c0_303, %c0_304] : memref<32x32xf32, #tpu.memory_space<vmem>>, vector<32x32xf32>
    %cst_305 = arith.constant dense<0.000000e+00> : vector<8x32xf32>
    %433 = tpu.matmul %424, %432, %cst_305 {dimension_numbers = #tpu.dot_dimension_numbers<[1], [0], [0], [1], [0, 0, 1, 1], [], []>} : vector<8x32xf32>, vector<32x32xf32>, vector<8x32xf32> -> vector<8x32xf32>
    %434 = arith.addf %431, %433 : vector<8x32xf32>
    %435 = vector.extract_strided_slice %426 {offsets = [1, 0, 0], sizes = [1, 8, 32], strides = [1, 1, 1]} : vector<3x8x32xf32> to vector<1x8x32xf32>
    %436 = vector.shape_cast %435 : vector<1x8x32xf32> to vector<8x32xf32>
    %c0_306 = arith.constant 0 : index
    %c0_307 = arith.constant 0 : index
    %437 = vector.load %arg17[%c0_306, %c0_307] : memref<32x32xf32, #tpu.memory_space<vmem>>, vector<32x32xf32>
    %cst_308 = arith.constant dense<0.000000e+00> : vector<8x32xf32>
    %438 = tpu.matmul %420, %437, %cst_308 {dimension_numbers = #tpu.dot_dimension_numbers<[1], [0], [0], [1], [0, 0, 1, 1], [], []>} : vector<8x32xf32>, vector<32x32xf32>, vector<8x32xf32> -> vector<8x32xf32>
    %439 = arith.addf %436, %438 : vector<8x32xf32>
    %c0_309 = arith.constant 0 : index
    %c0_310 = arith.constant 0 : index
    %440 = vector.load %arg20[%c0_309, %c0_310] : memref<32x32xf32, #tpu.memory_space<vmem>>, vector<32x32xf32>
    %cst_311 = arith.constant dense<0.000000e+00> : vector<8x32xf32>
    %441 = tpu.matmul %424, %440, %cst_311 {dimension_numbers = #tpu.dot_dimension_numbers<[1], [0], [0], [1], [0, 0, 1, 1], [], []>} : vector<8x32xf32>, vector<32x32xf32>, vector<8x32xf32> -> vector<8x32xf32>
    %442 = arith.addf %439, %441 : vector<8x32xf32>
    %443 = vector.extract_strided_slice %426 {offsets = [2, 0, 0], sizes = [1, 8, 32], strides = [1, 1, 1]} : vector<3x8x32xf32> to vector<1x8x32xf32>
    %444 = vector.shape_cast %443 : vector<1x8x32xf32> to vector<8x32xf32>
    %c0_312 = arith.constant 0 : index
    %c0_313 = arith.constant 0 : index
    %445 = vector.load %arg18[%c0_312, %c0_313] : memref<32x32xf32, #tpu.memory_space<vmem>>, vector<32x32xf32>
    %cst_314 = arith.constant dense<0.000000e+00> : vector<8x32xf32>
    %446 = tpu.matmul %420, %445, %cst_314 {dimension_numbers = #tpu.dot_dimension_numbers<[1], [0], [0], [1], [0, 0, 1, 1], [], []>} : vector<8x32xf32>, vector<32x32xf32>, vector<8x32xf32> -> vector<8x32xf32>
    %447 = arith.addf %444, %446 : vector<8x32xf32>
    %c0_315 = arith.constant 0 : index
    %c0_316 = arith.constant 0 : index
    %448 = vector.load %arg21[%c0_315, %c0_316] : memref<32x32xf32, #tpu.memory_space<vmem>>, vector<32x32xf32>
    %cst_317 = arith.constant dense<0.000000e+00> : vector<8x32xf32>
    %449 = tpu.matmul %424, %448, %cst_317 {dimension_numbers = #tpu.dot_dimension_numbers<[1], [0], [0], [1], [0, 0, 1, 1], [], []>} : vector<8x32xf32>, vector<32x32xf32>, vector<8x32xf32> -> vector<8x32xf32>
    %450 = arith.addf %447, %449 : vector<8x32xf32>
    %c0_318 = arith.constant 0 : index
    %c0_319 = arith.constant 0 : index
    %451 = vector.load %arg12[%c0_318, %c0_319] : memref<32x32xf32, #tpu.memory_space<vmem>>, vector<32x32xf32>
    %cst_320 = arith.constant dense<0.000000e+00> : vector<8x32xf32>
    %452 = tpu.matmul %381, %451, %cst_320 {dimension_numbers = #tpu.dot_dimension_numbers<[1], [0], [0], [1], [0, 0, 1, 1], [], []>} : vector<8x32xf32>, vector<32x32xf32>, vector<8x32xf32> -> vector<8x32xf32>
    %453 = arith.addf %434, %452 : vector<8x32xf32>
    %454 = arith.negf %453 : vector<8x32xf32>
    %455 = math.exp %454 : vector<8x32xf32>
    %cst_321 = arith.constant 1.000000e+00 : f32
    %456 = vector.broadcast %cst_321 : f32 to vector<8x32xf32>
    %457 = arith.addf %456, %455 : vector<8x32xf32>
    %458 = arith.divf %456, %457 : vector<8x32xf32>
    %c0_322 = arith.constant 0 : index
    %c0_323 = arith.constant 0 : index
    %459 = vector.load %arg13[%c0_322, %c0_323] : memref<32x32xf32, #tpu.memory_space<vmem>>, vector<32x32xf32>
    %cst_324 = arith.constant dense<0.000000e+00> : vector<8x32xf32>
    %460 = tpu.matmul %381, %459, %cst_324 {dimension_numbers = #tpu.dot_dimension_numbers<[1], [0], [0], [1], [0, 0, 1, 1], [], []>} : vector<8x32xf32>, vector<32x32xf32>, vector<8x32xf32> -> vector<8x32xf32>
    %461 = arith.addf %442, %460 : vector<8x32xf32>
    %462 = arith.negf %461 : vector<8x32xf32>
    %463 = math.exp %462 : vector<8x32xf32>
    %cst_325 = arith.constant 1.000000e+00 : f32
    %464 = vector.broadcast %cst_325 : f32 to vector<8x32xf32>
    %465 = arith.addf %464, %463 : vector<8x32xf32>
    %466 = arith.divf %464, %465 : vector<8x32xf32>
    %c0_326 = arith.constant 0 : index
    %c0_327 = arith.constant 0 : index
    %467 = vector.load %arg14[%c0_326, %c0_327] : memref<32x32xf32, #tpu.memory_space<vmem>>, vector<32x32xf32>
    %cst_328 = arith.constant dense<0.000000e+00> : vector<8x32xf32>
    %468 = tpu.matmul %381, %467, %cst_328 {dimension_numbers = #tpu.dot_dimension_numbers<[1], [0], [0], [1], [0, 0, 1, 1], [], []>} : vector<8x32xf32>, vector<32x32xf32>, vector<8x32xf32> -> vector<8x32xf32>
    %c0_329 = arith.constant 0 : index
    %c0_330 = arith.constant 0 : index
    %469 = vector.load %arg15[%c0_329, %c0_330] : memref<1x32xf32, #tpu.memory_space<vmem>>, vector<1x32xf32>
    %470 = vector.broadcast %469 : vector<1x32xf32> to vector<8x32xf32>
    %471 = arith.addf %468, %470 : vector<8x32xf32>
    %472 = arith.mulf %458, %471 : vector<8x32xf32>
    %473 = arith.addf %450, %472 : vector<8x32xf32>
    %474 = math.tanh %473 : vector<8x32xf32>
    %cst_331 = arith.constant 1.000000e+00 : f32
    %475 = vector.broadcast %cst_331 : f32 to vector<8x32xf32>
    %476 = arith.subf %475, %466 : vector<8x32xf32>
    %477 = arith.mulf %476, %474 : vector<8x32xf32>
    %478 = arith.mulf %466, %381 : vector<8x32xf32>
    %479 = arith.addf %477, %478 : vector<8x32xf32>
    %c4_332 = arith.constant 4 : index
    %c0_333 = arith.constant 0 : index
    %c0_334 = arith.constant 0 : index
    %480 = vector.load %arg3[%c4_332, %c0_333, %c0_334] : memref<8x8x128xf32, #tpu.memory_space<vmem>>, vector<1x8x128xf32>
    %481 = vector.shape_cast %480 : vector<1x8x128xf32> to vector<8x128xf32>
    %c0_335 = arith.constant 0 : index
    %c0_336 = arith.constant 0 : index
    %482 = vector.load %arg22[%c0_335, %c0_336] : memref<32x128xf32, #tpu.memory_space<vmem>>, vector<32x128xf32>
    %cst_337 = arith.constant dense<0.000000e+00> : vector<8x128xf32>
    %483 = tpu.matmul %479, %482, %cst_337 {dimension_numbers = #tpu.dot_dimension_numbers<[1], [0], [0], [1], [0, 0, 1, 1], [], []>} : vector<8x32xf32>, vector<32x128xf32>, vector<8x128xf32> -> vector<8x128xf32>
    %484 = arith.addf %481, %483 : vector<8x128xf32>
    %c0_338 = arith.constant 0 : index
    %c0_339 = arith.constant 0 : index
    %485 = vector.load %arg23[%c0_338, %c0_339] : memref<32x128xf32, #tpu.memory_space<vmem>>, vector<32x128xf32>
    %cst_340 = arith.constant dense<0.000000e+00> : vector<8x128xf32>
    %486 = tpu.matmul %420, %485, %cst_340 {dimension_numbers = #tpu.dot_dimension_numbers<[1], [0], [0], [1], [0, 0, 1, 1], [], []>} : vector<8x32xf32>, vector<32x128xf32>, vector<8x128xf32> -> vector<8x128xf32>
    %487 = arith.addf %484, %486 : vector<8x128xf32>
    %c0_341 = arith.constant 0 : index
    %c0_342 = arith.constant 0 : index
    %488 = vector.load %arg24[%c0_341, %c0_342] : memref<32x128xf32, #tpu.memory_space<vmem>>, vector<32x128xf32>
    %cst_343 = arith.constant dense<0.000000e+00> : vector<8x128xf32>
    %489 = tpu.matmul %424, %488, %cst_343 {dimension_numbers = #tpu.dot_dimension_numbers<[1], [0], [0], [1], [0, 0, 1, 1], [], []>} : vector<8x32xf32>, vector<32x128xf32>, vector<8x128xf32> -> vector<8x128xf32>
    %490 = arith.addf %487, %489 : vector<8x128xf32>
    %c4_344 = arith.constant 4 : index
    %c0_345 = arith.constant 0 : index
    %c0_346 = arith.constant 0 : index
    %491 = vector.load %arg25[%c4_344, %c0_345, %c0_346] : memref<8x8x128xf32, #tpu.memory_space<vmem>>, vector<1x8x128xf32>
    %492 = vector.shape_cast %491 : vector<1x8x128xf32> to vector<8x128xf32>
    %493 = vector.shape_cast %490 : vector<8x128xf32> to vector<1x8x128xf32>
    tpu.vector_store %arg25[%c4_344, %c0_345, %c0_346], %493 {strides = array<i32>} : memref<8x8x128xf32, #tpu.memory_space<vmem>>, vector<1x8x128xf32>,
    %c0_347 = arith.constant 0 : index
    %c0_348 = arith.constant 0 : index
    %494 = vector.load %arg7[%c0_347, %c0_348] : memref<32x32xf32, #tpu.memory_space<vmem>>, vector<32x32xf32>
    %cst_349 = arith.constant dense<0.000000e+00> : vector<8x32xf32>
    %495 = tpu.matmul %479, %494, %cst_349 {dimension_numbers = #tpu.dot_dimension_numbers<[1], [0], [0], [1], [0, 0, 1, 1], [], []>} : vector<8x32xf32>, vector<32x32xf32>, vector<8x32xf32> -> vector<8x32xf32>
    %c0_350 = arith.constant 0 : index
    %c0_351 = arith.constant 0 : index
    %c0_352 = arith.constant 0 : index
    %496 = vector.load %arg27[%c0_350, %c0_351, %c0_352] : memref<8x8x32xf32, #tpu.memory_space<vmem>>, vector<8x8x32xf32>
    %497 = vector.shape_cast %495 : vector<8x32xf32> to vector<1x8x32xf32>
    %498 = vector.broadcast %497 : vector<1x8x32xf32> to vector<8x8x32xf32>
    %499 = arith.addf %496, %498 : vector<8x8x32xf32>
    %500 = math.tanh %499 : vector<8x8x32xf32>
    %501 = vector.shape_cast %500 : vector<8x8x32xf32> to vector<64x32xf32>
    %c0_353 = arith.constant 0 : index
    %c0_354 = arith.constant 0 : index
    %502 = vector.load %arg11[%c0_353, %c0_354] : memref<32x1xf32, #tpu.memory_space<vmem>>, vector<32x1xf32>
    %cst_355 = arith.constant dense<0.000000e+00> : vector<64x1xf32>
    %503 = tpu.matmul %501, %502, %cst_355 {dimension_numbers = #tpu.dot_dimension_numbers<[1], [0], [0], [1], [0, 0, 1, 1], [], []>} : vector<64x32xf32>, vector<32x1xf32>, vector<64x1xf32> -> vector<64x1xf32>
    %504 = vector.shape_cast %503 : vector<64x1xf32> to vector<8x8x1xf32>
    %cst_356 = arith.constant dense<0xFF800000> : vector<8x1xf32>
    %505 = vector.multi_reduction <maximumf>, %504, %cst_356 [0] : vector<8x8x1xf32> to vector<8x1xf32>
    %506 = vector.shape_cast %505 : vector<8x1xf32> to vector<1x8x1xf32>
    %507 = vector.broadcast %506 : vector<1x8x1xf32> to vector<8x8x1xf32>
    %508 = arith.subf %504, %507 : vector<8x8x1xf32>
    %509 = math.exp %508 : vector<8x8x1xf32>
    %cst_357 = arith.constant dense<0.000000e+00> : vector<8x1xf32>
    %510 = vector.multi_reduction <add>, %509, %cst_357 [0] : vector<8x8x1xf32> to vector<8x1xf32>
    %511 = vector.shape_cast %510 : vector<8x1xf32> to vector<1x8x1xf32>
    %512 = tpu.reciprocal %511 {approx = true} : vector<1x8x1xf32> -> vector<1x8x1xf32>
    %513 = vector.broadcast %512 : vector<1x8x1xf32> to vector<8x8x1xf32>
    %514 = arith.mulf %509, %513 : vector<8x8x1xf32>
    %c0_358 = arith.constant 0 : index
    %c0_359 = arith.constant 0 : index
    %c0_360 = arith.constant 0 : index
    %515 = vector.load %arg4[%c0_358, %c0_359, %c0_360] : memref<8x8x32xf32, #tpu.memory_space<vmem>>, vector<8x8x32xf32>
    %516 = vector.broadcast %514 : vector<8x8x1xf32> to vector<8x8x32xf32>
    %517 = arith.mulf %516, %515 : vector<8x8x32xf32>
    %cst_361 = arith.constant dense<0.000000e+00> : vector<8x32xf32>
    %518 = vector.multi_reduction <add>, %517, %cst_361 [0] : vector<8x8x32xf32> to vector<8x32xf32>
    %c0_362 = arith.constant 0 : index
    %c0_363 = arith.constant 0 : index
    %c0_364 = arith.constant 0 : index
    %519 = vector.load %arg5[%c0_362, %c0_363, %c0_364] : memref<8x8x32xf32, #tpu.memory_space<vmem>>, vector<8x8x32xf32>
    %520 = vector.broadcast %514 : vector<8x8x1xf32> to vector<8x8x32xf32>
    %521 = arith.mulf %520, %519 : vector<8x8x32xf32>
    %cst_365 = arith.constant dense<0.000000e+00> : vector<8x32xf32>
    %522 = vector.multi_reduction <add>, %521, %cst_365 [0] : vector<8x8x32xf32> to vector<8x32xf32>
    %c5 = arith.constant 5 : index
    %c0_366 = arith.constant 0 : index
    %c0_367 = arith.constant 0 : index
    %c0_368 = arith.constant 0 : index
    %523 = vector.load %arg2[%c5, %c0_366, %c0_367, %c0_368] : memref<8x3x8x32xf32, #tpu.memory_space<vmem>>, vector<1x3x8x32xf32>
    %524 = vector.shape_cast %523 : vector<1x3x8x32xf32> to vector<3x8x32xf32>
    %525 = vector.extract_strided_slice %524 {offsets = [0, 0, 0], sizes = [1, 8, 32], strides = [1, 1, 1]} : vector<3x8x32xf32> to vector<1x8x32xf32>
    %526 = vector.shape_cast %525 : vector<1x8x32xf32> to vector<8x32xf32>
    %c0_369 = arith.constant 0 : index
    %c0_370 = arith.constant 0 : index
    %527 = vector.load %arg16[%c0_369, %c0_370] : memref<32x32xf32, #tpu.memory_space<vmem>>, vector<32x32xf32>
    %cst_371 = arith.constant dense<0.000000e+00> : vector<8x32xf32>
    %528 = tpu.matmul %518, %527, %cst_371 {dimension_numbers = #tpu.dot_dimension_numbers<[1], [0], [0], [1], [0, 0, 1, 1], [], []>} : vector<8x32xf32>, vector<32x32xf32>, vector<8x32xf32> -> vector<8x32xf32>
    %529 = arith.addf %526, %528 : vector<8x32xf32>
    %c0_372 = arith.constant 0 : index
    %c0_373 = arith.constant 0 : index
    %530 = vector.load %arg19[%c0_372, %c0_373] : memref<32x32xf32, #tpu.memory_space<vmem>>, vector<32x32xf32>
    %cst_374 = arith.constant dense<0.000000e+00> : vector<8x32xf32>
    %531 = tpu.matmul %522, %530, %cst_374 {dimension_numbers = #tpu.dot_dimension_numbers<[1], [0], [0], [1], [0, 0, 1, 1], [], []>} : vector<8x32xf32>, vector<32x32xf32>, vector<8x32xf32> -> vector<8x32xf32>
    %532 = arith.addf %529, %531 : vector<8x32xf32>
    %533 = vector.extract_strided_slice %524 {offsets = [1, 0, 0], sizes = [1, 8, 32], strides = [1, 1, 1]} : vector<3x8x32xf32> to vector<1x8x32xf32>
    %534 = vector.shape_cast %533 : vector<1x8x32xf32> to vector<8x32xf32>
    %c0_375 = arith.constant 0 : index
    %c0_376 = arith.constant 0 : index
    %535 = vector.load %arg17[%c0_375, %c0_376] : memref<32x32xf32, #tpu.memory_space<vmem>>, vector<32x32xf32>
    %cst_377 = arith.constant dense<0.000000e+00> : vector<8x32xf32>
    %536 = tpu.matmul %518, %535, %cst_377 {dimension_numbers = #tpu.dot_dimension_numbers<[1], [0], [0], [1], [0, 0, 1, 1], [], []>} : vector<8x32xf32>, vector<32x32xf32>, vector<8x32xf32> -> vector<8x32xf32>
    %537 = arith.addf %534, %536 : vector<8x32xf32>
    %c0_378 = arith.constant 0 : index
    %c0_379 = arith.constant 0 : index
    %538 = vector.load %arg20[%c0_378, %c0_379] : memref<32x32xf32, #tpu.memory_space<vmem>>, vector<32x32xf32>
    %cst_380 = arith.constant dense<0.000000e+00> : vector<8x32xf32>
    %539 = tpu.matmul %522, %538, %cst_380 {dimension_numbers = #tpu.dot_dimension_numbers<[1], [0], [0], [1], [0, 0, 1, 1], [], []>} : vector<8x32xf32>, vector<32x32xf32>, vector<8x32xf32> -> vector<8x32xf32>
    %540 = arith.addf %537, %539 : vector<8x32xf32>
    %541 = vector.extract_strided_slice %524 {offsets = [2, 0, 0], sizes = [1, 8, 32], strides = [1, 1, 1]} : vector<3x8x32xf32> to vector<1x8x32xf32>
    %542 = vector.shape_cast %541 : vector<1x8x32xf32> to vector<8x32xf32>
    %c0_381 = arith.constant 0 : index
    %c0_382 = arith.constant 0 : index
    %543 = vector.load %arg18[%c0_381, %c0_382] : memref<32x32xf32, #tpu.memory_space<vmem>>, vector<32x32xf32>
    %cst_383 = arith.constant dense<0.000000e+00> : vector<8x32xf32>
    %544 = tpu.matmul %518, %543, %cst_383 {dimension_numbers = #tpu.dot_dimension_numbers<[1], [0], [0], [1], [0, 0, 1, 1], [], []>} : vector<8x32xf32>, vector<32x32xf32>, vector<8x32xf32> -> vector<8x32xf32>
    %545 = arith.addf %542, %544 : vector<8x32xf32>
    %c0_384 = arith.constant 0 : index
    %c0_385 = arith.constant 0 : index
    %546 = vector.load %arg21[%c0_384, %c0_385] : memref<32x32xf32, #tpu.memory_space<vmem>>, vector<32x32xf32>
    %cst_386 = arith.constant dense<0.000000e+00> : vector<8x32xf32>
    %547 = tpu.matmul %522, %546, %cst_386 {dimension_numbers = #tpu.dot_dimension_numbers<[1], [0], [0], [1], [0, 0, 1, 1], [], []>} : vector<8x32xf32>, vector<32x32xf32>, vector<8x32xf32> -> vector<8x32xf32>
    %548 = arith.addf %545, %547 : vector<8x32xf32>
    %c0_387 = arith.constant 0 : index
    %c0_388 = arith.constant 0 : index
    %549 = vector.load %arg12[%c0_387, %c0_388] : memref<32x32xf32, #tpu.memory_space<vmem>>, vector<32x32xf32>
    %cst_389 = arith.constant dense<0.000000e+00> : vector<8x32xf32>
    %550 = tpu.matmul %479, %549, %cst_389 {dimension_numbers = #tpu.dot_dimension_numbers<[1], [0], [0], [1], [0, 0, 1, 1], [], []>} : vector<8x32xf32>, vector<32x32xf32>, vector<8x32xf32> -> vector<8x32xf32>
    %551 = arith.addf %532, %550 : vector<8x32xf32>
    %552 = arith.negf %551 : vector<8x32xf32>
    %553 = math.exp %552 : vector<8x32xf32>
    %cst_390 = arith.constant 1.000000e+00 : f32
    %554 = vector.broadcast %cst_390 : f32 to vector<8x32xf32>
    %555 = arith.addf %554, %553 : vector<8x32xf32>
    %556 = arith.divf %554, %555 : vector<8x32xf32>
    %c0_391 = arith.constant 0 : index
    %c0_392 = arith.constant 0 : index
    %557 = vector.load %arg13[%c0_391, %c0_392] : memref<32x32xf32, #tpu.memory_space<vmem>>, vector<32x32xf32>
    %cst_393 = arith.constant dense<0.000000e+00> : vector<8x32xf32>
    %558 = tpu.matmul %479, %557, %cst_393 {dimension_numbers = #tpu.dot_dimension_numbers<[1], [0], [0], [1], [0, 0, 1, 1], [], []>} : vector<8x32xf32>, vector<32x32xf32>, vector<8x32xf32> -> vector<8x32xf32>
    %559 = arith.addf %540, %558 : vector<8x32xf32>
    %560 = arith.negf %559 : vector<8x32xf32>
    %561 = math.exp %560 : vector<8x32xf32>
    %cst_394 = arith.constant 1.000000e+00 : f32
    %562 = vector.broadcast %cst_394 : f32 to vector<8x32xf32>
    %563 = arith.addf %562, %561 : vector<8x32xf32>
    %564 = arith.divf %562, %563 : vector<8x32xf32>
    %c0_395 = arith.constant 0 : index
    %c0_396 = arith.constant 0 : index
    %565 = vector.load %arg14[%c0_395, %c0_396] : memref<32x32xf32, #tpu.memory_space<vmem>>, vector<32x32xf32>
    %cst_397 = arith.constant dense<0.000000e+00> : vector<8x32xf32>
    %566 = tpu.matmul %479, %565, %cst_397 {dimension_numbers = #tpu.dot_dimension_numbers<[1], [0], [0], [1], [0, 0, 1, 1], [], []>} : vector<8x32xf32>, vector<32x32xf32>, vector<8x32xf32> -> vector<8x32xf32>
    %c0_398 = arith.constant 0 : index
    %c0_399 = arith.constant 0 : index
    %567 = vector.load %arg15[%c0_398, %c0_399] : memref<1x32xf32, #tpu.memory_space<vmem>>, vector<1x32xf32>
    %568 = vector.broadcast %567 : vector<1x32xf32> to vector<8x32xf32>
    %569 = arith.addf %566, %568 : vector<8x32xf32>
    %570 = arith.mulf %556, %569 : vector<8x32xf32>
    %571 = arith.addf %548, %570 : vector<8x32xf32>
    %572 = math.tanh %571 : vector<8x32xf32>
    %cst_400 = arith.constant 1.000000e+00 : f32
    %573 = vector.broadcast %cst_400 : f32 to vector<8x32xf32>
    %574 = arith.subf %573, %564 : vector<8x32xf32>
    %575 = arith.mulf %574, %572 : vector<8x32xf32>
    %576 = arith.mulf %564, %479 : vector<8x32xf32>
    %577 = arith.addf %575, %576 : vector<8x32xf32>
    %c5_401 = arith.constant 5 : index
    %c0_402 = arith.constant 0 : index
    %c0_403 = arith.constant 0 : index
    %578 = vector.load %arg3[%c5_401, %c0_402, %c0_403] : memref<8x8x128xf32, #tpu.memory_space<vmem>>, vector<1x8x128xf32>
    %579 = vector.shape_cast %578 : vector<1x8x128xf32> to vector<8x128xf32>
    %c0_404 = arith.constant 0 : index
    %c0_405 = arith.constant 0 : index
    %580 = vector.load %arg22[%c0_404, %c0_405] : memref<32x128xf32, #tpu.memory_space<vmem>>, vector<32x128xf32>
    %cst_406 = arith.constant dense<0.000000e+00> : vector<8x128xf32>
    %581 = tpu.matmul %577, %580, %cst_406 {dimension_numbers = #tpu.dot_dimension_numbers<[1], [0], [0], [1], [0, 0, 1, 1], [], []>} : vector<8x32xf32>, vector<32x128xf32>, vector<8x128xf32> -> vector<8x128xf32>
    %582 = arith.addf %579, %581 : vector<8x128xf32>
    %c0_407 = arith.constant 0 : index
    %c0_408 = arith.constant 0 : index
    %583 = vector.load %arg23[%c0_407, %c0_408] : memref<32x128xf32, #tpu.memory_space<vmem>>, vector<32x128xf32>
    %cst_409 = arith.constant dense<0.000000e+00> : vector<8x128xf32>
    %584 = tpu.matmul %518, %583, %cst_409 {dimension_numbers = #tpu.dot_dimension_numbers<[1], [0], [0], [1], [0, 0, 1, 1], [], []>} : vector<8x32xf32>, vector<32x128xf32>, vector<8x128xf32> -> vector<8x128xf32>
    %585 = arith.addf %582, %584 : vector<8x128xf32>
    %c0_410 = arith.constant 0 : index
    %c0_411 = arith.constant 0 : index
    %586 = vector.load %arg24[%c0_410, %c0_411] : memref<32x128xf32, #tpu.memory_space<vmem>>, vector<32x128xf32>
    %cst_412 = arith.constant dense<0.000000e+00> : vector<8x128xf32>
    %587 = tpu.matmul %522, %586, %cst_412 {dimension_numbers = #tpu.dot_dimension_numbers<[1], [0], [0], [1], [0, 0, 1, 1], [], []>} : vector<8x32xf32>, vector<32x128xf32>, vector<8x128xf32> -> vector<8x128xf32>
    %588 = arith.addf %585, %587 : vector<8x128xf32>
    %c5_413 = arith.constant 5 : index
    %c0_414 = arith.constant 0 : index
    %c0_415 = arith.constant 0 : index
    %589 = vector.load %arg25[%c5_413, %c0_414, %c0_415] : memref<8x8x128xf32, #tpu.memory_space<vmem>>, vector<1x8x128xf32>
    %590 = vector.shape_cast %589 : vector<1x8x128xf32> to vector<8x128xf32>
    %591 = vector.shape_cast %588 : vector<8x128xf32> to vector<1x8x128xf32>
    tpu.vector_store %arg25[%c5_413, %c0_414, %c0_415], %591 {strides = array<i32>} : memref<8x8x128xf32, #tpu.memory_space<vmem>>, vector<1x8x128xf32>,
    %c0_416 = arith.constant 0 : index
    %c0_417 = arith.constant 0 : index
    %592 = vector.load %arg7[%c0_416, %c0_417] : memref<32x32xf32, #tpu.memory_space<vmem>>, vector<32x32xf32>
    %cst_418 = arith.constant dense<0.000000e+00> : vector<8x32xf32>
    %593 = tpu.matmul %577, %592, %cst_418 {dimension_numbers = #tpu.dot_dimension_numbers<[1], [0], [0], [1], [0, 0, 1, 1], [], []>} : vector<8x32xf32>, vector<32x32xf32>, vector<8x32xf32> -> vector<8x32xf32>
    %c0_419 = arith.constant 0 : index
    %c0_420 = arith.constant 0 : index
    %c0_421 = arith.constant 0 : index
    %594 = vector.load %arg27[%c0_419, %c0_420, %c0_421] : memref<8x8x32xf32, #tpu.memory_space<vmem>>, vector<8x8x32xf32>
    %595 = vector.shape_cast %593 : vector<8x32xf32> to vector<1x8x32xf32>
    %596 = vector.broadcast %595 : vector<1x8x32xf32> to vector<8x8x32xf32>
    %597 = arith.addf %594, %596 : vector<8x8x32xf32>
    %598 = math.tanh %597 : vector<8x8x32xf32>
    %599 = vector.shape_cast %598 : vector<8x8x32xf32> to vector<64x32xf32>
    %c0_422 = arith.constant 0 : index
    %c0_423 = arith.constant 0 : index
    %600 = vector.load %arg11[%c0_422, %c0_423] : memref<32x1xf32, #tpu.memory_space<vmem>>, vector<32x1xf32>
    %cst_424 = arith.constant dense<0.000000e+00> : vector<64x1xf32>
    %601 = tpu.matmul %599, %600, %cst_424 {dimension_numbers = #tpu.dot_dimension_numbers<[1], [0], [0], [1], [0, 0, 1, 1], [], []>} : vector<64x32xf32>, vector<32x1xf32>, vector<64x1xf32> -> vector<64x1xf32>
    %602 = vector.shape_cast %601 : vector<64x1xf32> to vector<8x8x1xf32>
    %cst_425 = arith.constant dense<0xFF800000> : vector<8x1xf32>
    %603 = vector.multi_reduction <maximumf>, %602, %cst_425 [0] : vector<8x8x1xf32> to vector<8x1xf32>
    %604 = vector.shape_cast %603 : vector<8x1xf32> to vector<1x8x1xf32>
    %605 = vector.broadcast %604 : vector<1x8x1xf32> to vector<8x8x1xf32>
    %606 = arith.subf %602, %605 : vector<8x8x1xf32>
    %607 = math.exp %606 : vector<8x8x1xf32>
    %cst_426 = arith.constant dense<0.000000e+00> : vector<8x1xf32>
    %608 = vector.multi_reduction <add>, %607, %cst_426 [0] : vector<8x8x1xf32> to vector<8x1xf32>
    %609 = vector.shape_cast %608 : vector<8x1xf32> to vector<1x8x1xf32>
    %610 = tpu.reciprocal %609 {approx = true} : vector<1x8x1xf32> -> vector<1x8x1xf32>
    %611 = vector.broadcast %610 : vector<1x8x1xf32> to vector<8x8x1xf32>
    %612 = arith.mulf %607, %611 : vector<8x8x1xf32>
    %c0_427 = arith.constant 0 : index
    %c0_428 = arith.constant 0 : index
    %c0_429 = arith.constant 0 : index
    %613 = vector.load %arg4[%c0_427, %c0_428, %c0_429] : memref<8x8x32xf32, #tpu.memory_space<vmem>>, vector<8x8x32xf32>
    %614 = vector.broadcast %612 : vector<8x8x1xf32> to vector<8x8x32xf32>
    %615 = arith.mulf %614, %613 : vector<8x8x32xf32>
    %cst_430 = arith.constant dense<0.000000e+00> : vector<8x32xf32>
    %616 = vector.multi_reduction <add>, %615, %cst_430 [0] : vector<8x8x32xf32> to vector<8x32xf32>
    %c0_431 = arith.constant 0 : index
    %c0_432 = arith.constant 0 : index
    %c0_433 = arith.constant 0 : index
    %617 = vector.load %arg5[%c0_431, %c0_432, %c0_433] : memref<8x8x32xf32, #tpu.memory_space<vmem>>, vector<8x8x32xf32>
    %618 = vector.broadcast %612 : vector<8x8x1xf32> to vector<8x8x32xf32>
    %619 = arith.mulf %618, %617 : vector<8x8x32xf32>
    %cst_434 = arith.constant dense<0.000000e+00> : vector<8x32xf32>
    %620 = vector.multi_reduction <add>, %619, %cst_434 [0] : vector<8x8x32xf32> to vector<8x32xf32>
    %c6 = arith.constant 6 : index
    %c0_435 = arith.constant 0 : index
    %c0_436 = arith.constant 0 : index
    %c0_437 = arith.constant 0 : index
    %621 = vector.load %arg2[%c6, %c0_435, %c0_436, %c0_437] : memref<8x3x8x32xf32, #tpu.memory_space<vmem>>, vector<1x3x8x32xf32>
    %622 = vector.shape_cast %621 : vector<1x3x8x32xf32> to vector<3x8x32xf32>
    %623 = vector.extract_strided_slice %622 {offsets = [0, 0, 0], sizes = [1, 8, 32], strides = [1, 1, 1]} : vector<3x8x32xf32> to vector<1x8x32xf32>
    %624 = vector.shape_cast %623 : vector<1x8x32xf32> to vector<8x32xf32>
    %c0_438 = arith.constant 0 : index
    %c0_439 = arith.constant 0 : index
    %625 = vector.load %arg16[%c0_438, %c0_439] : memref<32x32xf32, #tpu.memory_space<vmem>>, vector<32x32xf32>
    %cst_440 = arith.constant dense<0.000000e+00> : vector<8x32xf32>
    %626 = tpu.matmul %616, %625, %cst_440 {dimension_numbers = #tpu.dot_dimension_numbers<[1], [0], [0], [1], [0, 0, 1, 1], [], []>} : vector<8x32xf32>, vector<32x32xf32>, vector<8x32xf32> -> vector<8x32xf32>
    %627 = arith.addf %624, %626 : vector<8x32xf32>
    %c0_441 = arith.constant 0 : index
    %c0_442 = arith.constant 0 : index
    %628 = vector.load %arg19[%c0_441, %c0_442] : memref<32x32xf32, #tpu.memory_space<vmem>>, vector<32x32xf32>
    %cst_443 = arith.constant dense<0.000000e+00> : vector<8x32xf32>
    %629 = tpu.matmul %620, %628, %cst_443 {dimension_numbers = #tpu.dot_dimension_numbers<[1], [0], [0], [1], [0, 0, 1, 1], [], []>} : vector<8x32xf32>, vector<32x32xf32>, vector<8x32xf32> -> vector<8x32xf32>
    %630 = arith.addf %627, %629 : vector<8x32xf32>
    %631 = vector.extract_strided_slice %622 {offsets = [1, 0, 0], sizes = [1, 8, 32], strides = [1, 1, 1]} : vector<3x8x32xf32> to vector<1x8x32xf32>
    %632 = vector.shape_cast %631 : vector<1x8x32xf32> to vector<8x32xf32>
    %c0_444 = arith.constant 0 : index
    %c0_445 = arith.constant 0 : index
    %633 = vector.load %arg17[%c0_444, %c0_445] : memref<32x32xf32, #tpu.memory_space<vmem>>, vector<32x32xf32>
    %cst_446 = arith.constant dense<0.000000e+00> : vector<8x32xf32>
    %634 = tpu.matmul %616, %633, %cst_446 {dimension_numbers = #tpu.dot_dimension_numbers<[1], [0], [0], [1], [0, 0, 1, 1], [], []>} : vector<8x32xf32>, vector<32x32xf32>, vector<8x32xf32> -> vector<8x32xf32>
    %635 = arith.addf %632, %634 : vector<8x32xf32>
    %c0_447 = arith.constant 0 : index
    %c0_448 = arith.constant 0 : index
    %636 = vector.load %arg20[%c0_447, %c0_448] : memref<32x32xf32, #tpu.memory_space<vmem>>, vector<32x32xf32>
    %cst_449 = arith.constant dense<0.000000e+00> : vector<8x32xf32>
    %637 = tpu.matmul %620, %636, %cst_449 {dimension_numbers = #tpu.dot_dimension_numbers<[1], [0], [0], [1], [0, 0, 1, 1], [], []>} : vector<8x32xf32>, vector<32x32xf32>, vector<8x32xf32> -> vector<8x32xf32>
    %638 = arith.addf %635, %637 : vector<8x32xf32>
    %639 = vector.extract_strided_slice %622 {offsets = [2, 0, 0], sizes = [1, 8, 32], strides = [1, 1, 1]} : vector<3x8x32xf32> to vector<1x8x32xf32>
    %640 = vector.shape_cast %639 : vector<1x8x32xf32> to vector<8x32xf32>
    %c0_450 = arith.constant 0 : index
    %c0_451 = arith.constant 0 : index
    %641 = vector.load %arg18[%c0_450, %c0_451] : memref<32x32xf32, #tpu.memory_space<vmem>>, vector<32x32xf32>
    %cst_452 = arith.constant dense<0.000000e+00> : vector<8x32xf32>
    %642 = tpu.matmul %616, %641, %cst_452 {dimension_numbers = #tpu.dot_dimension_numbers<[1], [0], [0], [1], [0, 0, 1, 1], [], []>} : vector<8x32xf32>, vector<32x32xf32>, vector<8x32xf32> -> vector<8x32xf32>
    %643 = arith.addf %640, %642 : vector<8x32xf32>
    %c0_453 = arith.constant 0 : index
    %c0_454 = arith.constant 0 : index
    %644 = vector.load %arg21[%c0_453, %c0_454] : memref<32x32xf32, #tpu.memory_space<vmem>>, vector<32x32xf32>
    %cst_455 = arith.constant dense<0.000000e+00> : vector<8x32xf32>
    %645 = tpu.matmul %620, %644, %cst_455 {dimension_numbers = #tpu.dot_dimension_numbers<[1], [0], [0], [1], [0, 0, 1, 1], [], []>} : vector<8x32xf32>, vector<32x32xf32>, vector<8x32xf32> -> vector<8x32xf32>
    %646 = arith.addf %643, %645 : vector<8x32xf32>
    %c0_456 = arith.constant 0 : index
    %c0_457 = arith.constant 0 : index
    %647 = vector.load %arg12[%c0_456, %c0_457] : memref<32x32xf32, #tpu.memory_space<vmem>>, vector<32x32xf32>
    %cst_458 = arith.constant dense<0.000000e+00> : vector<8x32xf32>
    %648 = tpu.matmul %577, %647, %cst_458 {dimension_numbers = #tpu.dot_dimension_numbers<[1], [0], [0], [1], [0, 0, 1, 1], [], []>} : vector<8x32xf32>, vector<32x32xf32>, vector<8x32xf32> -> vector<8x32xf32>
    %649 = arith.addf %630, %648 : vector<8x32xf32>
    %650 = arith.negf %649 : vector<8x32xf32>
    %651 = math.exp %650 : vector<8x32xf32>
    %cst_459 = arith.constant 1.000000e+00 : f32
    %652 = vector.broadcast %cst_459 : f32 to vector<8x32xf32>
    %653 = arith.addf %652, %651 : vector<8x32xf32>
    %654 = arith.divf %652, %653 : vector<8x32xf32>
    %c0_460 = arith.constant 0 : index
    %c0_461 = arith.constant 0 : index
    %655 = vector.load %arg13[%c0_460, %c0_461] : memref<32x32xf32, #tpu.memory_space<vmem>>, vector<32x32xf32>
    %cst_462 = arith.constant dense<0.000000e+00> : vector<8x32xf32>
    %656 = tpu.matmul %577, %655, %cst_462 {dimension_numbers = #tpu.dot_dimension_numbers<[1], [0], [0], [1], [0, 0, 1, 1], [], []>} : vector<8x32xf32>, vector<32x32xf32>, vector<8x32xf32> -> vector<8x32xf32>
    %657 = arith.addf %638, %656 : vector<8x32xf32>
    %658 = arith.negf %657 : vector<8x32xf32>
    %659 = math.exp %658 : vector<8x32xf32>
    %cst_463 = arith.constant 1.000000e+00 : f32
    %660 = vector.broadcast %cst_463 : f32 to vector<8x32xf32>
    %661 = arith.addf %660, %659 : vector<8x32xf32>
    %662 = arith.divf %660, %661 : vector<8x32xf32>
    %c0_464 = arith.constant 0 : index
    %c0_465 = arith.constant 0 : index
    %663 = vector.load %arg14[%c0_464, %c0_465] : memref<32x32xf32, #tpu.memory_space<vmem>>, vector<32x32xf32>
    %cst_466 = arith.constant dense<0.000000e+00> : vector<8x32xf32>
    %664 = tpu.matmul %577, %663, %cst_466 {dimension_numbers = #tpu.dot_dimension_numbers<[1], [0], [0], [1], [0, 0, 1, 1], [], []>} : vector<8x32xf32>, vector<32x32xf32>, vector<8x32xf32> -> vector<8x32xf32>
    %c0_467 = arith.constant 0 : index
    %c0_468 = arith.constant 0 : index
    %665 = vector.load %arg15[%c0_467, %c0_468] : memref<1x32xf32, #tpu.memory_space<vmem>>, vector<1x32xf32>
    %666 = vector.broadcast %665 : vector<1x32xf32> to vector<8x32xf32>
    %667 = arith.addf %664, %666 : vector<8x32xf32>
    %668 = arith.mulf %654, %667 : vector<8x32xf32>
    %669 = arith.addf %646, %668 : vector<8x32xf32>
    %670 = math.tanh %669 : vector<8x32xf32>
    %cst_469 = arith.constant 1.000000e+00 : f32
    %671 = vector.broadcast %cst_469 : f32 to vector<8x32xf32>
    %672 = arith.subf %671, %662 : vector<8x32xf32>
    %673 = arith.mulf %672, %670 : vector<8x32xf32>
    %674 = arith.mulf %662, %577 : vector<8x32xf32>
    %675 = arith.addf %673, %674 : vector<8x32xf32>
    %c6_470 = arith.constant 6 : index
    %c0_471 = arith.constant 0 : index
    %c0_472 = arith.constant 0 : index
    %676 = vector.load %arg3[%c6_470, %c0_471, %c0_472] : memref<8x8x128xf32, #tpu.memory_space<vmem>>, vector<1x8x128xf32>
    %677 = vector.shape_cast %676 : vector<1x8x128xf32> to vector<8x128xf32>
    %c0_473 = arith.constant 0 : index
    %c0_474 = arith.constant 0 : index
    %678 = vector.load %arg22[%c0_473, %c0_474] : memref<32x128xf32, #tpu.memory_space<vmem>>, vector<32x128xf32>
    %cst_475 = arith.constant dense<0.000000e+00> : vector<8x128xf32>
    %679 = tpu.matmul %675, %678, %cst_475 {dimension_numbers = #tpu.dot_dimension_numbers<[1], [0], [0], [1], [0, 0, 1, 1], [], []>} : vector<8x32xf32>, vector<32x128xf32>, vector<8x128xf32> -> vector<8x128xf32>
    %680 = arith.addf %677, %679 : vector<8x128xf32>
    %c0_476 = arith.constant 0 : index
    %c0_477 = arith.constant 0 : index
    %681 = vector.load %arg23[%c0_476, %c0_477] : memref<32x128xf32, #tpu.memory_space<vmem>>, vector<32x128xf32>
    %cst_478 = arith.constant dense<0.000000e+00> : vector<8x128xf32>
    %682 = tpu.matmul %616, %681, %cst_478 {dimension_numbers = #tpu.dot_dimension_numbers<[1], [0], [0], [1], [0, 0, 1, 1], [], []>} : vector<8x32xf32>, vector<32x128xf32>, vector<8x128xf32> -> vector<8x128xf32>
    %683 = arith.addf %680, %682 : vector<8x128xf32>
    %c0_479 = arith.constant 0 : index
    %c0_480 = arith.constant 0 : index
    %684 = vector.load %arg24[%c0_479, %c0_480] : memref<32x128xf32, #tpu.memory_space<vmem>>, vector<32x128xf32>
    %cst_481 = arith.constant dense<0.000000e+00> : vector<8x128xf32>
    %685 = tpu.matmul %620, %684, %cst_481 {dimension_numbers = #tpu.dot_dimension_numbers<[1], [0], [0], [1], [0, 0, 1, 1], [], []>} : vector<8x32xf32>, vector<32x128xf32>, vector<8x128xf32> -> vector<8x128xf32>
    %686 = arith.addf %683, %685 : vector<8x128xf32>
    %c6_482 = arith.constant 6 : index
    %c0_483 = arith.constant 0 : index
    %c0_484 = arith.constant 0 : index
    %687 = vector.load %arg25[%c6_482, %c0_483, %c0_484] : memref<8x8x128xf32, #tpu.memory_space<vmem>>, vector<1x8x128xf32>
    %688 = vector.shape_cast %687 : vector<1x8x128xf32> to vector<8x128xf32>
    %689 = vector.shape_cast %686 : vector<8x128xf32> to vector<1x8x128xf32>
    tpu.vector_store %arg25[%c6_482, %c0_483, %c0_484], %689 {strides = array<i32>} : memref<8x8x128xf32, #tpu.memory_space<vmem>>, vector<1x8x128xf32>,
    %c0_485 = arith.constant 0 : index
    %c0_486 = arith.constant 0 : index
    %690 = vector.load %arg7[%c0_485, %c0_486] : memref<32x32xf32, #tpu.memory_space<vmem>>, vector<32x32xf32>
    %cst_487 = arith.constant dense<0.000000e+00> : vector<8x32xf32>
    %691 = tpu.matmul %675, %690, %cst_487 {dimension_numbers = #tpu.dot_dimension_numbers<[1], [0], [0], [1], [0, 0, 1, 1], [], []>} : vector<8x32xf32>, vector<32x32xf32>, vector<8x32xf32> -> vector<8x32xf32>
    %c0_488 = arith.constant 0 : index
    %c0_489 = arith.constant 0 : index
    %c0_490 = arith.constant 0 : index
    %692 = vector.load %arg27[%c0_488, %c0_489, %c0_490] : memref<8x8x32xf32, #tpu.memory_space<vmem>>, vector<8x8x32xf32>
    %693 = vector.shape_cast %691 : vector<8x32xf32> to vector<1x8x32xf32>
    %694 = vector.broadcast %693 : vector<1x8x32xf32> to vector<8x8x32xf32>
    %695 = arith.addf %692, %694 : vector<8x8x32xf32>
    %696 = math.tanh %695 : vector<8x8x32xf32>
    %697 = vector.shape_cast %696 : vector<8x8x32xf32> to vector<64x32xf32>
    %c0_491 = arith.constant 0 : index
    %c0_492 = arith.constant 0 : index
    %698 = vector.load %arg11[%c0_491, %c0_492] : memref<32x1xf32, #tpu.memory_space<vmem>>, vector<32x1xf32>
    %cst_493 = arith.constant dense<0.000000e+00> : vector<64x1xf32>
    %699 = tpu.matmul %697, %698, %cst_493 {dimension_numbers = #tpu.dot_dimension_numbers<[1], [0], [0], [1], [0, 0, 1, 1], [], []>} : vector<64x32xf32>, vector<32x1xf32>, vector<64x1xf32> -> vector<64x1xf32>
    %700 = vector.shape_cast %699 : vector<64x1xf32> to vector<8x8x1xf32>
    %cst_494 = arith.constant dense<0xFF800000> : vector<8x1xf32>
    %701 = vector.multi_reduction <maximumf>, %700, %cst_494 [0] : vector<8x8x1xf32> to vector<8x1xf32>
    %702 = vector.shape_cast %701 : vector<8x1xf32> to vector<1x8x1xf32>
    %703 = vector.broadcast %702 : vector<1x8x1xf32> to vector<8x8x1xf32>
    %704 = arith.subf %700, %703 : vector<8x8x1xf32>
    %705 = math.exp %704 : vector<8x8x1xf32>
    %cst_495 = arith.constant dense<0.000000e+00> : vector<8x1xf32>
    %706 = vector.multi_reduction <add>, %705, %cst_495 [0] : vector<8x8x1xf32> to vector<8x1xf32>
    %707 = vector.shape_cast %706 : vector<8x1xf32> to vector<1x8x1xf32>
    %708 = tpu.reciprocal %707 {approx = true} : vector<1x8x1xf32> -> vector<1x8x1xf32>
    %709 = vector.broadcast %708 : vector<1x8x1xf32> to vector<8x8x1xf32>
    %710 = arith.mulf %705, %709 : vector<8x8x1xf32>
    %c0_496 = arith.constant 0 : index
    %c0_497 = arith.constant 0 : index
    %c0_498 = arith.constant 0 : index
    %711 = vector.load %arg4[%c0_496, %c0_497, %c0_498] : memref<8x8x32xf32, #tpu.memory_space<vmem>>, vector<8x8x32xf32>
    %712 = vector.broadcast %710 : vector<8x8x1xf32> to vector<8x8x32xf32>
    %713 = arith.mulf %712, %711 : vector<8x8x32xf32>
    %cst_499 = arith.constant dense<0.000000e+00> : vector<8x32xf32>
    %714 = vector.multi_reduction <add>, %713, %cst_499 [0] : vector<8x8x32xf32> to vector<8x32xf32>
    %c0_500 = arith.constant 0 : index
    %c0_501 = arith.constant 0 : index
    %c0_502 = arith.constant 0 : index
    %715 = vector.load %arg5[%c0_500, %c0_501, %c0_502] : memref<8x8x32xf32, #tpu.memory_space<vmem>>, vector<8x8x32xf32>
    %716 = vector.broadcast %710 : vector<8x8x1xf32> to vector<8x8x32xf32>
    %717 = arith.mulf %716, %715 : vector<8x8x32xf32>
    %cst_503 = arith.constant dense<0.000000e+00> : vector<8x32xf32>
    %718 = vector.multi_reduction <add>, %717, %cst_503 [0] : vector<8x8x32xf32> to vector<8x32xf32>
    %c7 = arith.constant 7 : index
    %c0_504 = arith.constant 0 : index
    %c0_505 = arith.constant 0 : index
    %c0_506 = arith.constant 0 : index
    %719 = vector.load %arg2[%c7, %c0_504, %c0_505, %c0_506] : memref<8x3x8x32xf32, #tpu.memory_space<vmem>>, vector<1x3x8x32xf32>
    %720 = vector.shape_cast %719 : vector<1x3x8x32xf32> to vector<3x8x32xf32>
    %721 = vector.extract_strided_slice %720 {offsets = [0, 0, 0], sizes = [1, 8, 32], strides = [1, 1, 1]} : vector<3x8x32xf32> to vector<1x8x32xf32>
    %722 = vector.shape_cast %721 : vector<1x8x32xf32> to vector<8x32xf32>
    %c0_507 = arith.constant 0 : index
    %c0_508 = arith.constant 0 : index
    %723 = vector.load %arg16[%c0_507, %c0_508] : memref<32x32xf32, #tpu.memory_space<vmem>>, vector<32x32xf32>
    %cst_509 = arith.constant dense<0.000000e+00> : vector<8x32xf32>
    %724 = tpu.matmul %714, %723, %cst_509 {dimension_numbers = #tpu.dot_dimension_numbers<[1], [0], [0], [1], [0, 0, 1, 1], [], []>} : vector<8x32xf32>, vector<32x32xf32>, vector<8x32xf32> -> vector<8x32xf32>
    %725 = arith.addf %722, %724 : vector<8x32xf32>
    %c0_510 = arith.constant 0 : index
    %c0_511 = arith.constant 0 : index
    %726 = vector.load %arg19[%c0_510, %c0_511] : memref<32x32xf32, #tpu.memory_space<vmem>>, vector<32x32xf32>
    %cst_512 = arith.constant dense<0.000000e+00> : vector<8x32xf32>
    %727 = tpu.matmul %718, %726, %cst_512 {dimension_numbers = #tpu.dot_dimension_numbers<[1], [0], [0], [1], [0, 0, 1, 1], [], []>} : vector<8x32xf32>, vector<32x32xf32>, vector<8x32xf32> -> vector<8x32xf32>
    %728 = arith.addf %725, %727 : vector<8x32xf32>
    %729 = vector.extract_strided_slice %720 {offsets = [1, 0, 0], sizes = [1, 8, 32], strides = [1, 1, 1]} : vector<3x8x32xf32> to vector<1x8x32xf32>
    %730 = vector.shape_cast %729 : vector<1x8x32xf32> to vector<8x32xf32>
    %c0_513 = arith.constant 0 : index
    %c0_514 = arith.constant 0 : index
    %731 = vector.load %arg17[%c0_513, %c0_514] : memref<32x32xf32, #tpu.memory_space<vmem>>, vector<32x32xf32>
    %cst_515 = arith.constant dense<0.000000e+00> : vector<8x32xf32>
    %732 = tpu.matmul %714, %731, %cst_515 {dimension_numbers = #tpu.dot_dimension_numbers<[1], [0], [0], [1], [0, 0, 1, 1], [], []>} : vector<8x32xf32>, vector<32x32xf32>, vector<8x32xf32> -> vector<8x32xf32>
    %733 = arith.addf %730, %732 : vector<8x32xf32>
    %c0_516 = arith.constant 0 : index
    %c0_517 = arith.constant 0 : index
    %734 = vector.load %arg20[%c0_516, %c0_517] : memref<32x32xf32, #tpu.memory_space<vmem>>, vector<32x32xf32>
    %cst_518 = arith.constant dense<0.000000e+00> : vector<8x32xf32>
    %735 = tpu.matmul %718, %734, %cst_518 {dimension_numbers = #tpu.dot_dimension_numbers<[1], [0], [0], [1], [0, 0, 1, 1], [], []>} : vector<8x32xf32>, vector<32x32xf32>, vector<8x32xf32> -> vector<8x32xf32>
    %736 = arith.addf %733, %735 : vector<8x32xf32>
    %737 = vector.extract_strided_slice %720 {offsets = [2, 0, 0], sizes = [1, 8, 32], strides = [1, 1, 1]} : vector<3x8x32xf32> to vector<1x8x32xf32>
    %738 = vector.shape_cast %737 : vector<1x8x32xf32> to vector<8x32xf32>
    %c0_519 = arith.constant 0 : index
    %c0_520 = arith.constant 0 : index
    %739 = vector.load %arg18[%c0_519, %c0_520] : memref<32x32xf32, #tpu.memory_space<vmem>>, vector<32x32xf32>
    %cst_521 = arith.constant dense<0.000000e+00> : vector<8x32xf32>
    %740 = tpu.matmul %714, %739, %cst_521 {dimension_numbers = #tpu.dot_dimension_numbers<[1], [0], [0], [1], [0, 0, 1, 1], [], []>} : vector<8x32xf32>, vector<32x32xf32>, vector<8x32xf32> -> vector<8x32xf32>
    %741 = arith.addf %738, %740 : vector<8x32xf32>
    %c0_522 = arith.constant 0 : index
    %c0_523 = arith.constant 0 : index
    %742 = vector.load %arg21[%c0_522, %c0_523] : memref<32x32xf32, #tpu.memory_space<vmem>>, vector<32x32xf32>
    %cst_524 = arith.constant dense<0.000000e+00> : vector<8x32xf32>
    %743 = tpu.matmul %718, %742, %cst_524 {dimension_numbers = #tpu.dot_dimension_numbers<[1], [0], [0], [1], [0, 0, 1, 1], [], []>} : vector<8x32xf32>, vector<32x32xf32>, vector<8x32xf32> -> vector<8x32xf32>
    %744 = arith.addf %741, %743 : vector<8x32xf32>
    %c0_525 = arith.constant 0 : index
    %c0_526 = arith.constant 0 : index
    %745 = vector.load %arg12[%c0_525, %c0_526] : memref<32x32xf32, #tpu.memory_space<vmem>>, vector<32x32xf32>
    %cst_527 = arith.constant dense<0.000000e+00> : vector<8x32xf32>
    %746 = tpu.matmul %675, %745, %cst_527 {dimension_numbers = #tpu.dot_dimension_numbers<[1], [0], [0], [1], [0, 0, 1, 1], [], []>} : vector<8x32xf32>, vector<32x32xf32>, vector<8x32xf32> -> vector<8x32xf32>
    %747 = arith.addf %728, %746 : vector<8x32xf32>
    %748 = arith.negf %747 : vector<8x32xf32>
    %749 = math.exp %748 : vector<8x32xf32>
    %cst_528 = arith.constant 1.000000e+00 : f32
    %750 = vector.broadcast %cst_528 : f32 to vector<8x32xf32>
    %751 = arith.addf %750, %749 : vector<8x32xf32>
    %752 = arith.divf %750, %751 : vector<8x32xf32>
    %c0_529 = arith.constant 0 : index
    %c0_530 = arith.constant 0 : index
    %753 = vector.load %arg13[%c0_529, %c0_530] : memref<32x32xf32, #tpu.memory_space<vmem>>, vector<32x32xf32>
    %cst_531 = arith.constant dense<0.000000e+00> : vector<8x32xf32>
    %754 = tpu.matmul %675, %753, %cst_531 {dimension_numbers = #tpu.dot_dimension_numbers<[1], [0], [0], [1], [0, 0, 1, 1], [], []>} : vector<8x32xf32>, vector<32x32xf32>, vector<8x32xf32> -> vector<8x32xf32>
    %755 = arith.addf %736, %754 : vector<8x32xf32>
    %756 = arith.negf %755 : vector<8x32xf32>
    %757 = math.exp %756 : vector<8x32xf32>
    %cst_532 = arith.constant 1.000000e+00 : f32
    %758 = vector.broadcast %cst_532 : f32 to vector<8x32xf32>
    %759 = arith.addf %758, %757 : vector<8x32xf32>
    %760 = arith.divf %758, %759 : vector<8x32xf32>
    %c0_533 = arith.constant 0 : index
    %c0_534 = arith.constant 0 : index
    %761 = vector.load %arg14[%c0_533, %c0_534] : memref<32x32xf32, #tpu.memory_space<vmem>>, vector<32x32xf32>
    %cst_535 = arith.constant dense<0.000000e+00> : vector<8x32xf32>
    %762 = tpu.matmul %675, %761, %cst_535 {dimension_numbers = #tpu.dot_dimension_numbers<[1], [0], [0], [1], [0, 0, 1, 1], [], []>} : vector<8x32xf32>, vector<32x32xf32>, vector<8x32xf32> -> vector<8x32xf32>
    %c0_536 = arith.constant 0 : index
    %c0_537 = arith.constant 0 : index
    %763 = vector.load %arg15[%c0_536, %c0_537] : memref<1x32xf32, #tpu.memory_space<vmem>>, vector<1x32xf32>
    %764 = vector.broadcast %763 : vector<1x32xf32> to vector<8x32xf32>
    %765 = arith.addf %762, %764 : vector<8x32xf32>
    %766 = arith.mulf %752, %765 : vector<8x32xf32>
    %767 = arith.addf %744, %766 : vector<8x32xf32>
    %768 = math.tanh %767 : vector<8x32xf32>
    %cst_538 = arith.constant 1.000000e+00 : f32
    %769 = vector.broadcast %cst_538 : f32 to vector<8x32xf32>
    %770 = arith.subf %769, %760 : vector<8x32xf32>
    %771 = arith.mulf %770, %768 : vector<8x32xf32>
    %772 = arith.mulf %760, %675 : vector<8x32xf32>
    %773 = arith.addf %771, %772 : vector<8x32xf32>
    %c7_539 = arith.constant 7 : index
    %c0_540 = arith.constant 0 : index
    %c0_541 = arith.constant 0 : index
    %774 = vector.load %arg3[%c7_539, %c0_540, %c0_541] : memref<8x8x128xf32, #tpu.memory_space<vmem>>, vector<1x8x128xf32>
    %775 = vector.shape_cast %774 : vector<1x8x128xf32> to vector<8x128xf32>
    %c0_542 = arith.constant 0 : index
    %c0_543 = arith.constant 0 : index
    %776 = vector.load %arg22[%c0_542, %c0_543] : memref<32x128xf32, #tpu.memory_space<vmem>>, vector<32x128xf32>
    %cst_544 = arith.constant dense<0.000000e+00> : vector<8x128xf32>
    %777 = tpu.matmul %773, %776, %cst_544 {dimension_numbers = #tpu.dot_dimension_numbers<[1], [0], [0], [1], [0, 0, 1, 1], [], []>} : vector<8x32xf32>, vector<32x128xf32>, vector<8x128xf32> -> vector<8x128xf32>
    %778 = arith.addf %775, %777 : vector<8x128xf32>
    %c0_545 = arith.constant 0 : index
    %c0_546 = arith.constant 0 : index
    %779 = vector.load %arg23[%c0_545, %c0_546] : memref<32x128xf32, #tpu.memory_space<vmem>>, vector<32x128xf32>
    %cst_547 = arith.constant dense<0.000000e+00> : vector<8x128xf32>
    %780 = tpu.matmul %714, %779, %cst_547 {dimension_numbers = #tpu.dot_dimension_numbers<[1], [0], [0], [1], [0, 0, 1, 1], [], []>} : vector<8x32xf32>, vector<32x128xf32>, vector<8x128xf32> -> vector<8x128xf32>
    %781 = arith.addf %778, %780 : vector<8x128xf32>
    %c0_548 = arith.constant 0 : index
    %c0_549 = arith.constant 0 : index
    %782 = vector.load %arg24[%c0_548, %c0_549] : memref<32x128xf32, #tpu.memory_space<vmem>>, vector<32x128xf32>
    %cst_550 = arith.constant dense<0.000000e+00> : vector<8x128xf32>
    %783 = tpu.matmul %718, %782, %cst_550 {dimension_numbers = #tpu.dot_dimension_numbers<[1], [0], [0], [1], [0, 0, 1, 1], [], []>} : vector<8x32xf32>, vector<32x128xf32>, vector<8x128xf32> -> vector<8x128xf32>
    %784 = arith.addf %781, %783 : vector<8x128xf32>
    %c7_551 = arith.constant 7 : index
    %c0_552 = arith.constant 0 : index
    %c0_553 = arith.constant 0 : index
    %785 = vector.load %arg25[%c7_551, %c0_552, %c0_553] : memref<8x8x128xf32, #tpu.memory_space<vmem>>, vector<1x8x128xf32>
    %786 = vector.shape_cast %785 : vector<1x8x128xf32> to vector<8x128xf32>
    %787 = vector.shape_cast %784 : vector<8x128xf32> to vector<1x8x128xf32>
    tpu.vector_store %arg25[%c7_551, %c0_552, %c0_553], %787 {strides = array<i32>} : memref<8x8x128xf32, #tpu.memory_space<vmem>>, vector<1x8x128xf32>,
    %c0_554 = arith.constant 0 : index
    %c0_555 = arith.constant 0 : index
    %788 = vector.load %arg26[%c0_554, %c0_555] : memref<8x32xf32, #tpu.memory_space<vmem>>, vector<8x32xf32>
    tpu.vector_store %arg26[%c0_554, %c0_555], %773 {strides = array<i32>} : memref<8x32xf32, #tpu.memory_space<vmem>>, vector<8x32xf32>,
    return
  }
  func.func @transform_0(%arg0: i32, %arg1: i32) -> (i32, i32, i32, i32) {
    %c0_i32 = arith.constant 0 : i32
    %c0_i32_0 = arith.constant 0 : i32
    %c0_i32_1 = arith.constant 0 : i32
    return %arg1, %c0_i32, %arg0, %c0_i32_0 : i32, i32, i32, i32
  }
  func.func @transform_1(%arg0: i32, %arg1: i32) -> (i32, i32, i32) {
    %c0_i32 = arith.constant 0 : i32
    %c0_i32_0 = arith.constant 0 : i32
    return %arg1, %arg0, %c0_i32 : i32, i32, i32
  }
  func.func @transform_2(%arg0: i32, %arg1: i32) -> (i32, i32, i32) {
    %c0_i32 = arith.constant 0 : i32
    %c0_i32_0 = arith.constant 0 : i32
    %c0_i32_1 = arith.constant 0 : i32
    return %c0_i32, %arg0, %c0_i32_0 : i32, i32, i32
  }
  func.func @transform_3(%arg0: i32, %arg1: i32) -> (i32, i32, i32) {
    %c0_i32 = arith.constant 0 : i32
    %c0_i32_0 = arith.constant 0 : i32
    %c0_i32_1 = arith.constant 0 : i32
    return %c0_i32, %arg0, %c0_i32_0 : i32, i32, i32
  }
  func.func @transform_4(%arg0: i32, %arg1: i32) -> (i32, i32) {
    %c0_i32 = arith.constant 0 : i32
    %c0_i32_0 = arith.constant 0 : i32
    return %arg0, %c0_i32 : i32, i32
  }
  func.func @transform_5(%arg0: i32, %arg1: i32) -> (i32, i32) {
    %c0_i32 = arith.constant 0 : i32
    %c0_i32_0 = arith.constant 0 : i32
    %c0_i32_1 = arith.constant 0 : i32
    return %c0_i32, %c0_i32_0 : i32, i32
  }
  func.func @transform_6(%arg0: i32, %arg1: i32) -> (i32, i32) {
    %c0_i32 = arith.constant 0 : i32
    %c0_i32_0 = arith.constant 0 : i32
    %c0_i32_1 = arith.constant 0 : i32
    return %c0_i32, %c0_i32_0 : i32, i32
  }
  func.func @transform_7(%arg0: i32, %arg1: i32) -> (i32, i32) {
    %c0_i32 = arith.constant 0 : i32
    %c0_i32_0 = arith.constant 0 : i32
    %c0_i32_1 = arith.constant 0 : i32
    return %c0_i32, %c0_i32_0 : i32, i32
  }
  func.func @transform_8(%arg0: i32, %arg1: i32) -> (i32, i32) {
    %c0_i32 = arith.constant 0 : i32
    %c0_i32_0 = arith.constant 0 : i32
    %c0_i32_1 = arith.constant 0 : i32
    return %c0_i32, %c0_i32_0 : i32, i32
  }
  func.func @transform_9(%arg0: i32, %arg1: i32) -> (i32, i32) {
    %c0_i32 = arith.constant 0 : i32
    %c0_i32_0 = arith.constant 0 : i32
    %c0_i32_1 = arith.constant 0 : i32
    return %c0_i32, %c0_i32_0 : i32, i32
  }
  func.func @transform_10(%arg0: i32, %arg1: i32) -> (i32, i32) {
    %c0_i32 = arith.constant 0 : i32
    %c0_i32_0 = arith.constant 0 : i32
    %c0_i32_1 = arith.constant 0 : i32
    return %c0_i32, %c0_i32_0 : i32, i32
  }
  func.func @transform_11(%arg0: i32, %arg1: i32) -> (i32, i32) {
    %c0_i32 = arith.constant 0 : i32
    %c0_i32_0 = arith.constant 0 : i32
    %c0_i32_1 = arith.constant 0 : i32
    return %c0_i32, %c0_i32_0 : i32, i32
  }
  func.func @transform_12(%arg0: i32, %arg1: i32) -> (i32, i32) {
    %c0_i32 = arith.constant 0 : i32
    %c0_i32_0 = arith.constant 0 : i32
    %c0_i32_1 = arith.constant 0 : i32
    return %c0_i32, %c0_i32_0 : i32, i32
  }
  func.func @transform_13(%arg0: i32, %arg1: i32) -> (i32, i32) {
    %c0_i32 = arith.constant 0 : i32
    %c0_i32_0 = arith.constant 0 : i32
    %c0_i32_1 = arith.constant 0 : i32
    return %c0_i32, %c0_i32_0 : i32, i32
  }
  func.func @transform_14(%arg0: i32, %arg1: i32) -> (i32, i32) {
    %c0_i32 = arith.constant 0 : i32
    %c0_i32_0 = arith.constant 0 : i32
    %c0_i32_1 = arith.constant 0 : i32
    return %c0_i32, %c0_i32_0 : i32, i32
  }
  func.func @transform_15(%arg0: i32, %arg1: i32) -> (i32, i32) {
    %c0_i32 = arith.constant 0 : i32
    %c0_i32_0 = arith.constant 0 : i32
    %c0_i32_1 = arith.constant 0 : i32
    return %c0_i32, %c0_i32_0 : i32, i32
  }
  func.func @transform_16(%arg0: i32, %arg1: i32) -> (i32, i32) {
    %c0_i32 = arith.constant 0 : i32
    %c0_i32_0 = arith.constant 0 : i32
    %c0_i32_1 = arith.constant 0 : i32
    return %c0_i32, %c0_i32_0 : i32, i32
  }
  func.func @transform_17(%arg0: i32, %arg1: i32) -> (i32, i32) {
    %c0_i32 = arith.constant 0 : i32
    %c0_i32_0 = arith.constant 0 : i32
    %c0_i32_1 = arith.constant 0 : i32
    return %c0_i32, %c0_i32_0 : i32, i32
  }
  func.func @transform_18(%arg0: i32, %arg1: i32) -> (i32, i32) {
    %c0_i32 = arith.constant 0 : i32
    %c0_i32_0 = arith.constant 0 : i32
    %c0_i32_1 = arith.constant 0 : i32
    return %c0_i32, %c0_i32_0 : i32, i32
  }
  func.func @transform_19(%arg0: i32, %arg1: i32) -> (i32, i32) {
    %c0_i32 = arith.constant 0 : i32
    %c0_i32_0 = arith.constant 0 : i32
    %c0_i32_1 = arith.constant 0 : i32
    return %c0_i32, %c0_i32_0 : i32, i32
  }
  func.func @transform_20(%arg0: i32, %arg1: i32) -> (i32, i32) {
    %c0_i32 = arith.constant 0 : i32
    %c0_i32_0 = arith.constant 0 : i32
    %c0_i32_1 = arith.constant 0 : i32
    return %c0_i32, %c0_i32_0 : i32, i32
  }
  func.func @transform_21(%arg0: i32, %arg1: i32) -> (i32, i32) {
    %c0_i32 = arith.constant 0 : i32
    %c0_i32_0 = arith.constant 0 : i32
    %c0_i32_1 = arith.constant 0 : i32
    return %c0_i32, %c0_i32_0 : i32, i32
  }
  func.func @transform_22(%arg0: i32, %arg1: i32) -> (i32, i32) {
    %c0_i32 = arith.constant 0 : i32
    %c0_i32_0 = arith.constant 0 : i32
    %c0_i32_1 = arith.constant 0 : i32
    return %c0_i32, %c0_i32_0 : i32, i32
  }
  func.func @transform_23(%arg0: i32, %arg1: i32) -> (i32, i32, i32) {
    %c0_i32 = arith.constant 0 : i32
    %c0_i32_0 = arith.constant 0 : i32
    return %arg1, %arg0, %c0_i32 : i32, i32, i32
  }
}

</mosaic_0001>

<bundles_post_ra>
// kernel: seq2seq_attn_forward.2
= control target key start
LH: loop header
LB: loop body
LE: loop exit
PB: predicated region body
PF: predicated region fallthrough
CT: control target
= control target key end

     0   :  { %vm90_vm0 = vcmask 261120   ;;  %v5953_v0 = vmov 0.0|0.0   ;;  %v5954_v4 = vmov 0.0   ;;  %vm5955_vm1 = vmmov 0   ;;  %s6965_s2 = inlined_call_operand.vmem [shape: f32[32,32], index: 2, kind: input, shape index: {}]   ;;  %s6966_s3 = inlined_call_operand.vmem [shape: f32[32,32], index: 3, kind: input, shape index: {}]   ;;  %s6967_s4 = inlined_call_operand.vmem [shape: f32[32,32], index: 4, kind: input, shape index: {}]   ;;  %s6968_s6 = inlined_call_operand.vmem [shape: f32[32,32], index: 6, kind: input, shape index: {}]   ;;  %s6969_s7 = inlined_call_operand.vmem [shape: f32[32,32], index: 7, kind: input, shape index: {}]   ;;  %s6970_s8 = inlined_call_operand.vmem [shape: f32[32,32], index: 8, kind: input, shape index: {}]   ;;  %s6971_s0 = inlined_call_operand.vmem [shape: f32[8,3,8,32], index: 0, kind: input, shape index: {}]   ;;  %s6972_s1 = inlined_call_operand.vmem [shape: f32[8,3,8,32], index: 1, kind: input, shape index: {}]   ;;  %s6973_s5 = inlined_call_operand.vmem [shape: f32[1,32], index: 5, kind: input, shape index: {}]   ;;  %s6974_s9 = inlined_call_operand.vmem [shape: f32[1,32], index: 9, kind: input, shape index: {}]   ;;  %s6975_s13 = inlined_call_operand.vmem [shape: f32[8,8,32], index: 13, kind: output, shape index: {0}]   ;;  %s6976_s14 = inlined_call_operand.vmem [shape: f32[8,8,32], index: 14, kind: output, shape index: {1}]   ;;  %s6977_s10 = inlined_call_operand.vmem [shape: f32[32,32], index: 10, kind: input, shape index: {}]   ;;  %s6978_s11 = inlined_call_operand.vmem [shape: f32[32,32], index: 11, kind: input, shape index: {}]   ;;  %s6979_s12 = inlined_call_operand.vmem [shape: f32[1,32], index: 12, kind: input, shape index: {}]   ;;  %s6980_s15 = inlined_call_operand.vmem [shape: f32[8,32], index: 15, kind: output, shape index: {2}]  }
   0x1   :  { %5488 = vmatprep.subr.bf16.mxu0 %v5953_v0  ;;  %5494 = vmatprep.subr.bf16.mxu1 %v5953_v0  ;;  %v99_v1 = vld [vmem:[%s6965_s2] sm:$0xff]  ;;  %v100_v2 = vld [vmem:[%s6965_s2 + $0x8] sm:$0xff]  ;;  %91 = vst.msk [vmem:[#allocation2] sm:$0xff] %vm90_vm0, %v5954_v4  ;;  %92 = vst.msk [vmem:[#allocation3] sm:$0xff] %vm90_vm0, %v5954_v4 }
   0x2   :  { %v184_v3 = vld [vmem:[%s6966_s3] sm:$0xff]  ;;  %v6051_v5 = vpack.c.bf16 %v100_v2, %v99_v1  ;;  %v185_v6 = vld [vmem:[%s6966_s3 + $0x8] sm:$0xff]  ;;  %v101_v7 = vld [vmem:[%s6965_s2 + $0x10] sm:$0xff]  ;;  %4946 = vmatprep.mubr.msk.f32.mxu0 %vm5955_vm1, %v5954_v4  ;;  %4957 = vmatprep.mubr.msk.f32.mxu1 %vm5955_vm1, %v5954_v4 }
   0x3   :  { %v102_v8 = vld [vmem:[%s6965_s2 + $0x18] sm:$0xff]  ;;  %v6066_v9 = vpack.c.bf16 %v185_v6, %v184_v3  ;;  %v186_v10 = vld [vmem:[%s6966_s3 + $0x10] sm:$0xff]  ;;  %v265_v14 = vld [vmem:[%s6967_s4] sm:$0xff] }
   0x4   :  { %v187_v11 = vld [vmem:[%s6966_s3 + $0x18] sm:$0xff]  ;;  %5490 = vmatpush3.bf16.msra.mxu0 %v6051_v5  ;;  %v6075_v12 = vpack.c.bf16 %v102_v8, %v101_v7  ;;  %v266_v15 = vld [vmem:[%s6967_s4 + $0x8] sm:$0xff]  ;;  %v363_v16 = vld [vmem:[%s6968_s6] sm:$0xff] }
   0x5   :  { %5496 = vmatpush3.bf16.msra.mxu1 %v6066_v9  ;;  %5491 = vmatprep.subr.bf16.mxu0 %v5953_v0  ;;  %v6079_v13 = vpack.c.bf16 %v187_v11, %v186_v10  ;;  %v364_v17 = vld [vmem:[%s6968_s6 + $0x8] sm:$0xff]  ;;  %v6097_v19 = vpack.c.bf16 %v266_v15, %v265_v14  ;;  %v267_v21 = vld [vmem:[%s6967_s4 + $0x10] sm:$0xff]  ;;  %v268_v22 = vld [vmem:[%s6967_s4 + $0x18] sm:$0xff] }
   0x6   :  { %5497 = vmatprep.subr.bf16.mxu1 %v5953_v0  ;;  %v6100_v20 = vpack.c.bf16 %v364_v17, %v363_v16  ;;  %v365_v23 = vld [vmem:[%s6968_s6 + $0x10] sm:$0xff]  ;;  %v366_v24 = vld [vmem:[%s6968_s6 + $0x18] sm:$0xff]  ;;  %v6121_v25 = vpack.c.bf16 %v268_v22, %v267_v21  ;;  %v447_v27 = vld [vmem:[%s6969_s7] sm:$0xff] }
   0x7   :  { %v6124_v26 = vpack.c.bf16 %v366_v24, %v365_v23  ;;  %v448_v28 = vld [vmem:[%s6969_s7 + $0x8] sm:$0xff]  ;;  %v528_v29 = vld [vmem:[%s6970_s8] sm:$0xff]  ;;  %v449_v33 = vld [vmem:[%s6969_s7 + $0x10] sm:$0xff] }
   0x8   :  { %5493 = vmatpush3.bf16.msra.mxu0 %v6075_v12  ;;  %v6095_v18 = vld [vmem:[#allocation2] sm:$0xff]  ;;  %v529_v30 = vld [vmem:[%s6970_s8 + $0x8] sm:$0xff]  ;;  %v6145_v31 = vpack.c.bf16 %v448_v28, %v447_v27  ;;  %v450_v34 = vld [vmem:[%s6969_s7 + $0x18] sm:$0xff] }
   0x9   :  { %5499 = vmatpush3.bf16.msra.mxu1 %v6079_v13  ;;  %5500 = vmatprep.subr.bf16.mxu0 %v5953_v0  ;;  %v6148_v32 = vld [vmem:[#allocation3] sm:$0xff]  ;;  %v6158_v35 = vpack.c.bf16 %v529_v30, %v528_v29  ;;  %v530_v36 = vld [vmem:[%s6970_s8 + $0x10] sm:$0xff]  ;;  %v531_v37 = vld [vmem:[%s6970_s8 + $0x18] sm:$0xff]  ;;  %v6171_v38 = vpack.c.bf16 %v450_v34, %v449_v33 }
   0xa   :  { %5506 = vmatprep.subr.bf16.mxu1 %v5953_v0  ;;  %v6177_v39 = vpack.c.bf16 %v531_v37, %v530_v36  ;;  %v96_v40 = vld [vmem:[%s6971_s0] sm:$0xff]  ;;  %v97_v43 = vld [vmem:[%s6971_s0 + $0x8] sm:$0xff]  ;;  %v4540_v57 = vld [vmem:[%s6972_s1 + $0xb0] sm:$0xff] }
   0xb   :  { %4947 = vmatmul.mubr.msk.f32.vlgmr.msra.gmra.mrb[0].mxu0 %vm90_vm0, %v6095_v18  ;;  %v4539_v49 = vld [vmem:[%s6972_s1 + $0xa8] sm:$0xff]  ;;  %v6217_v7 = vld [vmem:[%s6973_s5] ss:$0 sm:$0xff]  ;;  %v98_v15 = vld [vmem:[%s6971_s0 + $0x10] sm:$0xff] }
   0xc   :  { %4958 = vmatmul.mubr.msk.f32.vlgmr.msra.gmra.mrb[0].mxu1 %vm90_vm0, %v6095_v18  ;;  %5502 = vmatpush3.bf16.msra.mxu0 %v6097_v19  ;;  %v6226_v22 = vld [vmem:[%s6974_s9] ss:$0 sm:$0xff]  ;;  %v4541_v28 = vld [vmem:[%s6972_s1 + $0xb8] sm:$0xff] }
   0xd   :  { %5508 = vmatpush3.bf16.msra.mxu1 %v6100_v20  ;;  %4979 = vmatprep.mubr.msk.f32.mxu1 %vm5955_vm1, %v5954_v4 }
   0xe   :  { %5509 = vmatprep.subr.bf16.mxu1 %v5953_v0  ;;  %5503 = vmatprep.subr.bf16.mxu0 %v5953_v0 }
   0xf   :  { %4968 = vmatprep.mubr.msk.f32.mxu0 %vm5955_vm1, %v5954_v4 }
  0x10   :  { %5505 = vmatpush3.bf16.msra.mxu0 %v6121_v25 }
  0x11   :  { %5511 = vmatpush3.bf16.msra.mxu1 %v6124_v26  ;;  %5512 = vmatprep.subr.bf16.mxu0 %v5953_v0 }
  0x12   :  { %5518 = vmatprep.subr.bf16.mxu1 %v5953_v0 }
  0x13   :  { %4969 = vmatmul.mubr.msk.f32.vlgmr.msra.gmra.mrb[2].mxu0 %vm90_vm0, %v6095_v18 }
  0x14   :  { %4980 = vmatmul.mubr.msk.f32.vlgmr.msra.gmra.mrb[2].mxu1 %vm90_vm0, %v6148_v32  ;;  %5514 = vmatpush3.bf16.msra.mxu0 %v6145_v31 }
  0x15   :  { %5515 = vmatprep.subr.bf16.mxu0 %v5953_v0  ;;  %4990 = vmatprep.mubr.msk.f32.mxu0 %vm5955_vm1, %v5954_v4 }
  0x16   :  { %5520 = vmatpush3.bf16.msra.mxu1 %v6158_v35  ;;  %5001 = vmatprep.mubr.msk.f32.mxu1 %vm5955_vm1, %v5954_v4 }
  0x17   :  { %5521 = vmatprep.subr.bf16.mxu1 %v5953_v0 }
  0x18   :  { %5517 = vmatpush3.bf16.msra.mxu0 %v6171_v38 }
  0x19   :  { %5524 = vmatprep.subr.bf16.mxu0 %v5953_v0 }
  0x1a   :  { %5523 = vmatpush3.bf16.msra.mxu1 %v6177_v39 }
  0x1b   :  { %4991 = vmatmul.mubr.msk.f32.vlgmr.msra.gmra.mrb[4].mxu0 %vm90_vm0, %v6148_v32  ;;  %5530 = vmatprep.subr.bf16.mxu1 %v5953_v0 }
  0x1c   :  { %5526 = vmatpush3.bf16.msra.mxu0 %v6051_v5  ;;  %5012 = vmatprep.mubr.msk.f32.mxu0 %vm5955_vm1, %v5954_v4 }
  0x1d   :  { %5002 = vmatmul.mubr.msk.f32.vlgmr.msra.gmra.mrb[4].mxu1 %vm90_vm0, %v6148_v32  ;;  %5527 = vmatprep.subr.bf16.mxu0 %v5953_v0 }
  0x1e   :  { %5532 = vmatpush3.bf16.msra.mxu1 %v6066_v9  ;;  %5023 = vmatprep.mubr.msk.f32.mxu1 %vm5955_vm1, %v5954_v4 }
  0x1f   :  { %5533 = vmatprep.subr.bf16.mxu1 %v5953_v0 }
  0x20   :  { %5529 = vmatpush3.bf16.msra.mxu0 %v6075_v12 }
  0x21   :  { %5536 = vmatprep.subr.bf16.mxu0 %v5953_v0 }
  0x22   :  { %5535 = vmatpush3.bf16.msra.mxu1 %v6079_v13 }
  0x23   :  { %5542 = vmatprep.subr.bf16.mxu1 %v5953_v0 }
  0xde   :  { %v173_v41 = vpop.f32.mrb[0].mxu0 }
  0xdf   :  { %v177_v42 = vadd.f32 %v173_v41, %v96_v40  ;;  %v254_v44 = vpop.f32.mrb[0].mxu1  ;;  %v4948_v45 = vpop.f32.mrb[1].mxu0 }
  0xe0   :  { %v4959_v46 = vpop.f32.mrb[1].mxu1  ;;  %v258_v48 = vadd.f32 %v254_v44, %v97_v43 }
  0xe1   :  { %v4534_v47 = vmul.f32 -1.442695, %v177_v42 }
  0xe2   :  { %v4536_v50 = vmul.f32 -1.442695, %v258_v48 }
  0xe3   :  { %5791 = vpow2.f32 %v4534_v47 }
  0xe4   :  { %5793 = vpow2.f32 %v4536_v50  ;;  %v4550_v50 = vld [vmem:[%s6971_s0 + $0x20] sm:$0xff] }
  0xe6   :  { %v342_v51 = vpop.f32.mrb[2].mxu0 }
  0xe7   :  { %v436_v52 = vpop.f32.mrb[2].mxu1  ;;  %v4970_v53 = vpop.f32.mrb[3].mxu0  ;;  %v343_v11 = vadd.f32 %v6217_v7, %v342_v51 }
  0xe8   :  { %v440_v54 = vadd.f32 %v4539_v49, %v436_v52  ;;  %v4981_v55 = vpop.f32.mrb[3].mxu1 }
  0xe9   :  { %v4559_v55 = vld [vmem:[%s6972_s1 + $0x90] sm:$0xff] }
  0xea   :  { %v4543_v56 = vmul.f32 -1.442695, %v440_v54 }
  0xec   :  { %5795 = vpow2.f32 %v4543_v56 }
  0xed   :  { %v5792_v58 = vpop.eup %5791 }
  0xee   :  { %v181_v59 = vadd.f32 1.0, %v5792_v58  ;;  %v517_v60 = vpop.f32.mrb[4].mxu0  ;;  %v5794_v3 = vpop.eup %5793 }
  0xef   :  { %v521_v61 = vadd.f32 %v4540_v57, %v517_v60  ;;  %v4992_v62 = vpop.f32.mrb[5].mxu0  ;;  %v262_v8 = vadd.f32 1.0, %v5794_v3 }
  0xf0   :  { %5797 = vrcp.f32 %v181_v59  ;;  %v605_v63 = vpop.f32.mrb[4].mxu1 }
  0xf1   :  { %v4545_v1 = vmul.f32 -1.442695, %v521_v61  ;;  %v5003_v2 = vpop.f32.mrb[5].mxu1  ;;  %v606_v24 = vadd.f32 %v6226_v22, %v605_v63  ;;  %v4560_v63 = vld [vmem:[%s6972_s1 + $0x98] sm:$0xff] }
  0xf3   :  { %5799 = vpow2.f32 %v4545_v1 }
  0xf6   :  { %v5796_v6 = vpop.eup %5795 }
  0xf7   :  { %v444_v10 = vadd.f32 1.0, %v5796_v6 }
  0xf9   :  { %5801 = vrcp.f32 %v444_v10 }
  0xfa   :  { %v5798_v14 = vpop.eup %5797  ;;  %5803 = vrcp.f32 %v262_v8 }
  0xfb   :  { %v346_v16 = vmul.f32 %v5798_v14, %v343_v11 }
  0xfd   :  { %v5800_v17 = vpop.eup %5799  ;;  %v347_v21 = vadd.f32 %v346_v16, %v98_v15 }
  0xfe   :  { %v525_v23 = vadd.f32 1.0, %v5800_v17 }
  0xff   :  { %5805 = vtanh.f32 %v347_v21 }
 0x100   :  { %5807 = vrcp.f32 %v525_v23 }
 0x103   :  { %v5802_v27 = vpop.eup %5801 }
 0x104   :  { %v609_v29 = vmul.f32 %v5802_v27, %v606_v24  ;;  %v5804_v30 = vpop.eup %5803  ;;  %v4551_v27 = vld [vmem:[%s6971_s0 + $0x28] sm:$0xff] }
 0x105   :  { %v349_v34 = vsub.f32 1.0, %v5804_v30  ;;  %v351_v40 = vmul.f32 %v5804_v30, %v6095_v18 }
 0x106   :  { %v610_v33 = vadd.f32 %v4541_v28, %v609_v29 }
 0x108   :  { %5809 = vtanh.f32 %v610_v33 }
 0x109   :  { %v5806_v36 = vpop.eup %5805 }
 0x10a   :  { %v350_v37 = vmul.f32 %v5806_v36, %v349_v34  ;;  %v5808_v41 = vpop.eup %5807 }
 0x10b   :  { %v612_v43 = vsub.f32 1.0, %v5808_v41  ;;  %v614_v45 = vmul.f32 %v5808_v41, %v6148_v32  ;;  %v4549_v32 = vld [vmem:[%s6971_s0 + $0x18] sm:$0xff] }
 0x10c   :  { %v6233_v42 = vadd.f32 %v351_v40, %v350_v37  ;;  %v4561_v37 = vld [vmem:[%s6972_s1 + $0xa0] sm:$0xff] }
 0x10e   :  { %358 = vst.msk [vmem:[%s6975_s13] sm:$0xff] %vm90_vm0, %v6233_v42  ;;  %5013 = vmatmul.mubr.msk.f32.vlgmr.msra.gmra.mrb[6].mxu0 %vm90_vm0, %v6233_v42  ;;  %5024 = vmatmul.mubr.msk.f32.vlgmr.msra.gmra.mrb[6].mxu1 %vm90_vm0, %v6233_v42 }
 0x10f   :  { %5538 = vmatpush3.bf16.msra.mxu0 %v6097_v19  ;;  %5544 = vmatpush3.bf16.msra.mxu1 %v6100_v20 }
 0x110   :  { %5539 = vmatprep.subr.bf16.mxu0 %v5953_v0  ;;  %5545 = vmatprep.subr.bf16.mxu1 %v5953_v0 }
 0x111   :  { %5034 = vmatprep.mubr.msk.f32.mxu0 %vm5955_vm1, %v5954_v4  ;;  %5045 = vmatprep.mubr.msk.f32.mxu1 %vm5955_vm1, %v5954_v4 }
 0x112   :  { %v5810_v18 = vpop.eup %5809 }
 0x113   :  { %5541 = vmatpush3.bf16.msra.mxu0 %v6121_v25  ;;  %5547 = vmatpush3.bf16.msra.mxu1 %v6124_v26  ;;  %v613_v44 = vmul.f32 %v5810_v18, %v612_v43 }
 0x114   :  { %5548 = vmatprep.subr.bf16.mxu0 %v5953_v0  ;;  %5554 = vmatprep.subr.bf16.mxu1 %v5953_v0 }
 0x115   :  { %v6257_v46 = vadd.f32 %v614_v45, %v613_v44 }
 0x116   :  { %5035 = vmatmul.mubr.msk.f32.vlgmr.msra.gmra.mrb[8].mxu0 %vm90_vm0, %v6233_v42 }
 0x117   :  { %4548 = vst.msk [vmem:[%s6976_s14 + $0x38] sm:$0xff] %vm90_vm0, %v6257_v46  ;;  %5046 = vmatmul.mubr.msk.f32.vlgmr.msra.gmra.mrb[8].mxu1 %vm90_vm0, %v6257_v46  ;;  %5550 = vmatpush3.bf16.msra.mxu0 %v6145_v31 }
 0x118   :  { %5556 = vmatpush3.bf16.msra.mxu1 %v6158_v35  ;;  %5551 = vmatprep.subr.bf16.mxu0 %v5953_v0 }
 0x119   :  { %5557 = vmatprep.subr.bf16.mxu1 %v5953_v0  ;;  %5056 = vmatprep.mubr.msk.f32.mxu0 %vm5955_vm1, %v5954_v4 }
 0x11a   :  { %5067 = vmatprep.mubr.msk.f32.mxu1 %vm5955_vm1, %v5954_v4 }
 0x11b   :  { %5553 = vmatpush3.bf16.msra.mxu0 %v6171_v38 }
 0x11c   :  { %5559 = vmatpush3.bf16.msra.mxu1 %v6177_v39  ;;  %5560 = vmatprep.subr.bf16.mxu0 %v5953_v0 }
 0x11d   :  { %5566 = vmatprep.subr.bf16.mxu1 %v5953_v0 }
 0x11e   :  { %5057 = vmatmul.mubr.msk.f32.vlgmr.msra.gmra.mrb[10].mxu0 %vm90_vm0, %v6257_v46 }
 0x11f   :  { %5068 = vmatmul.mubr.msk.f32.vlgmr.msra.gmra.mrb[10].mxu1 %vm90_vm0, %v6257_v46  ;;  %5562 = vmatpush3.bf16.msra.mxu0 %v6051_v5 }
 0x120   :  { %5568 = vmatpush3.bf16.msra.mxu1 %v6066_v9  ;;  %5563 = vmatprep.subr.bf16.mxu0 %v5953_v0 }
 0x121   :  { %5569 = vmatprep.subr.bf16.mxu1 %v5953_v0  ;;  %5078 = vmatprep.mubr.msk.f32.mxu0 %vm5955_vm1, %v5954_v4 }
 0x122   :  { %5089 = vmatprep.mubr.msk.f32.mxu1 %vm5955_vm1, %v5954_v4 }
 0x123   :  { %5565 = vmatpush3.bf16.msra.mxu0 %v6075_v12 }
 0x124   :  { %5571 = vmatpush3.bf16.msra.mxu1 %v6079_v13  ;;  %5572 = vmatprep.subr.bf16.mxu0 %v5953_v0 }
 0x125   :  { %5578 = vmatprep.subr.bf16.mxu1 %v5953_v0 }
 0x1e1   :  { %v701_v47 = vpop.f32.mrb[6].mxu0  ;;  %v782_v48 = vpop.f32.mrb[6].mxu1 }
 0x1e2   :  { %v705_v49 = vadd.f32 %v4549_v32, %v701_v47  ;;  %v5014_v51 = vpop.f32.mrb[7].mxu0  ;;  %v5025_v52 = vpop.f32.mrb[7].mxu1  ;;  %v786_v54 = vadd.f32 %v4550_v50, %v782_v48 }
 0x1e4   :  { %v4553_v53 = vmul.f32 -1.442695, %v705_v49  ;;  %v4555_v56 = vmul.f32 -1.442695, %v786_v54  ;;  %v4570_v54 = vld [vmem:[%s6971_s0 + $0x38] sm:$0xff] }
 0x1e6   :  { %5811 = vpow2.f32 %v4553_v53 }
 0x1e7   :  { %5813 = vpow2.f32 %v4555_v56 }
 0x1e9   :  { %v870_v57 = vpop.f32.mrb[8].mxu0 }
 0x1ea   :  { %v5036_v58 = vpop.f32.mrb[9].mxu0  ;;  %v965_v59 = vpop.f32.mrb[8].mxu1  ;;  %v871_v23 = vadd.f32 %v6217_v7, %v870_v57 }
 0x1eb   :  { %v969_v60 = vadd.f32 %v4559_v55, %v965_v59  ;;  %v5047_v61 = vpop.f32.mrb[9].mxu1 }
 0x1ed   :  { %v4563_v62 = vmul.f32 -1.442695, %v969_v60 }
 0x1ef   :  { %5815 = vpow2.f32 %v4563_v62 }
 0x1f0   :  { %v5812_v1 = vpop.eup %5811 }
 0x1f1   :  { %v709_v2 = vadd.f32 1.0, %v5812_v1  ;;  %v1046_v3 = vpop.f32.mrb[10].mxu0  ;;  %v5814_v15 = vpop.eup %5813 }
 0x1f2   :  { %v1050_v6 = vadd.f32 %v4560_v63, %v1046_v3  ;;  %v1134_v8 = vpop.f32.mrb[10].mxu1  ;;  %v5058_v10 = vpop.f32.mrb[11].mxu0  ;;  %v790_v17 = vadd.f32 1.0, %v5814_v15 }
 0x1f3   :  { %5817 = vrcp.f32 %v709_v2  ;;  %v5069_v11 = vpop.f32.mrb[11].mxu1  ;;  %v1135_v34 = vadd.f32 %v6226_v22, %v1134_v8  ;;  %v4580_v2 = vld [vmem:[%s6972_s1 + $0x80] sm:$0xff] }
 0x1f4   :  { %v4565_v14 = vmul.f32 -1.442695, %v1050_v6 }
 0x1f6   :  { %5819 = vpow2.f32 %v4565_v14 }
 0x1f9   :  { %v5816_v16 = vpop.eup %5815 }
 0x1fa   :  { %v973_v21 = vadd.f32 1.0, %v5816_v16 }
 0x1fc   :  { %5821 = vrcp.f32 %v973_v21 }
 0x1fd   :  { %v5818_v24 = vpop.eup %5817  ;;  %5823 = vrcp.f32 %v790_v17 }
 0x1fe   :  { %v874_v28 = vmul.f32 %v5818_v24, %v871_v23 }
 0x200   :  { %v5820_v29 = vpop.eup %5819  ;;  %v875_v30 = vadd.f32 %v4551_v27, %v874_v28 }
 0x201   :  { %v1054_v33 = vadd.f32 1.0, %v5820_v29  ;;  %v4571_v29 = vld [vmem:[%s6971_s0 + $0x40] sm:$0xff] }
 0x202   :  { %5825 = vtanh.f32 %v875_v30 }
 0x203   :  { %5827 = vrcp.f32 %v1054_v33 }
 0x206   :  { %v5822_v36 = vpop.eup %5821 }
 0x207   :  { %v1138_v40 = vmul.f32 %v5822_v36, %v1135_v34  ;;  %v5824_v41 = vpop.eup %5823 }
 0x208   :  { %v877_v18 = vsub.f32 1.0, %v5824_v41  ;;  %v879_v32 = vmul.f32 %v5824_v41, %v6233_v42  ;;  %v4581_v41 = vld [vmem:[%s6972_s1 + $0x88] sm:$0xff] }
 0x209   :  { %v1139_v43 = vadd.f32 %v4561_v37, %v1138_v40 }
 0x20b   :  { %5829 = vtanh.f32 %v1139_v43 }
 0x20c   :  { %v5826_v44 = vpop.eup %5825 }
 0x20d   :  { %v878_v45 = vmul.f32 %v5826_v44, %v877_v18  ;;  %v5828_v48 = vpop.eup %5827 }
 0x20e   :  { %v1141_v42 = vsub.f32 1.0, %v5828_v48  ;;  %v1143_v51 = vmul.f32 %v5828_v48, %v6257_v46 }
 0x20f   :  { %v6317_v47 = vadd.f32 %v879_v32, %v878_v45 }
 0x211   :  { %4558 = vst.msk [vmem:[%s6975_s13 + $0x8] sm:$0xff] %vm90_vm0, %v6317_v47  ;;  %5079 = vmatmul.mubr.msk.f32.vlgmr.msra.gmra.mrb[12].mxu0 %vm90_vm0, %v6317_v47  ;;  %5090 = vmatmul.mubr.msk.f32.vlgmr.msra.gmra.mrb[12].mxu1 %vm90_vm0, %v6317_v47 }
 0x212   :  { %5574 = vmatpush3.bf16.msra.mxu0 %v6097_v19  ;;  %5580 = vmatpush3.bf16.msra.mxu1 %v6100_v20 }
 0x213   :  { %5575 = vmatprep.subr.bf16.mxu0 %v5953_v0  ;;  %5581 = vmatprep.subr.bf16.mxu1 %v5953_v0 }
 0x214   :  { %5100 = vmatprep.mubr.msk.f32.mxu0 %vm5955_vm1, %v5954_v4  ;;  %5111 = vmatprep.mubr.msk.f32.mxu1 %vm5955_vm1, %v5954_v4 }
 0x215   :  { %v5830_v49 = vpop.eup %5829 }
 0x216   :  { %5577 = vmatpush3.bf16.msra.mxu0 %v6121_v25  ;;  %5583 = vmatpush3.bf16.msra.mxu1 %v6124_v26  ;;  %v1142_v50 = vmul.f32 %v5830_v49, %v1141_v42 }
 0x217   :  { %5584 = vmatprep.subr.bf16.mxu0 %v5953_v0  ;;  %5590 = vmatprep.subr.bf16.mxu1 %v5953_v0 }
 0x218   :  { %v6341_v52 = vadd.f32 %v1143_v51, %v1142_v50 }
 0x219   :  { %5101 = vmatmul.mubr.msk.f32.vlgmr.msra.gmra.mrb[14].mxu0 %vm90_vm0, %v6317_v47 }
 0x21a   :  { %4568 = vst.msk [vmem:[%s6976_s14 + $0x30] sm:$0xff] %vm90_vm0, %v6341_v52  ;;  %5112 = vmatmul.mubr.msk.f32.vlgmr.msra.gmra.mrb[14].mxu1 %vm90_vm0, %v6341_v52  ;;  %5586 = vmatpush3.bf16.msra.mxu0 %v6145_v31 }
 0x21b   :  { %5592 = vmatpush3.bf16.msra.mxu1 %v6158_v35  ;;  %5587 = vmatprep.subr.bf16.mxu0 %v5953_v0 }
 0x21c   :  { %5593 = vmatprep.subr.bf16.mxu1 %v5953_v0  ;;  %5122 = vmatprep.mubr.msk.f32.mxu0 %vm5955_vm1, %v5954_v4 }
 0x21d   :  { %5133 = vmatprep.mubr.msk.f32.mxu1 %vm5955_vm1, %v5954_v4 }
 0x21e   :  { %5589 = vmatpush3.bf16.msra.mxu0 %v6171_v38 }
 0x21f   :  { %5595 = vmatpush3.bf16.msra.mxu1 %v6177_v39  ;;  %5596 = vmatprep.subr.bf16.mxu0 %v5953_v0 }
 0x220   :  { %5602 = vmatprep.subr.bf16.mxu1 %v5953_v0 }
 0x221   :  { %5123 = vmatmul.mubr.msk.f32.vlgmr.msra.gmra.mrb[16].mxu0 %vm90_vm0, %v6341_v52 }
 0x222   :  { %5134 = vmatmul.mubr.msk.f32.vlgmr.msra.gmra.mrb[16].mxu1 %vm90_vm0, %v6341_v52  ;;  %5598 = vmatpush3.bf16.msra.mxu0 %v6051_v5  ;;  %v4569_v5 = vld [vmem:[%s6971_s0 + $0x30] sm:$0xff] }
 0x223   :  { %5604 = vmatpush3.bf16.msra.mxu1 %v6066_v9  ;;  %5599 = vmatprep.subr.bf16.mxu0 %v5953_v0 }
 0x224   :  { %5605 = vmatprep.subr.bf16.mxu1 %v5953_v0  ;;  %5144 = vmatprep.mubr.msk.f32.mxu0 %vm5955_vm1, %v5954_v4 }
 0x225   :  { %5155 = vmatprep.mubr.msk.f32.mxu1 %vm5955_vm1, %v5954_v4 }
 0x226   :  { %5601 = vmatpush3.bf16.msra.mxu0 %v6075_v12 }
 0x227   :  { %5607 = vmatpush3.bf16.msra.mxu1 %v6079_v13  ;;  %5608 = vmatprep.subr.bf16.mxu0 %v5953_v0  ;;  %v4579_v13 = vld [vmem:[%s6972_s1 + $0x78] sm:$0xff] }
 0x228   :  { %5614 = vmatprep.subr.bf16.mxu1 %v5953_v0 }
 0x2e4   :  { %v1230_v9 = vpop.f32.mrb[12].mxu0  ;;  %v1311_v46 = vpop.f32.mrb[12].mxu1 }
 0x2e5   :  { %v1234_v53 = vadd.f32 %v4569_v5, %v1230_v9  ;;  %v5080_v55 = vpop.f32.mrb[13].mxu0  ;;  %v5091_v56 = vpop.f32.mrb[13].mxu1  ;;  %v1315_v57 = vadd.f32 %v4570_v54, %v1311_v46  ;;  %v2218_v9 = vld [vmem:[%s6965_s2 + $0x18] sm:$0xff]  ;;  %v2301_v46 = vld [vmem:[%s6966_s3 + $0x10] sm:$0xff] }
 0x2e6   :  { %v2302_v54 = vld [vmem:[%s6966_s3 + $0x18] sm:$0xff]  ;;  %v4589_v56 = vld [vmem:[%s6971_s0 + $0x48] sm:$0xff] }
 0x2e7   :  { %v4573_v12 = vmul.f32 -1.442695, %v1234_v53  ;;  %v4575_v58 = vmul.f32 -1.442695, %v1315_v57  ;;  %v6490_v55 = vpack.c.bf16 %v2302_v54, %v2301_v46  ;;  %v2383_v54 = vld [vmem:[%s6967_s4 + $0x18] sm:$0xff] }
 0x2e9   :  { %5831 = vpow2.f32 %v4573_v12 }
 0x2ea   :  { %5833 = vpow2.f32 %v4575_v58  ;;  %v4590_v58 = vld [vmem:[%s6971_s0 + $0x50] sm:$0xff] }
 0x2ec   :  { %v1399_v59 = vpop.f32.mrb[14].mxu0 }
 0x2ed   :  { %v5102_v60 = vpop.f32.mrb[15].mxu0  ;;  %v1494_v61 = vpop.f32.mrb[14].mxu1  ;;  %v1400_v27 = vadd.f32 %v6217_v7, %v1399_v59 }
 0x2ee   :  { %v1498_v62 = vadd.f32 %v4579_v13, %v1494_v61  ;;  %v5113_v63 = vpop.f32.mrb[15].mxu1 }
 0x2ef   :  { %v4599_v63 = vld [vmem:[%s6972_s1 + $0x60] sm:$0xff] }
 0x2f0   :  { %v4583_v1 = vmul.f32 -1.442695, %v1498_v62 }
 0x2f2   :  { %5835 = vpow2.f32 %v4583_v1 }
 0x2f3   :  { %v5832_v3 = vpop.eup %5831 }
 0x2f4   :  { %v1238_v6 = vadd.f32 1.0, %v5832_v3  ;;  %v1575_v8 = vpop.f32.mrb[16].mxu0  ;;  %v5834_v17 = vpop.eup %5833 }
 0x2f5   :  { %v1579_v10 = vadd.f32 %v4580_v2, %v1575_v8  ;;  %v1663_v11 = vpop.f32.mrb[16].mxu1  ;;  %v5124_v14 = vpop.f32.mrb[17].mxu0  ;;  %v1319_v23 = vadd.f32 1.0, %v5834_v17 }
 0x2f6   :  { %5837 = vrcp.f32 %v1238_v6  ;;  %v5135_v15 = vpop.f32.mrb[17].mxu1  ;;  %v1664_v37 = vadd.f32 %v6226_v22, %v1663_v11  ;;  %v4600_v14 = vld [vmem:[%s6972_s1 + $0x68] sm:$0xff] }
 0x2f7   :  { %v4585_v16 = vmul.f32 -1.442695, %v1579_v10 }
 0x2f9   :  { %5839 = vpow2.f32 %v4585_v16 }
 0x2fc   :  { %v5836_v21 = vpop.eup %5835 }
 0x2fd   :  { %v1502_v24 = vadd.f32 1.0, %v5836_v21 }
 0x2ff   :  { %5841 = vrcp.f32 %v1502_v24 }
 0x300   :  { %v5838_v28 = vpop.eup %5837  ;;  %5843 = vrcp.f32 %v1319_v23 }
 0x301   :  { %v1403_v30 = vmul.f32 %v5838_v28, %v1400_v27 }
 0x303   :  { %v5840_v33 = vpop.eup %5839  ;;  %v1404_v34 = vadd.f32 %v4571_v29, %v1403_v30 }
 0x304   :  { %v1583_v36 = vadd.f32 1.0, %v5840_v33 }
 0x305   :  { %5845 = vtanh.f32 %v1404_v34 }
 0x306   :  { %5847 = vrcp.f32 %v1583_v36 }
 0x309   :  { %v5842_v40 = vpop.eup %5841 }
 0x30a   :  { %v1667_v43 = vmul.f32 %v5842_v40, %v1664_v37  ;;  %v5844_v18 = vpop.eup %5843  ;;  %v4591_v40 = vld [vmem:[%s6971_s0 + $0x58] sm:$0xff] }
 0x30b   :  { %v1406_v45 = vsub.f32 1.0, %v5844_v18  ;;  %v1408_v42 = vmul.f32 %v5844_v18, %v6317_v47 }
 0x30c   :  { %v1668_v44 = vadd.f32 %v4581_v41, %v1667_v43 }
 0x30e   :  { %5849 = vtanh.f32 %v1668_v44 }
 0x30f   :  { %v5846_v32 = vpop.eup %5845 }
 0x310   :  { %v1407_v48 = vmul.f32 %v5846_v32, %v1406_v45  ;;  %v5848_v50 = vpop.eup %5847 }
 0x311   :  { %v1670_v47 = vsub.f32 1.0, %v5848_v50 }
 0x312   :  { %v6401_v49 = vadd.f32 %v1408_v42, %v1407_v48  ;;  %v4601_v48 = vld [vmem:[%s6972_s1 + $0x70] sm:$0xff] }
 0x314   :  { %4578 = vst.msk [vmem:[%s6975_s13 + $0x10] sm:$0xff] %vm90_vm0, %v6401_v49  ;;  %5145 = vmatmul.mubr.msk.f32.vlgmr.msra.gmra.mrb[18].mxu0 %vm90_vm0, %v6401_v49  ;;  %5156 = vmatmul.mubr.msk.f32.vlgmr.msra.gmra.mrb[18].mxu1 %vm90_vm0, %v6401_v49 }
 0x315   :  { %5610 = vmatpush3.bf16.msra.mxu0 %v6097_v19  ;;  %5616 = vmatpush3.bf16.msra.mxu1 %v6100_v20  ;;  %v1672_v19 = vmul.f32 %v5848_v50, %v6341_v52  ;;  %v2217_v52 = vld [vmem:[%s6965_s2 + $0x10] sm:$0xff] }
 0x316   :  { %5611 = vmatprep.subr.bf16.mxu0 %v5953_v0  ;;  %5617 = vmatprep.subr.bf16.mxu1 %v5953_v0  ;;  %v6485_v53 = vpack.c.bf16 %v2218_v9, %v2217_v52  ;;  %v2382_v9 = vld [vmem:[%s6967_s4 + $0x10] sm:$0xff] }
 0x317   :  { %5166 = vmatprep.mubr.msk.f32.mxu0 %vm5955_vm1, %v5954_v4  ;;  %5177 = vmatprep.mubr.msk.f32.mxu1 %vm5955_vm1, %v5954_v4 }
 0x318   :  { %v5850_v51 = vpop.eup %5849 }
 0x319   :  { %5613 = vmatpush3.bf16.msra.mxu0 %v6121_v25  ;;  %5619 = vmatpush3.bf16.msra.mxu1 %v6124_v26  ;;  %v1671_v5 = vmul.f32 %v5850_v51, %v1670_v47  ;;  %v2215_v25 = vld [vmem:[%s6965_s2] sm:$0xff]  ;;  %v2216_v26 = vld [vmem:[%s6965_s2 + $0x8] sm:$0xff] }
 0x31a   :  { %5620 = vmatprep.subr.bf16.mxu0 %v5953_v0  ;;  %5626 = vmatprep.subr.bf16.mxu1 %v5953_v0  ;;  %v2380_v47 = vld [vmem:[%s6967_s4] sm:$0xff] }
 0x31b   :  { %v6425_v20 = vadd.f32 %v1672_v19, %v1671_v5  ;;  %v2381_v5 = vld [vmem:[%s6967_s4 + $0x8] sm:$0xff] }
 0x31c   :  { %5167 = vmatmul.mubr.msk.f32.vlgmr.msra.gmra.mrb[20].mxu0 %vm90_vm0, %v6401_v49  ;;  %v2480_v19 = vld [vmem:[%s6968_s6 + $0x8] sm:$0xff] }
 0x31d   :  { %4588 = vst.msk [vmem:[%s6976_s14 + $0x28] sm:$0xff] %vm90_vm0, %v6425_v20  ;;  %5178 = vmatmul.mubr.msk.f32.vlgmr.msra.gmra.mrb[20].mxu1 %vm90_vm0, %v6425_v20  ;;  %5622 = vmatpush3.bf16.msra.mxu0 %v6145_v31  ;;  %v2299_v31 = vld [vmem:[%s6966_s3] sm:$0xff] }
 0x31e   :  { %5628 = vmatpush3.bf16.msra.mxu1 %v6158_v35  ;;  %5623 = vmatprep.subr.bf16.mxu0 %v5953_v0  ;;  %v6465_v35 = vpack.c.bf16 %v2216_v26, %v2215_v25 }
 0x31f   :  { %5629 = vmatprep.subr.bf16.mxu1 %v5953_v0  ;;  %5188 = vmatprep.mubr.msk.f32.mxu0 %vm5955_vm1, %v5954_v4 }
 0x320   :  { %5199 = vmatprep.mubr.msk.f32.mxu1 %vm5955_vm1, %v5954_v4 }
 0x321   :  { %5625 = vmatpush3.bf16.msra.mxu0 %v6171_v38  ;;  %v2300_v38 = vld [vmem:[%s6966_s3 + $0x8] sm:$0xff] }
 0x322   :  { %5631 = vmatpush3.bf16.msra.mxu1 %v6177_v39  ;;  %5632 = vmatprep.subr.bf16.mxu0 %v5953_v0  ;;  %v6470_v39 = vpack.c.bf16 %v2300_v38, %v2299_v31  ;;  %v6529_v38 = vpack.c.bf16 %v2381_v5, %v2380_v47 }
 0x323   :  { %5638 = vmatprep.subr.bf16.mxu1 %v5953_v0 }
 0x324   :  { %5189 = vmatmul.mubr.msk.f32.vlgmr.msra.gmra.mrb[22].mxu0 %vm90_vm0, %v6425_v20 }
 0x325   :  { %5200 = vmatmul.mubr.msk.f32.vlgmr.msra.gmra.mrb[22].mxu1 %vm90_vm0, %v6425_v20  ;;  %5210 = vmatprep.mubr.msk.f32.mxu0 %vm5955_vm1, %v5954_v4 }
 0x326   :  { %5221 = vmatprep.mubr.msk.f32.mxu1 %vm5955_vm1, %v5954_v4  ;;  %5634 = vmatpush3.bf16.msra.mxu0 %v6465_v35 }
 0x327   :  { %5640 = vmatpush3.bf16.msra.mxu1 %v6470_v39  ;;  %5635 = vmatprep.subr.bf16.mxu0 %v5953_v0 }
 0x328   :  { %5641 = vmatprep.subr.bf16.mxu1 %v5953_v0 }
 0x32a   :  { %5637 = vmatpush3.bf16.msra.mxu0 %v6485_v53 }
 0x32b   :  { %5643 = vmatpush3.bf16.msra.mxu1 %v6490_v55  ;;  %5644 = vmatprep.subr.bf16.mxu0 %v5953_v0 }
 0x32c   :  { %5650 = vmatprep.subr.bf16.mxu1 %v5953_v0 }
 0x3e7   :  { %v1759_v12 = vpop.f32.mrb[18].mxu0  ;;  %v1840_v57 = vpop.f32.mrb[18].mxu1 }
 0x3e8   :  { %v1763_v13 = vadd.f32 %v4589_v56, %v1759_v12  ;;  %v5146_v59 = vpop.f32.mrb[19].mxu0  ;;  %v5157_v60 = vpop.f32.mrb[19].mxu1  ;;  %v1844_v62 = vadd.f32 %v4590_v58, %v1840_v57  ;;  %v2481_v56 = vld [vmem:[%s6968_s6 + $0x10] sm:$0xff]  ;;  %v6558_v57 = vpack.c.bf16 %v2383_v54, %v2382_v9  ;;  %v2563_v58 = vld [vmem:[%s6969_s7] sm:$0xff] }
 0x3e9   :  { %v2564_v59 = vld [vmem:[%s6969_s7 + $0x8] sm:$0xff] }
 0x3ea   :  { %v4593_v61 = vmul.f32 -1.442695, %v1763_v13  ;;  %v4595_v1 = vmul.f32 -1.442695, %v1844_v62  ;;  %v2645_v62 = vld [vmem:[%s6970_s8 + $0x8] sm:$0xff] }
 0x3ec   :  { %5851 = vpow2.f32 %v4593_v61  ;;  %v2644_v61 = vld [vmem:[%s6970_s8] sm:$0xff] }
 0x3ed   :  { %5853 = vpow2.f32 %v4595_v1 }
 0x3ef   :  { %v1928_v2 = vpop.f32.mrb[20].mxu0 }
 0x3f0   :  { %v5168_v3 = vpop.f32.mrb[21].mxu0  ;;  %v2023_v6 = vpop.f32.mrb[20].mxu1  ;;  %v1929_v36 = vadd.f32 %v6217_v7, %v1928_v2 }
 0x3f1   :  { %v2027_v8 = vadd.f32 %v4599_v63, %v2023_v6  ;;  %v5179_v10 = vpop.f32.mrb[21].mxu1  ;;  %v6583_v3 = vpack.c.bf16 %v2564_v59, %v2563_v58  ;;  %v6587_v6 = vpack.c.bf16 %v2645_v62, %v2644_v61  ;;  %v6668_v59 = vld [vmem:[%s6974_s9] ss:$0 sm:$0xff] }
 0x3f2   :  { %v2566_v10 = vld [vmem:[%s6969_s7 + $0x18] sm:$0xff] }
 0x3f3   :  { %v4603_v11 = vmul.f32 -1.442695, %v2027_v8  ;;  %v2565_v8 = vld [vmem:[%s6969_s7 + $0x10] sm:$0xff] }
 0x3f5   :  { %5855 = vpow2.f32 %v4603_v11 }
 0x3f6   :  { %v5852_v15 = vpop.eup %5851 }
 0x3f7   :  { %v1767_v16 = vadd.f32 1.0, %v5852_v15  ;;  %v2104_v17 = vpop.f32.mrb[22].mxu0  ;;  %v5854_v29 = vpop.eup %5853  ;;  %v6613_v15 = vpack.c.bf16 %v2566_v10, %v2565_v8 }
 0x3f8   :  { %v2108_v21 = vadd.f32 %v4600_v14, %v2104_v17  ;;  %v2192_v23 = vpop.f32.mrb[22].mxu1  ;;  %v5190_v24 = vpop.f32.mrb[23].mxu0  ;;  %v1848_v33 = vadd.f32 1.0, %v5854_v29  ;;  %v2647_v14 = vld [vmem:[%s6970_s8 + $0x18] sm:$0xff]  ;;  %v4609_v17 = vld [vmem:[%s6971_s0 + $0x60] sm:$0xff] }
 0x3f9   :  { %5857 = vrcp.f32 %v1767_v16  ;;  %v5201_v27 = vpop.f32.mrb[23].mxu1  ;;  %v2193_v45 = vadd.f32 %v6226_v22, %v2192_v23  ;;  %v2479_v22 = vld [vmem:[%s6968_s6] sm:$0xff] }
 0x3fa   :  { %v4605_v28 = vmul.f32 -1.442695, %v2108_v21  ;;  %v6531_v52 = vpack.c.bf16 %v2480_v19, %v2479_v22  ;;  %v4610_v27 = vld [vmem:[%s6971_s0 + $0x68] sm:$0xff] }
 0x3fc   :  { %5859 = vpow2.f32 %v4605_v28 }
 0x3ff   :  { %v5856_v30 = vpop.eup %5855 }
 0x400   :  { %v2031_v34 = vadd.f32 1.0, %v5856_v30 }
 0x402   :  { %5861 = vrcp.f32 %v2031_v34  ;;  %v4619_v34 = vld [vmem:[%s6972_s1 + $0x48] sm:$0xff] }
 0x403   :  { %v5858_v37 = vpop.eup %5857  ;;  %5863 = vrcp.f32 %v1848_v33 }
 0x404   :  { %v1932_v41 = vmul.f32 %v5858_v37, %v1929_v36 }
 0x406   :  { %v5860_v43 = vpop.eup %5859  ;;  %v1933_v18 = vadd.f32 %v4591_v40, %v1932_v41 }
 0x407   :  { %v2112_v44 = vadd.f32 1.0, %v5860_v43 }
 0x408   :  { %5865 = vtanh.f32 %v1933_v18 }
 0x409   :  { %5867 = vrcp.f32 %v2112_v44 }
 0x40c   :  { %v5862_v32 = vpop.eup %5861 }
 0x40d   :  { %v2196_v7 = vmul.f32 %v5862_v32, %v2193_v45  ;;  %v5864_v42 = vpop.eup %5863  ;;  %v4620_v45 = vld [vmem:[%s6972_s1 + $0x50] sm:$0xff] }
 0x40e   :  { %v1935_v51 = vsub.f32 1.0, %v5864_v42  ;;  %v1937_v31 = vmul.f32 %v5864_v42, %v6401_v49  ;;  %v2482_v49 = vld [vmem:[%s6968_s6 + $0x18] sm:$0xff] }
 0x40f   :  { %v2197_v50 = vadd.f32 %v4601_v48, %v2196_v7  ;;  %v6560_v13 = vpack.c.bf16 %v2482_v49, %v2481_v56  ;;  %v4611_v56 = vld [vmem:[%s6971_s0 + $0x70] sm:$0xff] }
 0x411   :  { %5869 = vtanh.f32 %v2197_v50 }
 0x412   :  { %v5866_v25 = vpop.eup %5865 }
 0x413   :  { %v1936_v26 = vmul.f32 %v5866_v25, %v1935_v51  ;;  %v5868_v12 = vpop.eup %5867  ;;  %v6659_v25 = vld [vmem:[%s6973_s5] ss:$0 sm:$0xff] }
 0x414   :  { %v2199_v60 = vsub.f32 1.0, %v5868_v12  ;;  %v2201_v2 = vmul.f32 %v5868_v12, %v6425_v20  ;;  %v2646_v20 = vld [vmem:[%s6970_s8 + $0x10] sm:$0xff] }
 0x415   :  { %v6536_v46 = vadd.f32 %v1937_v31, %v1936_v26  ;;  %v6617_v16 = vpack.c.bf16 %v2647_v14, %v2646_v20 }
 0x417   :  { %4598 = vst.msk [vmem:[%s6975_s13 + $0x18] sm:$0xff] %vm90_vm0, %v6536_v46  ;;  %5211 = vmatmul.mubr.msk.f32.vlgmr.msra.gmra.mrb[24].mxu0 %vm90_vm0, %v6536_v46  ;;  %5222 = vmatmul.mubr.msk.f32.vlgmr.msra.gmra.mrb[24].mxu1 %vm90_vm0, %v6536_v46 }
 0x418   :  { %5646 = vmatpush3.bf16.msra.mxu0 %v6529_v38  ;;  %5652 = vmatpush3.bf16.msra.mxu1 %v6531_v52 }
 0x419   :  { %5647 = vmatprep.subr.bf16.mxu0 %v5953_v0  ;;  %5653 = vmatprep.subr.bf16.mxu1 %v5953_v0 }
 0x41a   :  { %5232 = vmatprep.mubr.msk.f32.mxu0 %vm5955_vm1, %v5954_v4  ;;  %5243 = vmatprep.mubr.msk.f32.mxu1 %vm5955_vm1, %v5954_v4 }
 0x41b   :  { %v5870_v63 = vpop.eup %5869 }
 0x41c   :  { %5649 = vmatpush3.bf16.msra.mxu0 %v6558_v57  ;;  %5655 = vmatpush3.bf16.msra.mxu1 %v6560_v13  ;;  %v2200_v1 = vmul.f32 %v5870_v63, %v2199_v60  ;;  %v4621_v63 = vld [vmem:[%s6972_s1 + $0x58] sm:$0xff] }
 0x41d   :  { %5656 = vmatprep.subr.bf16.mxu0 %v5953_v0  ;;  %5662 = vmatprep.subr.bf16.mxu1 %v5953_v0 }
 0x41e   :  { %v6595_v11 = vadd.f32 %v2201_v2, %v2200_v1 }
 0x41f   :  { %5233 = vmatmul.mubr.msk.f32.vlgmr.msra.gmra.mrb[26].mxu0 %vm90_vm0, %v6536_v46 }
 0x420   :  { %4608 = vst.msk [vmem:[%s6976_s14 + $0x20] sm:$0xff] %vm90_vm0, %v6595_v11  ;;  %5244 = vmatmul.mubr.msk.f32.vlgmr.msra.gmra.mrb[26].mxu1 %vm90_vm0, %v6595_v11  ;;  %5658 = vmatpush3.bf16.msra.mxu0 %v6583_v3 }
 0x421   :  { %5664 = vmatpush3.bf16.msra.mxu1 %v6587_v6  ;;  %5659 = vmatprep.subr.bf16.mxu0 %v5953_v0 }
 0x422   :  { %5665 = vmatprep.subr.bf16.mxu1 %v5953_v0  ;;  %5254 = vmatprep.mubr.msk.f32.mxu0 %vm5955_vm1, %v5954_v4 }
 0x423   :  { %5265 = vmatprep.mubr.msk.f32.mxu1 %vm5955_vm1, %v5954_v4 }
 0x424   :  { %5661 = vmatpush3.bf16.msra.mxu0 %v6613_v15 }
 0x425   :  { %5667 = vmatpush3.bf16.msra.mxu1 %v6617_v16  ;;  %5668 = vmatprep.subr.bf16.mxu0 %v5953_v0 }
 0x426   :  { %5674 = vmatprep.subr.bf16.mxu1 %v5953_v0 }
 0x427   :  { %5255 = vmatmul.mubr.msk.f32.vlgmr.msra.gmra.mrb[28].mxu0 %vm90_vm0, %v6595_v11 }
 0x428   :  { %5266 = vmatmul.mubr.msk.f32.vlgmr.msra.gmra.mrb[28].mxu1 %vm90_vm0, %v6595_v11  ;;  %5670 = vmatpush3.bf16.msra.mxu0 %v6465_v35 }
 0x429   :  { %5676 = vmatpush3.bf16.msra.mxu1 %v6470_v39  ;;  %5671 = vmatprep.subr.bf16.mxu0 %v5953_v0 }
 0x42a   :  { %5677 = vmatprep.subr.bf16.mxu1 %v5953_v0  ;;  %5276 = vmatprep.mubr.msk.f32.mxu0 %vm5955_vm1, %v5954_v4 }
 0x42b   :  { %5287 = vmatprep.mubr.msk.f32.mxu1 %vm5955_vm1, %v5954_v4 }
 0x42c   :  { %5673 = vmatpush3.bf16.msra.mxu0 %v6485_v53 }
 0x42d   :  { %5679 = vmatpush3.bf16.msra.mxu1 %v6490_v55  ;;  %5680 = vmatprep.subr.bf16.mxu0 %v5953_v0 }
 0x42e   :  { %5686 = vmatprep.subr.bf16.mxu1 %v5953_v0 }
 0x4ea   :  { %v2288_v21 = vpop.f32.mrb[24].mxu0  ;;  %v2369_v23 = vpop.f32.mrb[24].mxu1 }
 0x4eb   :  { %v2292_v24 = vadd.f32 %v4609_v17, %v2288_v21  ;;  %v5212_v28 = vpop.f32.mrb[25].mxu0  ;;  %v5223_v29 = vpop.f32.mrb[25].mxu1  ;;  %v2373_v33 = vadd.f32 %v4610_v27, %v2369_v23 }
 0x4ed   :  { %v4613_v30 = vmul.f32 -1.442695, %v2292_v24  ;;  %v4615_v36 = vmul.f32 -1.442695, %v2373_v33 }
 0x4ef   :  { %5871 = vpow2.f32 %v4613_v30 }
 0x4f0   :  { %5873 = vpow2.f32 %v4615_v36  ;;  %v4630_v36 = vld [vmem:[%s6971_s0 + $0x80] sm:$0xff] }
 0x4f2   :  { %v2457_v37 = vpop.f32.mrb[26].mxu0 }
 0x4f3   :  { %v5234_v40 = vpop.f32.mrb[27].mxu0  ;;  %v2552_v41 = vpop.f32.mrb[26].mxu1  ;;  %v2458_v9 = vadd.f32 %v6659_v25, %v2457_v37 }
 0x4f4   :  { %v2556_v43 = vadd.f32 %v4619_v34, %v2552_v41  ;;  %v5245_v18 = vpop.f32.mrb[27].mxu1 }
 0x4f5   :  { %v4639_v18 = vld [vmem:[%s6972_s1 + $0x30] sm:$0xff] }
 0x4f6   :  { %v4623_v44 = vmul.f32 -1.442695, %v2556_v43 }
 0x4f8   :  { %5875 = vpow2.f32 %v4623_v44 }
 0x4f9   :  { %v5872_v32 = vpop.eup %5871 }
 0x4fa   :  { %v2296_v48 = vadd.f32 1.0, %v5872_v32  ;;  %v2633_v7 = vpop.f32.mrb[28].mxu0  ;;  %v5874_v22 = vpop.eup %5873 }
 0x4fb   :  { %v2637_v42 = vadd.f32 %v4620_v45, %v2633_v7  ;;  %v2721_v50 = vpop.f32.mrb[28].mxu1  ;;  %v5256_v47 = vpop.f32.mrb[29].mxu0  ;;  %v2377_v26 = vadd.f32 1.0, %v5874_v22 }
 0x4fc   :  { %5877 = vrcp.f32 %v2296_v48  ;;  %v5267_v51 = vpop.f32.mrb[29].mxu1  ;;  %v2722_v61 = vadd.f32 %v6668_v59, %v2721_v50  ;;  %v4640_v47 = vld [vmem:[%s6972_s1 + $0x38] sm:$0xff] }
 0x4fd   :  { %v4625_v5 = vmul.f32 -1.442695, %v2637_v42 }
 0x4ff   :  { %5879 = vpow2.f32 %v4625_v5 }
 0x502   :  { %v5876_v19 = vpop.eup %5875 }
 0x503   :  { %v2560_v31 = vadd.f32 1.0, %v5876_v19 }
 0x505   :  { %5881 = vrcp.f32 %v2560_v31 }
 0x506   :  { %v5878_v54 = vpop.eup %5877  ;;  %5883 = vrcp.f32 %v2377_v26 }
 0x507   :  { %v2461_v49 = vmul.f32 %v5878_v54, %v2458_v9 }
 0x509   :  { %v5880_v12 = vpop.eup %5879  ;;  %v2462_v58 = vadd.f32 %v4611_v56, %v2461_v49 }
 0x50a   :  { %v2641_v60 = vadd.f32 1.0, %v5880_v12 }
 0x50b   :  { %5885 = vtanh.f32 %v2462_v58 }
 0x50c   :  { %5887 = vrcp.f32 %v2641_v60 }
 0x50f   :  { %v5882_v62 = vpop.eup %5881 }
 0x510   :  { %v2725_v1 = vmul.f32 %v5882_v62, %v2722_v61  ;;  %v5884_v2 = vpop.eup %5883  ;;  %v4631_v62 = vld [vmem:[%s6971_s0 + $0x88] sm:$0xff] }
 0x511   :  { %v2464_v10 = vsub.f32 1.0, %v5884_v2  ;;  %v2466_v17 = vmul.f32 %v5884_v2, %v6536_v46 }
 0x512   :  { %v2726_v8 = vadd.f32 %v4621_v63, %v2725_v1 }
 0x514   :  { %5889 = vtanh.f32 %v2726_v8 }
 0x515   :  { %v5886_v20 = vpop.eup %5885 }
 0x516   :  { %v2465_v14 = vmul.f32 %v5886_v20, %v2464_v10  ;;  %v5888_v23 = vpop.eup %5887 }
 0x517   :  { %v2728_v46 = vsub.f32 1.0, %v5888_v23  ;;  %v2730_v28 = vmul.f32 %v5888_v23, %v6595_v11  ;;  %v4629_v11 = vld [vmem:[%s6971_s0 + $0x78] sm:$0xff] }
 0x518   :  { %v6675_v21 = vadd.f32 %v2466_v17, %v2465_v14  ;;  %v4641_v14 = vld [vmem:[%s6972_s1 + $0x40] sm:$0xff] }
 0x51a   :  { %4618 = vst.msk [vmem:[%s6975_s13 + $0x20] sm:$0xff] %vm90_vm0, %v6675_v21  ;;  %5277 = vmatmul.mubr.msk.f32.vlgmr.msra.gmra.mrb[30].mxu0 %vm90_vm0, %v6675_v21  ;;  %5288 = vmatmul.mubr.msk.f32.vlgmr.msra.gmra.mrb[30].mxu1 %vm90_vm0, %v6675_v21 }
 0x51b   :  { %5682 = vmatpush3.bf16.msra.mxu0 %v6529_v38  ;;  %5688 = vmatpush3.bf16.msra.mxu1 %v6531_v52 }
 0x51c   :  { %5683 = vmatprep.subr.bf16.mxu0 %v5953_v0  ;;  %5689 = vmatprep.subr.bf16.mxu1 %v5953_v0 }
 0x51d   :  { %5298 = vmatprep.mubr.msk.f32.mxu0 %vm5955_vm1, %v5954_v4  ;;  %5309 = vmatprep.mubr.msk.f32.mxu1 %vm5955_vm1, %v5954_v4 }
 0x51e   :  { %v5890_v24 = vpop.eup %5889 }
 0x51f   :  { %5685 = vmatpush3.bf16.msra.mxu0 %v6558_v57  ;;  %5691 = vmatpush3.bf16.msra.mxu1 %v6560_v13  ;;  %v2729_v27 = vmul.f32 %v5890_v24, %v2728_v46 }
 0x520   :  { %5692 = vmatprep.subr.bf16.mxu0 %v5953_v0  ;;  %5698 = vmatprep.subr.bf16.mxu1 %v5953_v0 }
 0x521   :  { %v6699_v29 = vadd.f32 %v2730_v28, %v2729_v27 }
 0x522   :  { %5299 = vmatmul.mubr.msk.f32.vlgmr.msra.gmra.mrb[32].mxu0 %vm90_vm0, %v6675_v21 }
 0x523   :  { %4628 = vst.msk [vmem:[%s6976_s14 + $0x18] sm:$0xff] %vm90_vm0, %v6699_v29  ;;  %5310 = vmatmul.mubr.msk.f32.vlgmr.msra.gmra.mrb[32].mxu1 %vm90_vm0, %v6699_v29  ;;  %5694 = vmatpush3.bf16.msra.mxu0 %v6583_v3 }
 0x524   :  { %5700 = vmatpush3.bf16.msra.mxu1 %v6587_v6  ;;  %5695 = vmatprep.subr.bf16.mxu0 %v5953_v0 }
 0x525   :  { %5701 = vmatprep.subr.bf16.mxu1 %v5953_v0  ;;  %5320 = vmatprep.mubr.msk.f32.mxu0 %vm5955_vm1, %v5954_v4 }
 0x526   :  { %5331 = vmatprep.mubr.msk.f32.mxu1 %vm5955_vm1, %v5954_v4 }
 0x527   :  { %5697 = vmatpush3.bf16.msra.mxu0 %v6613_v15 }
 0x528   :  { %5703 = vmatpush3.bf16.msra.mxu1 %v6617_v16  ;;  %5704 = vmatprep.subr.bf16.mxu0 %v5953_v0 }
 0x529   :  { %5710 = vmatprep.subr.bf16.mxu1 %v5953_v0 }
 0x52a   :  { %5321 = vmatmul.mubr.msk.f32.vlgmr.msra.gmra.mrb[34].mxu0 %vm90_vm0, %v6699_v29 }
 0x52b   :  { %5332 = vmatmul.mubr.msk.f32.vlgmr.msra.gmra.mrb[34].mxu1 %vm90_vm0, %v6699_v29  ;;  %5706 = vmatpush3.bf16.msra.mxu0 %v6465_v35 }
 0x52c   :  { %5712 = vmatpush3.bf16.msra.mxu1 %v6470_v39  ;;  %5707 = vmatprep.subr.bf16.mxu0 %v5953_v0 }
 0x52d   :  { %5713 = vmatprep.subr.bf16.mxu1 %v5953_v0  ;;  %5342 = vmatprep.mubr.msk.f32.mxu0 %vm5955_vm1, %v5954_v4 }
 0x52e   :  { %5353 = vmatprep.mubr.msk.f32.mxu1 %vm5955_vm1, %v5954_v4 }
 0x52f   :  { %5709 = vmatpush3.bf16.msra.mxu0 %v6485_v53 }
 0x530   :  { %5715 = vmatpush3.bf16.msra.mxu1 %v6490_v55  ;;  %5716 = vmatprep.subr.bf16.mxu0 %v5953_v0 }
 0x531   :  { %5722 = vmatprep.subr.bf16.mxu1 %v5953_v0 }
 0x5ed   :  { %v2817_v30 = vpop.f32.mrb[30].mxu0  ;;  %v2898_v33 = vpop.f32.mrb[30].mxu1 }
 0x5ee   :  { %v2821_v34 = vadd.f32 %v4629_v11, %v2817_v30  ;;  %v5278_v37 = vpop.f32.mrb[31].mxu0  ;;  %v5289_v40 = vpop.f32.mrb[31].mxu1  ;;  %v2902_v43 = vadd.f32 %v4630_v36, %v2898_v33 }
 0x5f0   :  { %v4633_v41 = vmul.f32 -1.442695, %v2821_v34  ;;  %v4635_v44 = vmul.f32 -1.442695, %v2902_v43  ;;  %v4650_v43 = vld [vmem:[%s6971_s0 + $0x98] sm:$0xff] }
 0x5f2   :  { %5891 = vpow2.f32 %v4633_v41 }
 0x5f3   :  { %5893 = vpow2.f32 %v4635_v44 }
 0x5f5   :  { %v2986_v45 = vpop.f32.mrb[32].mxu0 }
 0x5f6   :  { %v5300_v32 = vpop.f32.mrb[33].mxu0  ;;  %v3081_v48 = vpop.f32.mrb[32].mxu1  ;;  %v2987_v60 = vadd.f32 %v6659_v25, %v2986_v45 }
 0x5f7   :  { %v3085_v7 = vadd.f32 %v4639_v18, %v3081_v48  ;;  %v5311_v42 = vpop.f32.mrb[33].mxu1 }
 0x5f9   :  { %v4643_v50 = vmul.f32 -1.442695, %v3085_v7 }
 0x5fb   :  { %5895 = vpow2.f32 %v4643_v50 }
 0x5fc   :  { %v5892_v51 = vpop.eup %5891 }
 0x5fd   :  { %v2825_v5 = vadd.f32 1.0, %v5892_v51  ;;  %v3162_v22 = vpop.f32.mrb[34].mxu0  ;;  %v5894_v56 = vpop.eup %5893 }
 0x5fe   :  { %v3166_v19 = vadd.f32 %v4640_v47, %v3162_v22  ;;  %v3250_v26 = vpop.f32.mrb[34].mxu1  ;;  %v5322_v31 = vpop.f32.mrb[35].mxu0  ;;  %v2906_v12 = vadd.f32 1.0, %v5894_v56 }
 0x5ff   :  { %5897 = vrcp.f32 %v2825_v5  ;;  %v5333_v9 = vpop.f32.mrb[35].mxu1  ;;  %v3251_v10 = vadd.f32 %v6668_v59, %v3250_v26  ;;  %v4660_v5 = vld [vmem:[%s6972_s1 + $0x20] sm:$0xff] }
 0x600   :  { %v4645_v54 = vmul.f32 -1.442695, %v3166_v19 }
 0x602   :  { %5899 = vpow2.f32 %v4645_v54 }
 0x605   :  { %v5896_v49 = vpop.eup %5895 }
 0x606   :  { %v3089_v58 = vadd.f32 1.0, %v5896_v49 }
 0x608   :  { %5901 = vrcp.f32 %v3089_v58 }
 0x609   :  { %v5898_v61 = vpop.eup %5897  ;;  %5903 = vrcp.f32 %v2906_v12 }
 0x60a   :  { %v2990_v63 = vmul.f32 %v5898_v61, %v2987_v60 }
 0x60c   :  { %v5900_v1 = vpop.eup %5899  ;;  %v2991_v2 = vadd.f32 %v4631_v62, %v2990_v63 }
 0x60d   :  { %v3170_v8 = vadd.f32 1.0, %v5900_v1  ;;  %v4651_v1 = vld [vmem:[%s6971_s0 + $0xa0] sm:$0xff] }
 0x60e   :  { %5905 = vtanh.f32 %v2991_v2 }
 0x60f   :  { %5907 = vrcp.f32 %v3170_v8 }
 0x612   :  { %v5902_v20 = vpop.eup %5901 }
 0x613   :  { %v3254_v17 = vmul.f32 %v5902_v20, %v3251_v10  ;;  %v5904_v23 = vpop.eup %5903 }
 0x614   :  { %v2993_v24 = vsub.f32 1.0, %v5904_v23  ;;  %v2995_v11 = vmul.f32 %v5904_v23, %v6675_v21  ;;  %v4661_v23 = vld [vmem:[%s6972_s1 + $0x28] sm:$0xff] }
 0x615   :  { %v3255_v46 = vadd.f32 %v4641_v14, %v3254_v17 }
 0x617   :  { %5909 = vtanh.f32 %v3255_v46 }
 0x618   :  { %v5906_v27 = vpop.eup %5905 }
 0x619   :  { %v2994_v28 = vmul.f32 %v5906_v27, %v2993_v24  ;;  %v5908_v33 = vpop.eup %5907 }
 0x61a   :  { %v3257_v21 = vsub.f32 1.0, %v5908_v33  ;;  %v3259_v37 = vmul.f32 %v5908_v33, %v6699_v29 }
 0x61b   :  { %v6759_v30 = vadd.f32 %v2995_v11, %v2994_v28 }
 0x61d   :  { %4638 = vst.msk [vmem:[%s6975_s13 + $0x28] sm:$0xff] %vm90_vm0, %v6759_v30  ;;  %5343 = vmatmul.mubr.msk.f32.vlgmr.msra.gmra.mrb[36].mxu0 %vm90_vm0, %v6759_v30  ;;  %5354 = vmatmul.mubr.msk.f32.vlgmr.msra.gmra.mrb[36].mxu1 %vm90_vm0, %v6759_v30 }
 0x61e   :  { %5718 = vmatpush3.bf16.msra.mxu0 %v6529_v38  ;;  %5724 = vmatpush3.bf16.msra.mxu1 %v6531_v52 }
 0x61f   :  { %5719 = vmatprep.subr.bf16.mxu0 %v5953_v0  ;;  %5725 = vmatprep.subr.bf16.mxu1 %v5953_v0 }
 0x620   :  { %5364 = vmatprep.mubr.msk.f32.mxu0 %vm5955_vm1, %v5954_v4  ;;  %5375 = vmatprep.mubr.msk.f32.mxu1 %vm5955_vm1, %v5954_v4 }
 0x621   :  { %v5910_v34 = vpop.eup %5909 }
 0x622   :  { %5721 = vmatpush3.bf16.msra.mxu0 %v6558_v57  ;;  %5727 = vmatpush3.bf16.msra.mxu1 %v6560_v13  ;;  %v3258_v36 = vmul.f32 %v5910_v34, %v3257_v21 }
 0x623   :  { %5728 = vmatprep.subr.bf16.mxu0 %v5953_v0  ;;  %5734 = vmatprep.subr.bf16.mxu1 %v5953_v0 }
 0x624   :  { %v6783_v40 = vadd.f32 %v3259_v37, %v3258_v36 }
 0x625   :  { %5365 = vmatmul.mubr.msk.f32.vlgmr.msra.gmra.mrb[38].mxu0 %vm90_vm0, %v6759_v30 }
 0x626   :  { %4648 = vst.msk [vmem:[%s6976_s14 + $0x10] sm:$0xff] %vm90_vm0, %v6783_v40  ;;  %5376 = vmatmul.mubr.msk.f32.vlgmr.msra.gmra.mrb[38].mxu1 %vm90_vm0, %v6783_v40  ;;  %5730 = vmatpush3.bf16.msra.mxu0 %v6583_v3 }
 0x627   :  { %5736 = vmatpush3.bf16.msra.mxu1 %v6587_v6  ;;  %5731 = vmatprep.subr.bf16.mxu0 %v5953_v0 }
 0x628   :  { %5737 = vmatprep.subr.bf16.mxu1 %v5953_v0  ;;  %5386 = vmatprep.mubr.msk.f32.mxu0 %vm5955_vm1, %v5954_v4 }
 0x629   :  { %5397 = vmatprep.mubr.msk.f32.mxu1 %vm5955_vm1, %v5954_v4 }
 0x62a   :  { %5733 = vmatpush3.bf16.msra.mxu0 %v6613_v15 }
 0x62b   :  { %5739 = vmatpush3.bf16.msra.mxu1 %v6617_v16  ;;  %5740 = vmatprep.subr.bf16.mxu0 %v5953_v0 }
 0x62c   :  { %5746 = vmatprep.subr.bf16.mxu1 %v5953_v0 }
 0x62d   :  { %5387 = vmatmul.mubr.msk.f32.vlgmr.msra.gmra.mrb[40].mxu0 %vm90_vm0, %v6783_v40 }
 0x62e   :  { %5398 = vmatmul.mubr.msk.f32.vlgmr.msra.gmra.mrb[40].mxu1 %vm90_vm0, %v6783_v40  ;;  %5742 = vmatpush3.bf16.msra.mxu0 %v6465_v35  ;;  %v4649_v35 = vld [vmem:[%s6971_s0 + $0x90] sm:$0xff] }
 0x62f   :  { %5748 = vmatpush3.bf16.msra.mxu1 %v6470_v39  ;;  %5743 = vmatprep.subr.bf16.mxu0 %v5953_v0 }
 0x630   :  { %5749 = vmatprep.subr.bf16.mxu1 %v5953_v0  ;;  %5408 = vmatprep.mubr.msk.f32.mxu0 %vm5955_vm1, %v5954_v4 }
 0x631   :  { %5419 = vmatprep.mubr.msk.f32.mxu1 %vm5955_vm1, %v5954_v4 }
 0x632   :  { %5745 = vmatpush3.bf16.msra.mxu0 %v6485_v53 }
 0x633   :  { %5751 = vmatpush3.bf16.msra.mxu1 %v6490_v55  ;;  %5752 = vmatprep.subr.bf16.mxu0 %v5953_v0  ;;  %v4659_v55 = vld [vmem:[%s6972_s1 + $0x18] sm:$0xff] }
 0x634   :  { %5758 = vmatprep.subr.bf16.mxu1 %v5953_v0 }
 0x6f0   :  { %v3346_v39 = vpop.f32.mrb[36].mxu0  ;;  %v3427_v29 = vpop.f32.mrb[36].mxu1 }
 0x6f1   :  { %v3350_v41 = vadd.f32 %v4649_v35, %v3346_v39  ;;  %v5344_v18 = vpop.f32.mrb[37].mxu0  ;;  %v5355_v44 = vpop.f32.mrb[37].mxu1  ;;  %v3431_v45 = vadd.f32 %v4650_v43, %v3427_v29  ;;  %v4335_v39 = vld [vmem:[%s6978_s11 + $0x10] sm:$0xff] }
 0x6f2   :  { %v4669_v18 = vld [vmem:[%s6971_s0 + $0xa8] sm:$0xff] }
 0x6f3   :  { %v4653_v53 = vmul.f32 -1.442695, %v3350_v41  ;;  %v4655_v32 = vmul.f32 -1.442695, %v3431_v45  ;;  %v4336_v41 = vld [vmem:[%s6978_s11 + $0x18] sm:$0xff] }
 0x6f4   :  { %v5780_v43 = vpack.c.bf16 %v4336_v41, %v4335_v39 }
 0x6f5   :  { %5911 = vpow2.f32 %v4653_v53 }
 0x6f6   :  { %5913 = vpow2.f32 %v4655_v32 }
 0x6f8   :  { %v3515_v48 = vpop.f32.mrb[38].mxu0 }
 0x6f9   :  { %v5366_v7 = vpop.f32.mrb[39].mxu0  ;;  %v3610_v42 = vpop.f32.mrb[38].mxu1  ;;  %v3516_v62 = vadd.f32 %v6659_v25, %v3515_v48 }
 0x6fa   :  { %v3614_v50 = vadd.f32 %v4659_v55, %v3610_v42  ;;  %v5377_v47 = vpop.f32.mrb[39].mxu1  ;;  %v4670_v55 = vld [vmem:[%s6971_s0 + $0xb0] sm:$0xff] }
 0x6fc   :  { %v4663_v51 = vmul.f32 -1.442695, %v3614_v50 }
 0x6fe   :  { %5915 = vpow2.f32 %v4663_v51 }
 0x6ff   :  { %v5912_v22 = vpop.eup %5911 }
 0x700   :  { %v3354_v19 = vadd.f32 1.0, %v5912_v22  ;;  %v3691_v26 = vpop.f32.mrb[40].mxu0  ;;  %v5914_v12 = vpop.eup %5913 }
 0x701   :  { %v3695_v31 = vadd.f32 %v4660_v5, %v3691_v26  ;;  %v3779_v9 = vpop.f32.mrb[40].mxu1  ;;  %v5388_v54 = vpop.f32.mrb[41].mxu0  ;;  %v3435_v60 = vadd.f32 1.0, %v5914_v12 }
 0x702   :  { %5917 = vrcp.f32 %v3354_v19  ;;  %v5399_v56 = vpop.f32.mrb[41].mxu1  ;;  %v3780_v14 = vadd.f32 %v6668_v59, %v3779_v9 }
 0x703   :  { %v4665_v49 = vmul.f32 -1.442695, %v3695_v31  ;;  %v4063_v31 = vld [vmem:[%s6972_s1 + $0x8] sm:$0xff] }
 0x705   :  { %5919 = vpow2.f32 %v4665_v49 }
 0x708   :  { %v5916_v58 = vpop.eup %5915 }
 0x709   :  { %v3618_v61 = vadd.f32 1.0, %v5916_v58 }
 0x70b   :  { %5921 = vrcp.f32 %v3618_v61 }
 0x70c   :  { %v5918_v63 = vpop.eup %5917  ;;  %5923 = vrcp.f32 %v3435_v60 }
 0x70d   :  { %v3519_v2 = vmul.f32 %v5918_v63, %v3516_v62 }
 0x70f   :  { %v5920_v8 = vpop.eup %5919  ;;  %v3520_v10 = vadd.f32 %v4651_v1, %v3519_v2 }
 0x710   :  { %v3699_v20 = vadd.f32 1.0, %v5920_v8 }
 0x711   :  { %5925 = vtanh.f32 %v3520_v10 }
 0x712   :  { %5927 = vrcp.f32 %v3699_v20  ;;  %v4671_v20 = vld [vmem:[%s6971_s0 + $0xb8] sm:$0xff] }
 0x715   :  { %v5922_v17 = vpop.eup %5921 }
 0x716   :  { %v3783_v46 = vmul.f32 %v5922_v17, %v3780_v14  ;;  %v5924_v24 = vpop.eup %5923 }
 0x717   :  { %v3522_v28 = vsub.f32 1.0, %v5924_v24  ;;  %v3524_v21 = vmul.f32 %v5924_v24, %v6759_v30 }
 0x718   :  { %v3784_v27 = vadd.f32 %v4661_v23, %v3783_v46 }
 0x71a   :  { %5929 = vtanh.f32 %v3784_v27 }
 0x71b   :  { %v5926_v11 = vpop.eup %5925 }
 0x71c   :  { %v3523_v33 = vmul.f32 %v5926_v11, %v3522_v28  ;;  %v5928_v36 = vpop.eup %5927  ;;  %v4064_v28 = vld [vmem:[%s6972_s1 + $0x10] sm:$0xff] }
 0x71d   :  { %v3786_v30 = vsub.f32 1.0, %v5928_v36 }
 0x71e   :  { %v6843_v34 = vadd.f32 %v3524_v21, %v3523_v33 }
 0x720   :  { %4658 = vst.msk [vmem:[%s6975_s13 + $0x30] sm:$0xff] %vm90_vm0, %v6843_v34  ;;  %5409 = vmatmul.mubr.msk.f32.vlgmr.msra.gmra.mrb[42].mxu0 %vm90_vm0, %v6843_v34  ;;  %5420 = vmatmul.mubr.msk.f32.vlgmr.msra.gmra.mrb[42].mxu1 %vm90_vm0, %v6843_v34 }
 0x721   :  { %5754 = vmatpush3.bf16.msra.mxu0 %v6529_v38  ;;  %5760 = vmatpush3.bf16.msra.mxu1 %v6531_v52  ;;  %v3788_v38 = vmul.f32 %v5928_v36, %v6783_v40  ;;  %v4334_v40 = vld [vmem:[%s6978_s11 + $0x8] sm:$0xff] }
 0x722   :  { %5755 = vmatprep.subr.bf16.mxu0 %v5953_v0  ;;  %5761 = vmatprep.subr.bf16.mxu1 %v5953_v0 }
 0x723   :  { %5430 = vmatprep.mubr.msk.f32.mxu0 %vm5955_vm1, %v5954_v4  ;;  %5441 = vmatprep.mubr.msk.f32.mxu1 %vm5955_vm1, %v5954_v4 }
 0x724   :  { %v5930_v37 = vpop.eup %5929 }
 0x725   :  { %5757 = vmatpush3.bf16.msra.mxu0 %v6558_v57  ;;  %5763 = vmatpush3.bf16.msra.mxu1 %v6560_v13  ;;  %v3787_v35 = vmul.f32 %v5930_v37, %v3786_v30  ;;  %v4329_v57 = vld [vmem:[%s6977_s10] sm:$0xff]  ;;  %v4330_v13 = vld [vmem:[%s6977_s10 + $0x8] sm:$0xff] }
 0x726   :  { %5764 = vmatprep.subr.bf16.mxu0 %v5953_v0  ;;  %5770 = vmatprep.subr.bf16.mxu1 %v5953_v0 }
 0x727   :  { %v6867_v52 = vadd.f32 %v3788_v38, %v3787_v35 }
 0x728   :  { %5431 = vmatmul.mubr.msk.f32.vlgmr.msra.gmra.mrb[44].mxu0 %vm90_vm0, %v6843_v34 }
 0x729   :  { %4668 = vst.msk [vmem:[%s6976_s14 + $0x8] sm:$0xff] %vm90_vm0, %v6867_v52  ;;  %5442 = vmatmul.mubr.msk.f32.vlgmr.msra.gmra.mrb[44].mxu1 %vm90_vm0, %v6867_v52  ;;  %5766 = vmatpush3.bf16.msra.mxu0 %v6583_v3  ;;  %v5783_v3 = vpack.c.bf16 %v4330_v13, %v4329_v57 }
 0x72a   :  { %5772 = vmatpush3.bf16.msra.mxu1 %v6587_v6  ;;  %5767 = vmatprep.subr.bf16.mxu0 %v5953_v0  ;;  %v4331_v6 = vld [vmem:[%s6977_s10 + $0x10] sm:$0xff] }
 0x72b   :  { %5773 = vmatprep.subr.bf16.mxu1 %v5953_v0  ;;  %5452 = vmatprep.mubr.msk.f32.mxu0 %vm5955_vm1, %v5954_v4 }
 0x72c   :  { %5463 = vmatprep.mubr.msk.f32.mxu1 %vm5955_vm1, %v5954_v4 }
 0x72d   :  { %5769 = vmatpush3.bf16.msra.mxu0 %v6613_v15 }
 0x72e   :  { %5775 = vmatpush3.bf16.msra.mxu1 %v6617_v16  ;;  %5776 = vmatprep.subr.bf16.mxu0 %v5953_v0  ;;  %v4333_v16 = vld [vmem:[%s6978_s11] sm:$0xff] }
 0x72f   :  { %5782 = vmatprep.subr.bf16.mxu1 %v5953_v0  ;;  %v5777_v29 = vpack.c.bf16 %v4334_v40, %v4333_v16  ;;  %v4687_v16 = vld [vmem:[%s6979_s12] ss:$0 sm:$0xff] }
 0x730   :  { %5453 = vmatmul.mubr.msk.f32.vlgmr.msra.gmra.mrb[46].mxu0 %vm90_vm0, %v6867_v52 }
 0x731   :  { %5464 = vmatmul.mubr.msk.f32.vlgmr.msra.gmra.mrb[46].mxu1 %vm90_vm0, %v6867_v52  ;;  %5474 = vmatprep.mubr.msk.f32.mxu0 %vm5955_vm1, %v5954_v4 }
 0x732   :  { %5485 = vmatprep.mubr.msk.f32.mxu1 %vm5955_vm1, %v5954_v4  ;;  %5784 = vmatpush3.bf16.msra.mxu1 %v5783_v3  ;;  %v4332_v4 = vld [vmem:[%s6977_s10 + $0x18] sm:$0xff] }
 0x733   :  { %5785 = vmatprep.subr.bf16.mxu1 %v5953_v0  ;;  %v5786_v15 = vpack.c.bf16 %v4332_v4, %v4331_v6  ;;  %5778 = vmatpush3.bf16.msra.mxu0 %v5777_v29 }
 0x734   :  { %5779 = vmatprep.subr.bf16.mxu0 %v5953_v0  ;;  %v4062_v0 = vld [vmem:[%s6972_s1] sm:$0xff] }
 0x736   :  { %5787 = vmatpush3.bf16.msra.mxu1 %v5786_v15 }
 0x737   :  { %5781 = vmatpush3.bf16.msra.mxu0 %v5780_v43 }
 0x7f3   :  { %v3875_v44 = vpop.f32.mrb[42].mxu0  ;;  %v3956_v53 = vpop.f32.mrb[42].mxu1 }
 0x7f4   :  { %v3879_v45 = vadd.f32 %v4669_v18, %v3875_v44  ;;  %v5410_v32 = vpop.f32.mrb[43].mxu0  ;;  %v5421_v48 = vpop.f32.mrb[43].mxu1  ;;  %v3960_v42 = vadd.f32 %v4670_v55, %v3956_v53 }
 0x7f6   :  { %v4673_v7 = vmul.f32 -1.442695, %v3879_v45  ;;  %v4675_v50 = vmul.f32 -1.442695, %v3960_v42 }
 0x7f8   :  { %5931 = vpow2.f32 %v4673_v7 }
 0x7f9   :  { %5933 = vpow2.f32 %v4675_v50 }
 0x7fb   :  { %v4044_v47 = vpop.f32.mrb[44].mxu0 }
 0x7fc   :  { %v5432_v51 = vpop.f32.mrb[45].mxu0  ;;  %v4138_v5 = vpop.f32.mrb[44].mxu1  ;;  %v4045_v8 = vadd.f32 %v6659_v25, %v4044_v47 }
 0x7fd   :  { %v4142_v22 = vadd.f32 %v4138_v5, %v4062_v0  ;;  %v5443_v19 = vpop.f32.mrb[45].mxu1 }
 0x7ff   :  { %v4680_v26 = vmul.f32 -1.442695, %v4142_v22 }
 0x801   :  { %5935 = vpow2.f32 %v4680_v26 }
 0x802   :  { %v5932_v9 = vpop.eup %5931 }
 0x803   :  { %v3883_v54 = vadd.f32 1.0, %v5932_v9  ;;  %v4219_v56 = vpop.f32.mrb[46].mxu0  ;;  %v5934_v62 = vpop.eup %5933 }
 0x804   :  { %v4223_v49 = vadd.f32 %v4219_v56, %v4063_v31  ;;  %v4307_v12 = vpop.f32.mrb[46].mxu1  ;;  %v5454_v58 = vpop.f32.mrb[47].mxu0  ;;  %v3964_v1 = vadd.f32 1.0, %v5934_v62 }
 0x805   :  { %5937 = vrcp.f32 %v3883_v54  ;;  %v5465_v60 = vpop.f32.mrb[47].mxu1  ;;  %v4308_v24 = vadd.f32 %v6668_v59, %v4307_v12 }
 0x806   :  { %v4682_v61 = vmul.f32 -1.442695, %v4223_v49 }
 0x808   :  { %5939 = vpow2.f32 %v4682_v61 }
 0x80b   :  { %v5936_v63 = vpop.eup %5935 }
 0x80c   :  { %v4146_v2 = vadd.f32 1.0, %v5936_v63 }
 0x80e   :  { %5941 = vrcp.f32 %v4146_v2 }
 0x80f   :  { %v5938_v10 = vpop.eup %5937  ;;  %5943 = vrcp.f32 %v3964_v1 }
 0x810   :  { %v4048_v14 = vmul.f32 %v5938_v10, %v4045_v8 }
 0x812   :  { %v5940_v17 = vpop.eup %5939  ;;  %v4049_v23 = vadd.f32 %v4671_v20, %v4048_v14 }
 0x813   :  { %v4227_v46 = vadd.f32 1.0, %v5940_v17 }
 0x814   :  { %5945 = vtanh.f32 %v4049_v23 }
 0x815   :  { %5947 = vrcp.f32 %v4227_v46 }
 0x818   :  { %v5942_v27 = vpop.eup %5941 }
 0x819   :  { %v4311_v25 = vmul.f32 %v5942_v27, %v4308_v24  ;;  %v5944_v11 = vpop.eup %5943 }
 0x81a   :  { %v4051_v21 = vsub.f32 1.0, %v5944_v11  ;;  %v4053_v37 = vmul.f32 %v5944_v11, %v6843_v34 }
 0x81b   :  { %v4312_v33 = vadd.f32 %v4311_v25, %v4064_v28 }
 0x81d   :  { %5949 = vtanh.f32 %v4312_v33 }
 0x81e   :  { %v5946_v36 = vpop.eup %5945 }
 0x81f   :  { %v4052_v30 = vmul.f32 %v5946_v36, %v4051_v21  ;;  %v5948_v38 = vpop.eup %5947 }
 0x820   :  { %v4314_v59 = vsub.f32 1.0, %v5948_v38  ;;  %v4316_v3 = vmul.f32 %v5948_v38, %v6867_v52 }
 0x821   :  { %v4054_v35 = vadd.f32 %v4053_v37, %v4052_v30 }
 0x823   :  { %4678 = vst.msk [vmem:[%s6975_s13 + $0x38] sm:$0xff] %vm90_vm0, %v4054_v35  ;;  %4324 = vst.msk [vmem:[#allocation2] sm:$0xff] %vm90_vm0, %v4054_v35  ;;  %5486 = vmatmul.mubr.msk.f32.vlgmr.msra.gmra.mrb[48].mxu1 %vm90_vm0, %v4054_v35 }
 0x827   :  { %v5950_v57 = vpop.eup %5949 }
 0x828   :  { %v4315_v13 = vmul.f32 %v5950_v57, %v4314_v59 }
 0x82a   :  { %v4317_v6 = vadd.f32 %v4316_v3, %v4315_v13 }
 0x82c   :  { %4323 = vst.msk [vmem:[%s6976_s14] sm:$0xff] %vm90_vm0, %v4317_v6  ;;  %4325 = vst.msk [vmem:[#allocation3] sm:$0xff] %vm90_vm0, %v4317_v6  ;;  %5475 = vmatmul.mubr.msk.f32.vlgmr.msra.gmra.mrb[48].mxu0 %vm90_vm0, %v4317_v6 }
 0x8f6   :  { %v4479_v34 = vpop.f32.mrb[48].mxu1 }
 0x8f7   :  { %v5487_v4 = vpop.f32.mrb[49].mxu1 }
 0x8ff   :  { %v4406_v15 = vpop.f32.mrb[48].mxu0 }
 0x900   :  { %v4480_v40 = vadd.f32 %v4479_v34, %v4406_v15  ;;  %v5476_v39 = vpop.f32.mrb[49].mxu0 }
 0x902   :  { %v4490_v52 = vadd.f32 %v4687_v16, %v4480_v40 }
 0x904   :  { %5951 = vtanh.f32 %v4490_v52 }
 0x90e   :  { %v5952_v29 = vpop.eup %5951 }
 0x90f   :  { %4492 = vst.msk [vmem:[%s6980_s15] sm:$0xff] %vm90_vm0, %v5952_v29 }

// kernel: seq2seq_attn_forward.3
= control target key start
LH: loop header
LB: loop body
LE: loop exit
PB: predicated region body
PF: predicated region fallthrough
CT: control target
= control target key end

     0   :  { %vm79_vm0 = vcmask 261120   ;;  %v14516_v20 = vmov 0.0|0.0   ;;  %vm14517_vm1 = vmmov 0   ;;  %v14518_v36 = vmov 0.0   ;;  %s17603_s7 = inlined_call_operand.vmem [shape: f32[32,32], index: 7, kind: input, shape index: {}]   ;;  %s17604_s3 = inlined_call_operand.vmem [shape: f32[8,8,32], index: 3, kind: input, shape index: {}]   ;;  %s17605_s6 = inlined_call_operand.vmem [shape: f32[32,32], index: 6, kind: input, shape index: {}]   ;;  %s17606_s4 = inlined_call_operand.vmem [shape: f32[8,32], index: 4, kind: input, shape index: {}]   ;;  %s17607_s2 = inlined_call_operand.vmem [shape: f32[8,8,32], index: 2, kind: input, shape index: {}]   ;;  %s17608_s5 = inlined_call_operand.vmem [shape: f32[32,32], index: 5, kind: input, shape index: {}]   ;;  %s17609_s9 = inlined_call_operand.vmem [shape: f32[32,1], index: 9, kind: input, shape index: {}]   ;;  %s17610_s8 = inlined_call_operand.vmem [shape: f32[1,32], index: 8, kind: input, shape index: {}]   ;;  %s17611_s14 = inlined_call_operand.vmem [shape: f32[32,32], index: 14, kind: input, shape index: {}]   ;;  %s17612_s15 = inlined_call_operand.vmem [shape: f32[32,32], index: 15, kind: input, shape index: {}]   ;;  %s17613_s17 = inlined_call_operand.vmem [shape: f32[32,32], index: 17, kind: input, shape index: {}]   ;;  %s17614_s18 = inlined_call_operand.vmem [shape: f32[32,32], index: 18, kind: input, shape index: {}]   ;;  %s17615_s16 = inlined_call_operand.vmem [shape: f32[32,32], index: 16, kind: input, shape index: {}]   ;;  %s17616_s19 = inlined_call_operand.vmem [shape: f32[32,32], index: 19, kind: input, shape index: {}]   ;;  %s17617_s10 = inlined_call_operand.vmem [shape: f32[32,32], index: 10, kind: input, shape index: {}]   ;;  %s17618_s11 = inlined_call_operand.vmem [shape: f32[32,32], index: 11, kind: input, shape index: {}]   ;;  %s17619_s12 = inlined_call_operand.vmem [shape: f32[32,32], index: 12, kind: input, shape index: {}]   ;;  %s17620_s20 = inlined_call_operand.vmem [shape: f32[32,128], index: 20, kind: input, shape index: {}]   ;;  %s17621_s0 = inlined_call_operand.vmem [shape: f32[8,3,8,32], index: 0, kind: input, shape index: {}]   ;;  %s17622_s13 = inlined_call_operand.vmem [shape: f32[1,32], index: 13, kind: input, shape index: {}]   ;;  %s17623_s21 = inlined_call_operand.vmem [shape: f32[32,128], index: 21, kind: input, shape index: {}]   ;;  %s17624_s22 = inlined_call_operand.vmem [shape: f32[32,128], index: 22, kind: input, shape index: {}]   ;;  %s17625_s1 = inlined_call_operand.vmem [shape: f32[8,8,128], index: 1, kind: input, shape index: {}]   ;;  %s17626_s23 = inlined_call_operand.vmem [shape: f32[8,8,128], index: 23, kind: output, shape index: {}]  }
   0x1   :  { %17633 = sst [smem:[#allocation4_spill]] %s17603_s7  ;;  %vm622_vm2 = vcmask 7168  }
   0x2   :  { %17634 = sst [smem:[#allocation5_spill]] %s17604_s3  ;;  %s17641_s24 = sld [smem:[#allocation4_spill]] }
   0x3   :  { %17635 = sst [smem:[#allocation6_spill]] %s17605_s6  ;;  %s17642_s28 = sld [smem:[#allocation5_spill]] }
   0x4   :  { %17636 = sst [smem:[#allocation7_spill]] %s17606_s4  ;;  %s17643_s7 = sld [smem:[#allocation6_spill]] }
   0x5   :  { %17637 = sst [smem:[#allocation8_spill]] %s17607_s2  ;;  %s17644_s4 = sld [smem:[#allocation7_spill]] }
   0x6   :  { %17638 = sst [smem:[#allocation9_spill]] %s17608_s5  ;;  %s17645_s29 = sld [smem:[#allocation8_spill]] }
   0x7   :  { %17639 = sst [smem:[#allocation10_spill]] %s17609_s9  ;;  %s17646_s2 = sld [smem:[#allocation9_spill]] }
   0x8   :  { %17640 = sst [smem:[#allocation11_spill]] %s17610_s8  ;;  %v101_v0 = vld [vmem:[%s17641_s24] sm:$0xff]  ;;  %v102_v1 = vld [vmem:[%s17641_s24 + $0x8] sm:$0xff]  ;;  %v103_v2 = vld [vmem:[%s17641_s24 + $0x10] sm:$0xff] }
   0x9   :  { %v13326_v3 = vpack.c.bf16 %v102_v1, %v101_v0  ;;  %v104_v4 = vld [vmem:[%s17641_s24 + $0x18] sm:$0xff]  ;;  %v14655_v5 = vld [vmem:[%s17642_s28] sm:$0xff]  ;;  %v14674_v12 = vld [vmem:[%s17642_s28 + $0x8] sm:$0xff]  ;;  %s17648_s9 = sld [smem:[#allocation11_spill]] }
   0xa   :  { %v13330_v6 = vpack.c.bf16 %v104_v4, %v103_v2  ;;  %11990 = vmatprep.mubr.msk.f32.mxu0 %vm79_vm0, %v14655_v5  ;;  %v89_v7 = vld [vmem:[%s17643_s7] sm:$0xff]  ;;  %v90_v8 = vld [vmem:[%s17643_s7 + $0x8] sm:$0xff]  ;;  %v91_v10 = vld [vmem:[%s17643_s7 + $0x10] sm:$0xff] }
   0xb   :  { %13327 = vmatprep.subr.bf16.mxu0 %v13326_v3  ;;  %v13334_v9 = vpack.c.bf16 %v90_v8, %v89_v7  ;;  %v92_v11 = vld [vmem:[%s17643_s7 + $0x18] sm:$0xff]  ;;  %v14679_v13 = vld [vmem:[%s17642_s28 + $0x10] sm:$0xff]  ;;  %v78_v15 = vld [vmem:[%s17644_s4] sm:$0xff]  ;;  %s17647_s4 = sld [smem:[#allocation10_spill]] }
   0xc   :  { %13329 = vmatpush3.bf16.msra.mxu0 %v13326_v3  ;;  %v13338_v14 = vpack.c.bf16 %v92_v11, %v91_v10  ;;  %80 = vst.msk [vmem:[#allocation2] sm:$0xff] %vm79_vm0, %v78_v15  ;;  %v14692_v16 = vld [vmem:[%s17642_s28 + $0x18] sm:$0xff]  ;;  %v14697_v17 = vld [vmem:[%s17642_s28 + $0x20] sm:$0xff]  ;;  %v14706_v18 = vld [vmem:[%s17642_s28 + $0x28] sm:$0xff] }
   0xd   :  { %13331 = vmatprep.subr.bf16.mxu0 %v13330_v6  ;;  %v14711_v19 = vld [vmem:[%s17642_s28 + $0x30] sm:$0xff]  ;;  %v14721_v21 = vld [vmem:[%s17642_s28 + $0x38] sm:$0xff]  ;;  %v14726_v22 = vld [vmem:[%s17645_s29] sm:$0xff] }
   0xe   :  { %v387_v23 = vld [vmem:[%s17646_s2] sm:$0xff]  ;;  %v388_v24 = vld [vmem:[%s17646_s2 + $0x8] sm:$0xff]  ;;  %v14748_v27 = vld [vmem:[%s17645_s29 + $0x10] sm:$0xff] }
   0xf   :  { %v14741_v25 = vld [vmem:[%s17645_s29 + $0x8] sm:$0xff]  ;;  %v14743_v26 = vpack.c.bf16 %v388_v24, %v387_v23  ;;  %v389_v28 = vld [vmem:[%s17646_s2 + $0x10] sm:$0xff]  ;;  %v390_v29 = vld [vmem:[%s17646_s2 + $0x18] sm:$0xff] }
  0x10   :  { %13333 = vmatpush3.bf16.msra.mxu0 %v13330_v6  ;;  %v14764_v30 = vld [vmem:[%s17645_s29 + $0x18] sm:$0xff]  ;;  %v14766_v31 = vpack.c.bf16 %v390_v29, %v389_v28  ;;  %v14771_v32 = vld [vmem:[%s17645_s29 + $0x20] sm:$0xff]  ;;  %v14781_v33 = vld [vmem:[%s17645_s29 + $0x28] sm:$0xff] }
  0x11   :  { %13335 = vmatprep.subr.bf16.mxu0 %v13334_v9  ;;  %v14787_v34 = vld [vmem:[%s17645_s29 + $0x30] sm:$0xff]  ;;  %v14797_v35 = vld [vmem:[%s17645_s29 + $0x38] sm:$0xff]  ;;  %v489_v38 = vld [vmem:[%s17647_s4] sm:$0xff] }
  0x12   :  { %v490_v39 = vld [vmem:[%s17647_s4 + $0x8] sm:$0xff]  ;;  %v491_v41 = vld [vmem:[%s17647_s4 + $0x10] sm:$0xff]  ;;  %v492_v42 = vld [vmem:[%s17647_s4 + $0x18] sm:$0xff] }
  0x13   :  { %11991 = vmatmul.mubr.msk.f32.vlgmr.msra.gmra.mrb[0].mxu0 %vm79_vm0, %v14674_v12  ;;  %v14803_v37 = vld [vmem:[#allocation2] sm:$0xff]  ;;  %v14815_v40 = vpack.c.bf16 %v490_v39, %v489_v38  ;;  %v14825_v43 = vpack.c.bf16 %v492_v42, %v491_v41 }
  0x14   :  { %13337 = vmatpush3.bf16.msra.mxu0 %v13334_v9  ;;  %11993 = vmatprep.mubr.msk.f32.mxu0 %vm79_vm0, %v14679_v13  ;;  %v11114_v44 = vld [vmem:[%s17648_s9] ss:$0 sm:$0xff] }
  0x15   :  { %13339 = vmatprep.subr.bf16.mxu0 %v13338_v14  ;;  %13349 = vmatprep.subr.bf16.mxu1 %v14815_v40 }
  0x16   :  { %13351 = vmatpush3.bf16.msra.mxu1 %v14815_v40 }
  0x17   :  { %11994 = vmatmul.mubr.msk.f32.gmra.mrb[2].mxu0 %vm79_vm0, %v14692_v16  ;;  %13353 = vmatprep.subr.bf16.mxu1 %v14825_v43 }
  0x18   :  { %11996 = vmatprep.mubr.msk.f32.mxu0 %vm79_vm0, %v14697_v17  ;;  %13341 = vmatpush3.bf16.msra.mxu0 %v13338_v14 }
  0x19   :  { %13342 = vmatprep.subr.bf16.mxu0 %v14516_v20 }
  0x1a   :  { %13355 = vmatpush3.bf16.msra.mxu1 %v14825_v43 }
  0x1b   :  { %11997 = vmatmul.mubr.msk.f32.gmra.mrb[4].mxu0 %vm79_vm0, %v14706_v18  ;;  %13356 = vmatprep.subr.bf16.mxu1 %v14516_v20 }
  0x1c   :  { %11999 = vmatprep.mubr.msk.f32.mxu0 %vm79_vm0, %v14711_v19 }
  0x1f   :  { %12000 = vmatmul.mubr.msk.f32.gmra.mrb[6].mxu0 %vm79_vm0, %v14721_v21 }
  0x20   :  { %12010 = vmatprep.mubr.msk.f32.mxu0 %vm79_vm0, %v14726_v22 }
  0x23   :  { %12011 = vmatmul.mubr.msk.f32.vlgmr.msra.gmra.mrb[0].mxu0 %vm79_vm0, %v14741_v25 }
  0x24   :  { %13344 = vmatpush3.bf16.msra.mxu0 %v14743_v26  ;;  %12013 = vmatprep.mubr.msk.f32.mxu0 %vm79_vm0, %v14748_v27 }
  0x25   :  { %13345 = vmatprep.subr.bf16.mxu0 %v14516_v20 }
  0x27   :  { %12014 = vmatmul.mubr.msk.f32.gmra.mrb[2].mxu0 %vm79_vm0, %v14764_v30 }
  0x28   :  { %12016 = vmatprep.mubr.msk.f32.mxu0 %vm79_vm0, %v14771_v32  ;;  %13347 = vmatpush3.bf16.msra.mxu0 %v14766_v31 }
  0x29   :  { %13368 = vmatprep.subr.bf16.mxu0 %v14516_v20 }
  0x2b   :  { %12017 = vmatmul.mubr.msk.f32.gmra.mrb[4].mxu0 %vm79_vm0, %v14781_v33 }
  0x2c   :  { %12019 = vmatprep.mubr.msk.f32.mxu0 %vm79_vm0, %v14787_v34 }
  0x2f   :  { %12020 = vmatmul.mubr.msk.f32.gmra.mrb[6].mxu0 %vm79_vm0, %v14797_v35 }
  0x30   :  { %12030 = vmatprep.mubr.msk.f32.mxu0 %vm14517_vm1, %v14518_v36 }
  0x33   :  { %12031 = vmatmul.mubr.msk.f32.vlgmr.msra.gmra.mrb[8].mxu0 %vm79_vm0, %v14803_v37 }
  0x34   :  { %12083 = vmatprep.mubr.msk.f32.mxu0 %vm14517_vm1, %v14518_v36 }
  0xf6   :  { %v12012_v45 = vpop.f32.mrb[0].mxu0 }
  0xf7   :  { %v371_v46 = vadd.f32 %v12012_v45, %v11114_v44  ;;  %v324_v47 = vpop.f32.mrb[1].mxu0 }
  0xf8   :  { %v370_v48 = vadd.f32 %v11114_v44, %v324_v47 }
  0xf9   :  { %379 = vst.msk [vmem:[#allocation3 + $0x8] sm:$0xff] %vm79_vm0, %v371_v46  ;;  %v14519_v46 = vmov 0  }
  0xfa   :  { %378 = vst.msk [vmem:[#allocation3] sm:$0xff] %vm79_vm0, %v370_v48  ;;  %v12015_v49 = vpop.f32.mrb[2].mxu0  ;;  %14163 = vset.pattern.permute.xlu1 %v14519_v46  ;;  %14162 = vset.pattern.permute.xlu0 %v14519_v46 }
  0xfb   :  { %v373_v50 = vadd.f32 %v12015_v49, %v11114_v44  ;;  %v334_v51 = vpop.f32.mrb[3].mxu0 }
  0xfc   :  { %v372_v52 = vadd.f32 %v11114_v44, %v334_v51 }
  0xfd   :  { %381 = vst.msk [vmem:[#allocation3 + $0x18] sm:$0xff] %vm79_vm0, %v373_v50 }
  0xfe   :  { %380 = vst.msk [vmem:[#allocation3 + $0x10] sm:$0xff] %vm79_vm0, %v372_v52  ;;  %v12018_v53 = vpop.f32.mrb[4].mxu0 }
  0xff   :  { %v375_v54 = vadd.f32 %v12018_v53, %v11114_v44  ;;  %v344_v55 = vpop.f32.mrb[5].mxu0 }
 0x100   :  { %v374_v56 = vadd.f32 %v11114_v44, %v344_v55  ;;  %v14841_v63 = vld [vmem:[#allocation3 + $0x8] sm:$0xff] }
 0x101   :  { %383 = vst.msk [vmem:[#allocation3 + $0x28] sm:$0xff] %vm79_vm0, %v375_v54  ;;  %v14846_v2 = vld [vmem:[#allocation3] sm:$0xff] }
 0x102   :  { %382 = vst.msk [vmem:[#allocation3 + $0x20] sm:$0xff] %vm79_vm0, %v374_v56  ;;  %v12021_v57 = vpop.f32.mrb[6].mxu0 }
 0x103   :  { %v377_v58 = vadd.f32 %v12021_v57, %v11114_v44  ;;  %v354_v59 = vpop.f32.mrb[7].mxu0 }
 0x104   :  { %v376_v60 = vadd.f32 %v11114_v44, %v354_v59  ;;  %v14852_v7 = vld [vmem:[#allocation3 + $0x18] sm:$0xff] }
 0x105   :  { %385 = vst.msk [vmem:[#allocation3 + $0x38] sm:$0xff] %vm79_vm0, %v377_v58  ;;  %v14843_v0 = vld [vmem:[#allocation3 + $0x10] sm:$0xff] }
 0x106   :  { %384 = vst.msk [vmem:[#allocation3 + $0x30] sm:$0xff] %vm79_vm0, %v376_v60  ;;  %v461_v61 = vpop.f32.mrb[8].mxu0 }
 0x107   :  { %v12032_v62 = vpop.f32.mrb[9].mxu0  ;;  %v474_v1 = vadd.f32 %v14841_v63, %v461_v61  ;;  %v473_v3 = vadd.f32 %v14846_v2, %v461_v61  ;;  %v475_v4 = vadd.f32 %v14843_v0, %v461_v61  ;;  %v476_v8 = vadd.f32 %v14852_v7, %v461_v61 }
 0x108   :  { %v14855_v9 = vld [vmem:[#allocation3 + $0x28] sm:$0xff] }
 0x109   :  { %v14850_v6 = vld [vmem:[#allocation3 + $0x20] sm:$0xff]  ;;  %14164 = vtanh.f32 %v474_v1  ;;  %v478_v14 = vadd.f32 %v14855_v9, %v461_v61 }
 0x10a   :  { %14166 = vtanh.f32 %v473_v3  ;;  %v477_v10 = vadd.f32 %v14850_v6, %v461_v61 }
 0x10b   :  { %14168 = vtanh.f32 %v475_v4 }
 0x10c   :  { %14170 = vtanh.f32 %v476_v8  ;;  %v14861_v15 = vld [vmem:[#allocation3 + $0x38] sm:$0xff] }
 0x10d   :  { %v14858_v11 = vld [vmem:[#allocation3 + $0x30] sm:$0xff]  ;;  %14172 = vtanh.f32 %v477_v10  ;;  %v480_v28 = vadd.f32 %v14861_v15, %v461_v61 }
 0x10e   :  { %v479_v23 = vadd.f32 %v14858_v11, %v461_v61  ;;  %14174 = vtanh.f32 %v478_v14 }
 0x110   :  { %14176 = vtanh.f32 %v479_v23 }
 0x111   :  { %14178 = vtanh.f32 %v480_v28 }
 0x113   :  { %v14165_v24 = vpop.eup %14164 }
 0x114   :  { %v14167_v29 = vpop.eup %14166 }
 0x115   :  { %12041 = vmatprep.mubr.msk.f32.mxu1 %vm79_vm0, %v14167_v29  ;;  %v14169_v38 = vpop.eup %14168 }
 0x116   :  { %12042 = vmatmul.mubr.msk.f32.vlgmr.msra.gmra.mrb[0].mxu1 %vm79_vm0, %v14165_v24  ;;  %v14171_v39 = vpop.eup %14170 }
 0x117   :  { %12044 = vmatprep.mubr.msk.f32.mxu1 %vm79_vm0, %v14169_v38  ;;  %v14173_v41 = vpop.eup %14172 }
 0x118   :  { %v14175_v42 = vpop.eup %14174 }
 0x11a   :  { %12045 = vmatmul.mubr.msk.f32.gmra.mrb[2].mxu1 %vm79_vm0, %v14171_v39  ;;  %v14177_v44 = vpop.eup %14176 }
 0x11b   :  { %12047 = vmatprep.mubr.msk.f32.mxu1 %vm79_vm0, %v14173_v41  ;;  %v14179_v45 = vpop.eup %14178 }
 0x11e   :  { %12048 = vmatmul.mubr.msk.f32.gmra.mrb[4].mxu1 %vm79_vm0, %v14175_v42 }
 0x11f   :  { %12050 = vmatprep.mubr.msk.f32.mxu1 %vm79_vm0, %v14177_v44 }
 0x122   :  { %12051 = vmatmul.mubr.msk.f32.gmra.mrb[6].mxu1 %vm79_vm0, %v14179_v45 }
 0x123   :  { %12061 = vmatprep.mubr.msk.f32.mxu1 %vm14517_vm1, %v14518_v36 }
 0x1e9   :  { %v12043_v47 = vpop.f32.mrb[0].mxu1 }
 0x1ea   :  { %v583_v48 = vpop.f32.mrb[1].mxu1  ;;  %v624_v52 = vsel %vm622_vm2, %v12043_v47, -inf }
 0x1eb   :  { %v623_v55 = vsel %vm622_vm2, %v583_v48, -inf }
 0x1ed   :  { %v12046_v49 = vpop.f32.mrb[2].mxu1 }
 0x1ee   :  { %v593_v50 = vpop.f32.mrb[3].mxu1  ;;  %v626_v60 = vsel %vm622_vm2, %v12046_v49, -inf }
 0x1ef   :  { %v625_v3 = vsel %vm622_vm2, %v593_v50, -inf }
 0x1f1   :  { %v12049_v51 = vpop.f32.mrb[4].mxu1 }
 0x1f2   :  { %v629_v53 = vsel %vm622_vm2, %v12049_v51, -inf  ;;  %v603_v54 = vpop.f32.mrb[5].mxu1 }
 0x1f3   :  { %v630_v56 = vmax.f32 %v624_v52, %v629_v53  ;;  %v627_v57 = vsel %vm622_vm2, %v603_v54, -inf }
 0x1f4   :  { %v628_v58 = vmax.f32 %v623_v55, %v627_v57 }
 0x1f5   :  { %v12052_v59 = vpop.f32.mrb[6].mxu1 }
 0x1f6   :  { %v635_v61 = vmax.f32 %v628_v58, %v630_v56  ;;  %v633_v62 = vsel %vm622_vm2, %v12052_v59, -inf  ;;  %v613_v1 = vpop.f32.mrb[7].mxu1 }
 0x1f7   :  { %v634_v4 = vmax.f32 %v626_v60, %v633_v62  ;;  %v631_v8 = vsel %vm622_vm2, %v613_v1, -inf }
 0x1f8   :  { %v632_v10 = vmax.f32 %v625_v3, %v631_v8 }
 0x1fa   :  { %v636_v14 = vmax.f32 %v632_v10, %v634_v4 }
 0x1fc   :  { %v637_v23 = vmax.f32 %v635_v61, %v636_v14 }
 0x1fe   :  { %v638_v24 = vsub.f32 %v583_v48, %v637_v23  ;;  %v639_v28 = vsub.f32 %v12043_v47, %v637_v23  ;;  %v641_v29 = vsub.f32 %v12046_v49, %v637_v23  ;;  %v642_v38 = vsub.f32 %v603_v54, %v637_v23 }
 0x1ff   :  { %v643_v39 = vsub.f32 %v12049_v51, %v637_v23  ;;  %v644_v41 = vsub.f32 %v613_v1, %v637_v23  ;;  %v645_v42 = vsub.f32 %v12052_v59, %v637_v23  ;;  %v640_v44 = vsub.f32 %v593_v50, %v637_v23 }
 0x200   :  { %v646_v45 = vmul.f32 1.442695, %v638_v24  ;;  %v648_v46 = vmul.f32 1.442695, %v639_v28  ;;  %v652_v53 = vmul.f32 1.442695, %v641_v29 }
 0x201   :  { %v650_v52 = vmul.f32 1.442695, %v640_v44  ;;  %v654_v55 = vmul.f32 1.442695, %v642_v38  ;;  %v656_v56 = vmul.f32 1.442695, %v643_v39 }
 0x202   :  { %14180 = vpow2.f32 %v646_v45  ;;  %v658_v57 = vmul.f32 1.442695, %v644_v41  ;;  %v660_v47 = vmul.f32 1.442695, %v645_v42 }
 0x203   :  { %14182 = vpow2.f32 %v648_v46 }
 0x204   :  { %14184 = vpow2.f32 %v650_v52 }
 0x205   :  { %14186 = vpow2.f32 %v652_v53 }
 0x206   :  { %14188 = vpow2.f32 %v654_v55 }
 0x207   :  { %14190 = vpow2.f32 %v656_v56 }
 0x208   :  { %14192 = vpow2.f32 %v658_v57 }
 0x209   :  { %14194 = vpow2.f32 %v660_v47  ;;  %v791_v47 = vld [vmem:[%s17611_s14] sm:$0xff] }
 0x20c   :  { %v14181_v48 = vpop.eup %14180 }
 0x20d   :  { %v14183_v49 = vpop.eup %14182  ;;  %v662_v50 = vsel %vm622_vm2, %v14181_v48, 0.0 }
 0x20e   :  { %v14185_v51 = vpop.eup %14184  ;;  %v663_v54 = vsel %vm622_vm2, %v14183_v49, 0.0 }
 0x20f   :  { %v14187_v58 = vpop.eup %14186  ;;  %v664_v59 = vadd.f32 %v663_v54, %v662_v50  ;;  %v665_v60 = vsel %vm622_vm2, %v14185_v51, 0.0 }
 0x210   :  { %v14189_v61 = vpop.eup %14188  ;;  %v667_v1 = vsel %vm622_vm2, %v14187_v58, 0.0 }
 0x211   :  { %v666_v62 = vadd.f32 %v665_v60, %v664_v59  ;;  %v14191_v3 = vpop.eup %14190  ;;  %v669_v8 = vsel %vm622_vm2, %v14189_v61, 0.0  ;;  %v794_v59 = vld [vmem:[%s17611_s14 + $0x18] sm:$0xff]  ;;  %v949_v60 = vld [vmem:[%s17612_s15 + $0x10] sm:$0xff] }
 0x212   :  { %v14193_v10 = vpop.eup %14192  ;;  %v671_v23 = vsel %vm622_vm2, %v14191_v3, 0.0 }
 0x213   :  { %v668_v4 = vadd.f32 %v667_v1, %v666_v62  ;;  %v14195_v24 = vpop.eup %14194  ;;  %v673_v29 = vsel %vm622_vm2, %v14193_v10, 0.0  ;;  %v950_v62 = vld [vmem:[%s17612_s15 + $0x18] sm:$0xff] }
 0x214   :  { %v675_v39 = vsel %vm622_vm2, %v14195_v24, 0.0  ;;  %v14925_v1 = vpack.c.bf16 %v950_v62, %v949_v60 }
 0x215   :  { %v670_v14 = vadd.f32 %v669_v8, %v668_v4 }
 0x217   :  { %v672_v28 = vadd.f32 %v671_v23, %v670_v14 }
 0x219   :  { %v674_v38 = vadd.f32 %v673_v29, %v672_v28 }
 0x21b   :  { %v676_v41 = vadd.f32 %v675_v39, %v674_v38 }
 0x21d   :  { %14196 = vrcp.f32 %v676_v41 }
 0x227   :  { %v14197_v42 = vpop.eup %14196 }
 0x228   :  { %v680_v44 = vmul.f32 %v14197_v42, %v14185_v51  ;;  %v678_v45 = vmul.f32 %v14197_v42, %v14181_v48  ;;  %v681_v46 = vmul.f32 %v14197_v42, %v14187_v58  ;;  %v679_v52 = vmul.f32 %v14197_v42, %v14183_v49  ;;  %v792_v48 = vld [vmem:[%s17611_s14 + $0x8] sm:$0xff]  ;;  %v947_v49 = vld [vmem:[%s17612_s15] sm:$0xff]  ;;  %v793_v58 = vld [vmem:[%s17611_s14 + $0x10] sm:$0xff] }
 0x229   :  { %v683_v53 = vmul.f32 %v14197_v42, %v14191_v3  ;;  %v682_v55 = vmul.f32 %v14197_v42, %v14189_v61  ;;  %v685_v56 = vmul.f32 %v14197_v42, %v14195_v24  ;;  %v684_v57 = vmul.f32 %v14197_v42, %v14193_v10  ;;  %v948_v51 = vld [vmem:[%s17612_s15 + $0x8] sm:$0xff] }
 0x22a   :  { %706 = vperm.xlu1 %14163, %v680_v44   ;;  %696 = vperm.xlu0 %14162, %v678_v45   ;;  %v14897_v50 = vpack.c.bf16 %v792_v48, %v791_v47  ;;  %v14906_v54 = vpack.c.bf16 %v948_v51, %v947_v49  ;;  %v14920_v61 = vpack.c.bf16 %v794_v59, %v793_v58 }
 0x22c   :  { %13358 = vmatpush3.bf16.msra.mxu1 %v14897_v50  ;;  %13370 = vmatpush3.bf16.msra.mxu0 %v14906_v54 }
 0x22d   :  { %13359 = vmatprep.subr.bf16.mxu1 %v14516_v20  ;;  %13371 = vmatprep.subr.bf16.mxu0 %v14516_v20 }
 0x22e   :  { %711 = vperm.xlu1 %14163, %v681_v46   ;;  %701 = vperm.xlu0 %14162, %v679_v52  }
 0x230   :  { %13361 = vmatpush3.bf16.msra.mxu1 %v14920_v61  ;;  %13373 = vmatpush3.bf16.msra.mxu0 %v14925_v1 }
 0x231   :  { %13362 = vmatprep.subr.bf16.mxu1 %v14516_v20  ;;  %13374 = vmatprep.subr.bf16.mxu0 %v14516_v20 }
 0x232   :  { %721 = vperm.xlu1 %14163, %v683_v53   ;;  %716 = vperm.xlu0 %14162, %v682_v55  }
 0x236   :  { %731 = vperm.xlu1 %14163, %v685_v56   ;;  %726 = vperm.xlu0 %14162, %v684_v57  }
 0x2a9   :  { %v707_v3 = vpop.permute.xlu1 %706  ;;  %v697_v4 = vpop.permute.xlu0 %696 }
 0x2aa   :  { %v734_v8 = vmul.f32 %v697_v4, %v14726_v22  ;;  %v765_v10 = vmul.f32 %v697_v4, %v14655_v5  ;;  %v736_v24 = vmul.f32 %v707_v3, %v14748_v27  ;;  %v767_v28 = vmul.f32 %v707_v3, %v14679_v13 }
 0x2ac   :  { %v742_v39 = vsel %vm79_vm0, %v734_v8, 0.0  ;;  %v773_v41 = vsel %vm79_vm0, %v765_v10, 0.0 }
 0x2ad   :  { %v712_v14 = vpop.permute.xlu1 %711  ;;  %v702_v23 = vpop.permute.xlu0 %701 }
 0x2ae   :  { %v735_v29 = vmul.f32 %v702_v23, %v14741_v25  ;;  %v766_v38 = vmul.f32 %v702_v23, %v14674_v12  ;;  %v737_v42 = vmul.f32 %v712_v14, %v14764_v30  ;;  %v768_v22 = vmul.f32 %v712_v14, %v14692_v16 }
 0x2af   :  { %v745_v25 = vsel %vm79_vm0, %v736_v24, 0.0  ;;  %v776_v12 = vsel %vm79_vm0, %v767_v28, 0.0 }
 0x2b0   :  { %v743_v5 = vsel %vm79_vm0, %v735_v29, 0.0  ;;  %v774_v44 = vsel %vm79_vm0, %v766_v38, 0.0  ;;  %v747_v30 = vsel %vm79_vm0, %v737_v42, 0.0  ;;  %v778_v16 = vsel %vm79_vm0, %v768_v22, 0.0  ;;  %v872_v22 = vld [vmem:[%s17613_s17 + $0x18] sm:$0xff] }
 0x2b1   :  { %v744_v45 = vadd.f32 %v743_v5, %v742_v39  ;;  %v775_v27 = vadd.f32 %v774_v44, %v773_v41  ;;  %v722_v46 = vpop.permute.xlu1 %721  ;;  %v717_v13 = vpop.permute.xlu0 %716  ;;  %v871_v39 = vld [vmem:[%s17613_s17 + $0x10] sm:$0xff] }
 0x2b2   :  { %v738_v52 = vmul.f32 %v717_v13, %v14771_v32  ;;  %v739_v56 = vmul.f32 %v722_v46, %v14781_v33  ;;  %v769_v57 = vmul.f32 %v717_v13, %v14697_v17  ;;  %v770_v62 = vmul.f32 %v722_v46, %v14706_v18  ;;  %v869_v17 = vld [vmem:[%s17613_s17] sm:$0xff]  ;;  %v870_v33 = vld [vmem:[%s17613_s17 + $0x8] sm:$0xff]  ;;  %v1024_v5 = vld [vmem:[%s17614_s18 + $0x10] sm:$0xff] }
 0x2b3   :  { %v746_v53 = vadd.f32 %v745_v25, %v744_v45  ;;  %v777_v55 = vadd.f32 %v776_v12, %v775_v27  ;;  %v1023_v18 = vld [vmem:[%s17614_s18 + $0x8] sm:$0xff]  ;;  %v14969_v23 = vpack.c.bf16 %v870_v33, %v869_v17  ;;  %v14998_v27 = vpack.c.bf16 %v872_v22, %v871_v39  ;;  %v1097_v13 = vld [vmem:[%s17615_s16] sm:$0xff]  ;;  %v1250_v17 = vld [vmem:[%s17617_s10 + $0x18] sm:$0xff] }
 0x2b4   :  { %v749_v58 = vsel %vm79_vm0, %v738_v52, 0.0  ;;  %v751_v32 = vsel %vm79_vm0, %v739_v56, 0.0  ;;  %v780_v3 = vsel %vm79_vm0, %v769_v57, 0.0  ;;  %v782_v24 = vsel %vm79_vm0, %v770_v62, 0.0  ;;  %v1172_v12 = vld [vmem:[%s17616_s19] sm:$0xff]  ;;  %v1173_v52 = vld [vmem:[%s17616_s19 + $0x8] sm:$0xff] }
 0x2b5   :  { %v748_v47 = vadd.f32 %v747_v30, %v746_v53  ;;  %v779_v48 = vadd.f32 %v778_v16, %v777_v55  ;;  %v732_v49 = vpop.permute.xlu1 %731  ;;  %v727_v51 = vpop.permute.xlu0 %726  ;;  %v15025_v30 = vpack.c.bf16 %v1173_v52, %v1172_v12  ;;  %v1099_v16 = vld [vmem:[%s17615_s16 + $0x10] sm:$0xff]  ;;  %v1100_v57 = vld [vmem:[%s17615_s16 + $0x18] sm:$0xff]  ;;  %v1498_v39 = vld [vmem:[%s17620_s20] sm:$0xff] }
 0x2b6   :  { %v740_v59 = vmul.f32 %v727_v51, %v14787_v34  ;;  %v741_v4 = vmul.f32 %v732_v49, %v14797_v35  ;;  %v1022_v34 = vld [vmem:[%s17614_s18] sm:$0xff]  ;;  %v771_v29 = vmul.f32 %v727_v51, %v14711_v19  ;;  %v1025_v19 = vld [vmem:[%s17614_s18 + $0x18] sm:$0xff]  ;;  %v772_v44 = vmul.f32 %v732_v49, %v14721_v21  ;;  %v1098_v21 = vld [vmem:[%s17615_s16 + $0x8] sm:$0xff] }
 0x2b7   :  { %v750_v60 = vadd.f32 %v749_v58, %v748_v47  ;;  %v781_v8 = vadd.f32 %v780_v3, %v779_v48  ;;  %v14974_v38 = vpack.c.bf16 %v1023_v18, %v1022_v34  ;;  %v15000_v46 = vpack.c.bf16 %v1025_v19, %v1024_v5  ;;  %v1174_v47 = vld [vmem:[%s17616_s19 + $0x10] sm:$0xff]  ;;  %v1175_v48 = vld [vmem:[%s17616_s19 + $0x18] sm:$0xff]  ;;  %v1247_v58 = vld [vmem:[%s17617_s10] sm:$0xff] }
 0x2b8   :  { %v753_v35 = vsel %vm79_vm0, %v740_v59, 0.0  ;;  %v755_v28 = vsel %vm79_vm0, %v741_v4, 0.0  ;;  %v784_v45 = vsel %vm79_vm0, %v771_v29, 0.0  ;;  %v786_v53 = vsel %vm79_vm0, %v772_v44, 0.0  ;;  %v1248_v59 = vld [vmem:[%s17617_s10 + $0x8] sm:$0xff]  ;;  %v1249_v4 = vld [vmem:[%s17617_s10 + $0x10] sm:$0xff] }
 0x2b9   :  { %v752_v10 = vadd.f32 %v751_v32, %v750_v60  ;;  %v783_v41 = vadd.f32 %v782_v24, %v781_v8  ;;  %v15023_v55 = vpack.c.bf16 %v1098_v21, %v1097_v13  ;;  %v15049_v49 = vpack.c.bf16 %v1100_v57, %v1099_v16  ;;  %v1328_v60 = vld [vmem:[%s17618_s11] sm:$0xff]  ;;  %v1329_v32 = vld [vmem:[%s17618_s11 + $0x8] sm:$0xff]  ;;  %v1330_v33 = vld [vmem:[%s17618_s11 + $0x10] sm:$0xff] }
 0x2ba   :  { %v15051_v51 = vpack.c.bf16 %v1175_v48, %v1174_v47  ;;  %v15073_v62 = vpack.c.bf16 %v1248_v59, %v1247_v58  ;;  %v15075_v3 = vpack.c.bf16 %v1329_v32, %v1328_v60  ;;  %v1331_v8 = vld [vmem:[%s17618_s11 + $0x18] sm:$0xff]  ;;  %v1409_v18 = vld [vmem:[%s17619_s12] sm:$0xff]  ;;  %v1411_v24 = vld [vmem:[%s17619_s12 + $0x10] sm:$0xff] }
 0x2bb   :  { %v754_v14 = vadd.f32 %v753_v35, %v752_v10  ;;  %v785_v25 = vadd.f32 %v784_v45, %v783_v41  ;;  %v15097_v10 = vpack.c.bf16 %v1250_v17, %v1249_v4  ;;  %v15099_v34 = vpack.c.bf16 %v1331_v8, %v1330_v33  ;;  %v1410_v35 = vld [vmem:[%s17619_s12 + $0x8] sm:$0xff]  ;;  %v790_v19 = vld [vmem:[%s17621_s0 + $0x10] sm:$0xff]  ;;  %v788_v52 = vld [vmem:[%s17621_s0] sm:$0xff] }
 0x2bc   :  { %v1499_v41 = vld [vmem:[%s17620_s20 + $0x8] sm:$0xff] }
 0x2bd   :  { %v14979_v42 = vadd.f32 %v755_v28, %v754_v14  ;;  %v15030_v56 = vadd.f32 %v786_v53, %v785_v25  ;;  %v15115_v14 = vpack.c.bf16 %v1410_v35, %v1409_v18  ;;  %v1412_v28 = vld [vmem:[%s17619_s12 + $0x18] sm:$0xff]  ;;  %v15153_v22 = vpack.c.bf16 %v1499_v41, %v1498_v39  ;;  %v789_v47 = vld [vmem:[%s17621_s0 + $0x8] sm:$0xff]  ;;  %v15179_v35 = vld [vmem:[%s17622_s13] ss:$0 sm:$0xff] }
 0x2be   :  { %v15130_v29 = vpack.c.bf16 %v1412_v28, %v1411_v24 }
 0x2bf   :  { %12062 = vmatmul.mubr.msk.f32.vlgmr.msra.gmra.mrb[8].mxu1 %vm79_vm0, %v14979_v42  ;;  %12084 = vmatmul.mubr.msk.f32.vlgmr.msra.gmra.mrb[10].mxu0 %vm79_vm0, %v14979_v42 }
 0x2c0   :  { %13364 = vmatpush3.bf16.msra.mxu1 %v14969_v23  ;;  %13376 = vmatpush3.bf16.msra.mxu0 %v14974_v38 }
 0x2c1   :  { %13365 = vmatprep.subr.bf16.mxu1 %v14516_v20  ;;  %13377 = vmatprep.subr.bf16.mxu0 %v14516_v20 }
 0x2c2   :  { %12072 = vmatprep.mubr.msk.f32.mxu1 %vm14517_vm1, %v14518_v36  ;;  %12094 = vmatprep.mubr.msk.f32.mxu0 %vm14517_vm1, %v14518_v36 }
 0x2c4   :  { %13367 = vmatpush3.bf16.msra.mxu1 %v14998_v27  ;;  %13379 = vmatpush3.bf16.msra.mxu0 %v15000_v46 }
 0x2c5   :  { %13380 = vmatprep.subr.bf16.mxu1 %v14516_v20  ;;  %13386 = vmatprep.subr.bf16.mxu0 %v14516_v20 }
 0x2c7   :  { %12073 = vmatmul.mubr.msk.f32.vlgmr.msra.gmra.mrb[8].mxu1 %vm79_vm0, %v15030_v56  ;;  %12095 = vmatmul.mubr.msk.f32.vlgmr.msra.gmra.mrb[10].mxu0 %vm79_vm0, %v15030_v56 }
 0x2c8   :  { %13382 = vmatpush3.bf16.msra.mxu1 %v15023_v55  ;;  %13388 = vmatpush3.bf16.msra.mxu0 %v15025_v30 }
 0x2c9   :  { %13383 = vmatprep.subr.bf16.mxu1 %v14516_v20  ;;  %13389 = vmatprep.subr.bf16.mxu0 %v14516_v20 }
 0x2ca   :  { %12105 = vmatprep.mubr.msk.f32.mxu1 %vm14517_vm1, %v14518_v36  ;;  %12116 = vmatprep.mubr.msk.f32.mxu0 %vm14517_vm1, %v14518_v36 }
 0x2cc   :  { %13385 = vmatpush3.bf16.msra.mxu1 %v15049_v49  ;;  %13391 = vmatpush3.bf16.msra.mxu0 %v15051_v51 }
 0x2cd   :  { %13392 = vmatprep.subr.bf16.mxu1 %v14516_v20  ;;  %13398 = vmatprep.subr.bf16.mxu0 %v14516_v20 }
 0x2cf   :  { %12106 = vmatmul.mubr.msk.f32.vlgmr.msra.gmra.mrb[10].mxu1 %vm79_vm0, %v14979_v42  ;;  %12117 = vmatmul.mubr.msk.f32.vlgmr.msra.gmra.mrb[12].mxu0 %vm79_vm0, %v15030_v56 }
 0x2d0   :  { %13394 = vmatpush3.bf16.msra.mxu1 %v15073_v62  ;;  %13400 = vmatpush3.bf16.msra.mxu0 %v15075_v3 }
 0x2d1   :  { %13395 = vmatprep.subr.bf16.mxu1 %v14516_v20  ;;  %13401 = vmatprep.subr.bf16.mxu0 %v14516_v20 }
 0x2d2   :  { %12127 = vmatprep.mubr.msk.f32.mxu1 %vm14517_vm1, %v14518_v36  ;;  %12138 = vmatprep.mubr.msk.f32.mxu0 %vm14517_vm1, %v14518_v36 }
 0x2d4   :  { %13397 = vmatpush3.bf16.msra.mxu1 %v15097_v10  ;;  %13403 = vmatpush3.bf16.msra.mxu0 %v15099_v34 }
 0x2d5   :  { %13404 = vmatprep.subr.bf16.mxu1 %v14516_v20  ;;  %13410 = vmatprep.subr.bf16.mxu0 %v14516_v20 }
 0x2d7   :  { %12128 = vmatmul.mubr.msk.f32.vlgmr.msra.gmra.mrb[8].mxu1 %vm79_vm0, %v14803_v37  ;;  %12139 = vmatmul.mubr.msk.f32.vlgmr.msra.gmra.mrb[10].mxu0 %vm79_vm0, %v14803_v37 }
 0x2d8   :  { %13406 = vmatpush3.bf16.msra.mxu1 %v15115_v14  ;;  %12149 = vmatprep.mubr.msk.f32.mxu1 %vm14517_vm1, %v14518_v36 }
 0x2d9   :  { %13407 = vmatprep.subr.bf16.mxu1 %v14516_v20  ;;  %12160 = vmatprep.mubr.msk.f32.mxu0 %vm14517_vm1, %v14518_v36 }
 0x2da   :  { %13412 = vmatpush3.bf16.msra.mxu0 %v15153_v22 }
 0x2db   :  { %13413 = vmatprep.subr.bf16.mxu0 %v14516_v20 }
 0x2dc   :  { %13409 = vmatpush3.bf16.msra.mxu1 %v15130_v29 }
 0x2dd   :  { %13428 = vmatprep.subr.bf16.mxu1 %v14516_v20 }
 0x2df   :  { %12150 = vmatmul.mubr.msk.f32.vlgmr.msra.gmra.mrb[12].mxu1 %vm79_vm0, %v14803_v37 }
 0x2e0   :  { %13430 = vmatpush3.bf16.msra.mxu1 %v14743_v26  ;;  %12193 = vmatprep.mubr.msk.f32.mxu1 %vm14517_vm1, %v14518_v36  ;;  %v1500_v26 = vld [vmem:[%s17620_s20 + $0x10] sm:$0xff] }
 0x2e1   :  { %13431 = vmatprep.subr.bf16.mxu1 %v14516_v20 }
 0x2e4   :  { %13433 = vmatpush3.bf16.msra.mxu1 %v14766_v31  ;;  %v1501_v31 = vld [vmem:[%s17620_s20 + $0x18] sm:$0xff] }
 0x2e5   :  { %13435 = vmatprep.subr.bf16.mxu1 %v14815_v40  ;;  %v15163_v5 = vpack.c.bf16 %v1501_v31, %v1500_v26 }
 0x2e7   :  { %13415 = vmatpush3.bf16.msra.mxu0 %v15163_v5 }
 0x2e8   :  { %13416 = vmatprep.subr.bf16.mxu0 %v14516_v20 }
 0x3a2   :  { %v1167_v44 = vpop.f32.mrb[10].mxu1  ;;  %v1242_v45 = vpop.f32.mrb[12].mxu0 }
 0x3a3   :  { %v1171_v13 = vadd.f32 %v1167_v44, %v790_v19  ;;  %v12107_v25 = vpop.f32.mrb[11].mxu1  ;;  %v12118_v21 = vpop.f32.mrb[13].mxu0  ;;  %v1576_v44 = vld [vmem:[%s17623_s21] sm:$0xff] }
 0x3a5   :  { %v1246_v12 = vadd.f32 %v1242_v45, %v1171_v13  ;;  %v1577_v45 = vld [vmem:[%s17623_s21 + $0x8] sm:$0xff] }
 0x3aa   :  { %v1317_v53 = vpop.f32.mrb[8].mxu1  ;;  %v1398_v16 = vpop.f32.mrb[10].mxu0 }
 0x3ab   :  { %v14030_v57 = vadd.f32 %v1317_v53, %v788_v52  ;;  %v12129_v48 = vpop.f32.mrb[9].mxu1  ;;  %v12140_v58 = vpop.f32.mrb[11].mxu0  ;;  %v14031_v60 = vadd.f32 %v1398_v16, %v789_v47  ;;  %v15189_v52 = vpack.c.bf16 %v1577_v45, %v1576_v44  ;;  %v1579_v16 = vld [vmem:[%s17623_s21 + $0x18] sm:$0xff]  ;;  %v1652_v47 = vld [vmem:[%s17624_s22 + $0x8] sm:$0xff] }
 0x3ac   :  { %v1653_v58 = vld [vmem:[%s17624_s22 + $0x10] sm:$0xff] }
 0x3ad   :  { %v11131_v59 = vmul.f32 -1.442695, %v14030_v57  ;;  %v11133_v32 = vmul.f32 -1.442695, %v14031_v60  ;;  %v1651_v57 = vld [vmem:[%s17624_s22] sm:$0xff] }
 0x3ae   :  { %v15218_v48 = vpack.c.bf16 %v1652_v47, %v1651_v57 }
 0x3af   :  { %14198 = vpow2.f32 %v11131_v59  ;;  %v1654_v59 = vld [vmem:[%s17624_s22 + $0x18] sm:$0xff] }
 0x3b0   :  { %14200 = vpow2.f32 %v11133_v32 }
 0x3b2   :  { %v1486_v4 = vpop.f32.mrb[12].mxu1 }
 0x3b3   :  { %v12151_v17 = vpop.f32.mrb[13].mxu1  ;;  %v1487_v28 = vadd.f32 %v15179_v35, %v1486_v4 }
 0x3b9   :  { %v14199_v33 = vpop.eup %14198 }
 0x3ba   :  { %v1325_v8 = vadd.f32 1.0, %v14199_v33  ;;  %v14201_v18 = vpop.eup %14200 }
 0x3bb   :  { %v1406_v24 = vadd.f32 1.0, %v14201_v18 }
 0x3bc   :  { %14202 = vrcp.f32 %v1325_v8 }
 0x3bd   :  { %14204 = vrcp.f32 %v1406_v24 }
 0x3c6   :  { %v14203_v39 = vpop.eup %14202 }
 0x3c7   :  { %v1490_v41 = vmul.f32 %v14203_v39, %v1487_v28  ;;  %v14205_v31 = vpop.eup %14204 }
 0x3c8   :  { %v1493_v19 = vsub.f32 1.0, %v14205_v31  ;;  %v1495_v25 = vmul.f32 %v14205_v31, %v14803_v37 }
 0x3c9   :  { %v1491_v26 = vadd.f32 %v1490_v41, %v1246_v12  ;;  %v1578_v12 = vld [vmem:[%s17623_s21 + $0x10] sm:$0xff] }
 0x3ca   :  { %v15204_v37 = vpack.c.bf16 %v1579_v16, %v1578_v12 }
 0x3cb   :  { %14206 = vtanh.f32 %v1491_v26 }
 0x3d5   :  { %v14207_v13 = vpop.eup %14206 }
 0x3d6   :  { %v1494_v21 = vmul.f32 %v14207_v13, %v1493_v19 }
 0x3d8   :  { %v15191_v53 = vadd.f32 %v1495_v25, %v1494_v21 }
 0x3da   :  { %12161 = vmatmul.mubr.msk.f32.vlgmr.msra.gmra.mrb[14].mxu0 %vm79_vm0, %v15191_v53  ;;  %12194 = vmatmul.mubr.msk.f32.vlgmr.msra.gmra.mrb[14].mxu1 %vm79_vm0, %v15191_v53 }
 0x3db   :  { %13418 = vmatpush3.bf16.msra.mxu0 %v15189_v52  ;;  %12171 = vmatprep.mubr.msk.f32.mxu0 %vm14517_vm1, %v14518_v36 }
 0x3dc   :  { %13419 = vmatprep.subr.bf16.mxu0 %v14516_v20  ;;  %13437 = vmatpush3.bf16.msra.mxu1 %v14815_v40  ;;  %v15232_v40 = vpack.c.bf16 %v1654_v59, %v1653_v58 }
 0x3dd   :  { %13439 = vmatprep.subr.bf16.mxu1 %v14825_v43 }
 0x3df   :  { %13421 = vmatpush3.bf16.msra.mxu0 %v15204_v37 }
 0x3e0   :  { %13422 = vmatprep.subr.bf16.mxu0 %v14516_v20  ;;  %13441 = vmatpush3.bf16.msra.mxu1 %v14825_v43 }
 0x3e1   :  { %13454 = vmatprep.subr.bf16.mxu1 %v14516_v20 }
 0x3e2   :  { %12172 = vmatmul.mubr.msk.f32.vlgmr.msra.gmra.mrb[14].mxu0 %vm79_vm0, %v14979_v42 }
 0x3e3   :  { %13424 = vmatpush3.bf16.msra.mxu0 %v15218_v48  ;;  %12182 = vmatprep.mubr.msk.f32.mxu0 %vm14517_vm1, %v14518_v36 }
 0x3e4   :  { %13425 = vmatprep.subr.bf16.mxu0 %v14516_v20 }
 0x3e7   :  { %13427 = vmatpush3.bf16.msra.mxu0 %v15232_v40 }
 0x3e8   :  { %13442 = vmatprep.subr.bf16.mxu0 %v14516_v20 }
 0x3ea   :  { %12183 = vmatmul.mubr.msk.f32.vlgmr.msra.gmra.mrb[14].mxu0 %vm79_vm0, %v15030_v56 }
 0x3eb   :  { %13444 = vmatpush3.bf16.msra.mxu0 %v14897_v50  ;;  %12224 = vmatprep.mubr.msk.f32.mxu0 %vm14517_vm1, %v14518_v36 }
 0x3ec   :  { %13445 = vmatprep.subr.bf16.mxu0 %v14516_v20 }
 0x3ef   :  { %13447 = vmatpush3.bf16.msra.mxu0 %v14920_v61 }
 0x3f0   :  { %13448 = vmatprep.subr.bf16.mxu0 %v14516_v20 }
 0x4ad   :  { %v1797_v43 = vpop.f32.mrb[14].mxu1 }
 0x4ae   :  { %v1809_v42 = vadd.f32 %v1797_v43, %v14846_v2  ;;  %v1810_v60 = vadd.f32 %v1797_v43, %v14841_v63  ;;  %v1811_v32 = vadd.f32 %v1797_v43, %v14843_v0  ;;  %v12195_v4 = vpop.f32.mrb[15].mxu1  ;;  %v1812_v50 = vadd.f32 %v1797_v43, %v14852_v7  ;;  %v1497_v7 = vld [vmem:[%s17625_s1] sm:$0xff] }
 0x4af   :  { %v1813_v56 = vadd.f32 %v1797_v43, %v14850_v6  ;;  %v1814_v17 = vadd.f32 %v1797_v43, %v14855_v9  ;;  %v1815_v61 = vadd.f32 %v1797_v43, %v14858_v11  ;;  %v1816_v2 = vadd.f32 %v1797_v43, %v14861_v15 }
 0x4b0   :  { %14208 = vtanh.f32 %v1809_v42 }
 0x4b1   :  { %14210 = vtanh.f32 %v1810_v60 }
 0x4b2   :  { %14212 = vtanh.f32 %v1811_v32 }
 0x4b3   :  { %14214 = vtanh.f32 %v1812_v50 }
 0x4b4   :  { %14216 = vtanh.f32 %v1813_v56 }
 0x4b5   :  { %14218 = vtanh.f32 %v1814_v17 }
 0x4b6   :  { %14220 = vtanh.f32 %v1815_v61 }
 0x4b7   :  { %14222 = vtanh.f32 %v1816_v2 }
 0x4ba   :  { %v14209_v63 = vpop.eup %14208 }
 0x4bb   :  { %v14211_v0 = vpop.eup %14210  ;;  %12204 = vmatprep.mubr.msk.f32.mxu1 %vm79_vm0, %v14209_v63 }
 0x4bc   :  { %v14213_v6 = vpop.eup %14212  ;;  %12205 = vmatmul.mubr.msk.f32.vlgmr.msra.gmra.mrb[16].mxu1 %vm79_vm0, %v14211_v0 }
 0x4bd   :  { %v1721_v9 = vpop.f32.mrb[14].mxu0  ;;  %12207 = vmatprep.mubr.msk.f32.mxu1 %vm79_vm0, %v14213_v6  ;;  %13456 = vmatpush3.bf16.msra.mxu1 %v14906_v54  ;;  %v14215_v33 = vpop.eup %14214 }
 0x4be   :  { %v14032_v11 = vadd.f32 %v1721_v9, %v1497_v7  ;;  %v12184_v15 = vpop.f32.mrb[15].mxu0  ;;  %13457 = vmatprep.subr.bf16.mxu1 %v14516_v20  ;;  %v14217_v8 = vpop.eup %14216 }
 0x4bf   :  { %v14219_v18 = vpop.eup %14218 }
 0x4c0   :  { %1726 = vst [vmem:[%s17626_s23] sm:$0xff] %v14032_v11  ;;  %12208 = vmatmul.mubr.msk.f32.gmra.mrb[18].mxu1 %vm79_vm0, %v14215_v33  ;;  %v14221_v54 = vpop.eup %14220 }
 0x4c1   :  { %12210 = vmatprep.mubr.msk.f32.mxu1 %vm79_vm0, %v14217_v8  ;;  %13459 = vmatpush3.bf16.msra.mxu1 %v14925_v1  ;;  %v14223_v24 = vpop.eup %14222 }
 0x4c2   :  { %13460 = vmatprep.subr.bf16.mxu1 %v14516_v20 }
 0x4c4   :  { %12211 = vmatmul.mubr.msk.f32.gmra.mrb[20].mxu1 %vm79_vm0, %v14219_v18 }
 0x4c5   :  { %12213 = vmatprep.mubr.msk.f32.mxu1 %vm79_vm0, %v14221_v54 }
 0x4c8   :  { %12214 = vmatmul.mubr.msk.f32.gmra.mrb[22].mxu1 %vm79_vm0, %v14223_v24 }
 0x4c9   :  { %12246 = vmatprep.mubr.msk.f32.mxu1 %vm14517_vm1, %v14518_v36 }
 0x58f   :  { %v12206_v28 = vpop.f32.mrb[16].mxu1 }
 0x590   :  { %v1919_v39 = vpop.f32.mrb[17].mxu1  ;;  %v1959_v1 = vsel %vm622_vm2, %v12206_v28, -inf }
 0x591   :  { %v1958_v45 = vsel %vm622_vm2, %v1919_v39, -inf }
 0x593   :  { %v12209_v41 = vpop.f32.mrb[18].mxu1 }
 0x594   :  { %v1929_v26 = vpop.f32.mrb[19].mxu1  ;;  %v1961_v16 = vsel %vm622_vm2, %v12209_v41, -inf }
 0x595   :  { %v1960_v59 = vsel %vm622_vm2, %v1929_v26, -inf }
 0x597   :  { %v12212_v31 = vpop.f32.mrb[20].mxu1 }
 0x598   :  { %v1964_v19 = vsel %vm622_vm2, %v12212_v31, -inf  ;;  %v1939_v44 = vpop.f32.mrb[21].mxu1 }
 0x599   :  { %v1965_v13 = vmax.f32 %v1959_v1, %v1964_v19  ;;  %v1962_v25 = vsel %vm622_vm2, %v1939_v44, -inf }
 0x59a   :  { %v1963_v21 = vmax.f32 %v1958_v45, %v1962_v25 }
 0x59b   :  { %v12215_v12 = vpop.f32.mrb[22].mxu1 }
 0x59c   :  { %v1970_v57 = vmax.f32 %v1963_v21, %v1965_v13  ;;  %v1968_v47 = vsel %vm622_vm2, %v12215_v12, -inf  ;;  %v1949_v58 = vpop.f32.mrb[23].mxu1 }
 0x59d   :  { %v1969_v43 = vmax.f32 %v1961_v16, %v1968_v47  ;;  %v1966_v42 = vsel %vm622_vm2, %v1949_v58, -inf }
 0x59e   :  { %v1967_v60 = vmax.f32 %v1960_v59, %v1966_v42 }
 0x5a0   :  { %v1971_v32 = vmax.f32 %v1967_v60, %v1969_v43 }
 0x5a2   :  { %v1972_v4 = vmax.f32 %v1970_v57, %v1971_v32 }
 0x5a4   :  { %v1973_v50 = vsub.f32 %v1919_v39, %v1972_v4  ;;  %v1974_v56 = vsub.f32 %v12206_v28, %v1972_v4  ;;  %v1975_v17 = vsub.f32 %v1929_v26, %v1972_v4  ;;  %v1976_v61 = vsub.f32 %v12209_v41, %v1972_v4 }
 0x5a5   :  { %v1977_v2 = vsub.f32 %v1939_v44, %v1972_v4  ;;  %v1978_v63 = vsub.f32 %v12212_v31, %v1972_v4  ;;  %v1979_v0 = vsub.f32 %v1949_v58, %v1972_v4  ;;  %v1980_v7 = vsub.f32 %v12215_v12, %v1972_v4 }
 0x5a6   :  { %v1981_v6 = vmul.f32 1.442695, %v1973_v50  ;;  %v1983_v9 = vmul.f32 1.442695, %v1974_v56  ;;  %v1985_v11 = vmul.f32 1.442695, %v1975_v17 }
 0x5a7   :  { %v1987_v15 = vmul.f32 1.442695, %v1976_v61  ;;  %v1989_v33 = vmul.f32 1.442695, %v1977_v2  ;;  %v1991_v8 = vmul.f32 1.442695, %v1978_v63 }
 0x5a8   :  { %14224 = vpow2.f32 %v1981_v6  ;;  %v1993_v18 = vmul.f32 1.442695, %v1979_v0  ;;  %v1995_v54 = vmul.f32 1.442695, %v1980_v7  ;;  %v15294_v6 = vld [vmem:[%s17645_s29 + $0x8] sm:$0xff] }
 0x5a9   :  { %14226 = vpow2.f32 %v1983_v9  ;;  %v15299_v9 = vld [vmem:[%s17642_s28 + $0x8] sm:$0xff] }
 0x5aa   :  { %14228 = vpow2.f32 %v1985_v11  ;;  %v15304_v11 = vld [vmem:[%s17645_s29] sm:$0xff] }
 0x5ab   :  { %14230 = vpow2.f32 %v1987_v15  ;;  %v15309_v15 = vld [vmem:[%s17642_s28] sm:$0xff] }
 0x5ac   :  { %14232 = vpow2.f32 %v1989_v33 }
 0x5ad   :  { %14234 = vpow2.f32 %v1991_v8 }
 0x5ae   :  { %14236 = vpow2.f32 %v1993_v18 }
 0x5af   :  { %14238 = vpow2.f32 %v1995_v54 }
 0x5b2   :  { %v14225_v24 = vpop.eup %14224 }
 0x5b3   :  { %v14227_v28 = vpop.eup %14226  ;;  %v1997_v39 = vsel %vm622_vm2, %v14225_v24, 0.0 }
 0x5b4   :  { %v14229_v41 = vpop.eup %14228  ;;  %v1998_v26 = vsel %vm622_vm2, %v14227_v28, 0.0 }
 0x5b5   :  { %v14231_v31 = vpop.eup %14230  ;;  %v1999_v1 = vadd.f32 %v1998_v26, %v1997_v39  ;;  %v2000_v19 = vsel %vm622_vm2, %v14229_v41, 0.0  ;;  %v15318_v39 = vld [vmem:[%s17645_s29 + $0x18] sm:$0xff]  ;;  %v15328_v26 = vld [vmem:[%s17645_s29 + $0x10] sm:$0xff] }
 0x5b6   :  { %v14233_v44 = vpop.eup %14232  ;;  %v2002_v13 = vsel %vm622_vm2, %v14231_v31, 0.0 }
 0x5b7   :  { %v2001_v45 = vadd.f32 %v2000_v19, %v1999_v1  ;;  %v14235_v25 = vpop.eup %14234  ;;  %v2004_v12 = vsel %vm622_vm2, %v14233_v44, 0.0 }
 0x5b8   :  { %v14237_v16 = vpop.eup %14236  ;;  %v2006_v47 = vsel %vm622_vm2, %v14235_v25, 0.0 }
 0x5b9   :  { %v2003_v21 = vadd.f32 %v2002_v13, %v2001_v45  ;;  %v14239_v58 = vpop.eup %14238  ;;  %v2008_v43 = vsel %vm622_vm2, %v14237_v16, 0.0 }
 0x5ba   :  { %v2010_v60 = vsel %vm622_vm2, %v14239_v58, 0.0 }
 0x5bb   :  { %v2005_v57 = vadd.f32 %v2004_v12, %v2003_v21 }
 0x5bd   :  { %v2007_v59 = vadd.f32 %v2006_v47, %v2005_v57 }
 0x5bf   :  { %v2009_v42 = vadd.f32 %v2008_v43, %v2007_v59  ;;  %v15346_v59 = vld [vmem:[%s17645_s29 + $0x28] sm:$0xff]  ;;  %v15351_v43 = vld [vmem:[%s17645_s29 + $0x20] sm:$0xff] }
 0x5c1   :  { %v2011_v32 = vadd.f32 %v2010_v60, %v2009_v42  ;;  %v15356_v42 = vld [vmem:[%s17642_s28 + $0x20] sm:$0xff] }
 0x5c3   :  { %14240 = vrcp.f32 %v2011_v32 }
 0x5cd   :  { %v14241_v4 = vpop.eup %14240 }
 0x5ce   :  { %v2014_v50 = vmul.f32 %v14241_v4, %v14227_v28  ;;  %v2013_v56 = vmul.f32 %v14241_v4, %v14225_v24  ;;  %v2016_v17 = vmul.f32 %v14241_v4, %v14231_v31  ;;  %v2015_v61 = vmul.f32 %v14241_v4, %v14229_v41  ;;  %v15323_v41 = vld [vmem:[%s17642_s28 + $0x18] sm:$0xff]  ;;  %v15333_v31 = vld [vmem:[%s17642_s28 + $0x10] sm:$0xff] }
 0x5cf   :  { %v2018_v2 = vmul.f32 %v14241_v4, %v14235_v25  ;;  %v2017_v63 = vmul.f32 %v14241_v4, %v14233_v44  ;;  %v2020_v0 = vmul.f32 %v14241_v4, %v14239_v58  ;;  %v2019_v7 = vmul.f32 %v14241_v4, %v14237_v16 }
 0x5d0   :  { %2036 = vperm.xlu1 %14163, %v2014_v50   ;;  %2031 = vperm.xlu0 %14162, %v2013_v56  }
 0x5d4   :  { %2046 = vperm.xlu1 %14163, %v2016_v17   ;;  %2041 = vperm.xlu0 %14162, %v2015_v61  }
 0x5d8   :  { %2056 = vperm.xlu1 %14163, %v2018_v2   ;;  %2051 = vperm.xlu0 %14162, %v2017_v63  }
 0x5dc   :  { %2066 = vperm.xlu1 %14163, %v2020_v0   ;;  %2061 = vperm.xlu0 %14162, %v2019_v7  }
 0x64f   :  { %v2037_v33 = vpop.permute.xlu1 %2036  ;;  %v2032_v8 = vpop.permute.xlu0 %2031 }
 0x650   :  { %v2070_v18 = vmul.f32 %v2037_v33, %v15294_v6  ;;  %v2101_v54 = vmul.f32 %v15299_v9, %v2037_v33  ;;  %v2069_v24 = vmul.f32 %v2032_v8, %v15304_v11  ;;  %v2100_v28 = vmul.f32 %v15309_v15, %v2032_v8  ;;  %v15368_v33 = vld [vmem:[%s17642_s28 + $0x28] sm:$0xff] }
 0x652   :  { %v2078_v1 = vsel %vm79_vm0, %v2070_v18, 0.0  ;;  %v2109_v19 = vsel %vm79_vm0, %v2101_v54, 0.0  ;;  %v2077_v44 = vsel %vm79_vm0, %v2069_v24, 0.0  ;;  %v2108_v45 = vsel %vm79_vm0, %v2100_v28, 0.0  ;;  %v15373_v54 = vld [vmem:[%s17645_s29 + $0x38] sm:$0xff]  ;;  %v15378_v24 = vld [vmem:[%s17645_s29 + $0x30] sm:$0xff] }
 0x653   :  { %v2047_v13 = vpop.permute.xlu1 %2046  ;;  %v2042_v25 = vpop.permute.xlu0 %2041  ;;  %v2079_v47 = vadd.f32 %v2078_v1, %v2077_v44  ;;  %v2110_v58 = vadd.f32 %v2109_v19, %v2108_v45  ;;  %v15385_v45 = vld [vmem:[%s17642_s28 + $0x30] sm:$0xff] }
 0x654   :  { %v2072_v21 = vmul.f32 %v2047_v13, %v15318_v39  ;;  %v2103_v12 = vmul.f32 %v15323_v41, %v2047_v13  ;;  %v2071_v16 = vmul.f32 %v2042_v25, %v15328_v26  ;;  %v2102_v57 = vmul.f32 %v15333_v31, %v2042_v25 }
 0x656   :  { %v2080_v60 = vsel %vm79_vm0, %v2071_v16, 0.0  ;;  %v2111_v32 = vsel %vm79_vm0, %v2102_v57, 0.0  ;;  %v2082_v4 = vsel %vm79_vm0, %v2072_v21, 0.0  ;;  %v2113_v2 = vsel %vm79_vm0, %v2103_v12, 0.0 }
 0x657   :  { %v2081_v50 = vadd.f32 %v2080_v60, %v2079_v47  ;;  %v2112_v56 = vadd.f32 %v2111_v32, %v2110_v58  ;;  %v2057_v17 = vpop.permute.xlu1 %2056  ;;  %v2052_v61 = vpop.permute.xlu0 %2051 }
 0x658   :  { %v2074_v63 = vmul.f32 %v2057_v17, %v15346_v59  ;;  %v2073_v0 = vmul.f32 %v2052_v61, %v15351_v43  ;;  %v2104_v7 = vmul.f32 %v15356_v42, %v2052_v61  ;;  %v2105_v21 = vmul.f32 %v15368_v33, %v2057_v17 }
 0x659   :  { %v2083_v8 = vadd.f32 %v2082_v4, %v2081_v50  ;;  %v2114_v18 = vadd.f32 %v2113_v2, %v2112_v56  ;;  %v15398_v56 = vld [vmem:[%s17642_s28 + $0x38] sm:$0xff] }
 0x65a   :  { %v2084_v28 = vsel %vm79_vm0, %v2073_v0, 0.0  ;;  %v2115_v1 = vsel %vm79_vm0, %v2104_v7, 0.0  ;;  %v2086_v25 = vsel %vm79_vm0, %v2074_v63, 0.0  ;;  %v2117_v4 = vsel %vm79_vm0, %v2105_v21, 0.0 }
 0x65b   :  { %v2085_v19 = vadd.f32 %v2084_v28, %v2083_v8  ;;  %v2067_v44 = vpop.permute.xlu1 %2066  ;;  %v2062_v13 = vpop.permute.xlu0 %2061  ;;  %v2116_v57 = vadd.f32 %v2115_v1, %v2114_v18  ;;  %v11149_v28 = vld [vmem:[%s17621_s0 + $0x20] sm:$0xff] }
 0x65c   :  { %v2076_v12 = vmul.f32 %v2067_v44, %v15373_v54  ;;  %v2075_v16 = vmul.f32 %v2062_v13, %v15378_v24  ;;  %v2106_v60 = vmul.f32 %v15385_v45, %v2062_v13  ;;  %v2107_v63 = vmul.f32 %v15398_v56, %v2067_v44 }
 0x65d   :  { %v2087_v47 = vadd.f32 %v2086_v25, %v2085_v19  ;;  %v2118_v17 = vadd.f32 %v2117_v4, %v2116_v57 }
 0x65e   :  { %v2088_v58 = vsel %vm79_vm0, %v2075_v16, 0.0  ;;  %v2090_v50 = vsel %vm79_vm0, %v2076_v12, 0.0  ;;  %v2119_v2 = vsel %vm79_vm0, %v2106_v60, 0.0  ;;  %v2121_v7 = vsel %vm79_vm0, %v2107_v63, 0.0 }
 0x65f   :  { %v2089_v32 = vadd.f32 %v2088_v58, %v2087_v47  ;;  %v2120_v0 = vadd.f32 %v2119_v2, %v2118_v17 }
 0x661   :  { %v15400_v61 = vadd.f32 %v2090_v50, %v2089_v32 }
 0x663   :  { %12225 = vmatmul.mubr.msk.f32.vlgmr.msra.gmra.mrb[16].mxu0 %vm79_vm0, %v15400_v61  ;;  %12247 = vmatmul.mubr.msk.f32.vlgmr.msra.gmra.mrb[24].mxu1 %vm79_vm0, %v15400_v61 }
 0x664   :  { %13450 = vmatpush3.bf16.msra.mxu0 %v14969_v23  ;;  %13462 = vmatpush3.bf16.msra.mxu1 %v14974_v38  ;;  %v15419_v23 = vadd.f32 %v2121_v7, %v2120_v0  ;;  %v3065_v38 = vld [vmem:[%s17646_s2] sm:$0xff] }
 0x665   :  { %13451 = vmatprep.subr.bf16.mxu0 %v14516_v20  ;;  %13463 = vmatprep.subr.bf16.mxu1 %v14516_v20 }
 0x666   :  { %12235 = vmatprep.mubr.msk.f32.mxu0 %vm14517_vm1, %v14518_v36  ;;  %12257 = vmatprep.mubr.msk.f32.mxu1 %vm14517_vm1, %v14518_v36 }
 0x668   :  { %13453 = vmatpush3.bf16.msra.mxu0 %v14998_v27  ;;  %13465 = vmatpush3.bf16.msra.mxu1 %v15000_v46  ;;  %v3066_v27 = vld [vmem:[%s17646_s2 + $0x8] sm:$0xff] }
 0x669   :  { %13466 = vmatprep.subr.bf16.mxu0 %v14516_v20  ;;  %13472 = vmatprep.subr.bf16.mxu1 %v14516_v20  ;;  %v15481_v46 = vpack.c.bf16 %v3066_v27, %v3065_v38  ;;  %v15552_v27 = vld [vmem:[#allocation3 + $0x8] sm:$0xff] }
 0x66b   :  { %12236 = vmatmul.mubr.msk.f32.vlgmr.msra.gmra.mrb[16].mxu0 %vm79_vm0, %v15419_v23  ;;  %12258 = vmatmul.mubr.msk.f32.vlgmr.msra.gmra.mrb[24].mxu1 %vm79_vm0, %v15419_v23 }
 0x66c   :  { %13468 = vmatpush3.bf16.msra.mxu0 %v15023_v55  ;;  %13474 = vmatpush3.bf16.msra.mxu1 %v15025_v30  ;;  %v3067_v55 = vld [vmem:[%s17646_s2 + $0x10] sm:$0xff]  ;;  %v3068_v30 = vld [vmem:[%s17646_s2 + $0x18] sm:$0xff] }
 0x66d   :  { %13469 = vmatprep.subr.bf16.mxu0 %v14516_v20  ;;  %13475 = vmatprep.subr.bf16.mxu1 %v14516_v20 }
 0x66e   :  { %12268 = vmatprep.mubr.msk.f32.mxu0 %vm14517_vm1, %v14518_v36  ;;  %12279 = vmatprep.mubr.msk.f32.mxu1 %vm14517_vm1, %v14518_v36 }
 0x670   :  { %13471 = vmatpush3.bf16.msra.mxu0 %v15049_v49  ;;  %13477 = vmatpush3.bf16.msra.mxu1 %v15051_v51  ;;  %v15490_v49 = vpack.c.bf16 %v3068_v30, %v3067_v55  ;;  %v11150_v51 = vld [vmem:[%s17621_s0 + $0x28] sm:$0xff]  ;;  %v15554_v55 = vld [vmem:[#allocation3 + $0x10] sm:$0xff] }
 0x671   :  { %13478 = vmatprep.subr.bf16.mxu0 %v14516_v20  ;;  %13484 = vmatprep.subr.bf16.mxu1 %v14516_v20 }
 0x673   :  { %12269 = vmatmul.mubr.msk.f32.vlgmr.msra.gmra.mrb[18].mxu0 %vm79_vm0, %v15400_v61  ;;  %12280 = vmatmul.mubr.msk.f32.vlgmr.msra.gmra.mrb[26].mxu1 %vm79_vm0, %v15419_v23 }
 0x674   :  { %13480 = vmatpush3.bf16.msra.mxu0 %v15073_v62  ;;  %13486 = vmatpush3.bf16.msra.mxu1 %v15075_v3 }
 0x675   :  { %13481 = vmatprep.subr.bf16.mxu0 %v14516_v20  ;;  %13487 = vmatprep.subr.bf16.mxu1 %v14516_v20 }
 0x676   :  { %12290 = vmatprep.mubr.msk.f32.mxu0 %vm14517_vm1, %v14518_v36  ;;  %12301 = vmatprep.mubr.msk.f32.mxu1 %vm14517_vm1, %v14518_v36 }
 0x678   :  { %13483 = vmatpush3.bf16.msra.mxu0 %v15097_v10  ;;  %13489 = vmatpush3.bf16.msra.mxu1 %v15099_v34 }
 0x679   :  { %13490 = vmatprep.subr.bf16.mxu0 %v14516_v20  ;;  %13496 = vmatprep.subr.bf16.mxu1 %v14516_v20 }
 0x67b   :  { %12291 = vmatmul.mubr.msk.f32.vlgmr.msra.gmra.mrb[16].mxu0 %vm79_vm0, %v15191_v53  ;;  %12302 = vmatmul.mubr.msk.f32.vlgmr.msra.gmra.mrb[24].mxu1 %vm79_vm0, %v15191_v53 }
 0x67c   :  { %13492 = vmatpush3.bf16.msra.mxu0 %v15115_v14  ;;  %12312 = vmatprep.mubr.msk.f32.mxu0 %vm14517_vm1, %v14518_v36 }
 0x67d   :  { %13493 = vmatprep.subr.bf16.mxu0 %v14516_v20  ;;  %13498 = vmatpush3.bf16.msra.mxu1 %v15153_v22  ;;  %v11148_v22 = vld [vmem:[%s17621_s0 + $0x18] sm:$0xff] }
 0x67e   :  { %13499 = vmatprep.subr.bf16.mxu1 %v14516_v20  ;;  %12323 = vmatprep.mubr.msk.f32.mxu1 %vm14517_vm1, %v14518_v36 }
 0x680   :  { %13495 = vmatpush3.bf16.msra.mxu0 %v15130_v29 }
 0x681   :  { %13514 = vmatprep.subr.bf16.mxu0 %v14516_v20  ;;  %13501 = vmatpush3.bf16.msra.mxu1 %v15163_v5 }
 0x682   :  { %13502 = vmatprep.subr.bf16.mxu1 %v14516_v20 }
 0x683   :  { %12313 = vmatmul.mubr.msk.f32.vlgmr.msra.gmra.mrb[20].mxu0 %vm79_vm0, %v15191_v53 }
 0x684   :  { %12356 = vmatprep.mubr.msk.f32.mxu0 %vm14517_vm1, %v14518_v36  ;;  %13516 = vmatpush3.bf16.msra.mxu0 %v15481_v46 }
 0x685   :  { %13517 = vmatprep.subr.bf16.mxu0 %v14516_v20 }
 0x688   :  { %13519 = vmatpush3.bf16.msra.mxu0 %v15490_v49 }
 0x746   :  { %v2503_v62 = vpop.f32.mrb[18].mxu0  ;;  %v2578_v3 = vpop.f32.mrb[26].mxu1 }
 0x747   :  { %v2507_v10 = vadd.f32 %v11150_v51, %v2503_v62  ;;  %v12270_v34 = vpop.f32.mrb[19].mxu0  ;;  %v12281_v14 = vpop.f32.mrb[27].mxu1 }
 0x748   :  { %v15561_v34 = vld [vmem:[#allocation3 + $0x20] sm:$0xff] }
 0x749   :  { %v2582_v29 = vadd.f32 %v2578_v3, %v2507_v10  ;;  %v15559_v10 = vld [vmem:[#allocation3 + $0x18] sm:$0xff] }
 0x74e   :  { %v2653_v5 = vpop.f32.mrb[16].mxu0  ;;  %v2734_v8 = vpop.f32.mrb[24].mxu1 }
 0x74f   :  { %v14033_v18 = vadd.f32 %v11148_v22, %v2653_v5  ;;  %v12292_v1 = vpop.f32.mrb[17].mxu0  ;;  %v12303_v19 = vpop.f32.mrb[25].mxu1  ;;  %v14034_v13 = vadd.f32 %v11149_v28, %v2734_v8  ;;  %v15565_v22 = vld [vmem:[#allocation3 + $0x28] sm:$0xff]  ;;  %v15567_v5 = vld [vmem:[#allocation3 + $0x30] sm:$0xff]  ;;  %v15571_v28 = vld [vmem:[#allocation3 + $0x38] sm:$0xff] }
 0x751   :  { %v11158_v44 = vmul.f32 -1.442695, %v14033_v18  ;;  %v11160_v25 = vmul.f32 -1.442695, %v14034_v13  ;;  %v11163_v13 = vld [vmem:[%s17625_s1 + $0x8] sm:$0xff] }
 0x753   :  { %14242 = vpow2.f32 %v11158_v44 }
 0x754   :  { %14244 = vpow2.f32 %v11160_v25 }
 0x756   :  { %v2822_v21 = vpop.f32.mrb[20].mxu0 }
 0x757   :  { %v12314_v12 = vpop.f32.mrb[21].mxu0  ;;  %v2823_v60 = vadd.f32 %v15179_v35, %v2822_v21  ;;  %v3163_v35 = vld [vmem:[%s17647_s4] sm:$0xff] }
 0x75d   :  { %v14243_v16 = vpop.eup %14242 }
 0x75e   :  { %v2661_v57 = vadd.f32 1.0, %v14243_v16  ;;  %v14245_v47 = vpop.eup %14244 }
 0x75f   :  { %v2742_v58 = vadd.f32 1.0, %v14245_v47 }
 0x760   :  { %14246 = vrcp.f32 %v2661_v57 }
 0x761   :  { %14248 = vrcp.f32 %v2742_v58 }
 0x76a   :  { %v14247_v32 = vpop.eup %14246 }
 0x76b   :  { %v2826_v4 = vmul.f32 %v14247_v32, %v2823_v60  ;;  %v14249_v17 = vpop.eup %14248 }
 0x76c   :  { %v2829_v2 = vsub.f32 1.0, %v14249_v17  ;;  %v2831_v0 = vmul.f32 %v14249_v17, %v15191_v53  ;;  %v3165_v53 = vld [vmem:[%s17647_s4 + $0x10] sm:$0xff] }
 0x76d   :  { %v2827_v50 = vadd.f32 %v2826_v4, %v2582_v29 }
 0x76f   :  { %14250 = vtanh.f32 %v2827_v50 }
 0x779   :  { %v14251_v63 = vpop.eup %14250 }
 0x77a   :  { %v2830_v7 = vmul.f32 %v14251_v63, %v2829_v2 }
 0x77c   :  { %v15505_v38 = vadd.f32 %v2831_v0, %v2830_v7 }
 0x77e   :  { %12324 = vmatmul.mubr.msk.f32.vlgmr.msra.gmra.mrb[28].mxu1 %vm79_vm0, %v15505_v38  ;;  %12357 = vmatmul.mubr.msk.f32.vlgmr.msra.gmra.mrb[22].mxu0 %vm79_vm0, %v15505_v38 }
 0x77f   :  { %13504 = vmatpush3.bf16.msra.mxu1 %v15189_v52  ;;  %12334 = vmatprep.mubr.msk.f32.mxu1 %vm14517_vm1, %v14518_v36  ;;  %v3164_v52 = vld [vmem:[%s17647_s4 + $0x8] sm:$0xff] }
 0x780   :  { %13505 = vmatprep.subr.bf16.mxu1 %v14516_v20 }
 0x783   :  { %13507 = vmatpush3.bf16.msra.mxu1 %v15204_v37  ;;  %v15538_v37 = vpack.c.bf16 %v3164_v52, %v3163_v35 }
 0x784   :  { %13508 = vmatprep.subr.bf16.mxu1 %v14516_v20 }
 0x785   :  { %13521 = vmatprep.subr.bf16.mxu0 %v15538_v37 }
 0x786   :  { %12335 = vmatmul.mubr.msk.f32.vlgmr.msra.gmra.mrb[28].mxu1 %vm79_vm0, %v15400_v61  ;;  %13523 = vmatpush3.bf16.msra.mxu0 %v15538_v37 }
 0x787   :  { %13510 = vmatpush3.bf16.msra.mxu1 %v15218_v48  ;;  %12345 = vmatprep.mubr.msk.f32.mxu1 %vm14517_vm1, %v14518_v36  ;;  %v3166_v48 = vld [vmem:[%s17647_s4 + $0x18] sm:$0xff] }
 0x788   :  { %13511 = vmatprep.subr.bf16.mxu1 %v14516_v20 }
 0x78b   :  { %13513 = vmatpush3.bf16.msra.mxu1 %v15232_v40  ;;  %v15543_v40 = vpack.c.bf16 %v3166_v48, %v3165_v53 }
 0x78c   :  { %13528 = vmatprep.subr.bf16.mxu1 %v14516_v20 }
 0x78d   :  { %13525 = vmatprep.subr.bf16.mxu0 %v15543_v40 }
 0x78e   :  { %12346 = vmatmul.mubr.msk.f32.vlgmr.msra.gmra.mrb[28].mxu1 %vm79_vm0, %v15419_v23  ;;  %13527 = vmatpush3.bf16.msra.mxu0 %v15543_v40  ;;  %v15550_v23 = vld [vmem:[#allocation3] sm:$0xff] }
 0x78f   :  { %12387 = vmatprep.mubr.msk.f32.mxu1 %vm14517_vm1, %v14518_v36  ;;  %13540 = vmatprep.subr.bf16.mxu0 %v14516_v20 }
 0x851   :  { %v3135_v61 = vpop.f32.mrb[22].mxu0 }
 0x852   :  { %v3147_v30 = vadd.f32 %v15550_v23, %v3135_v61  ;;  %v3148_v51 = vadd.f32 %v15552_v27, %v3135_v61  ;;  %v3149_v62 = vadd.f32 %v15554_v55, %v3135_v61  ;;  %v12358_v3 = vpop.f32.mrb[23].mxu0  ;;  %v3150_v14 = vadd.f32 %v15559_v10, %v3135_v61 }
 0x853   :  { %v3151_v29 = vadd.f32 %v15561_v34, %v3135_v61  ;;  %v3152_v8 = vadd.f32 %v15565_v22, %v3135_v61  ;;  %v3153_v18 = vadd.f32 %v15567_v5, %v3135_v61  ;;  %v3154_v1 = vadd.f32 %v15571_v28, %v3135_v61 }
 0x854   :  { %14252 = vtanh.f32 %v3147_v30 }
 0x855   :  { %14254 = vtanh.f32 %v3148_v51 }
 0x856   :  { %14256 = vtanh.f32 %v3149_v62 }
 0x857   :  { %14258 = vtanh.f32 %v3150_v14 }
 0x858   :  { %14260 = vtanh.f32 %v3151_v29 }
 0x859   :  { %14262 = vtanh.f32 %v3152_v8 }
 0x85a   :  { %14264 = vtanh.f32 %v3153_v18 }
 0x85b   :  { %14266 = vtanh.f32 %v3154_v1 }
 0x85e   :  { %v14253_v19 = vpop.eup %14252 }
 0x85f   :  { %v14255_v44 = vpop.eup %14254  ;;  %12367 = vmatprep.mubr.msk.f32.mxu0 %vm79_vm0, %v14253_v19 }
 0x860   :  { %v14257_v25 = vpop.eup %14256  ;;  %12368 = vmatmul.mubr.msk.f32.vlgmr.msra.gmra.mrb[24].mxu0 %vm79_vm0, %v14255_v44 }
 0x861   :  { %v3058_v21 = vpop.f32.mrb[28].mxu1  ;;  %12370 = vmatprep.mubr.msk.f32.mxu0 %vm79_vm0, %v14257_v25  ;;  %v14259_v57 = vpop.eup %14258 }
 0x862   :  { %v14035_v12 = vadd.f32 %v11163_v13, %v3058_v21  ;;  %v12347_v16 = vpop.f32.mrb[29].mxu1  ;;  %v14261_v47 = vpop.eup %14260 }
 0x863   :  { %v14263_v58 = vpop.eup %14262 }
 0x864   :  { %11167 = vst [vmem:[%s17626_s23 + $0x8] sm:$0xff] %v14035_v12  ;;  %12371 = vmatmul.mubr.msk.f32.gmra.mrb[26].mxu0 %vm79_vm0, %v14259_v57  ;;  %v14265_v60 = vpop.eup %14264 }
 0x865   :  { %12373 = vmatprep.mubr.msk.f32.mxu0 %vm79_vm0, %v14261_v47  ;;  %v14267_v32 = vpop.eup %14266 }
 0x868   :  { %12374 = vmatmul.mubr.msk.f32.gmra.mrb[28].mxu0 %vm79_vm0, %v14263_v58 }
 0x869   :  { %12376 = vmatprep.mubr.msk.f32.mxu0 %vm79_vm0, %v14265_v60 }
 0x86c   :  { %12377 = vmatmul.mubr.msk.f32.gmra.mrb[30].mxu0 %vm79_vm0, %v14267_v32 }
 0x86d   :  { %12409 = vmatprep.mubr.msk.f32.mxu0 %vm14517_vm1, %v14518_v36 }
 0x933   :  { %v12369_v4 = vpop.f32.mrb[24].mxu0 }
 0x934   :  { %v3257_v50 = vpop.f32.mrb[25].mxu0  ;;  %v3297_v0 = vsel %vm622_vm2, %v12369_v4, -inf }
 0x935   :  { %v3296_v52 = vsel %vm622_vm2, %v3257_v50, -inf }
 0x937   :  { %v12372_v17 = vpop.f32.mrb[26].mxu0 }
 0x938   :  { %v3267_v2 = vpop.f32.mrb[27].mxu0  ;;  %v3299_v51 = vsel %vm622_vm2, %v12372_v17, -inf }
 0x939   :  { %v3298_v29 = vsel %vm622_vm2, %v3267_v2, -inf }
 0x93b   :  { %v12375_v63 = vpop.f32.mrb[28].mxu0 }
 0x93c   :  { %v3302_v7 = vsel %vm622_vm2, %v12375_v63, -inf  ;;  %v3277_v35 = vpop.f32.mrb[29].mxu0 }
 0x93d   :  { %v3303_v53 = vmax.f32 %v3297_v0, %v3302_v7  ;;  %v3300_v48 = vsel %vm622_vm2, %v3277_v35, -inf }
 0x93e   :  { %v3301_v61 = vmax.f32 %v3296_v52, %v3300_v48 }
 0x93f   :  { %v12378_v30 = vpop.f32.mrb[30].mxu0 }
 0x940   :  { %v3308_v62 = vmax.f32 %v3301_v61, %v3303_v53  ;;  %v3306_v3 = vsel %vm622_vm2, %v12378_v30, -inf  ;;  %v3287_v14 = vpop.f32.mrb[31].mxu0 }
 0x941   :  { %v3307_v8 = vmax.f32 %v3299_v51, %v3306_v3  ;;  %v3304_v18 = vsel %vm622_vm2, %v3287_v14, -inf }
 0x942   :  { %v3305_v1 = vmax.f32 %v3298_v29, %v3304_v18 }
 0x944   :  { %v3309_v19 = vmax.f32 %v3305_v1, %v3307_v8 }
 0x946   :  { %v3310_v44 = vmax.f32 %v3308_v62, %v3309_v19 }
 0x948   :  { %v3311_v13 = vsub.f32 %v3257_v50, %v3310_v44  ;;  %v3312_v25 = vsub.f32 %v12369_v4, %v3310_v44  ;;  %v3313_v21 = vsub.f32 %v3267_v2, %v3310_v44  ;;  %v3314_v12 = vsub.f32 %v12372_v17, %v3310_v44 }
 0x949   :  { %v3315_v16 = vsub.f32 %v3277_v35, %v3310_v44  ;;  %v3316_v57 = vsub.f32 %v12375_v63, %v3310_v44  ;;  %v3317_v47 = vsub.f32 %v3287_v14, %v3310_v44  ;;  %v3318_v58 = vsub.f32 %v12378_v30, %v3310_v44 }
 0x94a   :  { %v3319_v60 = vmul.f32 1.442695, %v3311_v13  ;;  %v3321_v32 = vmul.f32 1.442695, %v3312_v25  ;;  %v3323_v0 = vmul.f32 1.442695, %v3313_v21 }
 0x94b   :  { %v3325_v7 = vmul.f32 1.442695, %v3314_v12  ;;  %v3327_v52 = vmul.f32 1.442695, %v3315_v16  ;;  %v3329_v53 = vmul.f32 1.442695, %v3316_v57 }
 0x94c   :  { %14268 = vpow2.f32 %v3319_v60  ;;  %v3331_v48 = vmul.f32 1.442695, %v3317_v47  ;;  %v3333_v4 = vmul.f32 1.442695, %v3318_v58 }
 0x94d   :  { %14270 = vpow2.f32 %v3321_v32 }
 0x94e   :  { %14272 = vpow2.f32 %v3323_v0 }
 0x94f   :  { %14274 = vpow2.f32 %v3325_v7 }
 0x950   :  { %14276 = vpow2.f32 %v3327_v52 }
 0x951   :  { %14278 = vpow2.f32 %v3329_v53 }
 0x952   :  { %14280 = vpow2.f32 %v3331_v48 }
 0x953   :  { %14282 = vpow2.f32 %v3333_v4  ;;  %v3465_v4 = vld [vmem:[%s17611_s14] sm:$0xff] }
 0x956   :  { %v14269_v50 = vpop.eup %14268 }
 0x957   :  { %v14271_v17 = vpop.eup %14270  ;;  %v3335_v2 = vsel %vm622_vm2, %v14269_v50, 0.0 }
 0x958   :  { %v14273_v63 = vpop.eup %14272  ;;  %v3336_v35 = vsel %vm622_vm2, %v14271_v17, 0.0 }
 0x959   :  { %v14275_v61 = vpop.eup %14274  ;;  %v3337_v30 = vadd.f32 %v3336_v35, %v3335_v2  ;;  %v3338_v51 = vsel %vm622_vm2, %v14273_v63, 0.0 }
 0x95a   :  { %v14277_v62 = vpop.eup %14276  ;;  %v3340_v14 = vsel %vm622_vm2, %v14275_v61, 0.0 }
 0x95b   :  { %v3339_v3 = vadd.f32 %v3338_v51, %v3337_v30  ;;  %v14279_v29 = vpop.eup %14278  ;;  %v3342_v18 = vsel %vm622_vm2, %v14277_v62, 0.0  ;;  %v3468_v30 = vld [vmem:[%s17611_s14 + $0x18] sm:$0xff]  ;;  %v3623_v51 = vld [vmem:[%s17612_s15 + $0x10] sm:$0xff] }
 0x95c   :  { %v14281_v1 = vpop.eup %14280  ;;  %v3344_v44 = vsel %vm622_vm2, %v14279_v29, 0.0 }
 0x95d   :  { %v3341_v8 = vadd.f32 %v3340_v14, %v3339_v3  ;;  %v14283_v13 = vpop.eup %14282  ;;  %v3346_v21 = vsel %vm622_vm2, %v14281_v1, 0.0  ;;  %v3624_v3 = vld [vmem:[%s17612_s15 + $0x18] sm:$0xff] }
 0x95e   :  { %v3348_v16 = vsel %vm622_vm2, %v14283_v13, 0.0  ;;  %v15640_v14 = vpack.c.bf16 %v3624_v3, %v3623_v51 }
 0x95f   :  { %v3343_v19 = vadd.f32 %v3342_v18, %v3341_v8 }
 0x961   :  { %v3345_v25 = vadd.f32 %v3344_v44, %v3343_v19 }
 0x963   :  { %v3347_v12 = vadd.f32 %v3346_v21, %v3345_v25 }
 0x965   :  { %v3349_v57 = vadd.f32 %v3348_v16, %v3347_v12 }
 0x967   :  { %14284 = vrcp.f32 %v3349_v57 }
 0x971   :  { %v14285_v47 = vpop.eup %14284 }
 0x972   :  { %v3352_v58 = vmul.f32 %v14285_v47, %v14271_v17  ;;  %v3351_v60 = vmul.f32 %v14285_v47, %v14269_v50  ;;  %v3354_v32 = vmul.f32 %v14285_v47, %v14275_v61  ;;  %v3353_v0 = vmul.f32 %v14285_v47, %v14273_v63  ;;  %v3466_v50 = vld [vmem:[%s17611_s14 + $0x8] sm:$0xff]  ;;  %v3621_v17 = vld [vmem:[%s17612_s15] sm:$0xff]  ;;  %v3467_v61 = vld [vmem:[%s17611_s14 + $0x10] sm:$0xff] }
 0x973   :  { %v3356_v7 = vmul.f32 %v14285_v47, %v14279_v29  ;;  %v3355_v52 = vmul.f32 %v14285_v47, %v14277_v62  ;;  %v3358_v53 = vmul.f32 %v14285_v47, %v14283_v13  ;;  %v3357_v48 = vmul.f32 %v14285_v47, %v14281_v1  ;;  %v3622_v63 = vld [vmem:[%s17612_s15 + $0x8] sm:$0xff] }
 0x974   :  { %3374 = vperm.xlu1 %14163, %v3352_v58   ;;  %3369 = vperm.xlu0 %14162, %v3351_v60   ;;  %v15615_v2 = vpack.c.bf16 %v3466_v50, %v3465_v4  ;;  %v15620_v35 = vpack.c.bf16 %v3622_v63, %v3621_v17  ;;  %v15635_v62 = vpack.c.bf16 %v3468_v30, %v3467_v61 }
 0x976   :  { %13530 = vmatpush3.bf16.msra.mxu1 %v15615_v2  ;;  %13542 = vmatpush3.bf16.msra.mxu0 %v15620_v35 }
 0x977   :  { %13531 = vmatprep.subr.bf16.mxu1 %v14516_v20  ;;  %13543 = vmatprep.subr.bf16.mxu0 %v14516_v20 }
 0x978   :  { %3384 = vperm.xlu1 %14163, %v3354_v32   ;;  %3379 = vperm.xlu0 %14162, %v3353_v0  }
 0x97a   :  { %13533 = vmatpush3.bf16.msra.mxu1 %v15635_v62  ;;  %13545 = vmatpush3.bf16.msra.mxu0 %v15640_v14 }
 0x97b   :  { %13534 = vmatprep.subr.bf16.mxu1 %v14516_v20  ;;  %13546 = vmatprep.subr.bf16.mxu0 %v14516_v20 }
 0x97c   :  { %3394 = vperm.xlu1 %14163, %v3356_v7   ;;  %3389 = vperm.xlu0 %14162, %v3355_v52  }
 0x980   :  { %3404 = vperm.xlu1 %14163, %v3358_v53   ;;  %3399 = vperm.xlu0 %14162, %v3357_v48  }
 0x9f3   :  { %v3375_v29 = vpop.permute.xlu1 %3374  ;;  %v3370_v8 = vpop.permute.xlu0 %3369 }
 0x9f4   :  { %v3408_v18 = vmul.f32 %v3375_v29, %v15294_v6  ;;  %v3439_v1 = vmul.f32 %v3375_v29, %v15299_v9  ;;  %v3407_v19 = vmul.f32 %v3370_v8, %v15304_v11  ;;  %v3438_v44 = vmul.f32 %v3370_v8, %v15309_v15 }
 0x9f6   :  { %v3416_v13 = vsel %vm79_vm0, %v3408_v18, 0.0  ;;  %v3447_v25 = vsel %vm79_vm0, %v3439_v1, 0.0  ;;  %v3415_v21 = vsel %vm79_vm0, %v3407_v19, 0.0  ;;  %v3446_v12 = vsel %vm79_vm0, %v3438_v44, 0.0  ;;  %v3544_v1 = vld [vmem:[%s17613_s17 + $0x8] sm:$0xff]  ;;  %v3696_v19 = vld [vmem:[%s17614_s18] sm:$0xff] }
 0x9f7   :  { %v3385_v16 = vpop.permute.xlu1 %3384  ;;  %v3380_v57 = vpop.permute.xlu0 %3379  ;;  %v3417_v58 = vadd.f32 %v3416_v13, %v3415_v21  ;;  %v3448_v15 = vadd.f32 %v3447_v25, %v3446_v12 }
 0x9f8   :  { %v3410_v47 = vmul.f32 %v3385_v16, %v15318_v39  ;;  %v3441_v6 = vmul.f32 %v3385_v16, %v15323_v41  ;;  %v3409_v9 = vmul.f32 %v3380_v57, %v15328_v26  ;;  %v3440_v11 = vmul.f32 %v3380_v57, %v15333_v31  ;;  %v3545_v16 = vld [vmem:[%s17613_s17 + $0x10] sm:$0xff] }
 0x9fa   :  { %v3418_v60 = vsel %vm79_vm0, %v3409_v9, 0.0  ;;  %v3449_v32 = vsel %vm79_vm0, %v3440_v11, 0.0  ;;  %v3420_v0 = vsel %vm79_vm0, %v3410_v47, 0.0  ;;  %v3451_v39 = vsel %vm79_vm0, %v3441_v6, 0.0  ;;  %v3698_v6 = vld [vmem:[%s17614_s18 + $0x10] sm:$0xff]  ;;  %v3699_v9 = vld [vmem:[%s17614_s18 + $0x18] sm:$0xff] }
 0x9fb   :  { %v3419_v7 = vadd.f32 %v3418_v60, %v3417_v58  ;;  %v3450_v52 = vadd.f32 %v3449_v32, %v3448_v15  ;;  %v3395_v53 = vpop.permute.xlu1 %3394  ;;  %v3390_v48 = vpop.permute.xlu0 %3389  ;;  %v15715_v60 = vpack.c.bf16 %v3699_v9, %v3698_v6  ;;  %v3771_v32 = vld [vmem:[%s17615_s16] sm:$0xff] }
 0x9fc   :  { %v3412_v41 = vmul.f32 %v3395_v53, %v15346_v59  ;;  %v3411_v26 = vmul.f32 %v3390_v48, %v15351_v43  ;;  %v3442_v31 = vmul.f32 %v3390_v48, %v15356_v42  ;;  %v3443_v29 = vmul.f32 %v3395_v53, %v15368_v33  ;;  %v3543_v43 = vld [vmem:[%s17613_s17] sm:$0xff]  ;;  %v3697_v33 = vld [vmem:[%s17614_s18 + $0x8] sm:$0xff] }
 0x9fd   :  { %v3421_v4 = vadd.f32 %v3420_v0, %v3419_v7  ;;  %v3452_v50 = vadd.f32 %v3451_v39, %v3450_v52  ;;  %v15687_v21 = vpack.c.bf16 %v3544_v1, %v3543_v43  ;;  %v15689_v12 = vpack.c.bf16 %v3697_v33, %v3696_v19  ;;  %v3846_v7 = vld [vmem:[%s17616_s19] sm:$0xff]  ;;  %v3847_v52 = vld [vmem:[%s17616_s19 + $0x8] sm:$0xff]  ;;  %v3924_v43 = vld [vmem:[%s17617_s10 + $0x18] sm:$0xff] }
 0x9fe   :  { %v3422_v17 = vsel %vm79_vm0, %v3411_v26, 0.0  ;;  %v3453_v63 = vsel %vm79_vm0, %v3442_v31, 0.0  ;;  %v3424_v3 = vsel %vm79_vm0, %v3412_v41, 0.0  ;;  %v3455_v13 = vsel %vm79_vm0, %v3443_v29, 0.0  ;;  %v3773_v41 = vld [vmem:[%s17615_s16 + $0x10] sm:$0xff]  ;;  %v3774_v31 = vld [vmem:[%s17615_s16 + $0x18] sm:$0xff] }
 0x9ff   :  { %v3423_v61 = vadd.f32 %v3422_v17, %v3421_v4  ;;  %v3405_v30 = vpop.permute.xlu1 %3404  ;;  %v3400_v51 = vpop.permute.xlu0 %3399  ;;  %v3454_v42 = vadd.f32 %v3453_v63, %v3452_v50  ;;  %v15740_v39 = vpack.c.bf16 %v3847_v52, %v3846_v7  ;;  %v3848_v4 = vld [vmem:[%s17616_s19 + $0x10] sm:$0xff]  ;;  %v3849_v50 = vld [vmem:[%s17616_s19 + $0x18] sm:$0xff]  ;;  %v15764_v17 = vpack.c.bf16 %v3774_v31, %v3773_v41  ;;  %v4083_v33 = vld [vmem:[%s17619_s12] sm:$0xff] }
 0xa00   :  { %v3414_v8 = vmul.f32 %v3405_v30, %v15373_v54  ;;  %v3413_v59 = vmul.f32 %v3400_v51, %v15378_v24  ;;  %v3444_v24 = vmul.f32 %v3400_v51, %v15385_v45  ;;  %v3546_v45 = vld [vmem:[%s17613_s17 + $0x18] sm:$0xff]  ;;  %v3445_v58 = vmul.f32 %v3405_v30, %v15398_v56  ;;  %v3772_v56 = vld [vmem:[%s17615_s16 + $0x8] sm:$0xff]  ;;  %v4002_v51 = vld [vmem:[%s17618_s11] sm:$0xff] }
 0xa01   :  { %v3425_v18 = vadd.f32 %v3424_v3, %v3423_v61  ;;  %v3456_v57 = vadd.f32 %v3455_v13, %v3454_v42  ;;  %v15713_v15 = vpack.c.bf16 %v3546_v45, %v3545_v16  ;;  %v15738_v48 = vpack.c.bf16 %v3772_v56, %v3771_v32  ;;  %v3921_v61 = vld [vmem:[%s17617_s10] sm:$0xff]  ;;  %v3922_v30 = vld [vmem:[%s17617_s10 + $0x8] sm:$0xff]  ;;  %v4004_v42 = vld [vmem:[%s17618_s11 + $0x10] sm:$0xff] }
 0xa02   :  { %v3426_v54 = vsel %vm79_vm0, %v3413_v59, 0.0  ;;  %v3428_v25 = vsel %vm79_vm0, %v3414_v8, 0.0  ;;  %v3457_v11 = vsel %vm79_vm0, %v3444_v24, 0.0  ;;  %v3459_v53 = vsel %vm79_vm0, %v3445_v58, 0.0  ;;  %v4003_v3 = vld [vmem:[%s17618_s11 + $0x8] sm:$0xff]  ;;  %v3923_v59 = vld [vmem:[%s17617_s10 + $0x10] sm:$0xff] }
 0xa03   :  { %v3427_v44 = vadd.f32 %v3426_v54, %v3425_v18  ;;  %v3458_v0 = vadd.f32 %v3457_v11, %v3456_v57  ;;  %v15766_v63 = vpack.c.bf16 %v3849_v50, %v3848_v4  ;;  %v15788_v29 = vpack.c.bf16 %v3922_v30, %v3921_v61  ;;  %v4005_v18 = vld [vmem:[%s17618_s11 + $0x18] sm:$0xff]  ;;  %v4084_v54 = vld [vmem:[%s17619_s12 + $0x8] sm:$0xff]  ;;  %v4173_v16 = vld [vmem:[%s17620_s20] sm:$0xff] }
 0xa04   :  { %v15790_v8 = vpack.c.bf16 %v4003_v3, %v4002_v51  ;;  %v15812_v1 = vpack.c.bf16 %v3924_v43, %v3923_v59  ;;  %v15814_v19 = vpack.c.bf16 %v4005_v18, %v4004_v42  ;;  %v15830_v24 = vpack.c.bf16 %v4084_v54, %v4083_v33  ;;  %v4086_v13 = vld [vmem:[%s17619_s12 + $0x18] sm:$0xff]  ;;  %v4174_v57 = vld [vmem:[%s17620_s20 + $0x8] sm:$0xff]  ;;  %v11179_v9 = vld [vmem:[%s17621_s0 + $0x40] sm:$0xff] }
 0xa05   :  { %v15694_v47 = vadd.f32 %v3428_v25, %v3427_v44  ;;  %v15745_v26 = vadd.f32 %v3459_v53, %v3458_v0  ;;  %v4085_v44 = vld [vmem:[%s17619_s12 + $0x10] sm:$0xff]  ;;  %v15868_v45 = vpack.c.bf16 %v4174_v57, %v4173_v16  ;;  %v11178_v4 = vld [vmem:[%s17621_s0 + $0x38] sm:$0xff]  ;;  %v15894_v54 = vld [vmem:[%s17622_s13] ss:$0 sm:$0xff] }
 0xa06   :  { %v15845_v25 = vpack.c.bf16 %v4086_v13, %v4085_v44  ;;  %v11177_v52 = vld [vmem:[%s17621_s0 + $0x30] sm:$0xff] }
 0xa07   :  { %12388 = vmatmul.mubr.msk.f32.vlgmr.msra.gmra.mrb[30].mxu1 %vm79_vm0, %v15694_v47  ;;  %12410 = vmatmul.mubr.msk.f32.vlgmr.msra.gmra.mrb[32].mxu0 %vm79_vm0, %v15694_v47 }
 0xa08   :  { %13536 = vmatpush3.bf16.msra.mxu1 %v15687_v21  ;;  %13548 = vmatpush3.bf16.msra.mxu0 %v15689_v12 }
 0xa09   :  { %13537 = vmatprep.subr.bf16.mxu1 %v14516_v20  ;;  %13549 = vmatprep.subr.bf16.mxu0 %v14516_v20 }
 0xa0a   :  { %12398 = vmatprep.mubr.msk.f32.mxu1 %vm14517_vm1, %v14518_v36  ;;  %12420 = vmatprep.mubr.msk.f32.mxu0 %vm14517_vm1, %v14518_v36 }
 0xa0c   :  { %13539 = vmatpush3.bf16.msra.mxu1 %v15713_v15  ;;  %13551 = vmatpush3.bf16.msra.mxu0 %v15715_v60 }
 0xa0d   :  { %13552 = vmatprep.subr.bf16.mxu1 %v14516_v20  ;;  %13558 = vmatprep.subr.bf16.mxu0 %v14516_v20 }
 0xa0f   :  { %12399 = vmatmul.mubr.msk.f32.vlgmr.msra.gmra.mrb[30].mxu1 %vm79_vm0, %v15745_v26  ;;  %12421 = vmatmul.mubr.msk.f32.vlgmr.msra.gmra.mrb[32].mxu0 %vm79_vm0, %v15745_v26 }
 0xa10   :  { %13554 = vmatpush3.bf16.msra.mxu1 %v15738_v48  ;;  %13560 = vmatpush3.bf16.msra.mxu0 %v15740_v39 }
 0xa11   :  { %13555 = vmatprep.subr.bf16.mxu1 %v14516_v20  ;;  %13561 = vmatprep.subr.bf16.mxu0 %v14516_v20 }
 0xa12   :  { %12431 = vmatprep.mubr.msk.f32.mxu1 %vm14517_vm1, %v14518_v36  ;;  %12442 = vmatprep.mubr.msk.f32.mxu0 %vm14517_vm1, %v14518_v36 }
 0xa14   :  { %13557 = vmatpush3.bf16.msra.mxu1 %v15764_v17  ;;  %13563 = vmatpush3.bf16.msra.mxu0 %v15766_v63 }
 0xa15   :  { %13564 = vmatprep.subr.bf16.mxu1 %v14516_v20  ;;  %13570 = vmatprep.subr.bf16.mxu0 %v14516_v20 }
 0xa17   :  { %12432 = vmatmul.mubr.msk.f32.vlgmr.msra.gmra.mrb[32].mxu1 %vm79_vm0, %v15694_v47  ;;  %12443 = vmatmul.mubr.msk.f32.vlgmr.msra.gmra.mrb[34].mxu0 %vm79_vm0, %v15745_v26 }
 0xa18   :  { %13566 = vmatpush3.bf16.msra.mxu1 %v15788_v29  ;;  %13572 = vmatpush3.bf16.msra.mxu0 %v15790_v8 }
 0xa19   :  { %13567 = vmatprep.subr.bf16.mxu1 %v14516_v20  ;;  %13573 = vmatprep.subr.bf16.mxu0 %v14516_v20 }
 0xa1a   :  { %12453 = vmatprep.mubr.msk.f32.mxu1 %vm14517_vm1, %v14518_v36  ;;  %12464 = vmatprep.mubr.msk.f32.mxu0 %vm14517_vm1, %v14518_v36 }
 0xa1c   :  { %13569 = vmatpush3.bf16.msra.mxu1 %v15812_v1  ;;  %13575 = vmatpush3.bf16.msra.mxu0 %v15814_v19 }
 0xa1d   :  { %13576 = vmatprep.subr.bf16.mxu1 %v14516_v20  ;;  %13582 = vmatprep.subr.bf16.mxu0 %v14516_v20 }
 0xa1f   :  { %12454 = vmatmul.mubr.msk.f32.vlgmr.msra.gmra.mrb[30].mxu1 %vm79_vm0, %v15505_v38  ;;  %12465 = vmatmul.mubr.msk.f32.vlgmr.msra.gmra.mrb[32].mxu0 %vm79_vm0, %v15505_v38 }
 0xa20   :  { %13578 = vmatpush3.bf16.msra.mxu1 %v15830_v24  ;;  %12475 = vmatprep.mubr.msk.f32.mxu1 %vm14517_vm1, %v14518_v36 }
 0xa21   :  { %13579 = vmatprep.subr.bf16.mxu1 %v14516_v20  ;;  %12486 = vmatprep.mubr.msk.f32.mxu0 %vm14517_vm1, %v14518_v36 }
 0xa22   :  { %13584 = vmatpush3.bf16.msra.mxu0 %v15868_v45 }
 0xa23   :  { %13585 = vmatprep.subr.bf16.mxu0 %v14516_v20 }
 0xa24   :  { %13581 = vmatpush3.bf16.msra.mxu1 %v15845_v25 }
 0xa25   :  { %13600 = vmatprep.subr.bf16.mxu1 %v14516_v20 }
 0xa27   :  { %12476 = vmatmul.mubr.msk.f32.vlgmr.msra.gmra.mrb[34].mxu1 %vm79_vm0, %v15505_v38 }
 0xa28   :  { %13602 = vmatpush3.bf16.msra.mxu1 %v15481_v46  ;;  %12519 = vmatprep.mubr.msk.f32.mxu1 %vm14517_vm1, %v14518_v36  ;;  %v4175_v46 = vld [vmem:[%s17620_s20 + $0x10] sm:$0xff] }
 0xa29   :  { %13603 = vmatprep.subr.bf16.mxu1 %v14516_v20 }
 0xa2c   :  { %13605 = vmatpush3.bf16.msra.mxu1 %v15490_v49  ;;  %v4176_v49 = vld [vmem:[%s17620_s20 + $0x18] sm:$0xff] }
 0xa2d   :  { %13607 = vmatprep.subr.bf16.mxu1 %v15538_v37  ;;  %v15877_v6 = vpack.c.bf16 %v4176_v49, %v4175_v46 }
 0xa2f   :  { %13587 = vmatpush3.bf16.msra.mxu0 %v15877_v6 }
 0xa30   :  { %13588 = vmatprep.subr.bf16.mxu0 %v14516_v20 }
 0xaea   :  { %v3841_v11 = vpop.f32.mrb[32].mxu1  ;;  %v3916_v58 = vpop.f32.mrb[34].mxu0 }
 0xaeb   :  { %v3845_v32 = vadd.f32 %v11179_v9, %v3841_v11  ;;  %v12433_v0 = vpop.f32.mrb[33].mxu1  ;;  %v12444_v56 = vpop.f32.mrb[35].mxu0  ;;  %v4251_v11 = vld [vmem:[%s17623_s21] sm:$0xff] }
 0xaed   :  { %v3920_v7 = vadd.f32 %v3916_v58, %v3845_v32  ;;  %v4252_v58 = vld [vmem:[%s17623_s21 + $0x8] sm:$0xff] }
 0xaf2   :  { %v3991_v53 = vpop.f32.mrb[30].mxu1  ;;  %v4072_v41 = vpop.f32.mrb[32].mxu0 }
 0xaf3   :  { %v14036_v31 = vadd.f32 %v11177_v52, %v3991_v53  ;;  %v12455_v50 = vpop.f32.mrb[31].mxu1  ;;  %v12466_v61 = vpop.f32.mrb[33].mxu0  ;;  %v14037_v51 = vadd.f32 %v11178_v4, %v4072_v41  ;;  %v15904_v52 = vpack.c.bf16 %v4252_v58, %v4251_v11  ;;  %v4254_v41 = vld [vmem:[%s17623_s21 + $0x18] sm:$0xff]  ;;  %v4327_v4 = vld [vmem:[%s17624_s22 + $0x8] sm:$0xff] }
 0xaf4   :  { %v4328_v61 = vld [vmem:[%s17624_s22 + $0x10] sm:$0xff] }
 0xaf5   :  { %v11187_v30 = vmul.f32 -1.442695, %v14036_v31  ;;  %v11189_v3 = vmul.f32 -1.442695, %v14037_v51  ;;  %v4326_v31 = vld [vmem:[%s17624_s22] sm:$0xff] }
 0xaf6   :  { %v15933_v50 = vpack.c.bf16 %v4327_v4, %v4326_v31 }
 0xaf7   :  { %14286 = vpow2.f32 %v11187_v30  ;;  %v4329_v30 = vld [vmem:[%s17624_s22 + $0x18] sm:$0xff] }
 0xaf8   :  { %14288 = vpow2.f32 %v11189_v3 }
 0xafa   :  { %v4160_v59 = vpop.f32.mrb[34].mxu1 }
 0xafb   :  { %v12477_v43 = vpop.f32.mrb[35].mxu1  ;;  %v4161_v13 = vadd.f32 %v15894_v54, %v4160_v59 }
 0xb01   :  { %v14287_v42 = vpop.eup %14286 }
 0xb02   :  { %v3999_v18 = vadd.f32 1.0, %v14287_v42  ;;  %v14289_v33 = vpop.eup %14288 }
 0xb03   :  { %v4080_v44 = vadd.f32 1.0, %v14289_v33 }
 0xb04   :  { %14290 = vrcp.f32 %v3999_v18 }
 0xb05   :  { %14292 = vrcp.f32 %v4080_v44 }
 0xb0e   :  { %v14291_v16 = vpop.eup %14290 }
 0xb0f   :  { %v4164_v57 = vmul.f32 %v14291_v16, %v4161_v13  ;;  %v14293_v49 = vpop.eup %14292 }
 0xb10   :  { %v4167_v9 = vsub.f32 1.0, %v14293_v49  ;;  %v4169_v0 = vmul.f32 %v14293_v49, %v15505_v38 }
 0xb11   :  { %v4165_v46 = vadd.f32 %v4164_v57, %v3920_v7  ;;  %v4253_v7 = vld [vmem:[%s17623_s21 + $0x10] sm:$0xff] }
 0xb12   :  { %v15919_v38 = vpack.c.bf16 %v4254_v41, %v4253_v7 }
 0xb13   :  { %14294 = vtanh.f32 %v4165_v46 }
 0xb1d   :  { %v14295_v32 = vpop.eup %14294 }
 0xb1e   :  { %v4168_v56 = vmul.f32 %v14295_v32, %v4167_v9 }
 0xb20   :  { %v15906_v53 = vadd.f32 %v4169_v0, %v4168_v56 }
 0xb22   :  { %12487 = vmatmul.mubr.msk.f32.vlgmr.msra.gmra.mrb[36].mxu0 %vm79_vm0, %v15906_v53  ;;  %12520 = vmatmul.mubr.msk.f32.vlgmr.msra.gmra.mrb[36].mxu1 %vm79_vm0, %v15906_v53 }
 0xb23   :  { %13590 = vmatpush3.bf16.msra.mxu0 %v15904_v52  ;;  %12497 = vmatprep.mubr.msk.f32.mxu0 %vm14517_vm1, %v14518_v36 }
 0xb24   :  { %13591 = vmatprep.subr.bf16.mxu0 %v14516_v20  ;;  %13609 = vmatpush3.bf16.msra.mxu1 %v15538_v37  ;;  %v15947_v37 = vpack.c.bf16 %v4329_v30, %v4328_v61 }
 0xb25   :  { %13611 = vmatprep.subr.bf16.mxu1 %v15543_v40 }
 0xb27   :  { %13593 = vmatpush3.bf16.msra.mxu0 %v15919_v38 }
 0xb28   :  { %13594 = vmatprep.subr.bf16.mxu0 %v14516_v20  ;;  %13613 = vmatpush3.bf16.msra.mxu1 %v15543_v40 }
 0xb29   :  { %13626 = vmatprep.subr.bf16.mxu1 %v14516_v20 }
 0xb2a   :  { %12498 = vmatmul.mubr.msk.f32.vlgmr.msra.gmra.mrb[36].mxu0 %vm79_vm0, %v15694_v47 }
 0xb2b   :  { %13596 = vmatpush3.bf16.msra.mxu0 %v15933_v50  ;;  %12508 = vmatprep.mubr.msk.f32.mxu0 %vm14517_vm1, %v14518_v36 }
 0xb2c   :  { %13597 = vmatprep.subr.bf16.mxu0 %v14516_v20 }
 0xb2f   :  { %13599 = vmatpush3.bf16.msra.mxu0 %v15947_v37 }
 0xb30   :  { %13614 = vmatprep.subr.bf16.mxu0 %v14516_v20 }
 0xb32   :  { %12509 = vmatmul.mubr.msk.f32.vlgmr.msra.gmra.mrb[36].mxu0 %vm79_vm0, %v15745_v26 }
 0xb33   :  { %13616 = vmatpush3.bf16.msra.mxu0 %v15615_v2  ;;  %12550 = vmatprep.mubr.msk.f32.mxu0 %vm14517_vm1, %v14518_v36 }
 0xb34   :  { %13617 = vmatprep.subr.bf16.mxu0 %v14516_v20 }
 0xb37   :  { %13619 = vmatpush3.bf16.msra.mxu0 %v15635_v62 }
 0xb38   :  { %13620 = vmatprep.subr.bf16.mxu0 %v14516_v20 }
 0xbf5   :  { %v4473_v40 = vpop.f32.mrb[36].mxu1 }
 0xbf6   :  { %v4485_v47 = vadd.f32 %v4473_v40, %v15550_v23  ;;  %v4486_v51 = vadd.f32 %v4473_v40, %v15552_v27  ;;  %v4487_v3 = vadd.f32 %v4473_v40, %v15554_v55  ;;  %v12521_v59 = vpop.f32.mrb[37].mxu1  ;;  %v4488_v2 = vadd.f32 %v4473_v40, %v15559_v10  ;;  %v11192_v10 = vld [vmem:[%s17625_s1 + $0x10] sm:$0xff] }
 0xbf7   :  { %v4489_v26 = vadd.f32 %v4473_v40, %v15561_v34  ;;  %v4490_v43 = vadd.f32 %v4473_v40, %v15565_v22  ;;  %v4491_v62 = vadd.f32 %v4473_v40, %v15567_v5  ;;  %v4492_v23 = vadd.f32 %v4473_v40, %v15571_v28 }
 0xbf8   :  { %14296 = vtanh.f32 %v4485_v47 }
 0xbf9   :  { %14298 = vtanh.f32 %v4486_v51 }
 0xbfa   :  { %14300 = vtanh.f32 %v4487_v3 }
 0xbfb   :  { %14302 = vtanh.f32 %v4488_v2 }
 0xbfc   :  { %14304 = vtanh.f32 %v4489_v26 }
 0xbfd   :  { %14306 = vtanh.f32 %v4490_v43 }
 0xbfe   :  { %14308 = vtanh.f32 %v4491_v62 }
 0xbff   :  { %14310 = vtanh.f32 %v4492_v23 }
 0xc02   :  { %v14297_v27 = vpop.eup %14296 }
 0xc03   :  { %v14299_v55 = vpop.eup %14298  ;;  %12530 = vmatprep.mubr.msk.f32.mxu1 %vm79_vm0, %v14297_v27 }
 0xc04   :  { %v14301_v34 = vpop.eup %14300  ;;  %12531 = vmatmul.mubr.msk.f32.vlgmr.msra.gmra.mrb[38].mxu1 %vm79_vm0, %v14299_v55 }
 0xc05   :  { %v4396_v22 = vpop.f32.mrb[36].mxu0  ;;  %12533 = vmatprep.mubr.msk.f32.mxu1 %vm79_vm0, %v14301_v34  ;;  %13628 = vmatpush3.bf16.msra.mxu1 %v15620_v35  ;;  %v14303_v42 = vpop.eup %14302 }
 0xc06   :  { %v14038_v5 = vadd.f32 %v11192_v10, %v4396_v22  ;;  %v12510_v28 = vpop.f32.mrb[37].mxu0  ;;  %13629 = vmatprep.subr.bf16.mxu1 %v14516_v20  ;;  %v14305_v18 = vpop.eup %14304 }
 0xc07   :  { %v14307_v33 = vpop.eup %14306 }
 0xc08   :  { %11196 = vst [vmem:[%s17626_s23 + $0x10] sm:$0xff] %v14038_v5  ;;  %12534 = vmatmul.mubr.msk.f32.gmra.mrb[40].mxu1 %vm79_vm0, %v14303_v42  ;;  %v14309_v35 = vpop.eup %14308 }
 0xc09   :  { %12536 = vmatprep.mubr.msk.f32.mxu1 %vm79_vm0, %v14305_v18  ;;  %13631 = vmatpush3.bf16.msra.mxu1 %v15640_v14  ;;  %v14311_v44 = vpop.eup %14310 }
 0xc0a   :  { %13632 = vmatprep.subr.bf16.mxu1 %v14516_v20 }
 0xc0c   :  { %12537 = vmatmul.mubr.msk.f32.gmra.mrb[42].mxu1 %vm79_vm0, %v14307_v33 }
 0xc0d   :  { %12539 = vmatprep.mubr.msk.f32.mxu1 %vm79_vm0, %v14309_v35 }
 0xc10   :  { %12540 = vmatmul.mubr.msk.f32.gmra.mrb[44].mxu1 %vm79_vm0, %v14311_v44 }
 0xc11   :  { %12572 = vmatprep.mubr.msk.f32.mxu1 %vm14517_vm1, %v14518_v36 }
 0xcd7   :  { %v12532_v13 = vpop.f32.mrb[38].mxu1 }
 0xcd8   :  { %v4595_v16 = vpop.f32.mrb[39].mxu1  ;;  %v4635_v14 = vsel %vm622_vm2, %v12532_v13, -inf }
 0xcd9   :  { %v4634_v58 = vsel %vm622_vm2, %v4595_v16, -inf }
 0xcdb   :  { %v12535_v57 = vpop.f32.mrb[40].mxu1 }
 0xcdc   :  { %v4605_v46 = vpop.f32.mrb[41].mxu1  ;;  %v4637_v41 = vsel %vm622_vm2, %v12535_v57, -inf }
 0xcdd   :  { %v4636_v30 = vsel %vm622_vm2, %v4605_v46, -inf }
 0xcdf   :  { %v12538_v49 = vpop.f32.mrb[42].mxu1 }
 0xce0   :  { %v4640_v9 = vsel %vm622_vm2, %v12538_v49, -inf  ;;  %v4615_v11 = vpop.f32.mrb[43].mxu1 }
 0xce1   :  { %v4641_v32 = vmax.f32 %v4635_v14, %v4640_v9  ;;  %v4638_v0 = vsel %vm622_vm2, %v4615_v11, -inf }
 0xce2   :  { %v4639_v56 = vmax.f32 %v4634_v58, %v4638_v0 }
 0xce3   :  { %v12541_v7 = vpop.f32.mrb[44].mxu1 }
 0xce4   :  { %v4646_v31 = vmax.f32 %v4639_v56, %v4641_v32  ;;  %v4644_v4 = vsel %vm622_vm2, %v12541_v7, -inf  ;;  %v4625_v61 = vpop.f32.mrb[45].mxu1 }
 0xce5   :  { %v4645_v40 = vmax.f32 %v4637_v41, %v4644_v4  ;;  %v4642_v47 = vsel %vm622_vm2, %v4625_v61, -inf }
 0xce6   :  { %v4643_v51 = vmax.f32 %v4636_v30, %v4642_v47 }
 0xce8   :  { %v4647_v3 = vmax.f32 %v4643_v51, %v4645_v40 }
 0xcea   :  { %v4648_v59 = vmax.f32 %v4646_v31, %v4647_v3 }
 0xcec   :  { %v4649_v2 = vsub.f32 %v4595_v16, %v4648_v59  ;;  %v4650_v26 = vsub.f32 %v12532_v13, %v4648_v59  ;;  %v4651_v43 = vsub.f32 %v4605_v46, %v4648_v59  ;;  %v4652_v62 = vsub.f32 %v12535_v57, %v4648_v59 }
 0xced   :  { %v4653_v23 = vsub.f32 %v4615_v11, %v4648_v59  ;;  %v4654_v27 = vsub.f32 %v12538_v49, %v4648_v59  ;;  %v4655_v55 = vsub.f32 %v4625_v61, %v4648_v59  ;;  %v4656_v10 = vsub.f32 %v12541_v7, %v4648_v59 }
 0xcee   :  { %v4657_v34 = vmul.f32 1.442695, %v4649_v2  ;;  %v4659_v22 = vmul.f32 1.442695, %v4650_v26  ;;  %v4661_v5 = vmul.f32 1.442695, %v4651_v43 }
 0xcef   :  { %v4663_v28 = vmul.f32 1.442695, %v4652_v62  ;;  %v4665_v42 = vmul.f32 1.442695, %v4653_v23  ;;  %v4667_v18 = vmul.f32 1.442695, %v4654_v27 }
 0xcf0   :  { %14312 = vpow2.f32 %v4657_v34  ;;  %v4669_v33 = vmul.f32 1.442695, %v4655_v55  ;;  %v4671_v35 = vmul.f32 1.442695, %v4656_v10  ;;  %v16009_v34 = vld [vmem:[%s17645_s29 + $0x8] sm:$0xff] }
 0xcf1   :  { %14314 = vpow2.f32 %v4659_v22  ;;  %v16014_v22 = vld [vmem:[%s17642_s28 + $0x8] sm:$0xff] }
 0xcf2   :  { %14316 = vpow2.f32 %v4661_v5  ;;  %v16019_v5 = vld [vmem:[%s17645_s29] sm:$0xff] }
 0xcf3   :  { %14318 = vpow2.f32 %v4663_v28  ;;  %v16024_v28 = vld [vmem:[%s17642_s28] sm:$0xff] }
 0xcf4   :  { %14320 = vpow2.f32 %v4665_v42 }
 0xcf5   :  { %14322 = vpow2.f32 %v4667_v18 }
 0xcf6   :  { %14324 = vpow2.f32 %v4669_v33 }
 0xcf7   :  { %14326 = vpow2.f32 %v4671_v35 }
 0xcfa   :  { %v14313_v44 = vpop.eup %14312 }
 0xcfb   :  { %v14315_v13 = vpop.eup %14314  ;;  %v4673_v16 = vsel %vm622_vm2, %v14313_v44, 0.0 }
 0xcfc   :  { %v14317_v57 = vpop.eup %14316  ;;  %v4674_v46 = vsel %vm622_vm2, %v14315_v13, 0.0 }
 0xcfd   :  { %v14319_v49 = vpop.eup %14318  ;;  %v4675_v14 = vadd.f32 %v4674_v46, %v4673_v16  ;;  %v4676_v9 = vsel %vm622_vm2, %v14317_v57, 0.0  ;;  %v16033_v16 = vld [vmem:[%s17645_s29 + $0x18] sm:$0xff]  ;;  %v16043_v46 = vld [vmem:[%s17645_s29 + $0x10] sm:$0xff] }
 0xcfe   :  { %v14321_v11 = vpop.eup %14320  ;;  %v4678_v32 = vsel %vm622_vm2, %v14319_v49, 0.0 }
 0xcff   :  { %v4677_v58 = vadd.f32 %v4676_v9, %v4675_v14  ;;  %v14323_v0 = vpop.eup %14322  ;;  %v4680_v7 = vsel %vm622_vm2, %v14321_v11, 0.0 }
 0xd00   :  { %v14325_v41 = vpop.eup %14324  ;;  %v4682_v4 = vsel %vm622_vm2, %v14323_v0, 0.0 }
 0xd01   :  { %v4679_v56 = vadd.f32 %v4678_v32, %v4677_v58  ;;  %v14327_v61 = vpop.eup %14326  ;;  %v4684_v40 = vsel %vm622_vm2, %v14325_v41, 0.0 }
 0xd02   :  { %v4686_v51 = vsel %vm622_vm2, %v14327_v61, 0.0 }
 0xd03   :  { %v4681_v31 = vadd.f32 %v4680_v7, %v4679_v56 }
 0xd05   :  { %v4683_v30 = vadd.f32 %v4682_v4, %v4681_v31 }
 0xd07   :  { %v4685_v47 = vadd.f32 %v4684_v40, %v4683_v30  ;;  %v16061_v30 = vld [vmem:[%s17645_s29 + $0x28] sm:$0xff]  ;;  %v16066_v40 = vld [vmem:[%s17645_s29 + $0x20] sm:$0xff] }
 0xd09   :  { %v4687_v3 = vadd.f32 %v4686_v51, %v4685_v47  ;;  %v16071_v47 = vld [vmem:[%s17642_s28 + $0x20] sm:$0xff] }
 0xd0b   :  { %14328 = vrcp.f32 %v4687_v3 }
 0xd15   :  { %v14329_v59 = vpop.eup %14328 }
 0xd16   :  { %v4690_v2 = vmul.f32 %v14329_v59, %v14315_v13  ;;  %v4689_v26 = vmul.f32 %v14329_v59, %v14313_v44  ;;  %v4692_v43 = vmul.f32 %v14329_v59, %v14319_v49  ;;  %v4691_v62 = vmul.f32 %v14329_v59, %v14317_v57  ;;  %v16038_v57 = vld [vmem:[%s17642_s28 + $0x18] sm:$0xff]  ;;  %v16048_v49 = vld [vmem:[%s17642_s28 + $0x10] sm:$0xff] }
 0xd17   :  { %v4694_v23 = vmul.f32 %v14329_v59, %v14323_v0  ;;  %v4693_v27 = vmul.f32 %v14329_v59, %v14321_v11  ;;  %v4696_v55 = vmul.f32 %v14329_v59, %v14327_v61  ;;  %v4695_v10 = vmul.f32 %v14329_v59, %v14325_v41 }
 0xd18   :  { %4712 = vperm.xlu1 %14163, %v4690_v2   ;;  %4707 = vperm.xlu0 %14162, %v4689_v26  }
 0xd1c   :  { %4722 = vperm.xlu1 %14163, %v4692_v43   ;;  %4717 = vperm.xlu0 %14162, %v4691_v62  }
 0xd20   :  { %4732 = vperm.xlu1 %14163, %v4694_v23   ;;  %4727 = vperm.xlu0 %14162, %v4693_v27  }
 0xd24   :  { %4742 = vperm.xlu1 %14163, %v4696_v55   ;;  %4737 = vperm.xlu0 %14162, %v4695_v10  }
 0xd97   :  { %v4713_v42 = vpop.permute.xlu1 %4712  ;;  %v4708_v18 = vpop.permute.xlu0 %4707 }
 0xd98   :  { %v4746_v33 = vmul.f32 %v4713_v42, %v16009_v34  ;;  %v4777_v35 = vmul.f32 %v16014_v22, %v4713_v42  ;;  %v4745_v44 = vmul.f32 %v4708_v18, %v16019_v5  ;;  %v4776_v13 = vmul.f32 %v16024_v28, %v4708_v18  ;;  %v16083_v42 = vld [vmem:[%s17642_s28 + $0x28] sm:$0xff] }
 0xd9a   :  { %v4754_v14 = vsel %vm79_vm0, %v4746_v33, 0.0  ;;  %v4785_v9 = vsel %vm79_vm0, %v4777_v35, 0.0  ;;  %v4753_v11 = vsel %vm79_vm0, %v4745_v44, 0.0  ;;  %v4784_v58 = vsel %vm79_vm0, %v4776_v13, 0.0  ;;  %v16088_v35 = vld [vmem:[%s17645_s29 + $0x38] sm:$0xff]  ;;  %v16093_v44 = vld [vmem:[%s17645_s29 + $0x30] sm:$0xff] }
 0xd9b   :  { %v4723_v32 = vpop.permute.xlu1 %4722  ;;  %v4718_v0 = vpop.permute.xlu0 %4717  ;;  %v4755_v4 = vadd.f32 %v4754_v14, %v4753_v11  ;;  %v4786_v61 = vadd.f32 %v4785_v9, %v4784_v58  ;;  %v16100_v58 = vld [vmem:[%s17642_s28 + $0x30] sm:$0xff] }
 0xd9c   :  { %v4748_v56 = vmul.f32 %v4723_v32, %v16033_v16  ;;  %v4779_v7 = vmul.f32 %v16038_v57, %v4723_v32  ;;  %v4747_v41 = vmul.f32 %v4718_v0, %v16043_v46  ;;  %v4778_v31 = vmul.f32 %v16048_v49, %v4718_v0 }
 0xd9e   :  { %v4756_v51 = vsel %vm79_vm0, %v4747_v41, 0.0  ;;  %v4787_v3 = vsel %vm79_vm0, %v4778_v31, 0.0  ;;  %v4758_v59 = vsel %vm79_vm0, %v4748_v56, 0.0  ;;  %v4789_v23 = vsel %vm79_vm0, %v4779_v7, 0.0 }
 0xd9f   :  { %v4757_v2 = vadd.f32 %v4756_v51, %v4755_v4  ;;  %v4788_v26 = vadd.f32 %v4787_v3, %v4786_v61  ;;  %v4733_v43 = vpop.permute.xlu1 %4732  ;;  %v4728_v62 = vpop.permute.xlu0 %4727 }
 0xda0   :  { %v4750_v27 = vmul.f32 %v4733_v43, %v16061_v30  ;;  %v4749_v55 = vmul.f32 %v4728_v62, %v16066_v40  ;;  %v4780_v10 = vmul.f32 %v16071_v47, %v4728_v62  ;;  %v4781_v56 = vmul.f32 %v16083_v42, %v4733_v43 }
 0xda1   :  { %v4759_v18 = vadd.f32 %v4758_v59, %v4757_v2  ;;  %v4790_v33 = vadd.f32 %v4789_v23, %v4788_v26  ;;  %v16113_v26 = vld [vmem:[%s17642_s28 + $0x38] sm:$0xff] }
 0xda2   :  { %v4760_v13 = vsel %vm79_vm0, %v4749_v55, 0.0  ;;  %v4791_v14 = vsel %vm79_vm0, %v4780_v10, 0.0  ;;  %v4762_v0 = vsel %vm79_vm0, %v4750_v27, 0.0  ;;  %v4793_v59 = vsel %vm79_vm0, %v4781_v56, 0.0 }
 0xda3   :  { %v4761_v9 = vadd.f32 %v4760_v13, %v4759_v18  ;;  %v4743_v11 = vpop.permute.xlu1 %4742  ;;  %v4738_v32 = vpop.permute.xlu0 %4737  ;;  %v4792_v31 = vadd.f32 %v4791_v14, %v4790_v33  ;;  %v11207_v13 = vld [vmem:[%s17621_s0 + $0x50] sm:$0xff] }
 0xda4   :  { %v4752_v7 = vmul.f32 %v4743_v11, %v16088_v35  ;;  %v4751_v41 = vmul.f32 %v4738_v32, %v16093_v44  ;;  %v4782_v51 = vmul.f32 %v16100_v58, %v4738_v32  ;;  %v4783_v27 = vmul.f32 %v16113_v26, %v4743_v11 }
 0xda5   :  { %v4763_v4 = vadd.f32 %v4762_v0, %v4761_v9  ;;  %v4794_v43 = vadd.f32 %v4793_v59, %v4792_v31 }
 0xda6   :  { %v4764_v61 = vsel %vm79_vm0, %v4751_v41, 0.0  ;;  %v4766_v2 = vsel %vm79_vm0, %v4752_v7, 0.0  ;;  %v4795_v23 = vsel %vm79_vm0, %v4782_v51, 0.0  ;;  %v4797_v10 = vsel %vm79_vm0, %v4783_v27, 0.0 }
 0xda7   :  { %v4765_v3 = vadd.f32 %v4764_v61, %v4763_v4  ;;  %v4796_v55 = vadd.f32 %v4795_v23, %v4794_v43 }
 0xda9   :  { %v16115_v62 = vadd.f32 %v4766_v2, %v4765_v3 }
 0xdab   :  { %12551 = vmatmul.mubr.msk.f32.vlgmr.msra.gmra.mrb[38].mxu0 %vm79_vm0, %v16115_v62  ;;  %12573 = vmatmul.mubr.msk.f32.vlgmr.msra.gmra.mrb[46].mxu1 %vm79_vm0, %v16115_v62 }
 0xdac   :  { %13622 = vmatpush3.bf16.msra.mxu0 %v15687_v21  ;;  %13634 = vmatpush3.bf16.msra.mxu1 %v15689_v12  ;;  %v16134_v21 = vadd.f32 %v4797_v10, %v4796_v55  ;;  %v5741_v12 = vld [vmem:[%s17646_s2] sm:$0xff] }
 0xdad   :  { %13623 = vmatprep.subr.bf16.mxu0 %v14516_v20  ;;  %13635 = vmatprep.subr.bf16.mxu1 %v14516_v20 }
 0xdae   :  { %12561 = vmatprep.mubr.msk.f32.mxu0 %vm14517_vm1, %v14518_v36  ;;  %12583 = vmatprep.mubr.msk.f32.mxu1 %vm14517_vm1, %v14518_v36 }
 0xdb0   :  { %13625 = vmatpush3.bf16.msra.mxu0 %v15713_v15  ;;  %13637 = vmatpush3.bf16.msra.mxu1 %v15715_v60  ;;  %v5742_v15 = vld [vmem:[%s17646_s2 + $0x8] sm:$0xff] }
 0xdb1   :  { %13638 = vmatprep.subr.bf16.mxu0 %v14516_v20  ;;  %13644 = vmatprep.subr.bf16.mxu1 %v14516_v20  ;;  %v16196_v60 = vpack.c.bf16 %v5742_v15, %v5741_v12  ;;  %v16267_v15 = vld [vmem:[#allocation3 + $0x8] sm:$0xff] }
 0xdb3   :  { %12562 = vmatmul.mubr.msk.f32.vlgmr.msra.gmra.mrb[38].mxu0 %vm79_vm0, %v16134_v21  ;;  %12584 = vmatmul.mubr.msk.f32.vlgmr.msra.gmra.mrb[46].mxu1 %vm79_vm0, %v16134_v21 }
 0xdb4   :  { %13640 = vmatpush3.bf16.msra.mxu0 %v15738_v48  ;;  %13646 = vmatpush3.bf16.msra.mxu1 %v15740_v39  ;;  %v5743_v48 = vld [vmem:[%s17646_s2 + $0x10] sm:$0xff]  ;;  %v5744_v39 = vld [vmem:[%s17646_s2 + $0x18] sm:$0xff] }
 0xdb5   :  { %13641 = vmatprep.subr.bf16.mxu0 %v14516_v20  ;;  %13647 = vmatprep.subr.bf16.mxu1 %v14516_v20 }
 0xdb6   :  { %12594 = vmatprep.mubr.msk.f32.mxu0 %vm14517_vm1, %v14518_v36  ;;  %12605 = vmatprep.mubr.msk.f32.mxu1 %vm14517_vm1, %v14518_v36 }
 0xdb8   :  { %13643 = vmatpush3.bf16.msra.mxu0 %v15764_v17  ;;  %13649 = vmatpush3.bf16.msra.mxu1 %v15766_v63  ;;  %v16205_v17 = vpack.c.bf16 %v5744_v39, %v5743_v48  ;;  %v11208_v63 = vld [vmem:[%s17621_s0 + $0x58] sm:$0xff] }
 0xdb9   :  { %13650 = vmatprep.subr.bf16.mxu0 %v14516_v20  ;;  %13656 = vmatprep.subr.bf16.mxu1 %v14516_v20  ;;  %v16269_v48 = vld [vmem:[#allocation3 + $0x10] sm:$0xff] }
 0xdbb   :  { %12595 = vmatmul.mubr.msk.f32.vlgmr.msra.gmra.mrb[40].mxu0 %vm79_vm0, %v16115_v62  ;;  %12606 = vmatmul.mubr.msk.f32.vlgmr.msra.gmra.mrb[48].mxu1 %vm79_vm0, %v16134_v21 }
 0xdbc   :  { %13652 = vmatpush3.bf16.msra.mxu0 %v15788_v29  ;;  %13658 = vmatpush3.bf16.msra.mxu1 %v15790_v8 }
 0xdbd   :  { %13653 = vmatprep.subr.bf16.mxu0 %v14516_v20  ;;  %13659 = vmatprep.subr.bf16.mxu1 %v14516_v20 }
 0xdbe   :  { %12616 = vmatprep.mubr.msk.f32.mxu0 %vm14517_vm1, %v14518_v36  ;;  %12627 = vmatprep.mubr.msk.f32.mxu1 %vm14517_vm1, %v14518_v36 }
 0xdc0   :  { %13655 = vmatpush3.bf16.msra.mxu0 %v15812_v1  ;;  %13661 = vmatpush3.bf16.msra.mxu1 %v15814_v19 }
 0xdc1   :  { %13662 = vmatprep.subr.bf16.mxu0 %v14516_v20  ;;  %13668 = vmatprep.subr.bf16.mxu1 %v14516_v20 }
 0xdc3   :  { %12617 = vmatmul.mubr.msk.f32.vlgmr.msra.gmra.mrb[38].mxu0 %vm79_vm0, %v15906_v53  ;;  %12628 = vmatmul.mubr.msk.f32.vlgmr.msra.gmra.mrb[46].mxu1 %vm79_vm0, %v15906_v53 }
 0xdc4   :  { %13664 = vmatpush3.bf16.msra.mxu0 %v15830_v24  ;;  %12638 = vmatprep.mubr.msk.f32.mxu0 %vm14517_vm1, %v14518_v36 }
 0xdc5   :  { %13665 = vmatprep.subr.bf16.mxu0 %v14516_v20  ;;  %13670 = vmatpush3.bf16.msra.mxu1 %v15868_v45  ;;  %v11206_v45 = vld [vmem:[%s17621_s0 + $0x48] sm:$0xff] }
 0xdc6   :  { %13671 = vmatprep.subr.bf16.mxu1 %v14516_v20  ;;  %12649 = vmatprep.mubr.msk.f32.mxu1 %vm14517_vm1, %v14518_v36 }
 0xdc8   :  { %13667 = vmatpush3.bf16.msra.mxu0 %v15845_v25 }
 0xdc9   :  { %13686 = vmatprep.subr.bf16.mxu0 %v14516_v20  ;;  %13673 = vmatpush3.bf16.msra.mxu1 %v15877_v6 }
 0xdca   :  { %13674 = vmatprep.subr.bf16.mxu1 %v14516_v20 }
 0xdcb   :  { %12639 = vmatmul.mubr.msk.f32.vlgmr.msra.gmra.mrb[42].mxu0 %vm79_vm0, %v15906_v53 }
 0xdcc   :  { %12682 = vmatprep.mubr.msk.f32.mxu0 %vm14517_vm1, %v14518_v36  ;;  %13688 = vmatpush3.bf16.msra.mxu0 %v16196_v60 }
 0xdcd   :  { %13689 = vmatprep.subr.bf16.mxu0 %v14516_v20 }
 0xdd0   :  { %13691 = vmatpush3.bf16.msra.mxu0 %v16205_v17 }
 0xe8e   :  { %v5179_v29 = vpop.f32.mrb[40].mxu0  ;;  %v5254_v8 = vpop.f32.mrb[48].mxu1 }
 0xe8f   :  { %v5183_v1 = vadd.f32 %v11208_v63, %v5179_v29  ;;  %v12596_v19 = vpop.f32.mrb[41].mxu0  ;;  %v12607_v24 = vpop.f32.mrb[49].mxu1 }
 0xe90   :  { %v16276_v19 = vld [vmem:[#allocation3 + $0x20] sm:$0xff] }
 0xe91   :  { %v5258_v25 = vadd.f32 %v5254_v8, %v5183_v1  ;;  %v16274_v1 = vld [vmem:[#allocation3 + $0x18] sm:$0xff] }
 0xe96   :  { %v5329_v6 = vpop.f32.mrb[38].mxu0  ;;  %v5410_v18 = vpop.f32.mrb[46].mxu1 }
 0xe97   :  { %v14039_v33 = vadd.f32 %v11206_v45, %v5329_v6  ;;  %v12618_v14 = vpop.f32.mrb[39].mxu0  ;;  %v12629_v9 = vpop.f32.mrb[47].mxu1  ;;  %v14040_v32 = vadd.f32 %v11207_v13, %v5410_v18  ;;  %v16280_v45 = vld [vmem:[#allocation3 + $0x28] sm:$0xff]  ;;  %v16282_v6 = vld [vmem:[#allocation3 + $0x30] sm:$0xff]  ;;  %v16286_v13 = vld [vmem:[#allocation3 + $0x38] sm:$0xff] }
 0xe99   :  { %v11216_v11 = vmul.f32 -1.442695, %v14039_v33  ;;  %v11218_v0 = vmul.f32 -1.442695, %v14040_v32  ;;  %v11221_v32 = vld [vmem:[%s17625_s1 + $0x18] sm:$0xff] }
 0xe9b   :  { %14330 = vpow2.f32 %v11216_v11 }
 0xe9c   :  { %14332 = vpow2.f32 %v11218_v0 }
 0xe9e   :  { %v5498_v56 = vpop.f32.mrb[42].mxu0 }
 0xe9f   :  { %v12640_v7 = vpop.f32.mrb[43].mxu0  ;;  %v5499_v51 = vadd.f32 %v15894_v54, %v5498_v56  ;;  %v5839_v54 = vld [vmem:[%s17647_s4] sm:$0xff] }
 0xea5   :  { %v14331_v41 = vpop.eup %14330 }
 0xea6   :  { %v5337_v31 = vadd.f32 1.0, %v14331_v41  ;;  %v14333_v4 = vpop.eup %14332 }
 0xea7   :  { %v5418_v61 = vadd.f32 1.0, %v14333_v4 }
 0xea8   :  { %14334 = vrcp.f32 %v5337_v31 }
 0xea9   :  { %14336 = vrcp.f32 %v5418_v61 }
 0xeb2   :  { %v14335_v3 = vpop.eup %14334 }
 0xeb3   :  { %v5502_v59 = vmul.f32 %v14335_v3, %v5499_v51  ;;  %v14337_v43 = vpop.eup %14336 }
 0xeb4   :  { %v5505_v23 = vsub.f32 1.0, %v14337_v43  ;;  %v5507_v55 = vmul.f32 %v14337_v43, %v15906_v53  ;;  %v5841_v53 = vld [vmem:[%s17647_s4 + $0x10] sm:$0xff] }
 0xeb5   :  { %v5503_v2 = vadd.f32 %v5502_v59, %v5258_v25 }
 0xeb7   :  { %14338 = vtanh.f32 %v5503_v2 }
 0xec1   :  { %v14339_v27 = vpop.eup %14338 }
 0xec2   :  { %v5506_v10 = vmul.f32 %v14339_v27, %v5505_v23 }
 0xec4   :  { %v16220_v12 = vadd.f32 %v5507_v55, %v5506_v10 }
 0xec6   :  { %12650 = vmatmul.mubr.msk.f32.vlgmr.msra.gmra.mrb[50].mxu1 %vm79_vm0, %v16220_v12  ;;  %12683 = vmatmul.mubr.msk.f32.vlgmr.msra.gmra.mrb[44].mxu0 %vm79_vm0, %v16220_v12 }
 0xec7   :  { %13676 = vmatpush3.bf16.msra.mxu1 %v15904_v52  ;;  %12660 = vmatprep.mubr.msk.f32.mxu1 %vm14517_vm1, %v14518_v36  ;;  %v5840_v52 = vld [vmem:[%s17647_s4 + $0x8] sm:$0xff] }
 0xec8   :  { %13677 = vmatprep.subr.bf16.mxu1 %v14516_v20 }
 0xecb   :  { %13679 = vmatpush3.bf16.msra.mxu1 %v15919_v38  ;;  %v16253_v38 = vpack.c.bf16 %v5840_v52, %v5839_v54 }
 0xecc   :  { %13680 = vmatprep.subr.bf16.mxu1 %v14516_v20 }
 0xecd   :  { %13693 = vmatprep.subr.bf16.mxu0 %v16253_v38 }
 0xece   :  { %12661 = vmatmul.mubr.msk.f32.vlgmr.msra.gmra.mrb[50].mxu1 %vm79_vm0, %v16115_v62  ;;  %13695 = vmatpush3.bf16.msra.mxu0 %v16253_v38 }
 0xecf   :  { %13682 = vmatpush3.bf16.msra.mxu1 %v15933_v50  ;;  %12671 = vmatprep.mubr.msk.f32.mxu1 %vm14517_vm1, %v14518_v36  ;;  %v5842_v50 = vld [vmem:[%s17647_s4 + $0x18] sm:$0xff] }
 0xed0   :  { %13683 = vmatprep.subr.bf16.mxu1 %v14516_v20 }
 0xed3   :  { %13685 = vmatpush3.bf16.msra.mxu1 %v15947_v37  ;;  %v16258_v37 = vpack.c.bf16 %v5842_v50, %v5841_v53 }
 0xed4   :  { %13700 = vmatprep.subr.bf16.mxu1 %v14516_v20 }
 0xed5   :  { %13697 = vmatprep.subr.bf16.mxu0 %v16258_v37 }
 0xed6   :  { %12672 = vmatmul.mubr.msk.f32.vlgmr.msra.gmra.mrb[50].mxu1 %vm79_vm0, %v16134_v21  ;;  %13699 = vmatpush3.bf16.msra.mxu0 %v16258_v37  ;;  %v16265_v21 = vld [vmem:[#allocation3] sm:$0xff] }
 0xed7   :  { %12713 = vmatprep.mubr.msk.f32.mxu1 %vm14517_vm1, %v14518_v36  ;;  %13712 = vmatprep.subr.bf16.mxu0 %v14516_v20 }
 0xf99   :  { %v5811_v62 = vpop.f32.mrb[44].mxu0 }
 0xf9a   :  { %v5823_v39 = vadd.f32 %v16265_v21, %v5811_v62  ;;  %v5824_v63 = vadd.f32 %v16267_v15, %v5811_v62  ;;  %v5825_v29 = vadd.f32 %v16269_v48, %v5811_v62  ;;  %v12684_v8 = vpop.f32.mrb[45].mxu0  ;;  %v5826_v24 = vadd.f32 %v16274_v1, %v5811_v62 }
 0xf9b   :  { %v5827_v25 = vadd.f32 %v16276_v19, %v5811_v62  ;;  %v5828_v18 = vadd.f32 %v16280_v45, %v5811_v62  ;;  %v5829_v33 = vadd.f32 %v16282_v6, %v5811_v62  ;;  %v5830_v14 = vadd.f32 %v16286_v13, %v5811_v62 }
 0xf9c   :  { %14340 = vtanh.f32 %v5823_v39 }
 0xf9d   :  { %14342 = vtanh.f32 %v5824_v63 }
 0xf9e   :  { %14344 = vtanh.f32 %v5825_v29 }
 0xf9f   :  { %14346 = vtanh.f32 %v5826_v24 }
 0xfa0   :  { %14348 = vtanh.f32 %v5827_v25 }
 0xfa1   :  { %14350 = vtanh.f32 %v5828_v18 }
 0xfa2   :  { %14352 = vtanh.f32 %v5829_v33 }
 0xfa3   :  { %14354 = vtanh.f32 %v5830_v14 }
 0xfa6   :  { %v14341_v9 = vpop.eup %14340 }
 0xfa7   :  { %v14343_v11 = vpop.eup %14342  ;;  %12693 = vmatprep.mubr.msk.f32.mxu0 %vm79_vm0, %v14341_v9 }
 0xfa8   :  { %v14345_v0 = vpop.eup %14344  ;;  %12694 = vmatmul.mubr.msk.f32.vlgmr.msra.gmra.mrb[46].mxu0 %vm79_vm0, %v14343_v11 }
 0xfa9   :  { %v5734_v56 = vpop.f32.mrb[50].mxu1  ;;  %12696 = vmatprep.mubr.msk.f32.mxu0 %vm79_vm0, %v14345_v0  ;;  %v14347_v31 = vpop.eup %14346 }
 0xfaa   :  { %v14041_v7 = vadd.f32 %v11221_v32, %v5734_v56  ;;  %v12673_v41 = vpop.f32.mrb[51].mxu1  ;;  %v14349_v4 = vpop.eup %14348 }
 0xfab   :  { %v14351_v61 = vpop.eup %14350 }
 0xfac   :  { %11225 = vst [vmem:[%s17626_s23 + $0x18] sm:$0xff] %v14041_v7  ;;  %12697 = vmatmul.mubr.msk.f32.gmra.mrb[48].mxu0 %vm79_vm0, %v14347_v31  ;;  %v14353_v51 = vpop.eup %14352 }
 0xfad   :  { %12699 = vmatprep.mubr.msk.f32.mxu0 %vm79_vm0, %v14349_v4  ;;  %v14355_v3 = vpop.eup %14354 }
 0xfb0   :  { %12700 = vmatmul.mubr.msk.f32.gmra.mrb[50].mxu0 %vm79_vm0, %v14351_v61 }
 0xfb1   :  { %12702 = vmatprep.mubr.msk.f32.mxu0 %vm79_vm0, %v14353_v51 }
 0xfb4   :  { %12703 = vmatmul.mubr.msk.f32.gmra.mrb[52].mxu0 %vm79_vm0, %v14355_v3 }
 0xfb5   :  { %12735 = vmatprep.mubr.msk.f32.mxu0 %vm14517_vm1, %v14518_v36 }
0x107b   :  { %v12695_v59 = vpop.f32.mrb[46].mxu0 }
0x107c   :  { %v5933_v2 = vpop.f32.mrb[47].mxu0  ;;  %v5973_v55 = vsel %vm622_vm2, %v12695_v59, -inf }
0x107d   :  { %v5972_v52 = vsel %vm622_vm2, %v5933_v2, -inf }
0x107f   :  { %v12698_v43 = vpop.f32.mrb[48].mxu0 }
0x1080   :  { %v5943_v23 = vpop.f32.mrb[49].mxu0  ;;  %v5975_v63 = vsel %vm622_vm2, %v12698_v43, -inf }
0x1081   :  { %v5974_v25 = vsel %vm622_vm2, %v5943_v23, -inf }
0x1083   :  { %v12701_v27 = vpop.f32.mrb[50].mxu0 }
0x1084   :  { %v5978_v10 = vsel %vm622_vm2, %v12701_v27, -inf  ;;  %v5953_v54 = vpop.f32.mrb[51].mxu0 }
0x1085   :  { %v5979_v53 = vmax.f32 %v5973_v55, %v5978_v10  ;;  %v5976_v50 = vsel %vm622_vm2, %v5953_v54, -inf }
0x1086   :  { %v5977_v62 = vmax.f32 %v5972_v52, %v5976_v50 }
0x1087   :  { %v12704_v39 = vpop.f32.mrb[52].mxu0 }
0x1088   :  { %v5984_v29 = vmax.f32 %v5977_v62, %v5979_v53  ;;  %v5982_v8 = vsel %vm622_vm2, %v12704_v39, -inf  ;;  %v5963_v24 = vpop.f32.mrb[53].mxu0 }
0x1089   :  { %v5983_v18 = vmax.f32 %v5975_v63, %v5982_v8  ;;  %v5980_v33 = vsel %vm622_vm2, %v5963_v24, -inf }
0x108a   :  { %v5981_v14 = vmax.f32 %v5974_v25, %v5980_v33 }
0x108c   :  { %v5985_v9 = vmax.f32 %v5981_v14, %v5983_v18 }
0x108e   :  { %v5986_v11 = vmax.f32 %v5984_v29, %v5985_v9 }
0x1090   :  { %v5987_v32 = vsub.f32 %v5933_v2, %v5986_v11  ;;  %v5988_v0 = vsub.f32 %v12695_v59, %v5986_v11  ;;  %v5989_v56 = vsub.f32 %v5943_v23, %v5986_v11  ;;  %v5990_v7 = vsub.f32 %v12698_v43, %v5986_v11 }
0x1091   :  { %v5991_v41 = vsub.f32 %v5953_v54, %v5986_v11  ;;  %v5992_v31 = vsub.f32 %v12701_v27, %v5986_v11  ;;  %v5993_v4 = vsub.f32 %v5963_v24, %v5986_v11  ;;  %v5994_v61 = vsub.f32 %v12704_v39, %v5986_v11 }
0x1092   :  { %v5995_v51 = vmul.f32 1.442695, %v5987_v32  ;;  %v5997_v3 = vmul.f32 1.442695, %v5988_v0  ;;  %v5999_v55 = vmul.f32 1.442695, %v5989_v56 }
0x1093   :  { %v6001_v10 = vmul.f32 1.442695, %v5990_v7  ;;  %v6003_v52 = vmul.f32 1.442695, %v5991_v41  ;;  %v6005_v53 = vmul.f32 1.442695, %v5992_v31 }
0x1094   :  { %14356 = vpow2.f32 %v5995_v51  ;;  %v6007_v50 = vmul.f32 1.442695, %v5993_v4  ;;  %v6009_v59 = vmul.f32 1.442695, %v5994_v61 }
0x1095   :  { %14358 = vpow2.f32 %v5997_v3 }
0x1096   :  { %14360 = vpow2.f32 %v5999_v55 }
0x1097   :  { %14362 = vpow2.f32 %v6001_v10 }
0x1098   :  { %14364 = vpow2.f32 %v6003_v52 }
0x1099   :  { %14366 = vpow2.f32 %v6005_v53 }
0x109a   :  { %14368 = vpow2.f32 %v6007_v50 }
0x109b   :  { %14370 = vpow2.f32 %v6009_v59  ;;  %v6141_v59 = vld [vmem:[%s17611_s14] sm:$0xff] }
0x109e   :  { %v14357_v2 = vpop.eup %14356 }
0x109f   :  { %v14359_v43 = vpop.eup %14358  ;;  %v6011_v23 = vsel %vm622_vm2, %v14357_v2, 0.0 }
0x10a0   :  { %v14361_v27 = vpop.eup %14360  ;;  %v6012_v54 = vsel %vm622_vm2, %v14359_v43, 0.0 }
0x10a1   :  { %v14363_v62 = vpop.eup %14362  ;;  %v6013_v39 = vadd.f32 %v6012_v54, %v6011_v23  ;;  %v6014_v63 = vsel %vm622_vm2, %v14361_v27, 0.0 }
0x10a2   :  { %v14365_v29 = vpop.eup %14364  ;;  %v6016_v24 = vsel %vm622_vm2, %v14363_v62, 0.0 }
0x10a3   :  { %v6015_v8 = vadd.f32 %v6014_v63, %v6013_v39  ;;  %v14367_v25 = vpop.eup %14366  ;;  %v6018_v33 = vsel %vm622_vm2, %v14365_v29, 0.0  ;;  %v6144_v39 = vld [vmem:[%s17611_s14 + $0x18] sm:$0xff]  ;;  %v6299_v63 = vld [vmem:[%s17612_s15 + $0x10] sm:$0xff] }
0x10a4   :  { %v14369_v14 = vpop.eup %14368  ;;  %v6020_v11 = vsel %vm622_vm2, %v14367_v25, 0.0 }
0x10a5   :  { %v6017_v18 = vadd.f32 %v6016_v24, %v6015_v8  ;;  %v14371_v32 = vpop.eup %14370  ;;  %v6022_v56 = vsel %vm622_vm2, %v14369_v14, 0.0  ;;  %v6300_v8 = vld [vmem:[%s17612_s15 + $0x18] sm:$0xff] }
0x10a6   :  { %v6024_v41 = vsel %vm622_vm2, %v14371_v32, 0.0  ;;  %v16355_v24 = vpack.c.bf16 %v6300_v8, %v6299_v63 }
0x10a7   :  { %v6019_v9 = vadd.f32 %v6018_v33, %v6017_v18 }
0x10a9   :  { %v6021_v0 = vadd.f32 %v6020_v11, %v6019_v9 }
0x10ab   :  { %v6023_v7 = vadd.f32 %v6022_v56, %v6021_v0 }
0x10ad   :  { %v6025_v31 = vadd.f32 %v6024_v41, %v6023_v7 }
0x10af   :  { %14372 = vrcp.f32 %v6025_v31 }
0x10b9   :  { %v14373_v4 = vpop.eup %14372 }
0x10ba   :  { %v6028_v61 = vmul.f32 %v14373_v4, %v14359_v43  ;;  %v6027_v51 = vmul.f32 %v14373_v4, %v14357_v2  ;;  %v6030_v3 = vmul.f32 %v14373_v4, %v14363_v62  ;;  %v6029_v55 = vmul.f32 %v14373_v4, %v14361_v27  ;;  %v6142_v2 = vld [vmem:[%s17611_s14 + $0x8] sm:$0xff]  ;;  %v6297_v43 = vld [vmem:[%s17612_s15] sm:$0xff]  ;;  %v6143_v62 = vld [vmem:[%s17611_s14 + $0x10] sm:$0xff] }
0x10bb   :  { %v6032_v10 = vmul.f32 %v14373_v4, %v14367_v25  ;;  %v6031_v52 = vmul.f32 %v14373_v4, %v14365_v29  ;;  %v6034_v53 = vmul.f32 %v14373_v4, %v14371_v32  ;;  %v6033_v50 = vmul.f32 %v14373_v4, %v14369_v14  ;;  %v6298_v27 = vld [vmem:[%s17612_s15 + $0x8] sm:$0xff] }
0x10bc   :  { %6050 = vperm.xlu1 %14163, %v6028_v61   ;;  %6045 = vperm.xlu0 %14162, %v6027_v51   ;;  %v16330_v23 = vpack.c.bf16 %v6142_v2, %v6141_v59  ;;  %v16335_v54 = vpack.c.bf16 %v6298_v27, %v6297_v43  ;;  %v16350_v29 = vpack.c.bf16 %v6144_v39, %v6143_v62 }
0x10be   :  { %13702 = vmatpush3.bf16.msra.mxu1 %v16330_v23  ;;  %13714 = vmatpush3.bf16.msra.mxu0 %v16335_v54 }
0x10bf   :  { %13703 = vmatprep.subr.bf16.mxu1 %v14516_v20  ;;  %13715 = vmatprep.subr.bf16.mxu0 %v14516_v20 }
0x10c0   :  { %6060 = vperm.xlu1 %14163, %v6030_v3   ;;  %6055 = vperm.xlu0 %14162, %v6029_v55  }
0x10c2   :  { %13705 = vmatpush3.bf16.msra.mxu1 %v16350_v29  ;;  %13717 = vmatpush3.bf16.msra.mxu0 %v16355_v24 }
0x10c3   :  { %13706 = vmatprep.subr.bf16.mxu1 %v14516_v20  ;;  %13718 = vmatprep.subr.bf16.mxu0 %v14516_v20 }
0x10c4   :  { %6070 = vperm.xlu1 %14163, %v6032_v10   ;;  %6065 = vperm.xlu0 %14162, %v6031_v52  }
0x10c8   :  { %6080 = vperm.xlu1 %14163, %v6034_v53   ;;  %6075 = vperm.xlu0 %14162, %v6033_v50  }
0x113b   :  { %v6051_v25 = vpop.permute.xlu1 %6050  ;;  %v6046_v18 = vpop.permute.xlu0 %6045 }
0x113c   :  { %v6084_v33 = vmul.f32 %v6051_v25, %v16009_v34  ;;  %v6115_v14 = vmul.f32 %v6051_v25, %v16014_v22  ;;  %v6083_v9 = vmul.f32 %v6046_v18, %v16019_v5  ;;  %v6114_v11 = vmul.f32 %v6046_v18, %v16024_v28 }
0x113e   :  { %v6092_v32 = vsel %vm79_vm0, %v6084_v33, 0.0  ;;  %v6123_v0 = vsel %vm79_vm0, %v6115_v14, 0.0  ;;  %v6091_v56 = vsel %vm79_vm0, %v6083_v9, 0.0  ;;  %v6122_v7 = vsel %vm79_vm0, %v6114_v11, 0.0  ;;  %v6220_v14 = vld [vmem:[%s17613_s17 + $0x8] sm:$0xff]  ;;  %v6372_v9 = vld [vmem:[%s17614_s18] sm:$0xff] }
0x113f   :  { %v6061_v41 = vpop.permute.xlu1 %6060  ;;  %v6056_v31 = vpop.permute.xlu0 %6055  ;;  %v6093_v61 = vadd.f32 %v6092_v32, %v6091_v56  ;;  %v6124_v28 = vadd.f32 %v6123_v0, %v6122_v7 }
0x1140   :  { %v6086_v4 = vmul.f32 %v6061_v41, %v16033_v16  ;;  %v6117_v34 = vmul.f32 %v6061_v41, %v16038_v57  ;;  %v6085_v22 = vmul.f32 %v6056_v31, %v16043_v46  ;;  %v6116_v5 = vmul.f32 %v6056_v31, %v16048_v49  ;;  %v6221_v41 = vld [vmem:[%s17613_s17 + $0x10] sm:$0xff] }
0x1142   :  { %v6094_v51 = vsel %vm79_vm0, %v6085_v22, 0.0  ;;  %v6125_v3 = vsel %vm79_vm0, %v6116_v5, 0.0  ;;  %v6096_v55 = vsel %vm79_vm0, %v6086_v4, 0.0  ;;  %v6127_v16 = vsel %vm79_vm0, %v6117_v34, 0.0  ;;  %v6374_v34 = vld [vmem:[%s17614_s18 + $0x10] sm:$0xff]  ;;  %v6375_v22 = vld [vmem:[%s17614_s18 + $0x18] sm:$0xff] }
0x1143   :  { %v6095_v10 = vadd.f32 %v6094_v51, %v6093_v61  ;;  %v6126_v52 = vadd.f32 %v6125_v3, %v6124_v28  ;;  %v6071_v53 = vpop.permute.xlu1 %6070  ;;  %v6066_v50 = vpop.permute.xlu0 %6065  ;;  %v16430_v51 = vpack.c.bf16 %v6375_v22, %v6374_v34  ;;  %v6447_v3 = vld [vmem:[%s17615_s16] sm:$0xff]  ;;  %v11237_v22 = vld [vmem:[%s17621_s0 + $0x70] sm:$0xff] }
0x1144   :  { %v6088_v57 = vmul.f32 %v6071_v53, %v16061_v30  ;;  %v6087_v46 = vmul.f32 %v6066_v50, %v16066_v40  ;;  %v6118_v49 = vmul.f32 %v6066_v50, %v16071_v47  ;;  %v6119_v25 = vmul.f32 %v6071_v53, %v16083_v42  ;;  %v6219_v40 = vld [vmem:[%s17613_s17] sm:$0xff]  ;;  %v6373_v42 = vld [vmem:[%s17614_s18 + $0x8] sm:$0xff] }
0x1145   :  { %v6097_v59 = vadd.f32 %v6096_v55, %v6095_v10  ;;  %v6128_v2 = vadd.f32 %v6127_v16, %v6126_v52  ;;  %v16402_v56 = vpack.c.bf16 %v6220_v14, %v6219_v40  ;;  %v16404_v7 = vpack.c.bf16 %v6373_v42, %v6372_v9  ;;  %v6522_v10 = vld [vmem:[%s17616_s19] sm:$0xff]  ;;  %v6523_v52 = vld [vmem:[%s17616_s19 + $0x8] sm:$0xff]  ;;  %v6600_v40 = vld [vmem:[%s17617_s10 + $0x18] sm:$0xff] }
0x1146   :  { %v6098_v43 = vsel %vm79_vm0, %v6087_v46, 0.0  ;;  %v6129_v27 = vsel %vm79_vm0, %v6118_v49, 0.0  ;;  %v6100_v8 = vsel %vm79_vm0, %v6088_v57, 0.0  ;;  %v6131_v32 = vsel %vm79_vm0, %v6119_v25, 0.0  ;;  %v6449_v57 = vld [vmem:[%s17615_s16 + $0x10] sm:$0xff]  ;;  %v6450_v49 = vld [vmem:[%s17615_s16 + $0x18] sm:$0xff] }
0x1147   :  { %v6099_v62 = vadd.f32 %v6098_v43, %v6097_v59  ;;  %v6081_v39 = vpop.permute.xlu1 %6080  ;;  %v6076_v63 = vpop.permute.xlu0 %6075  ;;  %v6130_v47 = vadd.f32 %v6129_v27, %v6128_v2  ;;  %v16455_v16 = vpack.c.bf16 %v6523_v52, %v6522_v10  ;;  %v6524_v59 = vld [vmem:[%s17616_s19 + $0x10] sm:$0xff]  ;;  %v6525_v2 = vld [vmem:[%s17616_s19 + $0x18] sm:$0xff]  ;;  %v16479_v43 = vpack.c.bf16 %v6450_v49, %v6449_v57  ;;  %v6759_v42 = vld [vmem:[%s17619_s12] sm:$0xff] }
0x1148   :  { %v6090_v18 = vmul.f32 %v6081_v39, %v16088_v35  ;;  %v6089_v30 = vmul.f32 %v6076_v63, %v16093_v44  ;;  %v6120_v44 = vmul.f32 %v6076_v63, %v16100_v58  ;;  %v6222_v58 = vld [vmem:[%s17613_s17 + $0x18] sm:$0xff]  ;;  %v6121_v61 = vmul.f32 %v6081_v39, %v16113_v26  ;;  %v6448_v26 = vld [vmem:[%s17615_s16 + $0x8] sm:$0xff]  ;;  %v6678_v63 = vld [vmem:[%s17618_s11] sm:$0xff] }
0x1149   :  { %v6101_v33 = vadd.f32 %v6100_v8, %v6099_v62  ;;  %v6132_v31 = vadd.f32 %v6131_v32, %v6130_v47  ;;  %v16428_v28 = vpack.c.bf16 %v6222_v58, %v6221_v41  ;;  %v16453_v50 = vpack.c.bf16 %v6448_v26, %v6447_v3  ;;  %v6597_v62 = vld [vmem:[%s17617_s10] sm:$0xff]  ;;  %v6598_v39 = vld [vmem:[%s17617_s10 + $0x8] sm:$0xff]  ;;  %v6680_v47 = vld [vmem:[%s17618_s11 + $0x10] sm:$0xff] }
0x114a   :  { %v6102_v35 = vsel %vm79_vm0, %v6089_v30, 0.0  ;;  %v6104_v0 = vsel %vm79_vm0, %v6090_v18, 0.0  ;;  %v6133_v5 = vsel %vm79_vm0, %v6120_v44, 0.0  ;;  %v6135_v53 = vsel %vm79_vm0, %v6121_v61, 0.0  ;;  %v6679_v8 = vld [vmem:[%s17618_s11 + $0x8] sm:$0xff]  ;;  %v6599_v30 = vld [vmem:[%s17617_s10 + $0x10] sm:$0xff] }
0x114b   :  { %v6103_v11 = vadd.f32 %v6102_v35, %v6101_v33  ;;  %v6134_v55 = vadd.f32 %v6133_v5, %v6132_v31  ;;  %v16481_v27 = vpack.c.bf16 %v6525_v2, %v6524_v59  ;;  %v16503_v25 = vpack.c.bf16 %v6598_v39, %v6597_v62  ;;  %v6681_v33 = vld [vmem:[%s17618_s11 + $0x18] sm:$0xff]  ;;  %v6760_v35 = vld [vmem:[%s17619_s12 + $0x8] sm:$0xff]  ;;  %v6849_v41 = vld [vmem:[%s17620_s20] sm:$0xff] }
0x114c   :  { %v16505_v18 = vpack.c.bf16 %v6679_v8, %v6678_v63  ;;  %v16527_v14 = vpack.c.bf16 %v6600_v40, %v6599_v30  ;;  %v16529_v9 = vpack.c.bf16 %v6681_v33, %v6680_v47  ;;  %v16545_v44 = vpack.c.bf16 %v6760_v35, %v6759_v42  ;;  %v6762_v32 = vld [vmem:[%s17619_s12 + $0x18] sm:$0xff]  ;;  %v6850_v31 = vld [vmem:[%s17620_s20 + $0x8] sm:$0xff]  ;;  %v11235_v52 = vld [vmem:[%s17621_s0 + $0x60] sm:$0xff] }
0x114d   :  { %v16409_v4 = vadd.f32 %v6104_v0, %v6103_v11  ;;  %v16460_v46 = vadd.f32 %v6135_v53, %v6134_v55  ;;  %v6761_v11 = vld [vmem:[%s17619_s12 + $0x10] sm:$0xff]  ;;  %v16583_v58 = vpack.c.bf16 %v6850_v31, %v6849_v41  ;;  %v11236_v59 = vld [vmem:[%s17621_s0 + $0x68] sm:$0xff]  ;;  %v16609_v35 = vld [vmem:[%s17622_s13] ss:$0 sm:$0xff] }
0x114e   :  { %v16560_v0 = vpack.c.bf16 %v6762_v32, %v6761_v11 }
0x114f   :  { %12714 = vmatmul.mubr.msk.f32.vlgmr.msra.gmra.mrb[52].mxu1 %vm79_vm0, %v16409_v4  ;;  %12736 = vmatmul.mubr.msk.f32.vlgmr.msra.gmra.mrb[54].mxu0 %vm79_vm0, %v16409_v4 }
0x1150   :  { %13708 = vmatpush3.bf16.msra.mxu1 %v16402_v56  ;;  %13720 = vmatpush3.bf16.msra.mxu0 %v16404_v7 }
0x1151   :  { %13709 = vmatprep.subr.bf16.mxu1 %v14516_v20  ;;  %13721 = vmatprep.subr.bf16.mxu0 %v14516_v20 }
0x1152   :  { %12724 = vmatprep.mubr.msk.f32.mxu1 %vm14517_vm1, %v14518_v36  ;;  %12746 = vmatprep.mubr.msk.f32.mxu0 %vm14517_vm1, %v14518_v36 }
0x1154   :  { %13711 = vmatpush3.bf16.msra.mxu1 %v16428_v28  ;;  %13723 = vmatpush3.bf16.msra.mxu0 %v16430_v51 }
0x1155   :  { %13724 = vmatprep.subr.bf16.mxu1 %v14516_v20  ;;  %13730 = vmatprep.subr.bf16.mxu0 %v14516_v20 }
0x1157   :  { %12725 = vmatmul.mubr.msk.f32.vlgmr.msra.gmra.mrb[52].mxu1 %vm79_vm0, %v16460_v46  ;;  %12747 = vmatmul.mubr.msk.f32.vlgmr.msra.gmra.mrb[54].mxu0 %vm79_vm0, %v16460_v46 }
0x1158   :  { %13726 = vmatpush3.bf16.msra.mxu1 %v16453_v50  ;;  %13732 = vmatpush3.bf16.msra.mxu0 %v16455_v16 }
0x1159   :  { %13727 = vmatprep.subr.bf16.mxu1 %v14516_v20  ;;  %13733 = vmatprep.subr.bf16.mxu0 %v14516_v20 }
0x115a   :  { %12757 = vmatprep.mubr.msk.f32.mxu1 %vm14517_vm1, %v14518_v36  ;;  %12768 = vmatprep.mubr.msk.f32.mxu0 %vm14517_vm1, %v14518_v36 }
0x115c   :  { %13729 = vmatpush3.bf16.msra.mxu1 %v16479_v43  ;;  %13735 = vmatpush3.bf16.msra.mxu0 %v16481_v27 }
0x115d   :  { %13736 = vmatprep.subr.bf16.mxu1 %v14516_v20  ;;  %13742 = vmatprep.subr.bf16.mxu0 %v14516_v20 }
0x115f   :  { %12758 = vmatmul.mubr.msk.f32.vlgmr.msra.gmra.mrb[54].mxu1 %vm79_vm0, %v16409_v4  ;;  %12769 = vmatmul.mubr.msk.f32.vlgmr.msra.gmra.mrb[56].mxu0 %vm79_vm0, %v16460_v46 }
0x1160   :  { %13738 = vmatpush3.bf16.msra.mxu1 %v16503_v25  ;;  %13744 = vmatpush3.bf16.msra.mxu0 %v16505_v18 }
0x1161   :  { %13739 = vmatprep.subr.bf16.mxu1 %v14516_v20  ;;  %13745 = vmatprep.subr.bf16.mxu0 %v14516_v20 }
0x1162   :  { %12779 = vmatprep.mubr.msk.f32.mxu1 %vm14517_vm1, %v14518_v36  ;;  %12790 = vmatprep.mubr.msk.f32.mxu0 %vm14517_vm1, %v14518_v36 }
0x1164   :  { %13741 = vmatpush3.bf16.msra.mxu1 %v16527_v14  ;;  %13747 = vmatpush3.bf16.msra.mxu0 %v16529_v9 }
0x1165   :  { %13748 = vmatprep.subr.bf16.mxu1 %v14516_v20  ;;  %13754 = vmatprep.subr.bf16.mxu0 %v14516_v20 }
0x1167   :  { %12780 = vmatmul.mubr.msk.f32.vlgmr.msra.gmra.mrb[52].mxu1 %vm79_vm0, %v16220_v12  ;;  %12791 = vmatmul.mubr.msk.f32.vlgmr.msra.gmra.mrb[54].mxu0 %vm79_vm0, %v16220_v12 }
0x1168   :  { %13750 = vmatpush3.bf16.msra.mxu1 %v16545_v44  ;;  %12801 = vmatprep.mubr.msk.f32.mxu1 %vm14517_vm1, %v14518_v36 }
0x1169   :  { %13751 = vmatprep.subr.bf16.mxu1 %v14516_v20  ;;  %12812 = vmatprep.mubr.msk.f32.mxu0 %vm14517_vm1, %v14518_v36 }
0x116a   :  { %13756 = vmatpush3.bf16.msra.mxu0 %v16583_v58 }
0x116b   :  { %13757 = vmatprep.subr.bf16.mxu0 %v14516_v20 }
0x116c   :  { %13753 = vmatpush3.bf16.msra.mxu1 %v16560_v0 }
0x116d   :  { %13772 = vmatprep.subr.bf16.mxu1 %v14516_v20 }
0x116f   :  { %12802 = vmatmul.mubr.msk.f32.vlgmr.msra.gmra.mrb[56].mxu1 %vm79_vm0, %v16220_v12 }
0x1170   :  { %13774 = vmatpush3.bf16.msra.mxu1 %v16196_v60  ;;  %12845 = vmatprep.mubr.msk.f32.mxu1 %vm14517_vm1, %v14518_v36  ;;  %v6851_v60 = vld [vmem:[%s17620_s20 + $0x10] sm:$0xff] }
0x1171   :  { %13775 = vmatprep.subr.bf16.mxu1 %v14516_v20 }
0x1174   :  { %13777 = vmatpush3.bf16.msra.mxu1 %v16205_v17  ;;  %v6852_v17 = vld [vmem:[%s17620_s20 + $0x18] sm:$0xff] }
0x1175   :  { %13779 = vmatprep.subr.bf16.mxu1 %v16253_v38  ;;  %v16592_v34 = vpack.c.bf16 %v6852_v17, %v6851_v60 }
0x1177   :  { %13759 = vmatpush3.bf16.msra.mxu0 %v16592_v34 }
0x1178   :  { %13760 = vmatprep.subr.bf16.mxu0 %v14516_v20 }
0x1232   :  { %v6517_v5 = vpop.f32.mrb[54].mxu1  ;;  %v6592_v61 = vpop.f32.mrb[56].mxu0 }
0x1233   :  { %v6521_v3 = vadd.f32 %v11237_v22, %v6517_v5  ;;  %v12759_v55 = vpop.f32.mrb[55].mxu1  ;;  %v12770_v26 = vpop.f32.mrb[57].mxu0  ;;  %v6927_v5 = vld [vmem:[%s17623_s21] sm:$0xff] }
0x1235   :  { %v6596_v10 = vadd.f32 %v6592_v61, %v6521_v3  ;;  %v6928_v61 = vld [vmem:[%s17623_s21 + $0x8] sm:$0xff] }
0x123a   :  { %v6667_v53 = vpop.f32.mrb[52].mxu1  ;;  %v6748_v57 = vpop.f32.mrb[54].mxu0 }
0x123b   :  { %v14042_v49 = vadd.f32 %v11235_v52, %v6667_v53  ;;  %v12781_v2 = vpop.f32.mrb[53].mxu1  ;;  %v12792_v62 = vpop.f32.mrb[55].mxu0  ;;  %v14043_v63 = vadd.f32 %v11236_v59, %v6748_v57  ;;  %v16619_v52 = vpack.c.bf16 %v6928_v61, %v6927_v5  ;;  %v6930_v57 = vld [vmem:[%s17623_s21 + $0x18] sm:$0xff]  ;;  %v7003_v59 = vld [vmem:[%s17624_s22 + $0x8] sm:$0xff] }
0x123c   :  { %v7004_v62 = vld [vmem:[%s17624_s22 + $0x10] sm:$0xff] }
0x123d   :  { %v11245_v39 = vmul.f32 -1.442695, %v14042_v49  ;;  %v11247_v8 = vmul.f32 -1.442695, %v14043_v63  ;;  %v7002_v49 = vld [vmem:[%s17624_s22] sm:$0xff] }
0x123e   :  { %v16648_v2 = vpack.c.bf16 %v7003_v59, %v7002_v49 }
0x123f   :  { %14374 = vpow2.f32 %v11245_v39  ;;  %v7005_v39 = vld [vmem:[%s17624_s22 + $0x18] sm:$0xff] }
0x1240   :  { %14376 = vpow2.f32 %v11247_v8 }
0x1242   :  { %v6836_v30 = vpop.f32.mrb[56].mxu1 }
0x1243   :  { %v12803_v40 = vpop.f32.mrb[57].mxu1  ;;  %v6837_v32 = vadd.f32 %v16609_v35, %v6836_v30 }
0x1249   :  { %v14375_v47 = vpop.eup %14374 }
0x124a   :  { %v6675_v33 = vadd.f32 1.0, %v14375_v47  ;;  %v14377_v42 = vpop.eup %14376 }
0x124b   :  { %v6756_v11 = vadd.f32 1.0, %v14377_v42 }
0x124c   :  { %14378 = vrcp.f32 %v6675_v33 }
0x124d   :  { %14380 = vrcp.f32 %v6756_v11 }
0x1256   :  { %v14379_v41 = vpop.eup %14378 }
0x1257   :  { %v6840_v31 = vmul.f32 %v14379_v41, %v6837_v32  ;;  %v14381_v17 = vpop.eup %14380 }
0x1258   :  { %v6843_v22 = vsub.f32 1.0, %v14381_v17  ;;  %v6845_v55 = vmul.f32 %v14381_v17, %v16220_v12 }
0x1259   :  { %v6841_v60 = vadd.f32 %v6840_v31, %v6596_v10  ;;  %v6929_v10 = vld [vmem:[%s17623_s21 + $0x10] sm:$0xff] }
0x125a   :  { %v16634_v12 = vpack.c.bf16 %v6930_v57, %v6929_v10 }
0x125b   :  { %14382 = vtanh.f32 %v6841_v60 }
0x1265   :  { %v14383_v3 = vpop.eup %14382 }
0x1266   :  { %v6844_v26 = vmul.f32 %v14383_v3, %v6843_v22 }
0x1268   :  { %v16621_v53 = vadd.f32 %v6845_v55, %v6844_v26 }
0x126a   :  { %12813 = vmatmul.mubr.msk.f32.vlgmr.msra.gmra.mrb[58].mxu0 %vm79_vm0, %v16621_v53  ;;  %12846 = vmatmul.mubr.msk.f32.vlgmr.msra.gmra.mrb[58].mxu1 %vm79_vm0, %v16621_v53 }
0x126b   :  { %13762 = vmatpush3.bf16.msra.mxu0 %v16619_v52  ;;  %12823 = vmatprep.mubr.msk.f32.mxu0 %vm14517_vm1, %v14518_v36 }
0x126c   :  { %13763 = vmatprep.subr.bf16.mxu0 %v14516_v20  ;;  %13781 = vmatpush3.bf16.msra.mxu1 %v16253_v38  ;;  %v16662_v38 = vpack.c.bf16 %v7005_v39, %v7004_v62 }
0x126d   :  { %13783 = vmatprep.subr.bf16.mxu1 %v16258_v37 }
0x126f   :  { %13765 = vmatpush3.bf16.msra.mxu0 %v16634_v12 }
0x1270   :  { %13766 = vmatprep.subr.bf16.mxu0 %v14516_v20  ;;  %13785 = vmatpush3.bf16.msra.mxu1 %v16258_v37 }
0x1271   :  { %13798 = vmatprep.subr.bf16.mxu1 %v14516_v20 }
0x1272   :  { %12824 = vmatmul.mubr.msk.f32.vlgmr.msra.gmra.mrb[58].mxu0 %vm79_vm0, %v16409_v4 }
0x1273   :  { %13768 = vmatpush3.bf16.msra.mxu0 %v16648_v2  ;;  %12834 = vmatprep.mubr.msk.f32.mxu0 %vm14517_vm1, %v14518_v36 }
0x1274   :  { %13769 = vmatprep.subr.bf16.mxu0 %v14516_v20 }
0x1277   :  { %13771 = vmatpush3.bf16.msra.mxu0 %v16662_v38 }
0x1278   :  { %13786 = vmatprep.subr.bf16.mxu0 %v14516_v20 }
0x127a   :  { %12835 = vmatmul.mubr.msk.f32.vlgmr.msra.gmra.mrb[58].mxu0 %vm79_vm0, %v16460_v46 }
0x127b   :  { %13788 = vmatpush3.bf16.msra.mxu0 %v16330_v23  ;;  %12876 = vmatprep.mubr.msk.f32.mxu0 %vm14517_vm1, %v14518_v36 }
0x127c   :  { %13789 = vmatprep.subr.bf16.mxu0 %v14516_v20 }
0x127f   :  { %13791 = vmatpush3.bf16.msra.mxu0 %v16350_v29 }
0x1280   :  { %13792 = vmatprep.subr.bf16.mxu0 %v14516_v20 }
0x133d   :  { %v7149_v37 = vpop.f32.mrb[58].mxu1 }
0x133e   :  { %v7161_v4 = vadd.f32 %v7149_v37, %v16265_v21  ;;  %v7162_v63 = vadd.f32 %v7149_v37, %v16267_v15  ;;  %v7163_v8 = vadd.f32 %v7149_v37, %v16269_v48  ;;  %v12847_v30 = vpop.f32.mrb[59].mxu1  ;;  %v7164_v23 = vadd.f32 %v7149_v37, %v16274_v1  ;;  %v11250_v1 = vld [vmem:[%s17625_s1 + $0x20] sm:$0xff] }
0x133f   :  { %v7165_v46 = vadd.f32 %v7149_v37, %v16276_v19  ;;  %v7166_v40 = vadd.f32 %v7149_v37, %v16280_v45  ;;  %v7167_v29 = vadd.f32 %v7149_v37, %v16282_v6  ;;  %v7168_v21 = vadd.f32 %v7149_v37, %v16286_v13 }
0x1340   :  { %14384 = vtanh.f32 %v7161_v4 }
0x1341   :  { %14386 = vtanh.f32 %v7162_v63 }
0x1342   :  { %14388 = vtanh.f32 %v7163_v8 }
0x1343   :  { %14390 = vtanh.f32 %v7164_v23 }
0x1344   :  { %14392 = vtanh.f32 %v7165_v46 }
0x1345   :  { %14394 = vtanh.f32 %v7166_v40 }
0x1346   :  { %14396 = vtanh.f32 %v7167_v29 }
0x1347   :  { %14398 = vtanh.f32 %v7168_v21 }
0x134a   :  { %v14385_v15 = vpop.eup %14384 }
0x134b   :  { %v14387_v48 = vpop.eup %14386  ;;  %12856 = vmatprep.mubr.msk.f32.mxu1 %vm79_vm0, %v14385_v15 }
0x134c   :  { %v14389_v19 = vpop.eup %14388  ;;  %12857 = vmatmul.mubr.msk.f32.vlgmr.msra.gmra.mrb[60].mxu1 %vm79_vm0, %v14387_v48 }
0x134d   :  { %v7072_v45 = vpop.f32.mrb[58].mxu0  ;;  %12859 = vmatprep.mubr.msk.f32.mxu1 %vm79_vm0, %v14389_v19  ;;  %13800 = vmatpush3.bf16.msra.mxu1 %v16335_v54  ;;  %v14391_v47 = vpop.eup %14390 }
0x134e   :  { %v14044_v6 = vadd.f32 %v11250_v1, %v7072_v45  ;;  %v12836_v13 = vpop.f32.mrb[59].mxu0  ;;  %13801 = vmatprep.subr.bf16.mxu1 %v14516_v20  ;;  %v14393_v33 = vpop.eup %14392 }
0x134f   :  { %v14395_v42 = vpop.eup %14394 }
0x1350   :  { %11254 = vst [vmem:[%s17626_s23 + $0x20] sm:$0xff] %v14044_v6  ;;  %12860 = vmatmul.mubr.msk.f32.gmra.mrb[62].mxu1 %vm79_vm0, %v14391_v47  ;;  %v14397_v54 = vpop.eup %14396 }
0x1351   :  { %12862 = vmatprep.mubr.msk.f32.mxu1 %vm79_vm0, %v14393_v33  ;;  %13803 = vmatpush3.bf16.msra.mxu1 %v16355_v24  ;;  %v14399_v11 = vpop.eup %14398 }
0x1352   :  { %13804 = vmatprep.subr.bf16.mxu1 %v14516_v20 }
0x1354   :  { %12863 = vmatmul.mubr.msk.f32.gmra.mrb[64].mxu1 %vm79_vm0, %v14395_v42 }
0x1355   :  { %12865 = vmatprep.mubr.msk.f32.mxu1 %vm79_vm0, %v14397_v54 }
0x1358   :  { %12866 = vmatmul.mubr.msk.f32.gmra.mrb[66].mxu1 %vm79_vm0, %v14399_v11 }
0x1359   :  { %12898 = vmatprep.mubr.msk.f32.mxu1 %vm14517_vm1, %v14518_v36 }
0x141f   :  { %v12858_v32 = vpop.f32.mrb[60].mxu1 }
0x1420   :  { %v7271_v41 = vpop.f32.mrb[61].mxu1  ;;  %v7311_v24 = vsel %vm622_vm2, %v12858_v32, -inf }
0x1421   :  { %v7310_v61 = vsel %vm622_vm2, %v7271_v41, -inf }
0x1423   :  { %v12861_v31 = vpop.f32.mrb[62].mxu1 }
0x1424   :  { %v7281_v60 = vpop.f32.mrb[63].mxu1  ;;  %v7313_v57 = vsel %vm622_vm2, %v12861_v31, -inf }
0x1425   :  { %v7312_v39 = vsel %vm622_vm2, %v7281_v60, -inf }
0x1427   :  { %v12864_v17 = vpop.f32.mrb[64].mxu1 }
0x1428   :  { %v7316_v22 = vsel %vm622_vm2, %v12864_v17, -inf  ;;  %v7291_v5 = vpop.f32.mrb[65].mxu1 }
0x1429   :  { %v7317_v3 = vmax.f32 %v7311_v24, %v7316_v22  ;;  %v7314_v55 = vsel %vm622_vm2, %v7291_v5, -inf }
0x142a   :  { %v7315_v26 = vmax.f32 %v7310_v61, %v7314_v55 }
0x142b   :  { %v12867_v10 = vpop.f32.mrb[66].mxu1 }
0x142c   :  { %v7322_v49 = vmax.f32 %v7315_v26, %v7317_v3  ;;  %v7320_v59 = vsel %vm622_vm2, %v12867_v10, -inf  ;;  %v7301_v62 = vpop.f32.mrb[67].mxu1 }
0x142d   :  { %v7321_v37 = vmax.f32 %v7313_v57, %v7320_v59  ;;  %v7318_v4 = vsel %vm622_vm2, %v7301_v62, -inf }
0x142e   :  { %v7319_v63 = vmax.f32 %v7312_v39, %v7318_v4 }
0x1430   :  { %v7323_v8 = vmax.f32 %v7319_v63, %v7321_v37 }
0x1432   :  { %v7324_v30 = vmax.f32 %v7322_v49, %v7323_v8 }
0x1434   :  { %v7325_v23 = vsub.f32 %v7271_v41, %v7324_v30  ;;  %v7326_v46 = vsub.f32 %v12858_v32, %v7324_v30  ;;  %v7327_v40 = vsub.f32 %v7281_v60, %v7324_v30  ;;  %v7328_v29 = vsub.f32 %v12861_v31, %v7324_v30 }
0x1435   :  { %v7329_v21 = vsub.f32 %v7291_v5, %v7324_v30  ;;  %v7330_v15 = vsub.f32 %v12864_v17, %v7324_v30  ;;  %v7331_v48 = vsub.f32 %v7301_v62, %v7324_v30  ;;  %v7332_v1 = vsub.f32 %v12867_v10, %v7324_v30 }
0x1436   :  { %v7333_v19 = vmul.f32 1.442695, %v7325_v23  ;;  %v7335_v45 = vmul.f32 1.442695, %v7326_v46  ;;  %v7337_v6 = vmul.f32 1.442695, %v7327_v40 }
0x1437   :  { %v7339_v13 = vmul.f32 1.442695, %v7328_v29  ;;  %v7341_v47 = vmul.f32 1.442695, %v7329_v21  ;;  %v7343_v33 = vmul.f32 1.442695, %v7330_v15 }
0x1438   :  { %14400 = vpow2.f32 %v7333_v19  ;;  %v7345_v42 = vmul.f32 1.442695, %v7331_v48  ;;  %v7347_v54 = vmul.f32 1.442695, %v7332_v1  ;;  %v16724_v19 = vld [vmem:[%s17645_s29 + $0x8] sm:$0xff] }
0x1439   :  { %14402 = vpow2.f32 %v7335_v45  ;;  %v16729_v45 = vld [vmem:[%s17642_s28 + $0x8] sm:$0xff] }
0x143a   :  { %14404 = vpow2.f32 %v7337_v6  ;;  %v16734_v6 = vld [vmem:[%s17645_s29] sm:$0xff] }
0x143b   :  { %14406 = vpow2.f32 %v7339_v13  ;;  %v16739_v13 = vld [vmem:[%s17642_s28] sm:$0xff] }
0x143c   :  { %14408 = vpow2.f32 %v7341_v47 }
0x143d   :  { %14410 = vpow2.f32 %v7343_v33 }
0x143e   :  { %14412 = vpow2.f32 %v7345_v42 }
0x143f   :  { %14414 = vpow2.f32 %v7347_v54 }
0x1442   :  { %v14401_v11 = vpop.eup %14400 }
0x1443   :  { %v14403_v32 = vpop.eup %14402  ;;  %v7349_v41 = vsel %vm622_vm2, %v14401_v11, 0.0 }
0x1444   :  { %v14405_v31 = vpop.eup %14404  ;;  %v7350_v60 = vsel %vm622_vm2, %v14403_v32, 0.0 }
0x1445   :  { %v14407_v17 = vpop.eup %14406  ;;  %v7351_v24 = vadd.f32 %v7350_v60, %v7349_v41  ;;  %v7352_v22 = vsel %vm622_vm2, %v14405_v31, 0.0  ;;  %v16748_v41 = vld [vmem:[%s17645_s29 + $0x18] sm:$0xff]  ;;  %v16758_v60 = vld [vmem:[%s17645_s29 + $0x10] sm:$0xff] }
0x1446   :  { %v14409_v5 = vpop.eup %14408  ;;  %v7354_v3 = vsel %vm622_vm2, %v14407_v17, 0.0 }
0x1447   :  { %v7353_v61 = vadd.f32 %v7352_v22, %v7351_v24  ;;  %v14411_v55 = vpop.eup %14410  ;;  %v7356_v10 = vsel %vm622_vm2, %v14409_v5, 0.0 }
0x1448   :  { %v14413_v57 = vpop.eup %14412  ;;  %v7358_v59 = vsel %vm622_vm2, %v14411_v55, 0.0 }
0x1449   :  { %v7355_v26 = vadd.f32 %v7354_v3, %v7353_v61  ;;  %v14415_v62 = vpop.eup %14414  ;;  %v7360_v37 = vsel %vm622_vm2, %v14413_v57, 0.0 }
0x144a   :  { %v7362_v63 = vsel %vm622_vm2, %v14415_v62, 0.0 }
0x144b   :  { %v7357_v49 = vadd.f32 %v7356_v10, %v7355_v26 }
0x144d   :  { %v7359_v39 = vadd.f32 %v7358_v59, %v7357_v49 }
0x144f   :  { %v7361_v4 = vadd.f32 %v7360_v37, %v7359_v39  ;;  %v16776_v39 = vld [vmem:[%s17645_s29 + $0x28] sm:$0xff]  ;;  %v16781_v37 = vld [vmem:[%s17645_s29 + $0x20] sm:$0xff] }
0x1451   :  { %v7363_v8 = vadd.f32 %v7362_v63, %v7361_v4  ;;  %v16786_v4 = vld [vmem:[%s17642_s28 + $0x20] sm:$0xff] }
0x1453   :  { %14416 = vrcp.f32 %v7363_v8 }
0x145d   :  { %v14417_v30 = vpop.eup %14416 }
0x145e   :  { %v7366_v23 = vmul.f32 %v14417_v30, %v14403_v32  ;;  %v7365_v46 = vmul.f32 %v14417_v30, %v14401_v11  ;;  %v7368_v40 = vmul.f32 %v14417_v30, %v14407_v17  ;;  %v7367_v29 = vmul.f32 %v14417_v30, %v14405_v31  ;;  %v16753_v31 = vld [vmem:[%s17642_s28 + $0x18] sm:$0xff]  ;;  %v16763_v17 = vld [vmem:[%s17642_s28 + $0x10] sm:$0xff] }
0x145f   :  { %v7370_v21 = vmul.f32 %v14417_v30, %v14411_v55  ;;  %v7369_v15 = vmul.f32 %v14417_v30, %v14409_v5  ;;  %v7372_v48 = vmul.f32 %v14417_v30, %v14415_v62  ;;  %v7371_v1 = vmul.f32 %v14417_v30, %v14413_v57 }
0x1460   :  { %7388 = vperm.xlu1 %14163, %v7366_v23   ;;  %7383 = vperm.xlu0 %14162, %v7365_v46  }
0x1464   :  { %7398 = vperm.xlu1 %14163, %v7368_v40   ;;  %7393 = vperm.xlu0 %14162, %v7367_v29  }
0x1468   :  { %7408 = vperm.xlu1 %14163, %v7370_v21   ;;  %7403 = vperm.xlu0 %14162, %v7369_v15  }
0x146c   :  { %7418 = vperm.xlu1 %14163, %v7372_v48   ;;  %7413 = vperm.xlu0 %14162, %v7371_v1  }
0x14df   :  { %v7389_v47 = vpop.permute.xlu1 %7388  ;;  %v7384_v33 = vpop.permute.xlu0 %7383 }
0x14e0   :  { %v7422_v42 = vmul.f32 %v7389_v47, %v16724_v19  ;;  %v7453_v54 = vmul.f32 %v16729_v45, %v7389_v47  ;;  %v7421_v11 = vmul.f32 %v7384_v33, %v16734_v6  ;;  %v7452_v32 = vmul.f32 %v16739_v13, %v7384_v33  ;;  %v16798_v47 = vld [vmem:[%s17642_s28 + $0x28] sm:$0xff] }
0x14e2   :  { %v7430_v24 = vsel %vm79_vm0, %v7422_v42, 0.0  ;;  %v7461_v22 = vsel %vm79_vm0, %v7453_v54, 0.0  ;;  %v7429_v5 = vsel %vm79_vm0, %v7421_v11, 0.0  ;;  %v7460_v61 = vsel %vm79_vm0, %v7452_v32, 0.0  ;;  %v16803_v54 = vld [vmem:[%s17645_s29 + $0x38] sm:$0xff]  ;;  %v16808_v11 = vld [vmem:[%s17645_s29 + $0x30] sm:$0xff] }
0x14e3   :  { %v7399_v3 = vpop.permute.xlu1 %7398  ;;  %v7394_v55 = vpop.permute.xlu0 %7393  ;;  %v7431_v59 = vadd.f32 %v7430_v24, %v7429_v5  ;;  %v7462_v62 = vadd.f32 %v7461_v22, %v7460_v61  ;;  %v16815_v61 = vld [vmem:[%s17642_s28 + $0x30] sm:$0xff] }
0x14e4   :  { %v7424_v26 = vmul.f32 %v7399_v3, %v16748_v41  ;;  %v7455_v10 = vmul.f32 %v16753_v31, %v7399_v3  ;;  %v7423_v57 = vmul.f32 %v7394_v55, %v16758_v60  ;;  %v7454_v49 = vmul.f32 %v16763_v17, %v7394_v55 }
0x14e6   :  { %v7432_v63 = vsel %vm79_vm0, %v7423_v57, 0.0  ;;  %v7463_v8 = vsel %vm79_vm0, %v7454_v49, 0.0  ;;  %v7434_v30 = vsel %vm79_vm0, %v7424_v26, 0.0  ;;  %v7465_v21 = vsel %vm79_vm0, %v7455_v10, 0.0 }
0x14e7   :  { %v7433_v23 = vadd.f32 %v7432_v63, %v7431_v59  ;;  %v7464_v46 = vadd.f32 %v7463_v8, %v7462_v62  ;;  %v7409_v40 = vpop.permute.xlu1 %7408  ;;  %v7404_v29 = vpop.permute.xlu0 %7403 }
0x14e8   :  { %v7426_v15 = vmul.f32 %v7409_v40, %v16776_v39  ;;  %v7425_v48 = vmul.f32 %v7404_v29, %v16781_v37  ;;  %v7456_v1 = vmul.f32 %v16786_v4, %v7404_v29  ;;  %v7457_v26 = vmul.f32 %v16798_v47, %v7409_v40 }
0x14e9   :  { %v7435_v33 = vadd.f32 %v7434_v30, %v7433_v23  ;;  %v7466_v42 = vadd.f32 %v7465_v21, %v7464_v46  ;;  %v16828_v46 = vld [vmem:[%s17642_s28 + $0x38] sm:$0xff] }
0x14ea   :  { %v7436_v32 = vsel %vm79_vm0, %v7425_v48, 0.0  ;;  %v7467_v24 = vsel %vm79_vm0, %v7456_v1, 0.0  ;;  %v7438_v55 = vsel %vm79_vm0, %v7426_v15, 0.0  ;;  %v7469_v30 = vsel %vm79_vm0, %v7457_v26, 0.0 }
0x14eb   :  { %v7437_v22 = vadd.f32 %v7436_v32, %v7435_v33  ;;  %v7419_v5 = vpop.permute.xlu1 %7418  ;;  %v7414_v3 = vpop.permute.xlu0 %7413  ;;  %v7468_v49 = vadd.f32 %v7467_v24, %v7466_v42  ;;  %v11265_v32 = vld [vmem:[%s17621_s0 + $0x80] sm:$0xff] }
0x14ec   :  { %v7428_v10 = vmul.f32 %v7419_v5, %v16803_v54  ;;  %v7427_v57 = vmul.f32 %v7414_v3, %v16808_v11  ;;  %v7458_v63 = vmul.f32 %v16815_v61, %v7414_v3  ;;  %v7459_v15 = vmul.f32 %v16828_v46, %v7419_v5 }
0x14ed   :  { %v7439_v59 = vadd.f32 %v7438_v55, %v7437_v22  ;;  %v7470_v40 = vadd.f32 %v7469_v30, %v7468_v49 }
0x14ee   :  { %v7440_v62 = vsel %vm79_vm0, %v7427_v57, 0.0  ;;  %v7442_v23 = vsel %vm79_vm0, %v7428_v10, 0.0  ;;  %v7471_v21 = vsel %vm79_vm0, %v7458_v63, 0.0  ;;  %v7473_v1 = vsel %vm79_vm0, %v7459_v15, 0.0 }
0x14ef   :  { %v7441_v8 = vadd.f32 %v7440_v62, %v7439_v59  ;;  %v7472_v48 = vadd.f32 %v7471_v21, %v7470_v40 }
0x14f1   :  { %v16830_v29 = vadd.f32 %v7442_v23, %v7441_v8 }
0x14f3   :  { %12877 = vmatmul.mubr.msk.f32.vlgmr.msra.gmra.mrb[60].mxu0 %vm79_vm0, %v16830_v29  ;;  %12899 = vmatmul.mubr.msk.f32.vlgmr.msra.gmra.mrb[68].mxu1 %vm79_vm0, %v16830_v29 }
0x14f4   :  { %13794 = vmatpush3.bf16.msra.mxu0 %v16402_v56  ;;  %13806 = vmatpush3.bf16.msra.mxu1 %v16404_v7  ;;  %v16849_v56 = vadd.f32 %v7473_v1, %v7472_v48  ;;  %v8417_v7 = vld [vmem:[%s17646_s2] sm:$0xff] }
0x14f5   :  { %13795 = vmatprep.subr.bf16.mxu0 %v14516_v20  ;;  %13807 = vmatprep.subr.bf16.mxu1 %v14516_v20 }
0x14f6   :  { %12887 = vmatprep.mubr.msk.f32.mxu0 %vm14517_vm1, %v14518_v36  ;;  %12909 = vmatprep.mubr.msk.f32.mxu1 %vm14517_vm1, %v14518_v36 }
0x14f8   :  { %13797 = vmatpush3.bf16.msra.mxu0 %v16428_v28  ;;  %13809 = vmatpush3.bf16.msra.mxu1 %v16430_v51  ;;  %v8418_v28 = vld [vmem:[%s17646_s2 + $0x8] sm:$0xff] }
0x14f9   :  { %13810 = vmatprep.subr.bf16.mxu0 %v14516_v20  ;;  %13816 = vmatprep.subr.bf16.mxu1 %v14516_v20  ;;  %v16911_v51 = vpack.c.bf16 %v8418_v28, %v8417_v7  ;;  %v16982_v28 = vld [vmem:[#allocation3 + $0x8] sm:$0xff] }
0x14fb   :  { %12888 = vmatmul.mubr.msk.f32.vlgmr.msra.gmra.mrb[60].mxu0 %vm79_vm0, %v16849_v56  ;;  %12910 = vmatmul.mubr.msk.f32.vlgmr.msra.gmra.mrb[68].mxu1 %vm79_vm0, %v16849_v56 }
0x14fc   :  { %13812 = vmatpush3.bf16.msra.mxu0 %v16453_v50  ;;  %13818 = vmatpush3.bf16.msra.mxu1 %v16455_v16  ;;  %v8419_v50 = vld [vmem:[%s17646_s2 + $0x10] sm:$0xff]  ;;  %v8420_v16 = vld [vmem:[%s17646_s2 + $0x18] sm:$0xff] }
0x14fd   :  { %13813 = vmatprep.subr.bf16.mxu0 %v14516_v20  ;;  %13819 = vmatprep.subr.bf16.mxu1 %v14516_v20 }
0x14fe   :  { %12920 = vmatprep.mubr.msk.f32.mxu0 %vm14517_vm1, %v14518_v36  ;;  %12931 = vmatprep.mubr.msk.f32.mxu1 %vm14517_vm1, %v14518_v36 }
0x1500   :  { %13815 = vmatpush3.bf16.msra.mxu0 %v16479_v43  ;;  %13821 = vmatpush3.bf16.msra.mxu1 %v16481_v27  ;;  %v16920_v43 = vpack.c.bf16 %v8420_v16, %v8419_v50  ;;  %v11266_v27 = vld [vmem:[%s17621_s0 + $0x88] sm:$0xff]  ;;  %v16984_v50 = vld [vmem:[#allocation3 + $0x10] sm:$0xff] }
0x1501   :  { %13822 = vmatprep.subr.bf16.mxu0 %v14516_v20  ;;  %13828 = vmatprep.subr.bf16.mxu1 %v14516_v20 }
0x1503   :  { %12921 = vmatmul.mubr.msk.f32.vlgmr.msra.gmra.mrb[62].mxu0 %vm79_vm0, %v16830_v29  ;;  %12932 = vmatmul.mubr.msk.f32.vlgmr.msra.gmra.mrb[70].mxu1 %vm79_vm0, %v16849_v56 }
0x1504   :  { %13824 = vmatpush3.bf16.msra.mxu0 %v16503_v25  ;;  %13830 = vmatpush3.bf16.msra.mxu1 %v16505_v18 }
0x1505   :  { %13825 = vmatprep.subr.bf16.mxu0 %v14516_v20  ;;  %13831 = vmatprep.subr.bf16.mxu1 %v14516_v20 }
0x1506   :  { %12942 = vmatprep.mubr.msk.f32.mxu0 %vm14517_vm1, %v14518_v36  ;;  %12953 = vmatprep.mubr.msk.f32.mxu1 %vm14517_vm1, %v14518_v36 }
0x1508   :  { %13827 = vmatpush3.bf16.msra.mxu0 %v16527_v14  ;;  %13833 = vmatpush3.bf16.msra.mxu1 %v16529_v9 }
0x1509   :  { %13834 = vmatprep.subr.bf16.mxu0 %v14516_v20  ;;  %13840 = vmatprep.subr.bf16.mxu1 %v14516_v20 }
0x150b   :  { %12943 = vmatmul.mubr.msk.f32.vlgmr.msra.gmra.mrb[60].mxu0 %vm79_vm0, %v16621_v53  ;;  %12954 = vmatmul.mubr.msk.f32.vlgmr.msra.gmra.mrb[68].mxu1 %vm79_vm0, %v16621_v53 }
0x150c   :  { %13836 = vmatpush3.bf16.msra.mxu0 %v16545_v44  ;;  %12964 = vmatprep.mubr.msk.f32.mxu0 %vm14517_vm1, %v14518_v36 }
0x150d   :  { %13837 = vmatprep.subr.bf16.mxu0 %v14516_v20  ;;  %13842 = vmatpush3.bf16.msra.mxu1 %v16583_v58  ;;  %v11264_v58 = vld [vmem:[%s17621_s0 + $0x78] sm:$0xff] }
0x150e   :  { %13843 = vmatprep.subr.bf16.mxu1 %v14516_v20  ;;  %12975 = vmatprep.mubr.msk.f32.mxu1 %vm14517_vm1, %v14518_v36 }
0x1510   :  { %13839 = vmatpush3.bf16.msra.mxu0 %v16560_v0 }
0x1511   :  { %13858 = vmatprep.subr.bf16.mxu0 %v14516_v20  ;;  %13845 = vmatpush3.bf16.msra.mxu1 %v16592_v34 }
0x1512   :  { %13846 = vmatprep.subr.bf16.mxu1 %v14516_v20 }
0x1513   :  { %12965 = vmatmul.mubr.msk.f32.vlgmr.msra.gmra.mrb[64].mxu0 %vm79_vm0, %v16621_v53 }
0x1514   :  { %13008 = vmatprep.mubr.msk.f32.mxu0 %vm14517_vm1, %v14518_v36  ;;  %13860 = vmatpush3.bf16.msra.mxu0 %v16911_v51 }
0x1515   :  { %13861 = vmatprep.subr.bf16.mxu0 %v14516_v20 }
0x1518   :  { %13863 = vmatpush3.bf16.msra.mxu0 %v16920_v43 }
0x15d6   :  { %v7855_v25 = vpop.f32.mrb[62].mxu0  ;;  %v7930_v18 = vpop.f32.mrb[70].mxu1 }
0x15d7   :  { %v7859_v14 = vadd.f32 %v11266_v27, %v7855_v25  ;;  %v12922_v9 = vpop.f32.mrb[63].mxu0  ;;  %v12933_v44 = vpop.f32.mrb[71].mxu1 }
0x15d8   :  { %v16991_v9 = vld [vmem:[#allocation3 + $0x20] sm:$0xff] }
0x15d9   :  { %v7934_v0 = vadd.f32 %v7930_v18, %v7859_v14  ;;  %v16989_v14 = vld [vmem:[#allocation3 + $0x18] sm:$0xff] }
0x15de   :  { %v8005_v34 = vpop.f32.mrb[60].mxu0  ;;  %v8086_v33 = vpop.f32.mrb[68].mxu1 }
0x15df   :  { %v14045_v42 = vadd.f32 %v11264_v58, %v8005_v34  ;;  %v12944_v24 = vpop.f32.mrb[61].mxu0  ;;  %v12955_v22 = vpop.f32.mrb[69].mxu1  ;;  %v14046_v3 = vadd.f32 %v11265_v32, %v8086_v33  ;;  %v16995_v58 = vld [vmem:[#allocation3 + $0x28] sm:$0xff]  ;;  %v16997_v34 = vld [vmem:[#allocation3 + $0x30] sm:$0xff]  ;;  %v17001_v32 = vld [vmem:[#allocation3 + $0x38] sm:$0xff] }
0x15e1   :  { %v11274_v5 = vmul.f32 -1.442695, %v14045_v42  ;;  %v11276_v55 = vmul.f32 -1.442695, %v14046_v3  ;;  %v11279_v3 = vld [vmem:[%s17625_s1 + $0x28] sm:$0xff] }
0x15e3   :  { %14418 = vpow2.f32 %v11274_v5 }
0x15e4   :  { %14420 = vpow2.f32 %v11276_v55 }
0x15e6   :  { %v8174_v26 = vpop.f32.mrb[64].mxu0 }
0x15e7   :  { %v12966_v10 = vpop.f32.mrb[65].mxu0  ;;  %v8175_v63 = vadd.f32 %v16609_v35, %v8174_v26  ;;  %v8515_v35 = vld [vmem:[%s17647_s4] sm:$0xff] }
0x15ed   :  { %v14419_v57 = vpop.eup %14418 }
0x15ee   :  { %v8013_v49 = vadd.f32 1.0, %v14419_v57  ;;  %v14421_v59 = vpop.eup %14420 }
0x15ef   :  { %v8094_v62 = vadd.f32 1.0, %v14421_v59 }
0x15f0   :  { %14422 = vrcp.f32 %v8013_v49 }
0x15f1   :  { %14424 = vrcp.f32 %v8094_v62 }
0x15fa   :  { %v14423_v8 = vpop.eup %14422 }
0x15fb   :  { %v8178_v30 = vmul.f32 %v14423_v8, %v8175_v63  ;;  %v14425_v40 = vpop.eup %14424 }
0x15fc   :  { %v8181_v21 = vsub.f32 1.0, %v14425_v40  ;;  %v8183_v48 = vmul.f32 %v14425_v40, %v16621_v53  ;;  %v8517_v53 = vld [vmem:[%s17647_s4 + $0x10] sm:$0xff] }
0x15fd   :  { %v8179_v23 = vadd.f32 %v8178_v30, %v7934_v0 }
0x15ff   :  { %14426 = vtanh.f32 %v8179_v23 }
0x1609   :  { %v14427_v15 = vpop.eup %14426 }
0x160a   :  { %v8182_v1 = vmul.f32 %v14427_v15, %v8181_v21 }
0x160c   :  { %v16935_v7 = vadd.f32 %v8183_v48, %v8182_v1 }
0x160e   :  { %12976 = vmatmul.mubr.msk.f32.vlgmr.msra.gmra.mrb[72].mxu1 %vm79_vm0, %v16935_v7  ;;  %13009 = vmatmul.mubr.msk.f32.vlgmr.msra.gmra.mrb[66].mxu0 %vm79_vm0, %v16935_v7 }
0x160f   :  { %13848 = vmatpush3.bf16.msra.mxu1 %v16619_v52  ;;  %12986 = vmatprep.mubr.msk.f32.mxu1 %vm14517_vm1, %v14518_v36  ;;  %v8516_v52 = vld [vmem:[%s17647_s4 + $0x8] sm:$0xff] }
0x1610   :  { %13849 = vmatprep.subr.bf16.mxu1 %v14516_v20 }
0x1613   :  { %13851 = vmatpush3.bf16.msra.mxu1 %v16634_v12  ;;  %v16968_v12 = vpack.c.bf16 %v8516_v52, %v8515_v35 }
0x1614   :  { %13852 = vmatprep.subr.bf16.mxu1 %v14516_v20 }
0x1615   :  { %13865 = vmatprep.subr.bf16.mxu0 %v16968_v12 }
0x1616   :  { %12987 = vmatmul.mubr.msk.f32.vlgmr.msra.gmra.mrb[72].mxu1 %vm79_vm0, %v16830_v29  ;;  %13867 = vmatpush3.bf16.msra.mxu0 %v16968_v12 }
0x1617   :  { %13854 = vmatpush3.bf16.msra.mxu1 %v16648_v2  ;;  %12997 = vmatprep.mubr.msk.f32.mxu1 %vm14517_vm1, %v14518_v36  ;;  %v8518_v2 = vld [vmem:[%s17647_s4 + $0x18] sm:$0xff] }
0x1618   :  { %13855 = vmatprep.subr.bf16.mxu1 %v14516_v20 }
0x161b   :  { %13857 = vmatpush3.bf16.msra.mxu1 %v16662_v38  ;;  %v16973_v38 = vpack.c.bf16 %v8518_v2, %v8517_v53 }
0x161c   :  { %13872 = vmatprep.subr.bf16.mxu1 %v14516_v20 }
0x161d   :  { %13869 = vmatprep.subr.bf16.mxu0 %v16973_v38 }
0x161e   :  { %12998 = vmatmul.mubr.msk.f32.vlgmr.msra.gmra.mrb[72].mxu1 %vm79_vm0, %v16849_v56  ;;  %13871 = vmatpush3.bf16.msra.mxu0 %v16973_v38  ;;  %v16980_v56 = vld [vmem:[#allocation3] sm:$0xff] }
0x161f   :  { %13039 = vmatprep.mubr.msk.f32.mxu1 %vm14517_vm1, %v14518_v36  ;;  %13884 = vmatprep.subr.bf16.mxu0 %v14516_v20 }
0x16e1   :  { %v8487_v29 = vpop.f32.mrb[66].mxu0 }
0x16e2   :  { %v8499_v16 = vadd.f32 %v16980_v56, %v8487_v29  ;;  %v8500_v27 = vadd.f32 %v16982_v28, %v8487_v29  ;;  %v8501_v25 = vadd.f32 %v16984_v50, %v8487_v29  ;;  %v13010_v18 = vpop.f32.mrb[67].mxu0  ;;  %v8502_v44 = vadd.f32 %v16989_v14, %v8487_v29 }
0x16e3   :  { %v8503_v0 = vadd.f32 %v16991_v9, %v8487_v29  ;;  %v8504_v33 = vadd.f32 %v16995_v58, %v8487_v29  ;;  %v8505_v42 = vadd.f32 %v16997_v34, %v8487_v29  ;;  %v8506_v24 = vadd.f32 %v17001_v32, %v8487_v29 }
0x16e4   :  { %14428 = vtanh.f32 %v8499_v16 }
0x16e5   :  { %14430 = vtanh.f32 %v8500_v27 }
0x16e6   :  { %14432 = vtanh.f32 %v8501_v25 }
0x16e7   :  { %14434 = vtanh.f32 %v8502_v44 }
0x16e8   :  { %14436 = vtanh.f32 %v8503_v0 }
0x16e9   :  { %14438 = vtanh.f32 %v8504_v33 }
0x16ea   :  { %14440 = vtanh.f32 %v8505_v42 }
0x16eb   :  { %14442 = vtanh.f32 %v8506_v24 }
0x16ee   :  { %v14429_v22 = vpop.eup %14428 }
0x16ef   :  { %v14431_v5 = vpop.eup %14430  ;;  %13019 = vmatprep.mubr.msk.f32.mxu0 %vm79_vm0, %v14429_v22 }
0x16f0   :  { %v14433_v55 = vpop.eup %14432  ;;  %13020 = vmatmul.mubr.msk.f32.vlgmr.msra.gmra.mrb[68].mxu0 %vm79_vm0, %v14431_v5 }
0x16f1   :  { %v8410_v26 = vpop.f32.mrb[72].mxu1  ;;  %13022 = vmatprep.mubr.msk.f32.mxu0 %vm79_vm0, %v14433_v55  ;;  %v14435_v49 = vpop.eup %14434 }
0x16f2   :  { %v14047_v10 = vadd.f32 %v11279_v3, %v8410_v26  ;;  %v12999_v57 = vpop.f32.mrb[73].mxu1  ;;  %v14437_v59 = vpop.eup %14436 }
0x16f3   :  { %v14439_v62 = vpop.eup %14438 }
0x16f4   :  { %11283 = vst [vmem:[%s17626_s23 + $0x28] sm:$0xff] %v14047_v10  ;;  %13023 = vmatmul.mubr.msk.f32.gmra.mrb[70].mxu0 %vm79_vm0, %v14435_v49  ;;  %v14441_v63 = vpop.eup %14440 }
0x16f5   :  { %13025 = vmatprep.mubr.msk.f32.mxu0 %vm79_vm0, %v14437_v59  ;;  %v14443_v8 = vpop.eup %14442 }
0x16f8   :  { %13026 = vmatmul.mubr.msk.f32.gmra.mrb[72].mxu0 %vm79_vm0, %v14439_v62 }
0x16f9   :  { %13028 = vmatprep.mubr.msk.f32.mxu0 %vm79_vm0, %v14441_v63 }
0x16fc   :  { %13029 = vmatmul.mubr.msk.f32.gmra.mrb[74].mxu0 %vm79_vm0, %v14443_v8 }
0x16fd   :  { %13061 = vmatprep.mubr.msk.f32.mxu0 %vm14517_vm1, %v14518_v36 }
0x17c3   :  { %v13021_v30 = vpop.f32.mrb[68].mxu0 }
0x17c4   :  { %v8609_v23 = vpop.f32.mrb[69].mxu0  ;;  %v8649_v48 = vsel %vm622_vm2, %v13021_v30, -inf }
0x17c5   :  { %v8648_v52 = vsel %vm622_vm2, %v8609_v23, -inf }
0x17c7   :  { %v13024_v40 = vpop.f32.mrb[70].mxu0 }
0x17c8   :  { %v8619_v21 = vpop.f32.mrb[71].mxu0  ;;  %v8651_v27 = vsel %vm622_vm2, %v13024_v40, -inf }
0x17c9   :  { %v8650_v0 = vsel %vm622_vm2, %v8619_v21, -inf }
0x17cb   :  { %v13027_v15 = vpop.f32.mrb[72].mxu0 }
0x17cc   :  { %v8654_v1 = vsel %vm622_vm2, %v13027_v15, -inf  ;;  %v8629_v35 = vpop.f32.mrb[73].mxu0 }
0x17cd   :  { %v8655_v53 = vmax.f32 %v8649_v48, %v8654_v1  ;;  %v8652_v2 = vsel %vm622_vm2, %v8629_v35, -inf }
0x17ce   :  { %v8653_v29 = vmax.f32 %v8648_v52, %v8652_v2 }
0x17cf   :  { %v13030_v16 = vpop.f32.mrb[74].mxu0 }
0x17d0   :  { %v8660_v25 = vmax.f32 %v8653_v29, %v8655_v53  ;;  %v8658_v18 = vsel %vm622_vm2, %v13030_v16, -inf  ;;  %v8639_v44 = vpop.f32.mrb[75].mxu0 }
0x17d1   :  { %v8659_v33 = vmax.f32 %v8651_v27, %v8658_v18  ;;  %v8656_v42 = vsel %vm622_vm2, %v8639_v44, -inf }
0x17d2   :  { %v8657_v24 = vmax.f32 %v8650_v0, %v8656_v42 }
0x17d4   :  { %v8661_v22 = vmax.f32 %v8657_v24, %v8659_v33 }
0x17d6   :  { %v8662_v5 = vmax.f32 %v8660_v25, %v8661_v22 }
0x17d8   :  { %v8663_v3 = vsub.f32 %v8609_v23, %v8662_v5  ;;  %v8664_v55 = vsub.f32 %v13021_v30, %v8662_v5  ;;  %v8665_v26 = vsub.f32 %v8619_v21, %v8662_v5  ;;  %v8666_v10 = vsub.f32 %v13024_v40, %v8662_v5 }
0x17d9   :  { %v8667_v57 = vsub.f32 %v8629_v35, %v8662_v5  ;;  %v8668_v49 = vsub.f32 %v13027_v15, %v8662_v5  ;;  %v8669_v59 = vsub.f32 %v8639_v44, %v8662_v5  ;;  %v8670_v62 = vsub.f32 %v13030_v16, %v8662_v5 }
0x17da   :  { %v8671_v63 = vmul.f32 1.442695, %v8663_v3  ;;  %v8673_v8 = vmul.f32 1.442695, %v8664_v55  ;;  %v8675_v48 = vmul.f32 1.442695, %v8665_v26 }
0x17db   :  { %v8677_v1 = vmul.f32 1.442695, %v8666_v10  ;;  %v8679_v52 = vmul.f32 1.442695, %v8667_v57  ;;  %v8681_v53 = vmul.f32 1.442695, %v8668_v49 }
0x17dc   :  { %14444 = vpow2.f32 %v8671_v63  ;;  %v8683_v2 = vmul.f32 1.442695, %v8669_v59  ;;  %v8685_v30 = vmul.f32 1.442695, %v8670_v62 }
0x17dd   :  { %14446 = vpow2.f32 %v8673_v8 }
0x17de   :  { %14448 = vpow2.f32 %v8675_v48 }
0x17df   :  { %14450 = vpow2.f32 %v8677_v1 }
0x17e0   :  { %14452 = vpow2.f32 %v8679_v52 }
0x17e1   :  { %14454 = vpow2.f32 %v8681_v53 }
0x17e2   :  { %14456 = vpow2.f32 %v8683_v2 }
0x17e3   :  { %14458 = vpow2.f32 %v8685_v30  ;;  %v8817_v30 = vld [vmem:[%s17611_s14] sm:$0xff] }
0x17e6   :  { %v14445_v23 = vpop.eup %14444 }
0x17e7   :  { %v14447_v40 = vpop.eup %14446  ;;  %v8687_v21 = vsel %vm622_vm2, %v14445_v23, 0.0 }
0x17e8   :  { %v14449_v15 = vpop.eup %14448  ;;  %v8688_v35 = vsel %vm622_vm2, %v14447_v40, 0.0 }
0x17e9   :  { %v14451_v29 = vpop.eup %14450  ;;  %v8689_v16 = vadd.f32 %v8688_v35, %v8687_v21  ;;  %v8690_v27 = vsel %vm622_vm2, %v14449_v15, 0.0 }
0x17ea   :  { %v14453_v25 = vpop.eup %14452  ;;  %v8692_v44 = vsel %vm622_vm2, %v14451_v29, 0.0 }
0x17eb   :  { %v8691_v18 = vadd.f32 %v8690_v27, %v8689_v16  ;;  %v14455_v0 = vpop.eup %14454  ;;  %v8694_v42 = vsel %vm622_vm2, %v14453_v25, 0.0  ;;  %v8820_v16 = vld [vmem:[%s17611_s14 + $0x18] sm:$0xff]  ;;  %v8975_v27 = vld [vmem:[%s17612_s15 + $0x10] sm:$0xff] }
0x17ec   :  { %v14457_v24 = vpop.eup %14456  ;;  %v8696_v5 = vsel %vm622_vm2, %v14455_v0, 0.0 }
0x17ed   :  { %v8693_v33 = vadd.f32 %v8692_v44, %v8691_v18  ;;  %v14459_v3 = vpop.eup %14458  ;;  %v8698_v26 = vsel %vm622_vm2, %v14457_v24, 0.0  ;;  %v8976_v18 = vld [vmem:[%s17612_s15 + $0x18] sm:$0xff] }
0x17ee   :  { %v8700_v57 = vsel %vm622_vm2, %v14459_v3, 0.0  ;;  %v17070_v44 = vpack.c.bf16 %v8976_v18, %v8975_v27 }
0x17ef   :  { %v8695_v22 = vadd.f32 %v8694_v42, %v8693_v33 }
0x17f1   :  { %v8697_v55 = vadd.f32 %v8696_v5, %v8695_v22 }
0x17f3   :  { %v8699_v10 = vadd.f32 %v8698_v26, %v8697_v55 }
0x17f5   :  { %v8701_v49 = vadd.f32 %v8700_v57, %v8699_v10 }
0x17f7   :  { %14460 = vrcp.f32 %v8701_v49 }
0x1801   :  { %v14461_v59 = vpop.eup %14460 }
0x1802   :  { %v8704_v62 = vmul.f32 %v14461_v59, %v14447_v40  ;;  %v8703_v63 = vmul.f32 %v14461_v59, %v14445_v23  ;;  %v8706_v8 = vmul.f32 %v14461_v59, %v14451_v29  ;;  %v8705_v48 = vmul.f32 %v14461_v59, %v14449_v15  ;;  %v8818_v23 = vld [vmem:[%s17611_s14 + $0x8] sm:$0xff]  ;;  %v8973_v40 = vld [vmem:[%s17612_s15] sm:$0xff]  ;;  %v8819_v29 = vld [vmem:[%s17611_s14 + $0x10] sm:$0xff] }
0x1803   :  { %v8708_v1 = vmul.f32 %v14461_v59, %v14455_v0  ;;  %v8707_v52 = vmul.f32 %v14461_v59, %v14453_v25  ;;  %v8710_v53 = vmul.f32 %v14461_v59, %v14459_v3  ;;  %v8709_v2 = vmul.f32 %v14461_v59, %v14457_v24  ;;  %v8974_v15 = vld [vmem:[%s17612_s15 + $0x8] sm:$0xff] }
0x1804   :  { %8726 = vperm.xlu1 %14163, %v8704_v62   ;;  %8721 = vperm.xlu0 %14162, %v8703_v63   ;;  %v17045_v21 = vpack.c.bf16 %v8818_v23, %v8817_v30  ;;  %v17050_v35 = vpack.c.bf16 %v8974_v15, %v8973_v40  ;;  %v17065_v25 = vpack.c.bf16 %v8820_v16, %v8819_v29 }
0x1806   :  { %13874 = vmatpush3.bf16.msra.mxu1 %v17045_v21  ;;  %13886 = vmatpush3.bf16.msra.mxu0 %v17050_v35 }
0x1807   :  { %13875 = vmatprep.subr.bf16.mxu1 %v14516_v20  ;;  %13887 = vmatprep.subr.bf16.mxu0 %v14516_v20 }
0x1808   :  { %8736 = vperm.xlu1 %14163, %v8706_v8   ;;  %8731 = vperm.xlu0 %14162, %v8705_v48  }
0x180a   :  { %13877 = vmatpush3.bf16.msra.mxu1 %v17065_v25  ;;  %13889 = vmatpush3.bf16.msra.mxu0 %v17070_v44 }
0x180b   :  { %13878 = vmatprep.subr.bf16.mxu1 %v14516_v20  ;;  %13890 = vmatprep.subr.bf16.mxu0 %v14516_v20 }
0x180c   :  { %8746 = vperm.xlu1 %14163, %v8708_v1   ;;  %8741 = vperm.xlu0 %14162, %v8707_v52  }
0x1810   :  { %8756 = vperm.xlu1 %14163, %v8710_v53   ;;  %8751 = vperm.xlu0 %14162, %v8709_v2  }
0x1883   :  { %v8727_v0 = vpop.permute.xlu1 %8726  ;;  %v8722_v33 = vpop.permute.xlu0 %8721 }
0x1884   :  { %v8760_v42 = vmul.f32 %v8727_v0, %v16724_v19  ;;  %v8791_v24 = vmul.f32 %v8727_v0, %v16729_v45  ;;  %v8759_v22 = vmul.f32 %v8722_v33, %v16734_v6  ;;  %v8790_v5 = vmul.f32 %v8722_v33, %v16739_v13 }
0x1886   :  { %v8768_v3 = vsel %vm79_vm0, %v8760_v42, 0.0  ;;  %v8799_v55 = vsel %vm79_vm0, %v8791_v24, 0.0  ;;  %v8767_v26 = vsel %vm79_vm0, %v8759_v22, 0.0  ;;  %v8798_v10 = vsel %vm79_vm0, %v8790_v5, 0.0  ;;  %v8896_v24 = vld [vmem:[%s17613_s17 + $0x8] sm:$0xff]  ;;  %v9048_v22 = vld [vmem:[%s17614_s18] sm:$0xff] }
0x1887   :  { %v8737_v57 = vpop.permute.xlu1 %8736  ;;  %v8732_v49 = vpop.permute.xlu0 %8731  ;;  %v8769_v62 = vadd.f32 %v8768_v3, %v8767_v26  ;;  %v8800_v13 = vadd.f32 %v8799_v55, %v8798_v10 }
0x1888   :  { %v8762_v59 = vmul.f32 %v8737_v57, %v16748_v41  ;;  %v8793_v19 = vmul.f32 %v8737_v57, %v16753_v31  ;;  %v8761_v45 = vmul.f32 %v8732_v49, %v16758_v60  ;;  %v8792_v6 = vmul.f32 %v8732_v49, %v16763_v17  ;;  %v8897_v57 = vld [vmem:[%s17613_s17 + $0x10] sm:$0xff] }
0x188a   :  { %v8770_v63 = vsel %vm79_vm0, %v8761_v45, 0.0  ;;  %v8801_v8 = vsel %vm79_vm0, %v8792_v6, 0.0  ;;  %v8772_v48 = vsel %vm79_vm0, %v8762_v59, 0.0  ;;  %v8803_v41 = vsel %vm79_vm0, %v8793_v19, 0.0  ;;  %v9050_v19 = vld [vmem:[%s17614_s18 + $0x10] sm:$0xff]  ;;  %v9051_v45 = vld [vmem:[%s17614_s18 + $0x18] sm:$0xff] }
0x188b   :  { %v8771_v1 = vadd.f32 %v8770_v63, %v8769_v62  ;;  %v8802_v52 = vadd.f32 %v8801_v8, %v8800_v13  ;;  %v8747_v53 = vpop.permute.xlu1 %8746  ;;  %v8742_v2 = vpop.permute.xlu0 %8741  ;;  %v17145_v63 = vpack.c.bf16 %v9051_v45, %v9050_v19  ;;  %v9123_v8 = vld [vmem:[%s17615_s16] sm:$0xff] }
0x188c   :  { %v8764_v31 = vmul.f32 %v8747_v53, %v16776_v39  ;;  %v8763_v60 = vmul.f32 %v8742_v2, %v16781_v37  ;;  %v8794_v17 = vmul.f32 %v8742_v2, %v16786_v4  ;;  %v8795_v0 = vmul.f32 %v8747_v53, %v16798_v47  ;;  %v8895_v37 = vld [vmem:[%s17613_s17] sm:$0xff]  ;;  %v9049_v47 = vld [vmem:[%s17614_s18 + $0x8] sm:$0xff] }
0x188d   :  { %v8773_v30 = vadd.f32 %v8772_v48, %v8771_v1  ;;  %v8804_v23 = vadd.f32 %v8803_v41, %v8802_v52  ;;  %v17117_v26 = vpack.c.bf16 %v8896_v24, %v8895_v37  ;;  %v17119_v10 = vpack.c.bf16 %v9049_v47, %v9048_v22  ;;  %v9198_v1 = vld [vmem:[%s17616_s19] sm:$0xff]  ;;  %v9199_v52 = vld [vmem:[%s17616_s19 + $0x8] sm:$0xff]  ;;  %v9276_v37 = vld [vmem:[%s17617_s10 + $0x18] sm:$0xff] }
0x188e   :  { %v8774_v40 = vsel %vm79_vm0, %v8763_v60, 0.0  ;;  %v8805_v15 = vsel %vm79_vm0, %v8794_v17, 0.0  ;;  %v8776_v18 = vsel %vm79_vm0, %v8764_v31, 0.0  ;;  %v8807_v3 = vsel %vm79_vm0, %v8795_v0, 0.0  ;;  %v9125_v31 = vld [vmem:[%s17615_s16 + $0x10] sm:$0xff]  ;;  %v9126_v17 = vld [vmem:[%s17615_s16 + $0x18] sm:$0xff] }
0x188f   :  { %v8775_v29 = vadd.f32 %v8774_v40, %v8773_v30  ;;  %v8757_v16 = vpop.permute.xlu1 %8756  ;;  %v8752_v27 = vpop.permute.xlu0 %8751  ;;  %v8806_v4 = vadd.f32 %v8805_v15, %v8804_v23  ;;  %v17170_v41 = vpack.c.bf16 %v9199_v52, %v9198_v1  ;;  %v9200_v30 = vld [vmem:[%s17616_s19 + $0x10] sm:$0xff]  ;;  %v9201_v23 = vld [vmem:[%s17616_s19 + $0x18] sm:$0xff]  ;;  %v17194_v40 = vpack.c.bf16 %v9126_v17, %v9125_v31  ;;  %v9435_v47 = vld [vmem:[%s17619_s12] sm:$0xff] }
0x1890   :  { %v8766_v33 = vmul.f32 %v8757_v16, %v16803_v54  ;;  %v8765_v39 = vmul.f32 %v8752_v27, %v16808_v11  ;;  %v8796_v11 = vmul.f32 %v8752_v27, %v16815_v61  ;;  %v8898_v61 = vld [vmem:[%s17613_s17 + $0x18] sm:$0xff]  ;;  %v8797_v62 = vmul.f32 %v8757_v16, %v16828_v46  ;;  %v9124_v46 = vld [vmem:[%s17615_s16 + $0x8] sm:$0xff]  ;;  %v9354_v27 = vld [vmem:[%s17618_s11] sm:$0xff] }
0x1891   :  { %v8777_v42 = vadd.f32 %v8776_v18, %v8775_v29  ;;  %v8808_v49 = vadd.f32 %v8807_v3, %v8806_v4  ;;  %v17143_v13 = vpack.c.bf16 %v8898_v61, %v8897_v57  ;;  %v17168_v2 = vpack.c.bf16 %v9124_v46, %v9123_v8  ;;  %v9273_v29 = vld [vmem:[%s17617_s10] sm:$0xff]  ;;  %v9274_v16 = vld [vmem:[%s17617_s10 + $0x8] sm:$0xff]  ;;  %v9356_v4 = vld [vmem:[%s17618_s11 + $0x10] sm:$0xff] }
0x1892   :  { %v8778_v54 = vsel %vm79_vm0, %v8765_v39, 0.0  ;;  %v8780_v55 = vsel %vm79_vm0, %v8766_v33, 0.0  ;;  %v8809_v6 = vsel %vm79_vm0, %v8796_v11, 0.0  ;;  %v8811_v53 = vsel %vm79_vm0, %v8797_v62, 0.0  ;;  %v9355_v18 = vld [vmem:[%s17618_s11 + $0x8] sm:$0xff]  ;;  %v9275_v39 = vld [vmem:[%s17617_s10 + $0x10] sm:$0xff] }
0x1893   :  { %v8779_v5 = vadd.f32 %v8778_v54, %v8777_v42  ;;  %v8810_v48 = vadd.f32 %v8809_v6, %v8808_v49  ;;  %v17196_v15 = vpack.c.bf16 %v9201_v23, %v9200_v30  ;;  %v17218_v0 = vpack.c.bf16 %v9274_v16, %v9273_v29  ;;  %v9357_v42 = vld [vmem:[%s17618_s11 + $0x18] sm:$0xff]  ;;  %v9436_v54 = vld [vmem:[%s17619_s12 + $0x8] sm:$0xff]  ;;  %v9525_v57 = vld [vmem:[%s17620_s20] sm:$0xff] }
0x1894   :  { %v17220_v33 = vpack.c.bf16 %v9355_v18, %v9354_v27  ;;  %v17242_v24 = vpack.c.bf16 %v9276_v37, %v9275_v39  ;;  %v17244_v22 = vpack.c.bf16 %v9357_v42, %v9356_v4  ;;  %v17260_v11 = vpack.c.bf16 %v9436_v54, %v9435_v47  ;;  %v9438_v3 = vld [vmem:[%s17619_s12 + $0x18] sm:$0xff]  ;;  %v9526_v49 = vld [vmem:[%s17620_s20 + $0x8] sm:$0xff]  ;;  %v11295_v45 = vld [vmem:[%s17621_s0 + $0xa0] sm:$0xff] }
0x1895   :  { %v17124_v59 = vadd.f32 %v8780_v55, %v8779_v5  ;;  %v17175_v60 = vadd.f32 %v8811_v53, %v8810_v48  ;;  %v9437_v5 = vld [vmem:[%s17619_s12 + $0x10] sm:$0xff]  ;;  %v17298_v61 = vpack.c.bf16 %v9526_v49, %v9525_v57  ;;  %v11294_v30 = vld [vmem:[%s17621_s0 + $0x98] sm:$0xff]  ;;  %v17324_v54 = vld [vmem:[%s17622_s13] ss:$0 sm:$0xff] }
0x1896   :  { %v17275_v55 = vpack.c.bf16 %v9438_v3, %v9437_v5  ;;  %v11293_v52 = vld [vmem:[%s17621_s0 + $0x90] sm:$0xff] }
0x1897   :  { %13040 = vmatmul.mubr.msk.f32.vlgmr.msra.gmra.mrb[74].mxu1 %vm79_vm0, %v17124_v59  ;;  %13062 = vmatmul.mubr.msk.f32.vlgmr.msra.gmra.mrb[76].mxu0 %vm79_vm0, %v17124_v59 }
0x1898   :  { %13880 = vmatpush3.bf16.msra.mxu1 %v17117_v26  ;;  %13892 = vmatpush3.bf16.msra.mxu0 %v17119_v10 }
0x1899   :  { %13881 = vmatprep.subr.bf16.mxu1 %v14516_v20  ;;  %13893 = vmatprep.subr.bf16.mxu0 %v14516_v20 }
0x189a   :  { %13050 = vmatprep.mubr.msk.f32.mxu1 %vm14517_vm1, %v14518_v36  ;;  %13072 = vmatprep.mubr.msk.f32.mxu0 %vm14517_vm1, %v14518_v36 }
0x189c   :  { %13883 = vmatpush3.bf16.msra.mxu1 %v17143_v13  ;;  %13895 = vmatpush3.bf16.msra.mxu0 %v17145_v63 }
0x189d   :  { %13896 = vmatprep.subr.bf16.mxu1 %v14516_v20  ;;  %13902 = vmatprep.subr.bf16.mxu0 %v14516_v20 }
0x189f   :  { %13051 = vmatmul.mubr.msk.f32.vlgmr.msra.gmra.mrb[74].mxu1 %vm79_vm0, %v17175_v60  ;;  %13073 = vmatmul.mubr.msk.f32.vlgmr.msra.gmra.mrb[76].mxu0 %vm79_vm0, %v17175_v60 }
0x18a0   :  { %13898 = vmatpush3.bf16.msra.mxu1 %v17168_v2  ;;  %13904 = vmatpush3.bf16.msra.mxu0 %v17170_v41 }
0x18a1   :  { %13899 = vmatprep.subr.bf16.mxu1 %v14516_v20  ;;  %13905 = vmatprep.subr.bf16.mxu0 %v14516_v20 }
0x18a2   :  { %13083 = vmatprep.mubr.msk.f32.mxu1 %vm14517_vm1, %v14518_v36  ;;  %13094 = vmatprep.mubr.msk.f32.mxu0 %vm14517_vm1, %v14518_v36 }
0x18a4   :  { %13901 = vmatpush3.bf16.msra.mxu1 %v17194_v40  ;;  %13907 = vmatpush3.bf16.msra.mxu0 %v17196_v15 }
0x18a5   :  { %13908 = vmatprep.subr.bf16.mxu1 %v14516_v20  ;;  %13914 = vmatprep.subr.bf16.mxu0 %v14516_v20 }
0x18a7   :  { %13084 = vmatmul.mubr.msk.f32.vlgmr.msra.gmra.mrb[76].mxu1 %vm79_vm0, %v17124_v59  ;;  %13095 = vmatmul.mubr.msk.f32.vlgmr.msra.gmra.mrb[78].mxu0 %vm79_vm0, %v17175_v60 }
0x18a8   :  { %13910 = vmatpush3.bf16.msra.mxu1 %v17218_v0  ;;  %13916 = vmatpush3.bf16.msra.mxu0 %v17220_v33 }
0x18a9   :  { %13911 = vmatprep.subr.bf16.mxu1 %v14516_v20  ;;  %13917 = vmatprep.subr.bf16.mxu0 %v14516_v20 }
0x18aa   :  { %13105 = vmatprep.mubr.msk.f32.mxu1 %vm14517_vm1, %v14518_v36  ;;  %13116 = vmatprep.mubr.msk.f32.mxu0 %vm14517_vm1, %v14518_v36 }
0x18ac   :  { %13913 = vmatpush3.bf16.msra.mxu1 %v17242_v24  ;;  %13919 = vmatpush3.bf16.msra.mxu0 %v17244_v22 }
0x18ad   :  { %13920 = vmatprep.subr.bf16.mxu1 %v14516_v20  ;;  %13926 = vmatprep.subr.bf16.mxu0 %v14516_v20 }
0x18af   :  { %13106 = vmatmul.mubr.msk.f32.vlgmr.msra.gmra.mrb[74].mxu1 %vm79_vm0, %v16935_v7  ;;  %13117 = vmatmul.mubr.msk.f32.vlgmr.msra.gmra.mrb[76].mxu0 %vm79_vm0, %v16935_v7 }
0x18b0   :  { %13922 = vmatpush3.bf16.msra.mxu1 %v17260_v11  ;;  %13127 = vmatprep.mubr.msk.f32.mxu1 %vm14517_vm1, %v14518_v36 }
0x18b1   :  { %13923 = vmatprep.subr.bf16.mxu1 %v14516_v20  ;;  %13138 = vmatprep.mubr.msk.f32.mxu0 %vm14517_vm1, %v14518_v36 }
0x18b2   :  { %13928 = vmatpush3.bf16.msra.mxu0 %v17298_v61 }
0x18b3   :  { %13929 = vmatprep.subr.bf16.mxu0 %v14516_v20 }
0x18b4   :  { %13925 = vmatpush3.bf16.msra.mxu1 %v17275_v55 }
0x18b5   :  { %13944 = vmatprep.subr.bf16.mxu1 %v14516_v20 }
0x18b7   :  { %13128 = vmatmul.mubr.msk.f32.vlgmr.msra.gmra.mrb[78].mxu1 %vm79_vm0, %v16935_v7 }
0x18b8   :  { %13946 = vmatpush3.bf16.msra.mxu1 %v16911_v51  ;;  %13171 = vmatprep.mubr.msk.f32.mxu1 %vm14517_vm1, %v14518_v36  ;;  %v9527_v51 = vld [vmem:[%s17620_s20 + $0x10] sm:$0xff] }
0x18b9   :  { %13947 = vmatprep.subr.bf16.mxu1 %v14516_v20 }
0x18bc   :  { %13949 = vmatpush3.bf16.msra.mxu1 %v16920_v43  ;;  %v9528_v43 = vld [vmem:[%s17620_s20 + $0x18] sm:$0xff] }
0x18bd   :  { %13951 = vmatprep.subr.bf16.mxu1 %v16968_v12  ;;  %v17307_v19 = vpack.c.bf16 %v9528_v43, %v9527_v51 }
0x18bf   :  { %13931 = vmatpush3.bf16.msra.mxu0 %v17307_v19 }
0x18c0   :  { %13932 = vmatprep.subr.bf16.mxu0 %v14516_v20 }
0x197a   :  { %v9193_v6 = vpop.f32.mrb[76].mxu1  ;;  %v9268_v62 = vpop.f32.mrb[78].mxu0 }
0x197b   :  { %v9197_v8 = vadd.f32 %v11295_v45, %v9193_v6  ;;  %v13085_v48 = vpop.f32.mrb[77].mxu1  ;;  %v13096_v46 = vpop.f32.mrb[79].mxu0  ;;  %v9603_v6 = vld [vmem:[%s17623_s21] sm:$0xff] }
0x197d   :  { %v9272_v1 = vadd.f32 %v9268_v62, %v9197_v8  ;;  %v9604_v62 = vld [vmem:[%s17623_s21 + $0x8] sm:$0xff] }
0x1982   :  { %v9343_v53 = vpop.f32.mrb[74].mxu1  ;;  %v9424_v31 = vpop.f32.mrb[76].mxu0 }
0x1983   :  { %v14048_v17 = vadd.f32 %v11293_v52, %v9343_v53  ;;  %v13107_v23 = vpop.f32.mrb[75].mxu1  ;;  %v13118_v29 = vpop.f32.mrb[77].mxu0  ;;  %v14049_v27 = vadd.f32 %v11294_v30, %v9424_v31  ;;  %v17334_v52 = vpack.c.bf16 %v9604_v62, %v9603_v6  ;;  %v9606_v31 = vld [vmem:[%s17623_s21 + $0x18] sm:$0xff]  ;;  %v9679_v30 = vld [vmem:[%s17624_s22 + $0x8] sm:$0xff] }
0x1984   :  { %v9680_v29 = vld [vmem:[%s17624_s22 + $0x10] sm:$0xff] }
0x1985   :  { %v11303_v16 = vmul.f32 -1.442695, %v14048_v17  ;;  %v11305_v18 = vmul.f32 -1.442695, %v14049_v27  ;;  %v9678_v17 = vld [vmem:[%s17624_s22] sm:$0xff] }
0x1986   :  { %v17363_v23 = vpack.c.bf16 %v9679_v30, %v9678_v17 }
0x1987   :  { %14462 = vpow2.f32 %v11303_v16  ;;  %v9681_v16 = vld [vmem:[%s17624_s22 + $0x18] sm:$0xff] }
0x1988   :  { %14464 = vpow2.f32 %v11305_v18 }
0x198a   :  { %v9512_v39 = vpop.f32.mrb[78].mxu1 }
0x198b   :  { %v13129_v37 = vpop.f32.mrb[79].mxu1  ;;  %v9513_v3 = vadd.f32 %v17324_v54, %v9512_v39 }
0x1991   :  { %v14463_v4 = vpop.eup %14462 }
0x1992   :  { %v9351_v42 = vadd.f32 1.0, %v14463_v4  ;;  %v14465_v47 = vpop.eup %14464 }
0x1993   :  { %v9432_v5 = vadd.f32 1.0, %v14465_v47 }
0x1994   :  { %14466 = vrcp.f32 %v9351_v42 }
0x1995   :  { %14468 = vrcp.f32 %v9432_v5 }
0x199e   :  { %v14467_v57 = vpop.eup %14466 }
0x199f   :  { %v9516_v49 = vmul.f32 %v14467_v57, %v9513_v3  ;;  %v14469_v43 = vpop.eup %14468 }
0x19a0   :  { %v9519_v45 = vsub.f32 1.0, %v14469_v43  ;;  %v9521_v48 = vmul.f32 %v14469_v43, %v16935_v7 }
0x19a1   :  { %v9517_v51 = vadd.f32 %v9516_v49, %v9272_v1  ;;  %v9605_v1 = vld [vmem:[%s17623_s21 + $0x10] sm:$0xff] }
0x19a2   :  { %v17349_v7 = vpack.c.bf16 %v9606_v31, %v9605_v1 }
0x19a3   :  { %14470 = vtanh.f32 %v9517_v51 }
0x19ad   :  { %v14471_v8 = vpop.eup %14470 }
0x19ae   :  { %v9520_v46 = vmul.f32 %v14471_v8, %v9519_v45 }
0x19b0   :  { %v17336_v53 = vadd.f32 %v9521_v48, %v9520_v46 }
0x19b2   :  { %13139 = vmatmul.mubr.msk.f32.vlgmr.msra.gmra.mrb[80].mxu0 %vm79_vm0, %v17336_v53  ;;  %13172 = vmatmul.mubr.msk.f32.vlgmr.msra.gmra.mrb[80].mxu1 %vm79_vm0, %v17336_v53 }
0x19b3   :  { %13934 = vmatpush3.bf16.msra.mxu0 %v17334_v52  ;;  %13149 = vmatprep.mubr.msk.f32.mxu0 %vm14517_vm1, %v14518_v36 }
0x19b4   :  { %13935 = vmatprep.subr.bf16.mxu0 %v14516_v20  ;;  %13953 = vmatpush3.bf16.msra.mxu1 %v16968_v12  ;;  %v17377_v12 = vpack.c.bf16 %v9681_v16, %v9680_v29 }
0x19b5   :  { %13955 = vmatprep.subr.bf16.mxu1 %v16973_v38 }
0x19b7   :  { %13937 = vmatpush3.bf16.msra.mxu0 %v17349_v7 }
0x19b8   :  { %13938 = vmatprep.subr.bf16.mxu0 %v14516_v20  ;;  %13957 = vmatpush3.bf16.msra.mxu1 %v16973_v38 }
0x19b9   :  { %13970 = vmatprep.subr.bf16.mxu1 %v14516_v20 }
0x19ba   :  { %13150 = vmatmul.mubr.msk.f32.vlgmr.msra.gmra.mrb[80].mxu0 %vm79_vm0, %v17124_v59 }
0x19bb   :  { %13940 = vmatpush3.bf16.msra.mxu0 %v17363_v23  ;;  %13160 = vmatprep.mubr.msk.f32.mxu0 %vm14517_vm1, %v14518_v36 }
0x19bc   :  { %13941 = vmatprep.subr.bf16.mxu0 %v14516_v20 }
0x19bf   :  { %13943 = vmatpush3.bf16.msra.mxu0 %v17377_v12 }
0x19c0   :  { %13958 = vmatprep.subr.bf16.mxu0 %v14516_v20 }
0x19c2   :  { %13161 = vmatmul.mubr.msk.f32.vlgmr.msra.gmra.mrb[80].mxu0 %vm79_vm0, %v17175_v60 }
0x19c3   :  { %13960 = vmatpush3.bf16.msra.mxu0 %v17045_v21  ;;  %13202 = vmatprep.mubr.msk.f32.mxu0 %vm14517_vm1, %v14518_v36 }
0x19c4   :  { %13961 = vmatprep.subr.bf16.mxu0 %v14516_v20 }
0x19c7   :  { %13963 = vmatpush3.bf16.msra.mxu0 %v17065_v25 }
0x19c8   :  { %13964 = vmatprep.subr.bf16.mxu0 %v14516_v20 }
0x1a85   :  { %v9825_v38 = vpop.f32.mrb[80].mxu1 }
0x1a86   :  { %v9837_v59 = vadd.f32 %v9825_v38, %v16980_v56  ;;  %v9838_v27 = vadd.f32 %v9825_v38, %v16982_v28  ;;  %v9839_v18 = vadd.f32 %v9825_v38, %v16984_v50  ;;  %v13173_v39 = vpop.f32.mrb[81].mxu1  ;;  %v9840_v21 = vadd.f32 %v9825_v38, %v16989_v14  ;;  %v11308_v14 = vld [vmem:[%s17625_s1 + $0x30] sm:$0xff] }
0x1a87   :  { %v9841_v60 = vadd.f32 %v9825_v38, %v16991_v9  ;;  %v9842_v37 = vadd.f32 %v9825_v38, %v16995_v58  ;;  %v9843_v25 = vadd.f32 %v9825_v38, %v16997_v34  ;;  %v9844_v56 = vadd.f32 %v9825_v38, %v17001_v32 }
0x1a88   :  { %14472 = vtanh.f32 %v9837_v59 }
0x1a89   :  { %14474 = vtanh.f32 %v9838_v27 }
0x1a8a   :  { %14476 = vtanh.f32 %v9839_v18 }
0x1a8b   :  { %14478 = vtanh.f32 %v9840_v21 }
0x1a8c   :  { %14480 = vtanh.f32 %v9841_v60 }
0x1a8d   :  { %14482 = vtanh.f32 %v9842_v37 }
0x1a8e   :  { %14484 = vtanh.f32 %v9843_v25 }
0x1a8f   :  { %14486 = vtanh.f32 %v9844_v56 }
0x1a92   :  { %v14473_v28 = vpop.eup %14472 }
0x1a93   :  { %v14475_v50 = vpop.eup %14474  ;;  %13182 = vmatprep.mubr.msk.f32.mxu1 %vm79_vm0, %v14473_v28 }
0x1a94   :  { %v14477_v9 = vpop.eup %14476  ;;  %13183 = vmatmul.mubr.msk.f32.vlgmr.msra.gmra.mrb[82].mxu1 %vm79_vm0, %v14475_v50 }
0x1a95   :  { %v9748_v58 = vpop.f32.mrb[80].mxu0  ;;  %13185 = vmatprep.mubr.msk.f32.mxu1 %vm79_vm0, %v14477_v9  ;;  %13972 = vmatpush3.bf16.msra.mxu1 %v17050_v35  ;;  %v14479_v4 = vpop.eup %14478 }
0x1a96   :  { %v14050_v34 = vadd.f32 %v11308_v14, %v9748_v58  ;;  %v13162_v32 = vpop.f32.mrb[81].mxu0  ;;  %13973 = vmatprep.subr.bf16.mxu1 %v14516_v20  ;;  %v14481_v42 = vpop.eup %14480 }
0x1a97   :  { %v14483_v47 = vpop.eup %14482 }
0x1a98   :  { %11312 = vst [vmem:[%s17626_s23 + $0x30] sm:$0xff] %v14050_v34  ;;  %13186 = vmatmul.mubr.msk.f32.gmra.mrb[84].mxu1 %vm79_vm0, %v14479_v4  ;;  %v14485_v35 = vpop.eup %14484 }
0x1a99   :  { %13188 = vmatprep.mubr.msk.f32.mxu1 %vm79_vm0, %v14481_v42  ;;  %13975 = vmatpush3.bf16.msra.mxu1 %v17070_v44  ;;  %v14487_v5 = vpop.eup %14486 }
0x1a9a   :  { %13976 = vmatprep.subr.bf16.mxu1 %v14516_v20 }
0x1a9c   :  { %13189 = vmatmul.mubr.msk.f32.gmra.mrb[86].mxu1 %vm79_vm0, %v14483_v47 }
0x1a9d   :  { %13191 = vmatprep.mubr.msk.f32.mxu1 %vm79_vm0, %v14485_v35 }
0x1aa0   :  { %13192 = vmatmul.mubr.msk.f32.gmra.mrb[88].mxu1 %vm79_vm0, %v14487_v5 }
0x1aa1   :  { %13224 = vmatprep.mubr.msk.f32.mxu1 %vm14517_vm1, %v14518_v36 }
0x1b67   :  { %v13184_v3 = vpop.f32.mrb[82].mxu1 }
0x1b68   :  { %v9947_v57 = vpop.f32.mrb[83].mxu1  ;;  %v9987_v44 = vsel %vm622_vm2, %v13184_v3, -inf }
0x1b69   :  { %v9986_v62 = vsel %vm622_vm2, %v9947_v57, -inf }
0x1b6b   :  { %v13187_v49 = vpop.f32.mrb[84].mxu1 }
0x1b6c   :  { %v9957_v51 = vpop.f32.mrb[85].mxu1  ;;  %v9989_v31 = vsel %vm622_vm2, %v13187_v49, -inf }
0x1b6d   :  { %v9988_v16 = vsel %vm622_vm2, %v9957_v51, -inf }
0x1b6f   :  { %v13190_v43 = vpop.f32.mrb[86].mxu1 }
0x1b70   :  { %v9992_v45 = vsel %vm622_vm2, %v13190_v43, -inf  ;;  %v9967_v6 = vpop.f32.mrb[87].mxu1 }
0x1b71   :  { %v9993_v8 = vmax.f32 %v9987_v44, %v9992_v45  ;;  %v9990_v48 = vsel %vm622_vm2, %v9967_v6, -inf }
0x1b72   :  { %v9991_v46 = vmax.f32 %v9986_v62, %v9990_v48 }
0x1b73   :  { %v13193_v1 = vpop.f32.mrb[88].mxu1 }
0x1b74   :  { %v9998_v17 = vmax.f32 %v9991_v46, %v9993_v8  ;;  %v9996_v30 = vsel %vm622_vm2, %v13193_v1, -inf  ;;  %v9977_v29 = vpop.f32.mrb[89].mxu1 }
0x1b75   :  { %v9997_v38 = vmax.f32 %v9989_v31, %v9996_v30  ;;  %v9994_v59 = vsel %vm622_vm2, %v9977_v29, -inf }
0x1b76   :  { %v9995_v27 = vmax.f32 %v9988_v16, %v9994_v59 }
0x1b78   :  { %v9999_v18 = vmax.f32 %v9995_v27, %v9997_v38 }
0x1b7a   :  { %v10000_v39 = vmax.f32 %v9998_v17, %v9999_v18 }
0x1b7c   :  { %v10001_v21 = vsub.f32 %v9947_v57, %v10000_v39  ;;  %v10002_v60 = vsub.f32 %v13184_v3, %v10000_v39  ;;  %v10003_v37 = vsub.f32 %v9957_v51, %v10000_v39  ;;  %v10004_v25 = vsub.f32 %v13187_v49, %v10000_v39 }
0x1b7d   :  { %v10005_v56 = vsub.f32 %v9967_v6, %v10000_v39  ;;  %v10006_v28 = vsub.f32 %v13190_v43, %v10000_v39  ;;  %v10007_v50 = vsub.f32 %v9977_v29, %v10000_v39  ;;  %v10008_v14 = vsub.f32 %v13193_v1, %v10000_v39 }
0x1b7e   :  { %v10009_v9 = vmul.f32 1.442695, %v10001_v21  ;;  %v10011_v58 = vmul.f32 1.442695, %v10002_v60  ;;  %v10013_v34 = vmul.f32 1.442695, %v10003_v37 }
0x1b7f   :  { %v10015_v32 = vmul.f32 1.442695, %v10004_v25  ;;  %v10017_v4 = vmul.f32 1.442695, %v10005_v56  ;;  %v10019_v42 = vmul.f32 1.442695, %v10006_v28 }
0x1b80   :  { %14488 = vpow2.f32 %v10009_v9  ;;  %v10021_v47 = vmul.f32 1.442695, %v10007_v50  ;;  %v10023_v35 = vmul.f32 1.442695, %v10008_v14  ;;  %v10050_v9 = vld [vmem:[%s17645_s29 + $0x8] sm:$0xff] }
0x1b81   :  { %14490 = vpow2.f32 %v10011_v58  ;;  %v10121_v58 = vld [vmem:[%s17642_s28 + $0x8] sm:$0xff] }
0x1b82   :  { %14492 = vpow2.f32 %v10013_v34  ;;  %v10049_v34 = vld [vmem:[%s17645_s29] sm:$0xff] }
0x1b83   :  { %14494 = vpow2.f32 %v10015_v32  ;;  %v10120_v32 = vld [vmem:[%s17642_s28] sm:$0xff] }
0x1b84   :  { %14496 = vpow2.f32 %v10017_v4 }
0x1b85   :  { %14498 = vpow2.f32 %v10019_v42 }
0x1b86   :  { %14500 = vpow2.f32 %v10021_v47 }
0x1b87   :  { %14502 = vpow2.f32 %v10023_v35 }
0x1b8a   :  { %v14489_v5 = vpop.eup %14488 }
0x1b8b   :  { %v14491_v3 = vpop.eup %14490  ;;  %v10025_v57 = vsel %vm622_vm2, %v14489_v5, 0.0 }
0x1b8c   :  { %v14493_v49 = vpop.eup %14492  ;;  %v10026_v51 = vsel %vm622_vm2, %v14491_v3, 0.0 }
0x1b8d   :  { %v14495_v43 = vpop.eup %14494  ;;  %v10027_v44 = vadd.f32 %v10026_v51, %v10025_v57  ;;  %v10028_v45 = vsel %vm622_vm2, %v14493_v49, 0.0  ;;  %v10052_v57 = vld [vmem:[%s17645_s29 + $0x18] sm:$0xff]  ;;  %v10051_v51 = vld [vmem:[%s17645_s29 + $0x10] sm:$0xff] }
0x1b8e   :  { %v14497_v6 = vpop.eup %14496  ;;  %v10030_v8 = vsel %vm622_vm2, %v14495_v43, 0.0 }
0x1b8f   :  { %v10029_v62 = vadd.f32 %v10028_v45, %v10027_v44  ;;  %v14499_v48 = vpop.eup %14498  ;;  %v10032_v1 = vsel %vm622_vm2, %v14497_v6, 0.0 }
0x1b90   :  { %v14501_v31 = vpop.eup %14500  ;;  %v10034_v30 = vsel %vm622_vm2, %v14499_v48, 0.0 }
0x1b91   :  { %v10031_v46 = vadd.f32 %v10030_v8, %v10029_v62  ;;  %v14503_v29 = vpop.eup %14502  ;;  %v10036_v38 = vsel %vm622_vm2, %v14501_v31, 0.0 }
0x1b92   :  { %v10038_v27 = vsel %vm622_vm2, %v14503_v29, 0.0 }
0x1b93   :  { %v10033_v17 = vadd.f32 %v10032_v1, %v10031_v46 }
0x1b95   :  { %v10035_v16 = vadd.f32 %v10034_v30, %v10033_v17 }
0x1b97   :  { %v10037_v59 = vadd.f32 %v10036_v38, %v10035_v16  ;;  %v10054_v16 = vld [vmem:[%s17645_s29 + $0x28] sm:$0xff]  ;;  %v10053_v38 = vld [vmem:[%s17645_s29 + $0x20] sm:$0xff] }
0x1b99   :  { %v10039_v18 = vadd.f32 %v10038_v27, %v10037_v59  ;;  %v10124_v59 = vld [vmem:[%s17642_s28 + $0x20] sm:$0xff] }
0x1b9b   :  { %14504 = vrcp.f32 %v10039_v18 }
0x1ba5   :  { %v14505_v39 = vpop.eup %14504 }
0x1ba6   :  { %v10042_v21 = vmul.f32 %v14505_v39, %v14491_v3  ;;  %v10041_v60 = vmul.f32 %v14505_v39, %v14489_v5  ;;  %v10044_v37 = vmul.f32 %v14505_v39, %v14495_v43  ;;  %v10043_v25 = vmul.f32 %v14505_v39, %v14493_v49  ;;  %v10123_v49 = vld [vmem:[%s17642_s28 + $0x18] sm:$0xff]  ;;  %v10122_v43 = vld [vmem:[%s17642_s28 + $0x10] sm:$0xff] }
0x1ba7   :  { %v10046_v56 = vmul.f32 %v14505_v39, %v14499_v48  ;;  %v10045_v28 = vmul.f32 %v14505_v39, %v14497_v6  ;;  %v10048_v50 = vmul.f32 %v14505_v39, %v14503_v29  ;;  %v10047_v14 = vmul.f32 %v14505_v39, %v14501_v31 }
0x1ba8   :  { %10064 = vperm.xlu1 %14163, %v10042_v21   ;;  %10059 = vperm.xlu0 %14162, %v10041_v60  }
0x1bac   :  { %10074 = vperm.xlu1 %14163, %v10044_v37   ;;  %10069 = vperm.xlu0 %14162, %v10043_v25  }
0x1bb0   :  { %10084 = vperm.xlu1 %14163, %v10046_v56   ;;  %10079 = vperm.xlu0 %14162, %v10045_v28  }
0x1bb4   :  { %10094 = vperm.xlu1 %14163, %v10048_v50   ;;  %10089 = vperm.xlu0 %14162, %v10047_v14  }
0x1c27   :  { %v10065_v4 = vpop.permute.xlu1 %10064  ;;  %v10060_v42 = vpop.permute.xlu0 %10059 }
0x1c28   :  { %v10098_v47 = vmul.f32 %v10065_v4, %v10050_v9  ;;  %v10129_v35 = vmul.f32 %v10121_v58, %v10065_v4  ;;  %v10097_v5 = vmul.f32 %v10060_v42, %v10049_v34  ;;  %v10128_v3 = vmul.f32 %v10120_v32, %v10060_v42  ;;  %v10125_v9 = vld [vmem:[%s17642_s28 + $0x28] sm:$0xff]  ;;  %v10056_v32 = vld [vmem:[%s17645_s29 + $0x38] sm:$0xff]  ;;  %v10055_v4 = vld [vmem:[%s17645_s29 + $0x30] sm:$0xff] }
0x1c2a   :  { %v10106_v44 = vsel %vm79_vm0, %v10098_v47, 0.0  ;;  %v10137_v45 = vsel %vm79_vm0, %v10129_v35, 0.0  ;;  %v10105_v6 = vsel %vm79_vm0, %v10097_v5, 0.0  ;;  %v10136_v62 = vsel %vm79_vm0, %v10128_v3, 0.0  ;;  %v10126_v3 = vld [vmem:[%s17642_s28 + $0x30] sm:$0xff] }
0x1c2b   :  { %v10075_v8 = vpop.permute.xlu1 %10074  ;;  %v10070_v48 = vpop.permute.xlu0 %10069  ;;  %v10107_v30 = vadd.f32 %v10106_v44, %v10105_v6  ;;  %v10138_v29 = vadd.f32 %v10137_v45, %v10136_v62 }
0x1c2c   :  { %v10100_v46 = vmul.f32 %v10075_v8, %v10052_v57  ;;  %v10131_v1 = vmul.f32 %v10123_v49, %v10075_v8  ;;  %v10099_v31 = vmul.f32 %v10070_v48, %v10051_v51  ;;  %v10130_v17 = vmul.f32 %v10122_v43, %v10070_v48 }
0x1c2e   :  { %v10108_v27 = vsel %vm79_vm0, %v10099_v31, 0.0  ;;  %v10139_v18 = vsel %vm79_vm0, %v10130_v17, 0.0  ;;  %v10110_v39 = vsel %vm79_vm0, %v10100_v46, 0.0  ;;  %v10141_v56 = vsel %vm79_vm0, %v10131_v1, 0.0  ;;  %v10127_v31 = vld [vmem:[%s17642_s28 + $0x38] sm:$0xff] }
0x1c2f   :  { %v10109_v21 = vadd.f32 %v10108_v27, %v10107_v30  ;;  %v10140_v60 = vadd.f32 %v10139_v18, %v10138_v29  ;;  %v10085_v37 = vpop.permute.xlu1 %10084  ;;  %v10080_v25 = vpop.permute.xlu0 %10079 }
0x1c30   :  { %v10102_v28 = vmul.f32 %v10085_v37, %v10054_v16  ;;  %v10101_v50 = vmul.f32 %v10080_v25, %v10053_v38  ;;  %v10132_v14 = vmul.f32 %v10124_v59, %v10080_v25  ;;  %v10133_v51 = vmul.f32 %v10125_v9, %v10085_v37 }
0x1c31   :  { %v10111_v58 = vadd.f32 %v10110_v39, %v10109_v21  ;;  %v10142_v34 = vadd.f32 %v10141_v56, %v10140_v60 }
0x1c32   :  { %v10112_v42 = vsel %vm79_vm0, %v10101_v50, 0.0  ;;  %v10143_v47 = vsel %vm79_vm0, %v10132_v14, 0.0  ;;  %v10114_v49 = vsel %vm79_vm0, %v10102_v28, 0.0  ;;  %v10145_v46 = vsel %vm79_vm0, %v10133_v51, 0.0 }
0x1c33   :  { %v10113_v35 = vadd.f32 %v10112_v42, %v10111_v58  ;;  %v10095_v5 = vpop.permute.xlu1 %10094  ;;  %v10090_v57 = vpop.permute.xlu0 %10089  ;;  %v10144_v45 = vadd.f32 %v10143_v47, %v10142_v34 }
0x1c34   :  { %v10104_v43 = vmul.f32 %v10095_v5, %v10056_v32  ;;  %v10103_v44 = vmul.f32 %v10090_v57, %v10055_v4  ;;  %v10134_v8 = vmul.f32 %v10126_v3, %v10090_v57  ;;  %v10135_v16 = vmul.f32 %v10127_v31, %v10095_v5 }
0x1c35   :  { %v10115_v6 = vadd.f32 %v10114_v49, %v10113_v35  ;;  %v10146_v17 = vadd.f32 %v10145_v46, %v10144_v45 }
0x1c36   :  { %v10116_v62 = vsel %vm79_vm0, %v10103_v44, 0.0  ;;  %v10118_v1 = vsel %vm79_vm0, %v10104_v43, 0.0  ;;  %v10147_v29 = vsel %vm79_vm0, %v10134_v8, 0.0  ;;  %v10149_v59 = vsel %vm79_vm0, %v10135_v16, 0.0 }
0x1c37   :  { %v10117_v48 = vadd.f32 %v10116_v62, %v10115_v6  ;;  %v10148_v38 = vadd.f32 %v10147_v29, %v10146_v17 }
0x1c39   :  { %v17498_v30 = vadd.f32 %v10118_v1, %v10117_v48 }
0x1c3b   :  { %13203 = vmatmul.mubr.msk.f32.vlgmr.msra.gmra.mrb[82].mxu0 %vm79_vm0, %v17498_v30  ;;  %13225 = vmatmul.mubr.msk.f32.vlgmr.msra.gmra.mrb[90].mxu1 %vm79_vm0, %v17498_v30 }
0x1c3c   :  { %13966 = vmatpush3.bf16.msra.mxu0 %v17117_v26  ;;  %13978 = vmatpush3.bf16.msra.mxu1 %v17119_v10  ;;  %v17516_v26 = vadd.f32 %v10149_v59, %v10148_v38  ;;  %v11324_v10 = vld [vmem:[%s17621_s0 + $0xb8] sm:$0xff] }
0x1c3d   :  { %13967 = vmatprep.subr.bf16.mxu0 %v14516_v20  ;;  %13979 = vmatprep.subr.bf16.mxu1 %v14516_v20 }
0x1c3e   :  { %13213 = vmatprep.mubr.msk.f32.mxu0 %vm14517_vm1, %v14518_v36  ;;  %13235 = vmatprep.mubr.msk.f32.mxu1 %vm14517_vm1, %v14518_v36 }
0x1c40   :  { %13969 = vmatpush3.bf16.msra.mxu0 %v17143_v13  ;;  %13981 = vmatpush3.bf16.msra.mxu1 %v17145_v63 }
0x1c41   :  { %13982 = vmatprep.subr.bf16.mxu0 %v14516_v20  ;;  %13988 = vmatprep.subr.bf16.mxu1 %v14516_v20 }
0x1c43   :  { %13214 = vmatmul.mubr.msk.f32.vlgmr.msra.gmra.mrb[82].mxu0 %vm79_vm0, %v17516_v26  ;;  %13236 = vmatmul.mubr.msk.f32.vlgmr.msra.gmra.mrb[90].mxu1 %vm79_vm0, %v17516_v26 }
0x1c44   :  { %13984 = vmatpush3.bf16.msra.mxu0 %v17168_v2  ;;  %13990 = vmatpush3.bf16.msra.mxu1 %v17170_v41 }
0x1c45   :  { %13985 = vmatprep.subr.bf16.mxu0 %v14516_v20  ;;  %13991 = vmatprep.subr.bf16.mxu1 %v14516_v20 }
0x1c46   :  { %13246 = vmatprep.mubr.msk.f32.mxu0 %vm14517_vm1, %v14518_v36  ;;  %13257 = vmatprep.mubr.msk.f32.mxu1 %vm14517_vm1, %v14518_v36 }
0x1c48   :  { %13987 = vmatpush3.bf16.msra.mxu0 %v17194_v40  ;;  %13993 = vmatpush3.bf16.msra.mxu1 %v17196_v15 }
0x1c49   :  { %13994 = vmatprep.subr.bf16.mxu0 %v14516_v20  ;;  %14000 = vmatprep.subr.bf16.mxu1 %v14516_v20 }
0x1c4b   :  { %13247 = vmatmul.mubr.msk.f32.vlgmr.msra.gmra.mrb[84].mxu0 %vm79_vm0, %v17498_v30  ;;  %13258 = vmatmul.mubr.msk.f32.vlgmr.msra.gmra.mrb[92].mxu1 %vm79_vm0, %v17516_v26 }
0x1c4c   :  { %13996 = vmatpush3.bf16.msra.mxu0 %v17218_v0  ;;  %14002 = vmatpush3.bf16.msra.mxu1 %v17220_v33  ;;  %v11322_v0 = vld [vmem:[%s17621_s0 + $0xa8] sm:$0xff] }
0x1c4d   :  { %13997 = vmatprep.subr.bf16.mxu0 %v14516_v20  ;;  %14003 = vmatprep.subr.bf16.mxu1 %v14516_v20 }
0x1c4e   :  { %13268 = vmatprep.mubr.msk.f32.mxu0 %vm14517_vm1, %v14518_v36  ;;  %13279 = vmatprep.mubr.msk.f32.mxu1 %vm14517_vm1, %v14518_v36 }
0x1c50   :  { %13999 = vmatpush3.bf16.msra.mxu0 %v17242_v24  ;;  %14005 = vmatpush3.bf16.msra.mxu1 %v17244_v22 }
0x1c51   :  { %14006 = vmatprep.subr.bf16.mxu0 %v14516_v20  ;;  %14012 = vmatprep.subr.bf16.mxu1 %v14516_v20 }
0x1c53   :  { %13269 = vmatmul.mubr.msk.f32.vlgmr.msra.gmra.mrb[82].mxu0 %vm79_vm0, %v17336_v53  ;;  %13280 = vmatmul.mubr.msk.f32.vlgmr.msra.gmra.mrb[90].mxu1 %vm79_vm0, %v17336_v53 }
0x1c54   :  { %14008 = vmatpush3.bf16.msra.mxu0 %v17260_v11  ;;  %13290 = vmatprep.mubr.msk.f32.mxu0 %vm14517_vm1, %v14518_v36  ;;  %v11323_v11 = vld [vmem:[%s17621_s0 + $0xb0] sm:$0xff] }
0x1c55   :  { %14009 = vmatprep.subr.bf16.mxu0 %v14516_v20  ;;  %14014 = vmatpush3.bf16.msra.mxu1 %v17298_v61 }
0x1c56   :  { %14015 = vmatprep.subr.bf16.mxu1 %v14516_v20  ;;  %13301 = vmatprep.mubr.msk.f32.mxu1 %vm14517_vm1, %v14518_v36 }
0x1c58   :  { %14011 = vmatpush3.bf16.msra.mxu0 %v17275_v55 }
0x1c59   :  { %14017 = vmatpush3.bf16.msra.mxu1 %v17307_v19 }
0x1c5a   :  { %14018 = vmatprep.subr.bf16.mxu1 %v14516_v20 }
0x1c5b   :  { %13291 = vmatmul.mubr.msk.f32.vlgmr.msra.gmra.mrb[86].mxu0 %vm79_vm0, %v17336_v53 }
0x1d1e   :  { %v10531_v13 = vpop.f32.mrb[84].mxu0  ;;  %v10606_v63 = vpop.f32.mrb[92].mxu1 }
0x1d1f   :  { %v10535_v2 = vadd.f32 %v11324_v10, %v10531_v13  ;;  %v13248_v41 = vpop.f32.mrb[85].mxu0  ;;  %v13259_v40 = vpop.f32.mrb[93].mxu1 }
0x1d21   :  { %v10610_v15 = vadd.f32 %v10606_v63, %v10535_v2 }
0x1d26   :  { %v10681_v33 = vpop.f32.mrb[82].mxu0  ;;  %v10762_v24 = vpop.f32.mrb[90].mxu1 }
0x1d27   :  { %v14051_v22 = vadd.f32 %v11322_v0, %v10681_v33  ;;  %v13270_v55 = vpop.f32.mrb[83].mxu0  ;;  %v13281_v61 = vpop.f32.mrb[91].mxu1  ;;  %v14052_v27 = vadd.f32 %v11323_v11, %v10762_v24 }
0x1d29   :  { %v11332_v19 = vmul.f32 -1.442695, %v14051_v22  ;;  %v11334_v18 = vmul.f32 -1.442695, %v14052_v27 }
0x1d2b   :  { %14506 = vpow2.f32 %v11332_v19 }
0x1d2c   :  { %14508 = vpow2.f32 %v11334_v18 }
0x1d2e   :  { %v10850_v39 = vpop.f32.mrb[86].mxu0 }
0x1d2f   :  { %v13292_v21 = vpop.f32.mrb[87].mxu0  ;;  %v10851_v28 = vadd.f32 %v17324_v54, %v10850_v39  ;;  %v11337_v54 = vld [vmem:[%s17625_s1 + $0x38] sm:$0xff] }
0x1d35   :  { %v14507_v60 = vpop.eup %14506 }
0x1d36   :  { %v10689_v37 = vadd.f32 1.0, %v14507_v60  ;;  %v14509_v25 = vpop.eup %14508 }
0x1d37   :  { %v10770_v56 = vadd.f32 1.0, %v14509_v25 }
0x1d38   :  { %14510 = vrcp.f32 %v10689_v37 }
0x1d39   :  { %14512 = vrcp.f32 %v10770_v56 }
0x1d42   :  { %v14511_v50 = vpop.eup %14510 }
0x1d43   :  { %v10854_v14 = vmul.f32 %v14511_v50, %v10851_v28  ;;  %v14513_v58 = vpop.eup %14512 }
0x1d44   :  { %v10857_v34 = vsub.f32 1.0, %v14513_v58  ;;  %v10859_v42 = vmul.f32 %v14513_v58, %v17336_v53 }
0x1d45   :  { %v10855_v9 = vadd.f32 %v10854_v14, %v10610_v15 }
0x1d47   :  { %14514 = vtanh.f32 %v10855_v9 }
0x1d51   :  { %v14515_v32 = vpop.eup %14514 }
0x1d52   :  { %v10858_v4 = vmul.f32 %v14515_v32, %v10857_v34 }
0x1d54   :  { %v10860_v47 = vadd.f32 %v10859_v42, %v10858_v4 }
0x1d56   :  { %13302 = vmatmul.mubr.msk.f32.vlgmr.msra.gmra.mrb[94].mxu1 %vm79_vm0, %v10860_v47  ;;  %11093 = vst.msk [vmem:[#allocation2] sm:$0xff] %vm79_vm0, %v10860_v47 }
0x1d57   :  { %14020 = vmatpush3.bf16.msra.mxu1 %v17334_v52  ;;  %13312 = vmatprep.mubr.msk.f32.mxu1 %vm14517_vm1, %v14518_v36 }
0x1d58   :  { %14021 = vmatprep.subr.bf16.mxu1 %v14516_v20 }
0x1d5b   :  { %14023 = vmatpush3.bf16.msra.mxu1 %v17349_v7 }
0x1d5c   :  { %14024 = vmatprep.subr.bf16.mxu1 %v14516_v20 }
0x1d5e   :  { %13313 = vmatmul.mubr.msk.f32.vlgmr.msra.gmra.mrb[94].mxu1 %vm79_vm0, %v17498_v30 }
0x1d5f   :  { %14026 = vmatpush3.bf16.msra.mxu1 %v17363_v23  ;;  %13323 = vmatprep.mubr.msk.f32.mxu1 %vm14517_vm1, %v14518_v36 }
0x1d60   :  { %14027 = vmatprep.subr.bf16.mxu1 %v14516_v20 }
0x1d63   :  { %14029 = vmatpush3.bf16.msra.mxu1 %v17377_v12 }
0x1d66   :  { %13324 = vmatmul.mubr.msk.f32.vlgmr.msra.gmra.mrb[94].mxu1 %vm79_vm0, %v17516_v26 }
0x1e39   :  { %v11086_v52 = vpop.f32.mrb[94].mxu1 }
0x1e3a   :  { %v14053_v53 = vadd.f32 %v11337_v54, %v11086_v52  ;;  %v13325_v7 = vpop.f32.mrb[95].mxu1 }
0x1e3c   :  { %11341 = vst [vmem:[%s17626_s23 + $0x38] sm:$0xff] %v14053_v53 }

</bundles_post_ra>
